<compile_context>
chip_gen: v7x
topology: tpu7x:2x2x1
jax: 0.10.0
libtpu: 0.0.40
codegen_flags: <defaults>
</compile_context>

<pallas_src>
import math
import functools

import jax
import jax.numpy as jnp
from jax import lax
from jax.experimental import pallas as pl
from jax.experimental.pallas import tpu as pltpu

LANE = 128


def _round_up(v, m):
    return int(-(-v // m) * m)


def _pad_c(c):
    return _round_up(c, LANE)


# ----------------------------------------------------------------------------
# Pallas kernels
# ----------------------------------------------------------------------------

def _linear_kernel_nk1(x_ref, w_ref, b_ref, o_ref, *, relu):
    # Single K tile: dot + bias (+ ReLU) straight into the output block.
    y = jnp.dot(x_ref[...], w_ref[...],
                preferred_element_type=jnp.float32) + b_ref[...]
    if relu:
        y = jnp.maximum(y, 0.0)
    o_ref[...] = y.astype(o_ref.dtype)


def _linear_kernel_acc(x_ref, w_ref, b_ref, o_ref, acc_ref, *, relu, n_k):
    k = pl.program_id(1)

    @pl.when(k == 0)
    def _():
        acc_ref[...] = jnp.zeros_like(acc_ref)

    acc_ref[...] += jnp.dot(x_ref[...], w_ref[...],
                            preferred_element_type=jnp.float32)

    @pl.when(k == n_k - 1)
    def _():
        y = acc_ref[...] + b_ref[...]
        if relu:
            y = jnp.maximum(y, 0.0)
        o_ref[...] = y.astype(o_ref.dtype)


def pallas_linear(x, w, b, relu=False, out_dtype=jnp.float32):
    """y = relu?(x @ w + b).  bf16 operands, f32 accumulation."""
    M, K = x.shape
    N = w.shape[1]
    m8 = _round_up(M, 8)
    tm = min(512, m8)
    if m8 > 8 and m8 // tm < 2:
        tm = _round_up(m8 // 2, 8)          # keep >= 2 M tiles (v7x: 2 TCs)
    m_pad = _round_up(M, tm)
    if K > 2048:                            # K-tiling only for large slabs
        tk = 2048
        k_pad = _round_up(K, tk)
    else:
        tk = K
        k_pad = K
    n_k = k_pad // tk
    if m_pad != M or k_pad != K:
        x = jnp.pad(x, ((0, m_pad - M), (0, k_pad - K)))
    if k_pad != K:
        w = jnp.pad(w, ((0, k_pad - K), (0, 0)))
    x = x.astype(jnp.bfloat16)
    w = w.astype(jnp.bfloat16)
    b = b.reshape(1, N).astype(jnp.float32)

    if n_k == 1:
        out = pl.pallas_call(
            functools.partial(_linear_kernel_nk1, relu=relu),
            out_shape=jax.ShapeDtypeStruct((m_pad, N), out_dtype),
            grid_spec=pltpu.PrefetchScalarGridSpec(
                num_scalar_prefetch=0,
                grid=(m_pad // tm,),
                in_specs=[
                    pl.BlockSpec((tm, K), lambda i: (i, 0)),
                    pl.BlockSpec((K, N), lambda i: (0, 0)),
                    pl.BlockSpec((1, N), lambda i: (0, 0)),
                ],
                out_specs=pl.BlockSpec((tm, N), lambda i: (i, 0)),
            ),
            compiler_params=pltpu.CompilerParams(
                dimension_semantics=("parallel",)),
        )(x, w, b)
    else:
        out = pl.pallas_call(
            functools.partial(_linear_kernel_acc, relu=relu, n_k=n_k),
            out_shape=jax.ShapeDtypeStruct((m_pad, N), out_dtype),
            grid_spec=pltpu.PrefetchScalarGridSpec(
                num_scalar_prefetch=0,
                grid=(m_pad // tm, n_k),
                in_specs=[
                    pl.BlockSpec((tm, tk), lambda i, k: (i, k)),
                    pl.BlockSpec((tk, N), lambda i, k: (k, 0)),
                    pl.BlockSpec((1, N), lambda i, k: (0, 0)),
                ],
                out_specs=pl.BlockSpec((tm, N), lambda i, k: (i, 0)),
                scratch_shapes=[pltpu.VMEM((tm, N), jnp.float32)],
            ),
            compiler_params=pltpu.CompilerParams(
                dimension_semantics=("parallel", "arbitrary")),
        )(x, w, b)
    return out[:M]


def _selfatt_kernel(f_ref, g_ref, h_ref, x_ref, o_ref):
    # f, g: (nb, S, C4); h, x: (nb, S, C) -- channels-last, logical widths.
    s = jnp.einsum('bqc,bkc->bqk', g_ref[...], f_ref[...],
                   preferred_element_type=jnp.float32)            # (nb, S, S)
    s = s - jnp.max(s, axis=-1, keepdims=True)
    p = jnp.exp(s)
    p = p * pl.reciprocal(jnp.sum(p, axis=-1, keepdims=True), approx=True)
    o = jnp.einsum('bqk,bkc->bqc', p.astype(h_ref.dtype), h_ref[...],
                   preferred_element_type=jnp.float32)            # (nb, S, C)
    o_ref[...] = (o * x_ref[...].astype(jnp.float32)).astype(o_ref.dtype)


def _pick_nb_tile(nb):
    # Largest divisor of nb (<= 32) that still leaves >= 2 grid steps
    # (v7x has 2 TensorCores); fall back to nb only when unavoidable.
    for c in range(min(nb, 32), 0, -1):
        if nb % c == 0 and nb // c >= 2:
            return c
    return nb


def pallas_selfatt(f, g, h, x):
    NB, S, C4 = f.shape
    C = h.shape[-1]
    nb_t = _pick_nb_tile(NB)
    return pl.pallas_call(
        _selfatt_kernel,
        out_shape=jax.ShapeDtypeStruct((NB, S, C), jnp.bfloat16),
        grid_spec=pltpu.PrefetchScalarGridSpec(
            num_scalar_prefetch=0,
            grid=(NB // nb_t,),
            in_specs=[
                pl.BlockSpec((nb_t, S, C4), lambda n: (n, 0, 0)),
                pl.BlockSpec((nb_t, S, C4), lambda n: (n, 0, 0)),
                pl.BlockSpec((nb_t, S, C), lambda n: (n, 0, 0)),
                pl.BlockSpec((nb_t, S, C), lambda n: (n, 0, 0)),
            ],
            out_specs=pl.BlockSpec((nb_t, S, C), lambda n: (n, 0, 0)),
        ),
        compiler_params=pltpu.CompilerParams(
            dimension_semantics=("parallel",)),
    )(f, g, h, x)


def _sigmoid(v):
    return 1.0 / (1.0 + jnp.exp(-v))


def _bilstm_kernel(xg_ref, whh_ref, y_ref, *, T):
    """One LSTM direction per grid step; time loop lives inside the kernel.

    xg_ref : (T, B, 4*Hp) bf16  -- precomputed x@Wih + b for this direction
    whh_ref: (Hp, 4*Hp)   bf16  -- recurrent weights for this direction
    y_ref  : (T, B, Hp)   bf16  -- this direction's lane-half of the output
    """
    d = pl.program_id(0)
    Hp = whh_ref.shape[0]
    B = xg_ref.shape[1]

    def step(s, carry):
        h, c = carry                                       # h bf16, c f32
        t = jnp.where(d == 0, s, T - 1 - s)                # reverse for d==1
        gates = xg_ref[t].astype(jnp.float32) + jnp.dot(
            h, whh_ref[...], preferred_element_type=jnp.float32)   # (B, 4Hp)
        i_g = _sigmoid(gates[:, 0 * Hp:1 * Hp])            # lane-aligned slices
        f_g = _sigmoid(gates[:, 1 * Hp:2 * Hp])
        g_g = jnp.tanh(gates[:, 2 * Hp:3 * Hp])
        o_g = _sigmoid(gates[:, 3 * Hp:4 * Hp])
        c_new = f_g * c + i_g * g_g
        h_new = o_g * jnp.tanh(c_new)
        y_ref[t] = h_new.astype(y_ref.dtype)
        return h_new.astype(jnp.bfloat16), c_new

    lax.fori_loop(0, T, step,
                  (jnp.zeros((B, Hp), jnp.bfloat16),
                   jnp.zeros((B, Hp), jnp.float32)))


def _fc_logsoftmax_kernel(x_ref, w_ref, b_ref, o_ref):
    z = jnp.dot(x_ref[...], w_ref[...],
                preferred_element_type=jnp.float32) + b_ref[...]
    m = jnp.max(z, axis=-1, keepdims=True)
    e = jnp.exp(z - m)
    lse = jnp.log(jnp.sum(e, axis=-1, keepdims=True)) + m
    o_ref[...] = (z - lse).astype(o_ref.dtype)


def pallas_fc_logsoftmax(x, w, b):
    M, K = x.shape
    N = w.shape[1]
    m8 = _round_up(M, 8)
    tm = min(256, m8)
    if m8 > 8 and m8 // tm < 2:
        tm = _round_up(m8 // 2, 8)
    m_pad = _round_up(M, tm)
    if m_pad != M:
        x = jnp.pad(x, ((0, m_pad - M), (0, 0)))
    out = pl.pallas_call(
        _fc_logsoftmax_kernel,
        out_shape=jax.ShapeDtypeStruct((m_pad, N), jnp.float32),
        grid_spec=pltpu.PrefetchScalarGridSpec(
            num_scalar_prefetch=0,
            grid=(m_pad // tm,),
            in_specs=[
                pl.BlockSpec((tm, K), lambda i: (i, 0)),
                pl.BlockSpec((K, N), lambda i: (0, 0)),
                pl.BlockSpec((1, N), lambda i: (0, 0)),
            ],
            out_specs=pl.BlockSpec((tm, N), lambda i: (i, 0)),
        ),
        compiler_params=pltpu.CompilerParams(
            dimension_semantics=("parallel",)),
    )(x.astype(jnp.bfloat16), w.astype(jnp.bfloat16),
      b.reshape(1, N).astype(jnp.float32))
    return out[:M]


# ----------------------------------------------------------------------------
# Plain-JAX glue (im2col, reshapes)
# ----------------------------------------------------------------------------

def im2col(x, k, stride, pad):
    """x: (N, H, W, C) -> (N*Ho*Wo, k*k*C), Ho, Wo.  Logical channels only."""
    # TODO(synk): fuse this into a halo-tile Pallas conv kernel to avoid the
    # 9x im2col blow-up in HBM entirely.
    N, H, W, C = x.shape
    xp = jnp.pad(x, ((0, 0), (pad, pad), (pad, pad), (0, 0)))
    Ho = (H + 2 * pad - k) // stride + 1
    Wo = (W + 2 * pad - k) // stride + 1
    patches = []
    for i in range(k):
        for j in range(k):
            patches.append(xp[:, i:i + stride * Ho:stride,
                              j:j + stride * Wo:stride, :])
    cols = jnp.stack(patches, axis=3)              # (N, Ho, Wo, k*k, C)
    return cols.reshape(N * Ho * Wo, k * k * C), Ho, Wo


def conv_bn_relu(x_nhwc, w, b, stride):
    cols, Ho, Wo = im2col(x_nhwc, 3, stride, 1)
    y = pallas_linear(cols, w, b, relu=True, out_dtype=jnp.bfloat16)
    return y.reshape(x_nhwc.shape[0], Ho, Wo, w.shape[1])


def self_att(x_nhwc, p):
    N, H, W, C = x_nhwc.shape
    S = H * W
    xf = x_nhwc.reshape(N * S, C)
    # Fused f|g|h 1x1 projections (Conv1x1 + BN folded + ReLU, per reference).
    y = pallas_linear(xf, p['w_fgh'], p['b_fgh'], relu=True,
                      out_dtype=jnp.bfloat16)
    c4 = (y.shape[-1] - C) // 2
    y = y.reshape(N, S, 2 * c4 + C)
    f = y[:, :, 0 * c4:1 * c4]
    g = y[:, :, 1 * c4:2 * c4]
    h = y[:, :, 2 * c4:]
    o = pallas_selfatt(f, g, h, x_nhwc.reshape(N, S, C))
    return o.reshape(N, H, W, C)


def bilstm(x_tbi, p):
    """Bidirectional LSTM over the full sequence.  x:(T,B,I) -> (T,B,2*Hp)."""
    T, B, I = x_tbi.shape
    whh = p['whh']                               # (2, Hp, 4*Hp) bf16
    Hp = whh.shape[1]
    G = 4 * Hp
    # Hoisted input projection for BOTH directions in a single bf16 matmul.
    xg = pallas_linear(x_tbi.reshape(T * B, I), p['wih'], p['b'],
                       relu=False, out_dtype=jnp.bfloat16).reshape(T, B, 2 * G)
    # grid=(2,): one direction per grid step (one per TensorCore on v7x);
    # the time recurrence runs as a fori_loop inside the kernel.
    y = pl.pallas_call(
        functools.partial(_bilstm_kernel, T=T),
        out_shape=jax.ShapeDtypeStruct((T, B, 2 * Hp), jnp.bfloat16),
        grid_spec=pltpu.PrefetchScalarGridSpec(
            num_scalar_prefetch=0,
            grid=(2,),
            in_specs=[
                pl.BlockSpec((T, B, G), lambda d: (0, 0, d)),
                pl.BlockSpec((None, Hp, G), lambda d: (d, 0, 0)),
            ],
            out_specs=pl.BlockSpec((T, B, Hp), lambda d: (0, 0, d)),
        ),
        compiler_params=pltpu.CompilerParams(
            dimension_semantics=("parallel",)),
    )(xg, whh)
    return y


# ----------------------------------------------------------------------------
# Parameter construction (synthetic weights)
# ----------------------------------------------------------------------------

def conv_params(key, cin, cout, k, kaiming_relu=True):
    fan_in = cin * k * k
    if kaiming_relu:                       # LipNet.conv: kaiming_normal_(relu)
        std = math.sqrt(2.0 / fan_in)
        w = std * jax.random.normal(key, (k * k, cin, cout), jnp.float32)
        b = jnp.zeros((cout,), jnp.float32)
    else:                                  # SelfAtt convs: torch default init
        bound = 1.0 / math.sqrt(fan_in)
        k1, k2 = jax.random.split(key)
        w = jax.random.uniform(k1, (k * k, cin, cout), jnp.float32, -bound, bound)
        b = jax.random.uniform(k2, (cout,), jnp.float32, -bound, bound)
    # Fold eval-mode BatchNorm (default running stats) into W/b.
    scale = 1.0 / math.sqrt(1.0 + 1e-5)
    w = (w * scale).reshape(k * k * cin, cout).astype(jnp.bfloat16)
    b = b * scale
    return w, b


def att_params(key, c):
    c4 = c // 4
    k1, k2, k3 = jax.random.split(key, 3)
    wf, bf = conv_params(k1, c, c4, 1, kaiming_relu=False)
    wg, bg = conv_params(k2, c, c4, 1, kaiming_relu=False)
    wh, bh = conv_params(k3, c, c, 1, kaiming_relu=False)
    return dict(w_fgh=jnp.concatenate([wf, wg, wh], axis=1),
                b_fgh=jnp.concatenate([bf, bg, bh], axis=0))


def fc1_params(key, din, dout):
    # kaiming_normal_(nonlinearity='sigmoid') -> std = 1/sqrt(fan_in).
    # Rows are laid out for the natural NHWC flatten (a free offline row
    # permutation of torch's NCHW view(N,-1) order).
    std = 1.0 / math.sqrt(din)
    w = std * jax.random.normal(key, (din, dout), jnp.float32)
    b = jnp.zeros((dout,), jnp.float32)
    return w.astype(jnp.bfloat16), b


def lstm_dir_params(key, in_rows, in_dim, hidden, hp):
    """Padded (Wih, Whh, bias) for one direction; gate g occupies lane-aligned
    columns [g*hp, g*hp + hidden).  Pad columns stay exactly zero."""
    # TODO(synk): torch's per-gate orthogonal/uniform init approximated with
    # uniform init (synthetic weights, not a checkpoint load).
    ks = jax.random.split(key, 4)
    bound = 1.0 / math.sqrt(hidden)
    i_log = int(in_rows.shape[0])
    wih_log = jax.random.uniform(ks[0], (i_log, 4 * hidden), jnp.float32, -bound, bound)
    whh_log = jax.random.uniform(ks[1], (hidden, 4 * hidden), jnp.float32, -bound, bound)
    b_log = (jax.random.uniform(ks[2], (4 * hidden,), jnp.float32, -bound, bound)
             + jax.random.uniform(ks[3], (4 * hidden,), jnp.float32, -bound, bound))
    gate_cols = jnp.concatenate([g * hp + jnp.arange(hidden) for g in range(4)])
    wih = jnp.zeros((in_dim, 4 * hp), jnp.float32)
    wih = wih.at[in_rows[:, None], gate_cols[None, :]].set(wih_log)
    whh = jnp.zeros((hp, 4 * hp), jnp.float32)
    whh = whh.at[jnp.arange(hidden)[:, None], gate_cols[None, :]].set(whh_log)
    b = jnp.zeros((4 * hp,), jnp.float32).at[gate_cols].set(b_log)
    return wih, whh, b


def bilstm_params(key, in_rows, in_dim, hidden, hp):
    kf, kb = jax.random.split(key)
    wih_f, whh_f, b_f = lstm_dir_params(kf, in_rows, in_dim, hidden, hp)
    wih_b, whh_b, b_b = lstm_dir_params(kb, in_rows, in_dim, hidden, hp)
    return dict(
        wih=jnp.concatenate([wih_f, wih_b], axis=1).astype(jnp.bfloat16),
        b=jnp.concatenate([b_f, b_b], axis=0),
        whh=jnp.stack([whh_f, whh_b], axis=0).astype(jnp.bfloat16),  # bf16 MXU
    )


def fc_out_params(key, hidden, hp, n_cls, n_pad):
    din_log = 2 * hidden
    std = 1.0 / math.sqrt(din_log)     # kaiming_normal_, nonlinearity='sigmoid'
    w_log = std * jax.random.normal(key, (din_log, n_cls), jnp.float32)
    rows = jnp.concatenate([jnp.arange(hidden), hp + jnp.arange(hidden)])
    w = jnp.zeros((2 * hp, n_pad), jnp.float32)
    w = w.at[rows[:, None], jnp.arange(n_cls)[None, :]].set(w_log)
    # Pad logits carry -1e30 bias so log_softmax over n_pad lanes == n_cls.
    b = jnp.full((n_pad,), -1e30, jnp.float32).at[:n_cls].set(0.0)
    return w.astype(jnp.bfloat16), b


def make_params(key, base, height, width, hidden):
    ks = iter(jax.random.split(key, 12))
    c1, c2, c3 = base, int(base * 1.5), base * 3
    c4, c5 = base * 4, base * 8
    p = {}
    p['b1c1'] = conv_params(next(ks), 3, c1, 3)
    p['b1c2'] = conv_params(next(ks), c1, c2, 3)
    p['b1c3'] = conv_params(next(ks), c2, c3, 3)
    p['att1'] = att_params(next(ks), c3)
    p['b2c1'] = conv_params(next(ks), c3, c4, 3)
    p['att2'] = att_params(next(ks), c4)
    p['b3c1'] = conv_params(next(ks), c4, c5, 3)

    h, w = height, width
    for _ in range(4):
        if h % 2 == 1:
            h += 1
        if w % 2 == 1:
            w += 1
        h //= 2
        w //= 2
    p['fc1'] = fc1_params(next(ks), h * w * c5, c5)

    hp = _round_up(hidden, LANE)
    p['rnn1'] = bilstm_params(next(ks), jnp.arange(c5), c5, hidden, hp)
    rows2 = jnp.concatenate([jnp.arange(hidden), hp + jnp.arange(hidden)])
    p['rnn2'] = bilstm_params(next(ks), rows2, 2 * hp, hidden, hp)
    p['FC'] = fc_out_params(next(ks), hidden, hp, 27 + 1, _pad_c(27 + 1))
    return p


# ----------------------------------------------------------------------------
# Forward pass
# ----------------------------------------------------------------------------

def lipnet_forward(params, x_bcthw, input_length):
    """x: (B, 3, T, H, W) -> log-probs (B, T, 28)."""
    B, C, T, H, W = x_bcthw.shape
    x = jnp.transpose(x_bcthw, (0, 2, 3, 4, 1)).reshape(B * T, H, W, C)
    x = x.astype(jnp.bfloat16)                                   # NHWC bf16

    x = conv_bn_relu(x, *params['b1c1'], stride=1)               # block1
    x = conv_bn_relu(x, *params['b1c2'], stride=2)
    x = conv_bn_relu(x, *params['b1c3'], stride=2)
    x = self_att(x, params['att1'])                              # att1
    x = conv_bn_relu(x, *params['b2c1'], stride=2)               # block2
    x = self_att(x, params['att2'])                              # att2
    x = conv_bn_relu(x, *params['b3c1'], stride=2)               # block3

    # Natural NHWC flatten (fc1 weight rows are laid out to match, so there is
    # no runtime NCHW transpose of the block-3 activation).
    N, Hh, Ww, Cc = x.shape
    x = x.reshape(N, Hh * Ww * Cc)

    # block4: Linear + Dropout(eval: identity) + ReLU
    x = pallas_linear(x, params['fc1'][0], params['fc1'][1], relu=True,
                      out_dtype=jnp.bfloat16)

    # (B*T, F) -> (T, B, F) for the recurrence
    x = jnp.transpose(x.reshape(B, T, -1), (1, 0, 2))
    # TODO(synk): pack_padded_sequence variable-length masking not implemented;
    # example inputs use full-length sequences (input_length == T).
    x = bilstm(x, params['rnn1'])
    x = bilstm(x, params['rnn2'])

    x = pallas_fc_logsoftmax(x.reshape(T * B, -1),
                             params['FC'][0], params['FC'][1])
    n_cls = 27 + 1
    x = x[:, :n_cls].reshape(T, B, n_cls)
    return jnp.transpose(x, (1, 0, 2))


if __name__ == "__main__":
    key = jax.random.PRNGKey(0)
    base, height, width, hidden = 8, 32, 32, 32
    B, T = 2, 4

    kp, kx = jax.random.split(key)
    params = make_params(kp, base=base, height=height, width=width, hidden=hidden)
    x = jax.random.normal(kx, (B, 3, T, height, width), dtype=jnp.float32)
    input_length = jnp.array([T, T], dtype=jnp.int32)

    fwd = jax.jit(lambda xx: lipnet_forward(params, xx, input_length))
    out = fwd(x)
    jax.block_until_ready(out)

    assert out.shape == (B, T, 28), out.shape
    assert bool(jnp.all(jnp.isfinite(out)))
    print("KERNEL_OK")
</pallas_src>

<mosaic_0001>
module attributes {stable_mosaic.version = 11 : i64} {
  func.func @_linear_kernel_nk1(%arg0: i32, %arg1: memref<512x27xbf16, #tpu.memory_space<vmem>>, %arg2: memref<27x8xbf16, #tpu.memory_space<vmem>>, %arg3: memref<1x8xf32, #tpu.memory_space<vmem>>, %arg4: memref<512x8xbf16, #tpu.memory_space<vmem>>) attributes {dimension_semantics = [#tpu.dimension_semantics<parallel>], iteration_bounds = array<i64: 16>, scalar_prefetch = 0 : i64, scratch_operands = 0 : i64, tpu.core_type = #tpu.core_type<tc>, window_params = [{transform_indices = @transform_0, window_bounds = array<i64: 512, 27>}, {pipeline_mode = #tpu.pipeline_mode<synchronous>, transform_indices = @transform_1, window_bounds = array<i64: 27, 8>}, {pipeline_mode = #tpu.pipeline_mode<synchronous>, transform_indices = @transform_2, window_bounds = array<i64: 1, 8>}, {transform_indices = @transform_3, window_bounds = array<i64: 512, 8>}]} {
    %c0 = arith.constant 0 : index
    %c0_0 = arith.constant 0 : index
    %0 = vector.load %arg1[%c0, %c0_0] : memref<512x27xbf16, #tpu.memory_space<vmem>>, vector<512x27xbf16>
    %c0_1 = arith.constant 0 : index
    %c0_2 = arith.constant 0 : index
    %1 = vector.load %arg2[%c0_1, %c0_2] : memref<27x8xbf16, #tpu.memory_space<vmem>>, vector<27x8xbf16>
    %cst = arith.constant dense<0.000000e+00> : vector<512x8xf32>
    %2 = tpu.matmul %0, %1, %cst {dimension_numbers = #tpu.dot_dimension_numbers<[1], [0], [0], [1], [0, 0, 1, 1], [], []>} : vector<512x27xbf16>, vector<27x8xbf16>, vector<512x8xf32> -> vector<512x8xf32>
    %c0_3 = arith.constant 0 : index
    %c0_4 = arith.constant 0 : index
    %3 = vector.load %arg3[%c0_3, %c0_4] : memref<1x8xf32, #tpu.memory_space<vmem>>, vector<1x8xf32>
    %4 = vector.broadcast %3 : vector<1x8xf32> to vector<512x8xf32>
    %5 = arith.addf %2, %4 : vector<512x8xf32>
    %cst_5 = arith.constant 0.000000e+00 : f32
    %6 = vector.broadcast %cst_5 : f32 to vector<512x8xf32>
    %7 = arith.maximumf %5, %6 : vector<512x8xf32>
    %8 = arith.truncf %7 : vector<512x8xf32> to vector<512x8xbf16>
    %c0_6 = arith.constant 0 : index
    %c0_7 = arith.constant 0 : index
    %9 = vector.load %arg4[%c0_6, %c0_7] : memref<512x8xbf16, #tpu.memory_space<vmem>>, vector<512x8xbf16>
    tpu.vector_store %arg4[%c0_6, %c0_7], %8 {strides = array<i32>} : memref<512x8xbf16, #tpu.memory_space<vmem>>, vector<512x8xbf16>,
    return
  }
  func.func @transform_0(%arg0: i32) -> (i32, i32) {
    %c0_i32 = arith.constant 0 : i32
    %c0_i32_0 = arith.constant 0 : i32
    return %arg0, %c0_i32 : i32, i32
  }
  func.func @transform_1(%arg0: i32) -> (i32, i32) {
    %c0_i32 = arith.constant 0 : i32
    %c0_i32_0 = arith.constant 0 : i32
    %c0_i32_1 = arith.constant 0 : i32
    return %c0_i32, %c0_i32_0 : i32, i32
  }
  func.func @transform_2(%arg0: i32) -> (i32, i32) {
    %c0_i32 = arith.constant 0 : i32
    %c0_i32_0 = arith.constant 0 : i32
    %c0_i32_1 = arith.constant 0 : i32
    return %c0_i32, %c0_i32_0 : i32, i32
  }
  func.func @transform_3(%arg0: i32) -> (i32, i32) {
    %c0_i32 = arith.constant 0 : i32
    %c0_i32_0 = arith.constant 0 : i32
    return %arg0, %c0_i32 : i32, i32
  }
}

module attributes {stable_mosaic.version = 11 : i64} {
  func.func @_linear_kernel_nk1(%arg0: i32, %arg1: memref<512x72xbf16, #tpu.memory_space<vmem>>, %arg2: memref<72x12xbf16, #tpu.memory_space<vmem>>, %arg3: memref<1x12xf32, #tpu.memory_space<vmem>>, %arg4: memref<512x12xbf16, #tpu.memory_space<vmem>>) attributes {dimension_semantics = [#tpu.dimension_semantics<parallel>], iteration_bounds = array<i64: 4>, scalar_prefetch = 0 : i64, scratch_operands = 0 : i64, tpu.core_type = #tpu.core_type<tc>, window_params = [{transform_indices = @transform_0, window_bounds = array<i64: 512, 72>}, {pipeline_mode = #tpu.pipeline_mode<synchronous>, transform_indices = @transform_1, window_bounds = array<i64: 72, 12>}, {pipeline_mode = #tpu.pipeline_mode<synchronous>, transform_indices = @transform_2, window_bounds = array<i64: 1, 12>}, {transform_indices = @transform_3, window_bounds = array<i64: 512, 12>}]} {
    %c0 = arith.constant 0 : index
    %c0_0 = arith.constant 0 : index
    %0 = vector.load %arg1[%c0, %c0_0] : memref<512x72xbf16, #tpu.memory_space<vmem>>, vector<512x72xbf16>
    %c0_1 = arith.constant 0 : index
    %c0_2 = arith.constant 0 : index
    %1 = vector.load %arg2[%c0_1, %c0_2] : memref<72x12xbf16, #tpu.memory_space<vmem>>, vector<72x12xbf16>
    %cst = arith.constant dense<0.000000e+00> : vector<512x12xf32>
    %2 = tpu.matmul %0, %1, %cst {dimension_numbers = #tpu.dot_dimension_numbers<[1], [0], [0], [1], [0, 0, 1, 1], [], []>} : vector<512x72xbf16>, vector<72x12xbf16>, vector<512x12xf32> -> vector<512x12xf32>
    %c0_3 = arith.constant 0 : index
    %c0_4 = arith.constant 0 : index
    %3 = vector.load %arg3[%c0_3, %c0_4] : memref<1x12xf32, #tpu.memory_space<vmem>>, vector<1x12xf32>
    %4 = vector.broadcast %3 : vector<1x12xf32> to vector<512x12xf32>
    %5 = arith.addf %2, %4 : vector<512x12xf32>
    %cst_5 = arith.constant 0.000000e+00 : f32
    %6 = vector.broadcast %cst_5 : f32 to vector<512x12xf32>
    %7 = arith.maximumf %5, %6 : vector<512x12xf32>
    %8 = arith.truncf %7 : vector<512x12xf32> to vector<512x12xbf16>
    %c0_6 = arith.constant 0 : index
    %c0_7 = arith.constant 0 : index
    %9 = vector.load %arg4[%c0_6, %c0_7] : memref<512x12xbf16, #tpu.memory_space<vmem>>, vector<512x12xbf16>
    tpu.vector_store %arg4[%c0_6, %c0_7], %8 {strides = array<i32>} : memref<512x12xbf16, #tpu.memory_space<vmem>>, vector<512x12xbf16>,
    return
  }
  func.func @transform_0(%arg0: i32) -> (i32, i32) {
    %c0_i32 = arith.constant 0 : i32
    %c0_i32_0 = arith.constant 0 : i32
    return %arg0, %c0_i32 : i32, i32
  }
  func.func @transform_1(%arg0: i32) -> (i32, i32) {
    %c0_i32 = arith.constant 0 : i32
    %c0_i32_0 = arith.constant 0 : i32
    %c0_i32_1 = arith.constant 0 : i32
    return %c0_i32, %c0_i32_0 : i32, i32
  }
  func.func @transform_2(%arg0: i32) -> (i32, i32) {
    %c0_i32 = arith.constant 0 : i32
    %c0_i32_0 = arith.constant 0 : i32
    %c0_i32_1 = arith.constant 0 : i32
    return %c0_i32, %c0_i32_0 : i32, i32
  }
  func.func @transform_3(%arg0: i32) -> (i32, i32) {
    %c0_i32 = arith.constant 0 : i32
    %c0_i32_0 = arith.constant 0 : i32
    return %arg0, %c0_i32 : i32, i32
  }
}

module attributes {stable_mosaic.version = 11 : i64} {
  func.func @_linear_kernel_nk1(%arg0: i32, %arg1: memref<256x108xbf16, #tpu.memory_space<vmem>>, %arg2: memref<108x24xbf16, #tpu.memory_space<vmem>>, %arg3: memref<1x24xf32, #tpu.memory_space<vmem>>, %arg4: memref<256x24xbf16, #tpu.memory_space<vmem>>) attributes {dimension_semantics = [#tpu.dimension_semantics<parallel>], iteration_bounds = array<i64: 2>, scalar_prefetch = 0 : i64, scratch_operands = 0 : i64, tpu.core_type = #tpu.core_type<tc>, window_params = [{transform_indices = @transform_0, window_bounds = array<i64: 256, 108>}, {pipeline_mode = #tpu.pipeline_mode<synchronous>, transform_indices = @transform_1, window_bounds = array<i64: 108, 24>}, {pipeline_mode = #tpu.pipeline_mode<synchronous>, transform_indices = @transform_2, window_bounds = array<i64: 1, 24>}, {transform_indices = @transform_3, window_bounds = array<i64: 256, 24>}]} {
    %c0 = arith.constant 0 : index
    %c0_0 = arith.constant 0 : index
    %0 = vector.load %arg1[%c0, %c0_0] : memref<256x108xbf16, #tpu.memory_space<vmem>>, vector<256x108xbf16>
    %c0_1 = arith.constant 0 : index
    %c0_2 = arith.constant 0 : index
    %1 = vector.load %arg2[%c0_1, %c0_2] : memref<108x24xbf16, #tpu.memory_space<vmem>>, vector<108x24xbf16>
    %cst = arith.constant dense<0.000000e+00> : vector<256x24xf32>
    %2 = tpu.matmul %0, %1, %cst {dimension_numbers = #tpu.dot_dimension_numbers<[1], [0], [0], [1], [0, 0, 1, 1], [], []>} : vector<256x108xbf16>, vector<108x24xbf16>, vector<256x24xf32> -> vector<256x24xf32>
    %c0_3 = arith.constant 0 : index
    %c0_4 = arith.constant 0 : index
    %3 = vector.load %arg3[%c0_3, %c0_4] : memref<1x24xf32, #tpu.memory_space<vmem>>, vector<1x24xf32>
    %4 = vector.broadcast %3 : vector<1x24xf32> to vector<256x24xf32>
    %5 = arith.addf %2, %4 : vector<256x24xf32>
    %cst_5 = arith.constant 0.000000e+00 : f32
    %6 = vector.broadcast %cst_5 : f32 to vector<256x24xf32>
    %7 = arith.maximumf %5, %6 : vector<256x24xf32>
    %8 = arith.truncf %7 : vector<256x24xf32> to vector<256x24xbf16>
    %c0_6 = arith.constant 0 : index
    %c0_7 = arith.constant 0 : index
    %9 = vector.load %arg4[%c0_6, %c0_7] : memref<256x24xbf16, #tpu.memory_space<vmem>>, vector<256x24xbf16>
    tpu.vector_store %arg4[%c0_6, %c0_7], %8 {strides = array<i32>} : memref<256x24xbf16, #tpu.memory_space<vmem>>, vector<256x24xbf16>,
    return
  }
  func.func @transform_0(%arg0: i32) -> (i32, i32) {
    %c0_i32 = arith.constant 0 : i32
    %c0_i32_0 = arith.constant 0 : i32
    return %arg0, %c0_i32 : i32, i32
  }
  func.func @transform_1(%arg0: i32) -> (i32, i32) {
    %c0_i32 = arith.constant 0 : i32
    %c0_i32_0 = arith.constant 0 : i32
    %c0_i32_1 = arith.constant 0 : i32
    return %c0_i32, %c0_i32_0 : i32, i32
  }
  func.func @transform_2(%arg0: i32) -> (i32, i32) {
    %c0_i32 = arith.constant 0 : i32
    %c0_i32_0 = arith.constant 0 : i32
    %c0_i32_1 = arith.constant 0 : i32
    return %c0_i32, %c0_i32_0 : i32, i32
  }
  func.func @transform_3(%arg0: i32) -> (i32, i32) {
    %c0_i32 = arith.constant 0 : i32
    %c0_i32_0 = arith.constant 0 : i32
    return %arg0, %c0_i32 : i32, i32
  }
}

module attributes {stable_mosaic.version = 11 : i64} {
  func.func @_linear_kernel_nk1(%arg0: i32, %arg1: memref<256x24xbf16, #tpu.memory_space<vmem>>, %arg2: memref<24x36xbf16, #tpu.memory_space<vmem>>, %arg3: memref<1x36xf32, #tpu.memory_space<vmem>>, %arg4: memref<256x36xbf16, #tpu.memory_space<vmem>>) attributes {dimension_semantics = [#tpu.dimension_semantics<parallel>], iteration_bounds = array<i64: 2>, scalar_prefetch = 0 : i64, scratch_operands = 0 : i64, tpu.core_type = #tpu.core_type<tc>, window_params = [{transform_indices = @transform_0, window_bounds = array<i64: 256, 24>}, {pipeline_mode = #tpu.pipeline_mode<synchronous>, transform_indices = @transform_1, window_bounds = array<i64: 24, 36>}, {pipeline_mode = #tpu.pipeline_mode<synchronous>, transform_indices = @transform_2, window_bounds = array<i64: 1, 36>}, {transform_indices = @transform_3, window_bounds = array<i64: 256, 36>}]} {
    %c0 = arith.constant 0 : index
    %c0_0 = arith.constant 0 : index
    %0 = vector.load %arg1[%c0, %c0_0] : memref<256x24xbf16, #tpu.memory_space<vmem>>, vector<256x24xbf16>
    %c0_1 = arith.constant 0 : index
    %c0_2 = arith.constant 0 : index
    %1 = vector.load %arg2[%c0_1, %c0_2] : memref<24x36xbf16, #tpu.memory_space<vmem>>, vector<24x36xbf16>
    %cst = arith.constant dense<0.000000e+00> : vector<256x36xf32>
    %2 = tpu.matmul %0, %1, %cst {dimension_numbers = #tpu.dot_dimension_numbers<[1], [0], [0], [1], [0, 0, 1, 1], [], []>} : vector<256x24xbf16>, vector<24x36xbf16>, vector<256x36xf32> -> vector<256x36xf32>
    %c0_3 = arith.constant 0 : index
    %c0_4 = arith.constant 0 : index
    %3 = vector.load %arg3[%c0_3, %c0_4] : memref<1x36xf32, #tpu.memory_space<vmem>>, vector<1x36xf32>
    %4 = vector.broadcast %3 : vector<1x36xf32> to vector<256x36xf32>
    %5 = arith.addf %2, %4 : vector<256x36xf32>
    %cst_5 = arith.constant 0.000000e+00 : f32
    %6 = vector.broadcast %cst_5 : f32 to vector<256x36xf32>
    %7 = arith.maximumf %5, %6 : vector<256x36xf32>
    %8 = arith.truncf %7 : vector<256x36xf32> to vector<256x36xbf16>
    %c0_6 = arith.constant 0 : index
    %c0_7 = arith.constant 0 : index
    %9 = vector.load %arg4[%c0_6, %c0_7] : memref<256x36xbf16, #tpu.memory_space<vmem>>, vector<256x36xbf16>
    tpu.vector_store %arg4[%c0_6, %c0_7], %8 {strides = array<i32>} : memref<256x36xbf16, #tpu.memory_space<vmem>>, vector<256x36xbf16>,
    return
  }
  func.func @transform_0(%arg0: i32) -> (i32, i32) {
    %c0_i32 = arith.constant 0 : i32
    %c0_i32_0 = arith.constant 0 : i32
    return %arg0, %c0_i32 : i32, i32
  }
  func.func @transform_1(%arg0: i32) -> (i32, i32) {
    %c0_i32 = arith.constant 0 : i32
    %c0_i32_0 = arith.constant 0 : i32
    %c0_i32_1 = arith.constant 0 : i32
    return %c0_i32, %c0_i32_0 : i32, i32
  }
  func.func @transform_2(%arg0: i32) -> (i32, i32) {
    %c0_i32 = arith.constant 0 : i32
    %c0_i32_0 = arith.constant 0 : i32
    %c0_i32_1 = arith.constant 0 : i32
    return %c0_i32, %c0_i32_0 : i32, i32
  }
  func.func @transform_3(%arg0: i32) -> (i32, i32) {
    %c0_i32 = arith.constant 0 : i32
    %c0_i32_0 = arith.constant 0 : i32
    return %arg0, %c0_i32 : i32, i32
  }
}

module attributes {stable_mosaic.version = 11 : i64} {
  func.func @_selfatt_kernel(%arg0: i32, %arg1: memref<4x64x6xbf16, #tpu.memory_space<vmem>>, %arg2: memref<4x64x6xbf16, #tpu.memory_space<vmem>>, %arg3: memref<4x64x24xbf16, #tpu.memory_space<vmem>>, %arg4: memref<4x64x24xbf16, #tpu.memory_space<vmem>>, %arg5: memref<4x64x24xbf16, #tpu.memory_space<vmem>>) attributes {dimension_semantics = [#tpu.dimension_semantics<parallel>], iteration_bounds = array<i64: 2>, scalar_prefetch = 0 : i64, scratch_operands = 0 : i64, tpu.core_type = #tpu.core_type<tc>, window_params = [{transform_indices = @transform_0, window_bounds = array<i64: 4, 64, 6>}, {transform_indices = @transform_1, window_bounds = array<i64: 4, 64, 6>}, {transform_indices = @transform_2, window_bounds = array<i64: 4, 64, 24>}, {transform_indices = @transform_3, window_bounds = array<i64: 4, 64, 24>}, {transform_indices = @transform_4, window_bounds = array<i64: 4, 64, 24>}]} {
    %c0 = arith.constant 0 : index
    %c0_0 = arith.constant 0 : index
    %c0_1 = arith.constant 0 : index
    %0 = vector.load %arg2[%c0, %c0_0, %c0_1] : memref<4x64x6xbf16, #tpu.memory_space<vmem>>, vector<4x64x6xbf16>
    %c0_2 = arith.constant 0 : index
    %c0_3 = arith.constant 0 : index
    %c0_4 = arith.constant 0 : index
    %1 = vector.load %arg1[%c0_2, %c0_3, %c0_4] : memref<4x64x6xbf16, #tpu.memory_space<vmem>>, vector<4x64x6xbf16>
    "tpu.trace_start"() <{level = 10 : i32, message = "bqc,bkc->bqk"}> : () -> ()
    %cst = arith.constant dense<0.000000e+00> : vector<4x64x64xf32>
    %2 = tpu.matmul %0, %1, %cst {dimension_numbers = #tpu.dot_dimension_numbers<[2], [2], [1], [1], [0, 0, 0, 1, 1, 1], [0], [0]>} : vector<4x64x6xbf16>, vector<4x64x6xbf16>, vector<4x64x64xf32> -> vector<4x64x64xf32>
    "tpu.trace_stop"() : () -> ()
    %cst_5 = arith.constant dense<0xFF800000> : vector<4x64xf32>
    %3 = vector.multi_reduction <maximumf>, %2, %cst_5 [2] : vector<4x64x64xf32> to vector<4x64xf32>
    %4 = vector.shape_cast %3 : vector<4x64xf32> to vector<4x64x1xf32>
    %5 = vector.broadcast %4 : vector<4x64x1xf32> to vector<4x64x64xf32>
    %6 = arith.subf %2, %5 : vector<4x64x64xf32>
    %7 = math.exp %6 : vector<4x64x64xf32>
    %cst_6 = arith.constant dense<0.000000e+00> : vector<4x64xf32>
    %8 = vector.multi_reduction <add>, %7, %cst_6 [2] : vector<4x64x64xf32> to vector<4x64xf32>
    %9 = vector.shape_cast %8 : vector<4x64xf32> to vector<4x64x1xf32>
    %10 = tpu.reciprocal %9 {approx = true} : vector<4x64x1xf32> -> vector<4x64x1xf32>
    %11 = vector.broadcast %10 : vector<4x64x1xf32> to vector<4x64x64xf32>
    %12 = arith.mulf %7, %11 : vector<4x64x64xf32>
    %13 = arith.truncf %12 : vector<4x64x64xf32> to vector<4x64x64xbf16>
    %c0_7 = arith.constant 0 : index
    %c0_8 = arith.constant 0 : index
    %c0_9 = arith.constant 0 : index
    %14 = vector.load %arg3[%c0_7, %c0_8, %c0_9] : memref<4x64x24xbf16, #tpu.memory_space<vmem>>, vector<4x64x24xbf16>
    "tpu.trace_start"() <{level = 10 : i32, message = "bqk,bkc->bqc"}> : () -> ()
    %cst_10 = arith.constant dense<0.000000e+00> : vector<4x64x24xf32>
    %15 = tpu.matmul %13, %14, %cst_10 {dimension_numbers = #tpu.dot_dimension_numbers<[2], [1], [1], [2], [0, 0, 0, 1, 1, 2], [0], [0]>} : vector<4x64x64xbf16>, vector<4x64x24xbf16>, vector<4x64x24xf32> -> vector<4x64x24xf32>
    "tpu.trace_stop"() : () -> ()
    %c0_11 = arith.constant 0 : index
    %c0_12 = arith.constant 0 : index
    %c0_13 = arith.constant 0 : index
    %16 = vector.load %arg4[%c0_11, %c0_12, %c0_13] : memref<4x64x24xbf16, #tpu.memory_space<vmem>>, vector<4x64x24xbf16>
    %17 = arith.extf %16 : vector<4x64x24xbf16> to vector<4x64x24xf32>
    %18 = arith.mulf %15, %17 : vector<4x64x24xf32>
    %19 = arith.truncf %18 : vector<4x64x24xf32> to vector<4x64x24xbf16>
    %c0_14 = arith.constant 0 : index
    %c0_15 = arith.constant 0 : index
    %c0_16 = arith.constant 0 : index
    %20 = vector.load %arg5[%c0_14, %c0_15, %c0_16] : memref<4x64x24xbf16, #tpu.memory_space<vmem>>, vector<4x64x24xbf16>
    tpu.vector_store %arg5[%c0_14, %c0_15, %c0_16], %19 {strides = array<i32>} : memref<4x64x24xbf16, #tpu.memory_space<vmem>>, vector<4x64x24xbf16>,
    return
  }
  func.func @transform_0(%arg0: i32) -> (i32, i32, i32) {
    %c0_i32 = arith.constant 0 : i32
    %c0_i32_0 = arith.constant 0 : i32
    %c0_i32_1 = arith.constant 0 : i32
    return %arg0, %c0_i32, %c0_i32_0 : i32, i32, i32
  }
  func.func @transform_1(%arg0: i32) -> (i32, i32, i32) {
    %c0_i32 = arith.constant 0 : i32
    %c0_i32_0 = arith.constant 0 : i32
    %c0_i32_1 = arith.constant 0 : i32
    return %arg0, %c0_i32, %c0_i32_0 : i32, i32, i32
  }
  func.func @transform_2(%arg0: i32) -> (i32, i32, i32) {
    %c0_i32 = arith.constant 0 : i32
    %c0_i32_0 = arith.constant 0 : i32
    %c0_i32_1 = arith.constant 0 : i32
    return %arg0, %c0_i32, %c0_i32_0 : i32, i32, i32
  }
  func.func @transform_3(%arg0: i32) -> (i32, i32, i32) {
    %c0_i32 = arith.constant 0 : i32
    %c0_i32_0 = arith.constant 0 : i32
    %c0_i32_1 = arith.constant 0 : i32
    return %arg0, %c0_i32, %c0_i32_0 : i32, i32, i32
  }
  func.func @transform_4(%arg0: i32) -> (i32, i32, i32) {
    %c0_i32 = arith.constant 0 : i32
    %c0_i32_0 = arith.constant 0 : i32
    %c0_i32_1 = arith.constant 0 : i32
    return %arg0, %c0_i32, %c0_i32_0 : i32, i32, i32
  }
}

module attributes {stable_mosaic.version = 11 : i64} {
  func.func @_linear_kernel_nk1(%arg0: i32, %arg1: memref<64x216xbf16, #tpu.memory_space<vmem>>, %arg2: memref<216x32xbf16, #tpu.memory_space<vmem>>, %arg3: memref<1x32xf32, #tpu.memory_space<vmem>>, %arg4: memref<64x32xbf16, #tpu.memory_space<vmem>>) attributes {dimension_semantics = [#tpu.dimension_semantics<parallel>], iteration_bounds = array<i64: 2>, scalar_prefetch = 0 : i64, scratch_operands = 0 : i64, tpu.core_type = #tpu.core_type<tc>, window_params = [{transform_indices = @transform_0, window_bounds = array<i64: 64, 216>}, {pipeline_mode = #tpu.pipeline_mode<synchronous>, transform_indices = @transform_1, window_bounds = array<i64: 216, 32>}, {pipeline_mode = #tpu.pipeline_mode<synchronous>, transform_indices = @transform_2, window_bounds = array<i64: 1, 32>}, {transform_indices = @transform_3, window_bounds = array<i64: 64, 32>}]} {
    %c0 = arith.constant 0 : index
    %c0_0 = arith.constant 0 : index
    %0 = vector.load %arg1[%c0, %c0_0] : memref<64x216xbf16, #tpu.memory_space<vmem>>, vector<64x216xbf16>
    %c0_1 = arith.constant 0 : index
    %c0_2 = arith.constant 0 : index
    %1 = vector.load %arg2[%c0_1, %c0_2] : memref<216x32xbf16, #tpu.memory_space<vmem>>, vector<216x32xbf16>
    %cst = arith.constant dense<0.000000e+00> : vector<64x32xf32>
    %2 = tpu.matmul %0, %1, %cst {dimension_numbers = #tpu.dot_dimension_numbers<[1], [0], [0], [1], [0, 0, 1, 1], [], []>} : vector<64x216xbf16>, vector<216x32xbf16>, vector<64x32xf32> -> vector<64x32xf32>
    %c0_3 = arith.constant 0 : index
    %c0_4 = arith.constant 0 : index
    %3 = vector.load %arg3[%c0_3, %c0_4] : memref<1x32xf32, #tpu.memory_space<vmem>>, vector<1x32xf32>
    %4 = vector.broadcast %3 : vector<1x32xf32> to vector<64x32xf32>
    %5 = arith.addf %2, %4 : vector<64x32xf32>
    %cst_5 = arith.constant 0.000000e+00 : f32
    %6 = vector.broadcast %cst_5 : f32 to vector<64x32xf32>
    %7 = arith.maximumf %5, %6 : vector<64x32xf32>
    %8 = arith.truncf %7 : vector<64x32xf32> to vector<64x32xbf16>
    %c0_6 = arith.constant 0 : index
    %c0_7 = arith.constant 0 : index
    %9 = vector.load %arg4[%c0_6, %c0_7] : memref<64x32xbf16, #tpu.memory_space<vmem>>, vector<64x32xbf16>
    tpu.vector_store %arg4[%c0_6, %c0_7], %8 {strides = array<i32>} : memref<64x32xbf16, #tpu.memory_space<vmem>>, vector<64x32xbf16>,
    return
  }
  func.func @transform_0(%arg0: i32) -> (i32, i32) {
    %c0_i32 = arith.constant 0 : i32
    %c0_i32_0 = arith.constant 0 : i32
    return %arg0, %c0_i32 : i32, i32
  }
  func.func @transform_1(%arg0: i32) -> (i32, i32) {
    %c0_i32 = arith.constant 0 : i32
    %c0_i32_0 = arith.constant 0 : i32
    %c0_i32_1 = arith.constant 0 : i32
    return %c0_i32, %c0_i32_0 : i32, i32
  }
  func.func @transform_2(%arg0: i32) -> (i32, i32) {
    %c0_i32 = arith.constant 0 : i32
    %c0_i32_0 = arith.constant 0 : i32
    %c0_i32_1 = arith.constant 0 : i32
    return %c0_i32, %c0_i32_0 : i32, i32
  }
  func.func @transform_3(%arg0: i32) -> (i32, i32) {
    %c0_i32 = arith.constant 0 : i32
    %c0_i32_0 = arith.constant 0 : i32
    return %arg0, %c0_i32 : i32, i32
  }
}

module attributes {stable_mosaic.version = 11 : i64} {
  func.func @_linear_kernel_nk1(%arg0: i32, %arg1: memref<64x32xbf16, #tpu.memory_space<vmem>>, %arg2: memref<32x48xbf16, #tpu.memory_space<vmem>>, %arg3: memref<1x48xf32, #tpu.memory_space<vmem>>, %arg4: memref<64x48xbf16, #tpu.memory_space<vmem>>) attributes {dimension_semantics = [#tpu.dimension_semantics<parallel>], iteration_bounds = array<i64: 2>, scalar_prefetch = 0 : i64, scratch_operands = 0 : i64, tpu.core_type = #tpu.core_type<tc>, window_params = [{transform_indices = @transform_0, window_bounds = array<i64: 64, 32>}, {pipeline_mode = #tpu.pipeline_mode<synchronous>, transform_indices = @transform_1, window_bounds = array<i64: 32, 48>}, {pipeline_mode = #tpu.pipeline_mode<synchronous>, transform_indices = @transform_2, window_bounds = array<i64: 1, 48>}, {transform_indices = @transform_3, window_bounds = array<i64: 64, 48>}]} {
    %c0 = arith.constant 0 : index
    %c0_0 = arith.constant 0 : index
    %0 = vector.load %arg1[%c0, %c0_0] : memref<64x32xbf16, #tpu.memory_space<vmem>>, vector<64x32xbf16>
    %c0_1 = arith.constant 0 : index
    %c0_2 = arith.constant 0 : index
    %1 = vector.load %arg2[%c0_1, %c0_2] : memref<32x48xbf16, #tpu.memory_space<vmem>>, vector<32x48xbf16>
    %cst = arith.constant dense<0.000000e+00> : vector<64x48xf32>
    %2 = tpu.matmul %0, %1, %cst {dimension_numbers = #tpu.dot_dimension_numbers<[1], [0], [0], [1], [0, 0, 1, 1], [], []>} : vector<64x32xbf16>, vector<32x48xbf16>, vector<64x48xf32> -> vector<64x48xf32>
    %c0_3 = arith.constant 0 : index
    %c0_4 = arith.constant 0 : index
    %3 = vector.load %arg3[%c0_3, %c0_4] : memref<1x48xf32, #tpu.memory_space<vmem>>, vector<1x48xf32>
    %4 = vector.broadcast %3 : vector<1x48xf32> to vector<64x48xf32>
    %5 = arith.addf %2, %4 : vector<64x48xf32>
    %cst_5 = arith.constant 0.000000e+00 : f32
    %6 = vector.broadcast %cst_5 : f32 to vector<64x48xf32>
    %7 = arith.maximumf %5, %6 : vector<64x48xf32>
    %8 = arith.truncf %7 : vector<64x48xf32> to vector<64x48xbf16>
    %c0_6 = arith.constant 0 : index
    %c0_7 = arith.constant 0 : index
    %9 = vector.load %arg4[%c0_6, %c0_7] : memref<64x48xbf16, #tpu.memory_space<vmem>>, vector<64x48xbf16>
    tpu.vector_store %arg4[%c0_6, %c0_7], %8 {strides = array<i32>} : memref<64x48xbf16, #tpu.memory_space<vmem>>, vector<64x48xbf16>,
    return
  }
  func.func @transform_0(%arg0: i32) -> (i32, i32) {
    %c0_i32 = arith.constant 0 : i32
    %c0_i32_0 = arith.constant 0 : i32
    return %arg0, %c0_i32 : i32, i32
  }
  func.func @transform_1(%arg0: i32) -> (i32, i32) {
    %c0_i32 = arith.constant 0 : i32
    %c0_i32_0 = arith.constant 0 : i32
    %c0_i32_1 = arith.constant 0 : i32
    return %c0_i32, %c0_i32_0 : i32, i32
  }
  func.func @transform_2(%arg0: i32) -> (i32, i32) {
    %c0_i32 = arith.constant 0 : i32
    %c0_i32_0 = arith.constant 0 : i32
    %c0_i32_1 = arith.constant 0 : i32
    return %c0_i32, %c0_i32_0 : i32, i32
  }
  func.func @transform_3(%arg0: i32) -> (i32, i32) {
    %c0_i32 = arith.constant 0 : i32
    %c0_i32_0 = arith.constant 0 : i32
    return %arg0, %c0_i32 : i32, i32
  }
}

module attributes {stable_mosaic.version = 11 : i64} {
  func.func @_selfatt_kernel(%arg0: i32, %arg1: memref<4x16x8xbf16, #tpu.memory_space<vmem>>, %arg2: memref<4x16x8xbf16, #tpu.memory_space<vmem>>, %arg3: memref<4x16x32xbf16, #tpu.memory_space<vmem>>, %arg4: memref<4x16x32xbf16, #tpu.memory_space<vmem>>, %arg5: memref<4x16x32xbf16, #tpu.memory_space<vmem>>) attributes {dimension_semantics = [#tpu.dimension_semantics<parallel>], iteration_bounds = array<i64: 2>, scalar_prefetch = 0 : i64, scratch_operands = 0 : i64, tpu.core_type = #tpu.core_type<tc>, window_params = [{transform_indices = @transform_0, window_bounds = array<i64: 4, 16, 8>}, {transform_indices = @transform_1, window_bounds = array<i64: 4, 16, 8>}, {transform_indices = @transform_2, window_bounds = array<i64: 4, 16, 32>}, {transform_indices = @transform_3, window_bounds = array<i64: 4, 16, 32>}, {transform_indices = @transform_4, window_bounds = array<i64: 4, 16, 32>}]} {
    %c0 = arith.constant 0 : index
    %c0_0 = arith.constant 0 : index
    %c0_1 = arith.constant 0 : index
    %0 = vector.load %arg2[%c0, %c0_0, %c0_1] : memref<4x16x8xbf16, #tpu.memory_space<vmem>>, vector<4x16x8xbf16>
    %c0_2 = arith.constant 0 : index
    %c0_3 = arith.constant 0 : index
    %c0_4 = arith.constant 0 : index
    %1 = vector.load %arg1[%c0_2, %c0_3, %c0_4] : memref<4x16x8xbf16, #tpu.memory_space<vmem>>, vector<4x16x8xbf16>
    "tpu.trace_start"() <{level = 10 : i32, message = "bqc,bkc->bqk"}> : () -> ()
    %cst = arith.constant dense<0.000000e+00> : vector<4x16x16xf32>
    %2 = tpu.matmul %0, %1, %cst {dimension_numbers = #tpu.dot_dimension_numbers<[2], [2], [1], [1], [0, 0, 0, 1, 1, 1], [0], [0]>} : vector<4x16x8xbf16>, vector<4x16x8xbf16>, vector<4x16x16xf32> -> vector<4x16x16xf32>
    "tpu.trace_stop"() : () -> ()
    %cst_5 = arith.constant dense<0xFF800000> : vector<4x16xf32>
    %3 = vector.multi_reduction <maximumf>, %2, %cst_5 [2] : vector<4x16x16xf32> to vector<4x16xf32>
    %4 = vector.shape_cast %3 : vector<4x16xf32> to vector<4x16x1xf32>
    %5 = vector.broadcast %4 : vector<4x16x1xf32> to vector<4x16x16xf32>
    %6 = arith.subf %2, %5 : vector<4x16x16xf32>
    %7 = math.exp %6 : vector<4x16x16xf32>
    %cst_6 = arith.constant dense<0.000000e+00> : vector<4x16xf32>
    %8 = vector.multi_reduction <add>, %7, %cst_6 [2] : vector<4x16x16xf32> to vector<4x16xf32>
    %9 = vector.shape_cast %8 : vector<4x16xf32> to vector<4x16x1xf32>
    %10 = tpu.reciprocal %9 {approx = true} : vector<4x16x1xf32> -> vector<4x16x1xf32>
    %11 = vector.broadcast %10 : vector<4x16x1xf32> to vector<4x16x16xf32>
    %12 = arith.mulf %7, %11 : vector<4x16x16xf32>
    %13 = arith.truncf %12 : vector<4x16x16xf32> to vector<4x16x16xbf16>
    %c0_7 = arith.constant 0 : index
    %c0_8 = arith.constant 0 : index
    %c0_9 = arith.constant 0 : index
    %14 = vector.load %arg3[%c0_7, %c0_8, %c0_9] : memref<4x16x32xbf16, #tpu.memory_space<vmem>>, vector<4x16x32xbf16>
    "tpu.trace_start"() <{level = 10 : i32, message = "bqk,bkc->bqc"}> : () -> ()
    %cst_10 = arith.constant dense<0.000000e+00> : vector<4x16x32xf32>
    %15 = tpu.matmul %13, %14, %cst_10 {dimension_numbers = #tpu.dot_dimension_numbers<[2], [1], [1], [2], [0, 0, 0, 1, 1, 2], [0], [0]>} : vector<4x16x16xbf16>, vector<4x16x32xbf16>, vector<4x16x32xf32> -> vector<4x16x32xf32>
    "tpu.trace_stop"() : () -> ()
    %c0_11 = arith.constant 0 : index
    %c0_12 = arith.constant 0 : index
    %c0_13 = arith.constant 0 : index
    %16 = vector.load %arg4[%c0_11, %c0_12, %c0_13] : memref<4x16x32xbf16, #tpu.memory_space<vmem>>, vector<4x16x32xbf16>
    %17 = arith.extf %16 : vector<4x16x32xbf16> to vector<4x16x32xf32>
    %18 = arith.mulf %15, %17 : vector<4x16x32xf32>
    %19 = arith.truncf %18 : vector<4x16x32xf32> to vector<4x16x32xbf16>
    %c0_14 = arith.constant 0 : index
    %c0_15 = arith.constant 0 : index
    %c0_16 = arith.constant 0 : index
    %20 = vector.load %arg5[%c0_14, %c0_15, %c0_16] : memref<4x16x32xbf16, #tpu.memory_space<vmem>>, vector<4x16x32xbf16>
    tpu.vector_store %arg5[%c0_14, %c0_15, %c0_16], %19 {strides = array<i32>} : memref<4x16x32xbf16, #tpu.memory_space<vmem>>, vector<4x16x32xbf16>,
    return
  }
  func.func @transform_0(%arg0: i32) -> (i32, i32, i32) {
    %c0_i32 = arith.constant 0 : i32
    %c0_i32_0 = arith.constant 0 : i32
    %c0_i32_1 = arith.constant 0 : i32
    return %arg0, %c0_i32, %c0_i32_0 : i32, i32, i32
  }
  func.func @transform_1(%arg0: i32) -> (i32, i32, i32) {
    %c0_i32 = arith.constant 0 : i32
    %c0_i32_0 = arith.constant 0 : i32
    %c0_i32_1 = arith.constant 0 : i32
    return %arg0, %c0_i32, %c0_i32_0 : i32, i32, i32
  }
  func.func @transform_2(%arg0: i32) -> (i32, i32, i32) {
    %c0_i32 = arith.constant 0 : i32
    %c0_i32_0 = arith.constant 0 : i32
    %c0_i32_1 = arith.constant 0 : i32
    return %arg0, %c0_i32, %c0_i32_0 : i32, i32, i32
  }
  func.func @transform_3(%arg0: i32) -> (i32, i32, i32) {
    %c0_i32 = arith.constant 0 : i32
    %c0_i32_0 = arith.constant 0 : i32
    %c0_i32_1 = arith.constant 0 : i32
    return %arg0, %c0_i32, %c0_i32_0 : i32, i32, i32
  }
  func.func @transform_4(%arg0: i32) -> (i32, i32, i32) {
    %c0_i32 = arith.constant 0 : i32
    %c0_i32_0 = arith.constant 0 : i32
    %c0_i32_1 = arith.constant 0 : i32
    return %arg0, %c0_i32, %c0_i32_0 : i32, i32, i32
  }
}

module attributes {stable_mosaic.version = 11 : i64} {
  func.func @_linear_kernel_nk1(%arg0: i32, %arg1: memref<16x288xbf16, #tpu.memory_space<vmem>>, %arg2: memref<288x64xbf16, #tpu.memory_space<vmem>>, %arg3: memref<1x64xf32, #tpu.memory_space<vmem>>, %arg4: memref<16x64xbf16, #tpu.memory_space<vmem>>) attributes {dimension_semantics = [#tpu.dimension_semantics<parallel>], iteration_bounds = array<i64: 2>, scalar_prefetch = 0 : i64, scratch_operands = 0 : i64, tpu.core_type = #tpu.core_type<tc>, window_params = [{transform_indices = @transform_0, window_bounds = array<i64: 16, 288>}, {pipeline_mode = #tpu.pipeline_mode<synchronous>, transform_indices = @transform_1, window_bounds = array<i64: 288, 64>}, {pipeline_mode = #tpu.pipeline_mode<synchronous>, transform_indices = @transform_2, window_bounds = array<i64: 1, 64>}, {transform_indices = @transform_3, window_bounds = array<i64: 16, 64>}]} {
    %c0 = arith.constant 0 : index
    %c0_0 = arith.constant 0 : index
    %0 = vector.load %arg1[%c0, %c0_0] : memref<16x288xbf16, #tpu.memory_space<vmem>>, vector<16x288xbf16>
    %c0_1 = arith.constant 0 : index
    %c0_2 = arith.constant 0 : index
    %1 = vector.load %arg2[%c0_1, %c0_2] : memref<288x64xbf16, #tpu.memory_space<vmem>>, vector<288x64xbf16>
    %cst = arith.constant dense<0.000000e+00> : vector<16x64xf32>
    %2 = tpu.matmul %0, %1, %cst {dimension_numbers = #tpu.dot_dimension_numbers<[1], [0], [0], [1], [0, 0, 1, 1], [], []>} : vector<16x288xbf16>, vector<288x64xbf16>, vector<16x64xf32> -> vector<16x64xf32>
    %c0_3 = arith.constant 0 : index
    %c0_4 = arith.constant 0 : index
    %3 = vector.load %arg3[%c0_3, %c0_4] : memref<1x64xf32, #tpu.memory_space<vmem>>, vector<1x64xf32>
    %4 = vector.broadcast %3 : vector<1x64xf32> to vector<16x64xf32>
    %5 = arith.addf %2, %4 : vector<16x64xf32>
    %cst_5 = arith.constant 0.000000e+00 : f32
    %6 = vector.broadcast %cst_5 : f32 to vector<16x64xf32>
    %7 = arith.maximumf %5, %6 : vector<16x64xf32>
    %8 = arith.truncf %7 : vector<16x64xf32> to vector<16x64xbf16>
    %c0_6 = arith.constant 0 : index
    %c0_7 = arith.constant 0 : index
    %9 = vector.load %arg4[%c0_6, %c0_7] : memref<16x64xbf16, #tpu.memory_space<vmem>>, vector<16x64xbf16>
    tpu.vector_store %arg4[%c0_6, %c0_7], %8 {strides = array<i32>} : memref<16x64xbf16, #tpu.memory_space<vmem>>, vector<16x64xbf16>,
    return
  }
  func.func @transform_0(%arg0: i32) -> (i32, i32) {
    %c0_i32 = arith.constant 0 : i32
    %c0_i32_0 = arith.constant 0 : i32
    return %arg0, %c0_i32 : i32, i32
  }
  func.func @transform_1(%arg0: i32) -> (i32, i32) {
    %c0_i32 = arith.constant 0 : i32
    %c0_i32_0 = arith.constant 0 : i32
    %c0_i32_1 = arith.constant 0 : i32
    return %c0_i32, %c0_i32_0 : i32, i32
  }
  func.func @transform_2(%arg0: i32) -> (i32, i32) {
    %c0_i32 = arith.constant 0 : i32
    %c0_i32_0 = arith.constant 0 : i32
    %c0_i32_1 = arith.constant 0 : i32
    return %c0_i32, %c0_i32_0 : i32, i32
  }
  func.func @transform_3(%arg0: i32) -> (i32, i32) {
    %c0_i32 = arith.constant 0 : i32
    %c0_i32_0 = arith.constant 0 : i32
    return %arg0, %c0_i32 : i32, i32
  }
}

module attributes {stable_mosaic.version = 11 : i64} {
  func.func @_linear_kernel_nk1(%arg0: i32, %arg1: memref<8x256xbf16, #tpu.memory_space<vmem>>, %arg2: memref<256x64xbf16, #tpu.memory_space<vmem>>, %arg3: memref<1x64xf32, #tpu.memory_space<vmem>>, %arg4: memref<8x64xbf16, #tpu.memory_space<vmem>>) attributes {dimension_semantics = [#tpu.dimension_semantics<parallel>], iteration_bounds = array<i64: 1>, scalar_prefetch = 0 : i64, scratch_operands = 0 : i64, tpu.core_type = #tpu.core_type<tc>, window_params = [{transform_indices = @transform_0, window_bounds = array<i64: 8, 256>}, {pipeline_mode = #tpu.pipeline_mode<synchronous>, transform_indices = @transform_1, window_bounds = array<i64: 256, 64>}, {pipeline_mode = #tpu.pipeline_mode<synchronous>, transform_indices = @transform_2, window_bounds = array<i64: 1, 64>}, {transform_indices = @transform_3, window_bounds = array<i64: 8, 64>}]} {
    %c0 = arith.constant 0 : index
    %c0_0 = arith.constant 0 : index
    %0 = vector.load %arg1[%c0, %c0_0] : memref<8x256xbf16, #tpu.memory_space<vmem>>, vector<8x256xbf16>
    %c0_1 = arith.constant 0 : index
    %c0_2 = arith.constant 0 : index
    %1 = vector.load %arg2[%c0_1, %c0_2] : memref<256x64xbf16, #tpu.memory_space<vmem>>, vector<256x64xbf16>
    %cst = arith.constant dense<0.000000e+00> : vector<8x64xf32>
    %2 = tpu.matmul %0, %1, %cst {dimension_numbers = #tpu.dot_dimension_numbers<[1], [0], [0], [1], [0, 0, 1, 1], [], []>} : vector<8x256xbf16>, vector<256x64xbf16>, vector<8x64xf32> -> vector<8x64xf32>
    %c0_3 = arith.constant 0 : index
    %c0_4 = arith.constant 0 : index
    %3 = vector.load %arg3[%c0_3, %c0_4] : memref<1x64xf32, #tpu.memory_space<vmem>>, vector<1x64xf32>
    %4 = vector.broadcast %3 : vector<1x64xf32> to vector<8x64xf32>
    %5 = arith.addf %2, %4 : vector<8x64xf32>
    %cst_5 = arith.constant 0.000000e+00 : f32
    %6 = vector.broadcast %cst_5 : f32 to vector<8x64xf32>
    %7 = arith.maximumf %5, %6 : vector<8x64xf32>
    %8 = arith.truncf %7 : vector<8x64xf32> to vector<8x64xbf16>
    %c0_6 = arith.constant 0 : index
    %c0_7 = arith.constant 0 : index
    %9 = vector.load %arg4[%c0_6, %c0_7] : memref<8x64xbf16, #tpu.memory_space<vmem>>, vector<8x64xbf16>
    tpu.vector_store %arg4[%c0_6, %c0_7], %8 {strides = array<i32>} : memref<8x64xbf16, #tpu.memory_space<vmem>>, vector<8x64xbf16>,
    return
  }
  func.func @transform_0(%arg0: i32) -> (i32, i32) {
    %c0_i32 = arith.constant 0 : i32
    %c0_i32_0 = arith.constant 0 : i32
    return %arg0, %c0_i32 : i32, i32
  }
  func.func @transform_1(%arg0: i32) -> (i32, i32) {
    %c0_i32 = arith.constant 0 : i32
    %c0_i32_0 = arith.constant 0 : i32
    %c0_i32_1 = arith.constant 0 : i32
    return %c0_i32, %c0_i32_0 : i32, i32
  }
  func.func @transform_2(%arg0: i32) -> (i32, i32) {
    %c0_i32 = arith.constant 0 : i32
    %c0_i32_0 = arith.constant 0 : i32
    %c0_i32_1 = arith.constant 0 : i32
    return %c0_i32, %c0_i32_0 : i32, i32
  }
  func.func @transform_3(%arg0: i32) -> (i32, i32) {
    %c0_i32 = arith.constant 0 : i32
    %c0_i32_0 = arith.constant 0 : i32
    return %arg0, %c0_i32 : i32, i32
  }
}

module attributes {stable_mosaic.version = 11 : i64} {
  func.func @_linear_kernel_nk1(%arg0: i32, %arg1: memref<8x64xbf16, #tpu.memory_space<vmem>>, %arg2: memref<64x1024xbf16, #tpu.memory_space<vmem>>, %arg3: memref<1x1024xf32, #tpu.memory_space<vmem>>, %arg4: memref<8x1024xbf16, #tpu.memory_space<vmem>>) attributes {dimension_semantics = [#tpu.dimension_semantics<parallel>], iteration_bounds = array<i64: 1>, scalar_prefetch = 0 : i64, scratch_operands = 0 : i64, tpu.core_type = #tpu.core_type<tc>, window_params = [{transform_indices = @transform_0, window_bounds = array<i64: 8, 64>}, {pipeline_mode = #tpu.pipeline_mode<synchronous>, transform_indices = @transform_1, window_bounds = array<i64: 64, 1024>}, {pipeline_mode = #tpu.pipeline_mode<synchronous>, transform_indices = @transform_2, window_bounds = array<i64: 1, 1024>}, {transform_indices = @transform_3, window_bounds = array<i64: 8, 1024>}]} {
    %c0 = arith.constant 0 : index
    %c0_0 = arith.constant 0 : index
    %0 = vector.load %arg1[%c0, %c0_0] : memref<8x64xbf16, #tpu.memory_space<vmem>>, vector<8x64xbf16>
    %c0_1 = arith.constant 0 : index
    %c0_2 = arith.constant 0 : index
    %1 = vector.load %arg2[%c0_1, %c0_2] : memref<64x1024xbf16, #tpu.memory_space<vmem>>, vector<64x1024xbf16>
    %cst = arith.constant dense<0.000000e+00> : vector<8x1024xf32>
    %2 = tpu.matmul %0, %1, %cst {dimension_numbers = #tpu.dot_dimension_numbers<[1], [0], [0], [1], [0, 0, 1, 1], [], []>} : vector<8x64xbf16>, vector<64x1024xbf16>, vector<8x1024xf32> -> vector<8x1024xf32>
    %c0_3 = arith.constant 0 : index
    %c0_4 = arith.constant 0 : index
    %3 = vector.load %arg3[%c0_3, %c0_4] : memref<1x1024xf32, #tpu.memory_space<vmem>>, vector<1x1024xf32>
    %4 = vector.broadcast %3 : vector<1x1024xf32> to vector<8x1024xf32>
    %5 = arith.addf %2, %4 : vector<8x1024xf32>
    %6 = arith.truncf %5 : vector<8x1024xf32> to vector<8x1024xbf16>
    %c0_5 = arith.constant 0 : index
    %c0_6 = arith.constant 0 : index
    %7 = vector.load %arg4[%c0_5, %c0_6] : memref<8x1024xbf16, #tpu.memory_space<vmem>>, vector<8x1024xbf16>
    tpu.vector_store %arg4[%c0_5, %c0_6], %6 {strides = array<i32>} : memref<8x1024xbf16, #tpu.memory_space<vmem>>, vector<8x1024xbf16>,
    return
  }
  func.func @transform_0(%arg0: i32) -> (i32, i32) {
    %c0_i32 = arith.constant 0 : i32
    %c0_i32_0 = arith.constant 0 : i32
    return %arg0, %c0_i32 : i32, i32
  }
  func.func @transform_1(%arg0: i32) -> (i32, i32) {
    %c0_i32 = arith.constant 0 : i32
    %c0_i32_0 = arith.constant 0 : i32
    %c0_i32_1 = arith.constant 0 : i32
    return %c0_i32, %c0_i32_0 : i32, i32
  }
  func.func @transform_2(%arg0: i32) -> (i32, i32) {
    %c0_i32 = arith.constant 0 : i32
    %c0_i32_0 = arith.constant 0 : i32
    %c0_i32_1 = arith.constant 0 : i32
    return %c0_i32, %c0_i32_0 : i32, i32
  }
  func.func @transform_3(%arg0: i32) -> (i32, i32) {
    %c0_i32 = arith.constant 0 : i32
    %c0_i32_0 = arith.constant 0 : i32
    return %arg0, %c0_i32 : i32, i32
  }
}

module attributes {stable_mosaic.version = 11 : i64} {
  func.func @_bilstm_kernel(%arg0: i32, %arg1: memref<4x2x512xbf16, #tpu.memory_space<vmem>>, %arg2: memref<1x128x512xbf16, #tpu.memory_space<vmem>>, %arg3: memref<4x2x128xbf16, #tpu.memory_space<vmem>>) attributes {dimension_semantics = [#tpu.dimension_semantics<parallel>], iteration_bounds = array<i64: 2>, scalar_prefetch = 0 : i64, scratch_operands = 0 : i64, tpu.core_type = #tpu.core_type<tc>, window_params = [{transform_indices = @transform_0, window_bounds = array<i64: 4, 2, 512>}, {transform_indices = @transform_1, window_bounds = array<i64: 1, 128, 512>}, {transform_indices = @transform_2, window_bounds = array<i64: 4, 2, 128>}]} {
    %cst = arith.constant 0.000000e+00 : bf16
    %0 = vector.broadcast %cst : bf16 to vector<2x128xbf16>
    %cst_0 = arith.constant 0.000000e+00 : f32
    %1 = vector.broadcast %cst_0 : f32 to vector<2x128xf32>
    %c0_i32 = arith.constant 0 : i32
    %c4_i32 = arith.constant 4 : i32
    %2 = arith.addi %c0_i32, %c4_i32 : i32
    %c1_i32 = arith.constant 1 : i32
    %3:2 = scf.for %arg4 = %c0_i32 to %2 step %c1_i32 iter_args(%arg5 = %0, %arg6 = %1) -> (vector<2x128xbf16>, vector<2x128xf32>)  : i32 {
      %c0_i32_2 = arith.constant 0 : i32
      %4 = arith.cmpi eq, %arg0, %c0_i32_2 : i32
      %c3_i32 = arith.constant 3 : i32
      %5 = arith.subi %c3_i32, %arg4 : i32
      %6 = arith.select %4, %arg4, %5 : i32
      %7 = arith.index_cast %6 : i32 to index
      %c0 = arith.constant 0 : index
      %c0_3 = arith.constant 0 : index
      %8 = vector.load %arg1[%7, %c0, %c0_3] : memref<4x2x512xbf16, #tpu.memory_space<vmem>>, vector<1x2x512xbf16>
      %9 = vector.shape_cast %8 : vector<1x2x512xbf16> to vector<2x512xbf16>
      %10 = arith.extf %9 : vector<2x512xbf16> to vector<2x512xf32>
      %c0_4 = arith.constant 0 : index
      %c0_5 = arith.constant 0 : index
      %c0_6 = arith.constant 0 : index
      %11 = vector.load %arg2[%c0_4, %c0_5, %c0_6] : memref<1x128x512xbf16, #tpu.memory_space<vmem>>, vector<1x128x512xbf16>
      %12 = vector.shape_cast %11 : vector<1x128x512xbf16> to vector<128x512xbf16>
      %cst_7 = arith.constant dense<0.000000e+00> : vector<2x512xf32>
      %13 = tpu.matmul %arg5, %12, %cst_7 {dimension_numbers = #tpu.dot_dimension_numbers<[1], [0], [0], [1], [0, 0, 1, 1], [], []>} : vector<2x128xbf16>, vector<128x512xbf16>, vector<2x512xf32> -> vector<2x512xf32>
      %14 = arith.addf %10, %13 : vector<2x512xf32>
      %15 = vector.extract_strided_slice %14 {offsets = [0, 0], sizes = [2, 128], strides = [1, 1]} : vector<2x512xf32> to vector<2x128xf32>
      %cst_8 = arith.constant 0.000000e+00 : f32
      %16 = vector.broadcast %cst_8 : f32 to vector<2x128xf32>
      %17 = arith.subf %16, %15 : vector<2x128xf32>
      %18 = math.exp %17 : vector<2x128xf32>
      %cst_9 = arith.constant 1.000000e+00 : f32
      %19 = vector.broadcast %cst_9 : f32 to vector<2x128xf32>
      %20 = arith.addf %19, %18 : vector<2x128xf32>
      %cst_10 = arith.constant 1.000000e+00 : f32
      %21 = vector.broadcast %cst_10 : f32 to vector<2x128xf32>
      %22 = arith.divf %21, %20 : vector<2x128xf32>
      %23 = vector.extract_strided_slice %14 {offsets = [0, 128], sizes = [2, 128], strides = [1, 1]} : vector<2x512xf32> to vector<2x128xf32>
      %cst_11 = arith.constant 0.000000e+00 : f32
      %24 = vector.broadcast %cst_11 : f32 to vector<2x128xf32>
      %25 = arith.subf %24, %23 : vector<2x128xf32>
      %26 = math.exp %25 : vector<2x128xf32>
      %cst_12 = arith.constant 1.000000e+00 : f32
      %27 = vector.broadcast %cst_12 : f32 to vector<2x128xf32>
      %28 = arith.addf %27, %26 : vector<2x128xf32>
      %cst_13 = arith.constant 1.000000e+00 : f32
      %29 = vector.broadcast %cst_13 : f32 to vector<2x128xf32>
      %30 = arith.divf %29, %28 : vector<2x128xf32>
      %31 = vector.extract_strided_slice %14 {offsets = [0, 256], sizes = [2, 128], strides = [1, 1]} : vector<2x512xf32> to vector<2x128xf32>
      %32 = math.tanh %31 : vector<2x128xf32>
      %33 = vector.extract_strided_slice %14 {offsets = [0, 384], sizes = [2, 128], strides = [1, 1]} : vector<2x512xf32> to vector<2x128xf32>
      %cst_14 = arith.constant 0.000000e+00 : f32
      %34 = vector.broadcast %cst_14 : f32 to vector<2x128xf32>
      %35 = arith.subf %34, %33 : vector<2x128xf32>
      %36 = math.exp %35 : vector<2x128xf32>
      %cst_15 = arith.constant 1.000000e+00 : f32
      %37 = vector.broadcast %cst_15 : f32 to vector<2x128xf32>
      %38 = arith.addf %37, %36 : vector<2x128xf32>
      %cst_16 = arith.constant 1.000000e+00 : f32
      %39 = vector.broadcast %cst_16 : f32 to vector<2x128xf32>
      %40 = arith.divf %39, %38 : vector<2x128xf32>
      %41 = arith.mulf %30, %arg6 : vector<2x128xf32>
      %42 = arith.mulf %22, %32 : vector<2x128xf32>
      %43 = arith.addf %41, %42 : vector<2x128xf32>
      %44 = math.tanh %43 : vector<2x128xf32>
      %45 = arith.mulf %40, %44 : vector<2x128xf32>
      %46 = arith.truncf %45 : vector<2x128xf32> to vector<2x128xbf16>
      %47 = arith.index_cast %6 : i32 to index
      %c0_17 = arith.constant 0 : index
      %c0_18 = arith.constant 0 : index
      %48 = vector.load %arg3[%47, %c0_17, %c0_18] : memref<4x2x128xbf16, #tpu.memory_space<vmem>>, vector<1x2x128xbf16>
      %49 = vector.shape_cast %48 : vector<1x2x128xbf16> to vector<2x128xbf16>
      %50 = vector.shape_cast %46 : vector<2x128xbf16> to vector<1x2x128xbf16>
      tpu.vector_store %arg3[%47, %c0_17, %c0_18], %50 {strides = array<i32>} : memref<4x2x128xbf16, #tpu.memory_space<vmem>>, vector<1x2x128xbf16>,
      %51 = arith.truncf %45 : vector<2x128xf32> to vector<2x128xbf16>
      scf.yield %51, %43 : vector<2x128xbf16>, vector<2x128xf32>
    }
    %c4_i32_1 = arith.constant 4 : i32
    return
  }
  func.func @transform_0(%arg0: i32) -> (i32, i32, i32) {
    %c0_i32 = arith.constant 0 : i32
    %c0_i32_0 = arith.constant 0 : i32
    %c0_i32_1 = arith.constant 0 : i32
    return %c0_i32, %c0_i32_0, %arg0 : i32, i32, i32
  }
  func.func @transform_1(%arg0: i32) -> (i32, i32, i32) {
    %c0_i32 = arith.constant 0 : i32
    %c0_i32_0 = arith.constant 0 : i32
    %c0_i32_1 = arith.constant 0 : i32
    return %arg0, %c0_i32, %c0_i32_0 : i32, i32, i32
  }
  func.func @transform_2(%arg0: i32) -> (i32, i32, i32) {
    %c0_i32 = arith.constant 0 : i32
    %c0_i32_0 = arith.constant 0 : i32
    %c0_i32_1 = arith.constant 0 : i32
    return %c0_i32, %c0_i32_0, %arg0 : i32, i32, i32
  }
}

module attributes {stable_mosaic.version = 11 : i64} {
  func.func @_linear_kernel_nk1(%arg0: i32, %arg1: memref<8x256xbf16, #tpu.memory_space<vmem>>, %arg2: memref<256x1024xbf16, #tpu.memory_space<vmem>>, %arg3: memref<1x1024xf32, #tpu.memory_space<vmem>>, %arg4: memref<8x1024xbf16, #tpu.memory_space<vmem>>) attributes {dimension_semantics = [#tpu.dimension_semantics<parallel>], iteration_bounds = array<i64: 1>, scalar_prefetch = 0 : i64, scratch_operands = 0 : i64, tpu.core_type = #tpu.core_type<tc>, window_params = [{transform_indices = @transform_0, window_bounds = array<i64: 8, 256>}, {pipeline_mode = #tpu.pipeline_mode<synchronous>, transform_indices = @transform_1, window_bounds = array<i64: 256, 1024>}, {pipeline_mode = #tpu.pipeline_mode<synchronous>, transform_indices = @transform_2, window_bounds = array<i64: 1, 1024>}, {transform_indices = @transform_3, window_bounds = array<i64: 8, 1024>}]} {
    %c0 = arith.constant 0 : index
    %c0_0 = arith.constant 0 : index
    %0 = vector.load %arg1[%c0, %c0_0] : memref<8x256xbf16, #tpu.memory_space<vmem>>, vector<8x256xbf16>
    %c0_1 = arith.constant 0 : index
    %c0_2 = arith.constant 0 : index
    %1 = vector.load %arg2[%c0_1, %c0_2] : memref<256x1024xbf16, #tpu.memory_space<vmem>>, vector<256x1024xbf16>
    %cst = arith.constant dense<0.000000e+00> : vector<8x1024xf32>
    %2 = tpu.matmul %0, %1, %cst {dimension_numbers = #tpu.dot_dimension_numbers<[1], [0], [0], [1], [0, 0, 1, 1], [], []>} : vector<8x256xbf16>, vector<256x1024xbf16>, vector<8x1024xf32> -> vector<8x1024xf32>
    %c0_3 = arith.constant 0 : index
    %c0_4 = arith.constant 0 : index
    %3 = vector.load %arg3[%c0_3, %c0_4] : memref<1x1024xf32, #tpu.memory_space<vmem>>, vector<1x1024xf32>
    %4 = vector.broadcast %3 : vector<1x1024xf32> to vector<8x1024xf32>
    %5 = arith.addf %2, %4 : vector<8x1024xf32>
    %6 = arith.truncf %5 : vector<8x1024xf32> to vector<8x1024xbf16>
    %c0_5 = arith.constant 0 : index
    %c0_6 = arith.constant 0 : index
    %7 = vector.load %arg4[%c0_5, %c0_6] : memref<8x1024xbf16, #tpu.memory_space<vmem>>, vector<8x1024xbf16>
    tpu.vector_store %arg4[%c0_5, %c0_6], %6 {strides = array<i32>} : memref<8x1024xbf16, #tpu.memory_space<vmem>>, vector<8x1024xbf16>,
    return
  }
  func.func @transform_0(%arg0: i32) -> (i32, i32) {
    %c0_i32 = arith.constant 0 : i32
    %c0_i32_0 = arith.constant 0 : i32
    return %arg0, %c0_i32 : i32, i32
  }
  func.func @transform_1(%arg0: i32) -> (i32, i32) {
    %c0_i32 = arith.constant 0 : i32
    %c0_i32_0 = arith.constant 0 : i32
    %c0_i32_1 = arith.constant 0 : i32
    return %c0_i32, %c0_i32_0 : i32, i32
  }
  func.func @transform_2(%arg0: i32) -> (i32, i32) {
    %c0_i32 = arith.constant 0 : i32
    %c0_i32_0 = arith.constant 0 : i32
    %c0_i32_1 = arith.constant 0 : i32
    return %c0_i32, %c0_i32_0 : i32, i32
  }
  func.func @transform_3(%arg0: i32) -> (i32, i32) {
    %c0_i32 = arith.constant 0 : i32
    %c0_i32_0 = arith.constant 0 : i32
    return %arg0, %c0_i32 : i32, i32
  }
}

module attributes {stable_mosaic.version = 11 : i64} {
  func.func @_fc_logsoftmax_kernel(%arg0: i32, %arg1: memref<8x256xbf16, #tpu.memory_space<vmem>>, %arg2: memref<256x128xbf16, #tpu.memory_space<vmem>>, %arg3: memref<1x128xf32, #tpu.memory_space<vmem>>, %arg4: memref<8x128xf32, #tpu.memory_space<vmem>>) attributes {dimension_semantics = [#tpu.dimension_semantics<parallel>], iteration_bounds = array<i64: 1>, scalar_prefetch = 0 : i64, scratch_operands = 0 : i64, tpu.core_type = #tpu.core_type<tc>, window_params = [{transform_indices = @transform_0, window_bounds = array<i64: 8, 256>}, {pipeline_mode = #tpu.pipeline_mode<synchronous>, transform_indices = @transform_1, window_bounds = array<i64: 256, 128>}, {pipeline_mode = #tpu.pipeline_mode<synchronous>, transform_indices = @transform_2, window_bounds = array<i64: 1, 128>}, {transform_indices = @transform_3, window_bounds = array<i64: 8, 128>}]} {
    %c0 = arith.constant 0 : index
    %c0_0 = arith.constant 0 : index
    %0 = vector.load %arg1[%c0, %c0_0] : memref<8x256xbf16, #tpu.memory_space<vmem>>, vector<8x256xbf16>
    %c0_1 = arith.constant 0 : index
    %c0_2 = arith.constant 0 : index
    %1 = vector.load %arg2[%c0_1, %c0_2] : memref<256x128xbf16, #tpu.memory_space<vmem>>, vector<256x128xbf16>
    %cst = arith.constant dense<0.000000e+00> : vector<8x128xf32>
    %2 = tpu.matmul %0, %1, %cst {dimension_numbers = #tpu.dot_dimension_numbers<[1], [0], [0], [1], [0, 0, 1, 1], [], []>} : vector<8x256xbf16>, vector<256x128xbf16>, vector<8x128xf32> -> vector<8x128xf32>
    %c0_3 = arith.constant 0 : index
    %c0_4 = arith.constant 0 : index
    %3 = vector.load %arg3[%c0_3, %c0_4] : memref<1x128xf32, #tpu.memory_space<vmem>>, vector<1x128xf32>
    %4 = vector.broadcast %3 : vector<1x128xf32> to vector<8x128xf32>
    %5 = arith.addf %2, %4 : vector<8x128xf32>
    %cst_5 = arith.constant dense<0xFF800000> : vector<8xf32>
    %6 = vector.multi_reduction <maximumf>, %5, %cst_5 [1] : vector<8x128xf32> to vector<8xf32>
    %7 = vector.shape_cast %6 : vector<8xf32> to vector<8x1xf32>
    %8 = vector.broadcast %7 : vector<8x1xf32> to vector<8x128xf32>
    %9 = arith.subf %5, %8 : vector<8x128xf32>
    %10 = math.exp %9 : vector<8x128xf32>
    %cst_6 = arith.constant dense<0.000000e+00> : vector<8xf32>
    %11 = vector.multi_reduction <add>, %10, %cst_6 [1] : vector<8x128xf32> to vector<8xf32>
    %12 = vector.shape_cast %11 : vector<8xf32> to vector<8x1xf32>
    %13 = math.log %12 : vector<8x1xf32>
    %14 = arith.addf %13, %7 : vector<8x1xf32>
    %15 = vector.broadcast %14 : vector<8x1xf32> to vector<8x128xf32>
    %16 = arith.subf %5, %15 : vector<8x128xf32>
    %c0_7 = arith.constant 0 : index
    %c0_8 = arith.constant 0 : index
    %17 = vector.load %arg4[%c0_7, %c0_8] : memref<8x128xf32, #tpu.memory_space<vmem>>, vector<8x128xf32>
    tpu.vector_store %arg4[%c0_7, %c0_8], %16 {strides = array<i32>} : memref<8x128xf32, #tpu.memory_space<vmem>>, vector<8x128xf32>,
    return
  }
  func.func @transform_0(%arg0: i32) -> (i32, i32) {
    %c0_i32 = arith.constant 0 : i32
    %c0_i32_0 = arith.constant 0 : i32
    return %arg0, %c0_i32 : i32, i32
  }
  func.func @transform_1(%arg0: i32) -> (i32, i32) {
    %c0_i32 = arith.constant 0 : i32
    %c0_i32_0 = arith.constant 0 : i32
    %c0_i32_1 = arith.constant 0 : i32
    return %c0_i32, %c0_i32_0 : i32, i32
  }
  func.func @transform_2(%arg0: i32) -> (i32, i32) {
    %c0_i32 = arith.constant 0 : i32
    %c0_i32_0 = arith.constant 0 : i32
    %c0_i32_1 = arith.constant 0 : i32
    return %c0_i32, %c0_i32_0 : i32, i32
  }
  func.func @transform_3(%arg0: i32) -> (i32, i32) {
    %c0_i32 = arith.constant 0 : i32
    %c0_i32_0 = arith.constant 0 : i32
    return %arg0, %c0_i32 : i32, i32
  }
}

</mosaic_0001>

<bundles_post_ra>
// kernel: _lambda_.15
= control target key start
LH: loop header
LB: loop body
LE: loop exit
PB: predicated region body
PF: predicated region fallthrough
CT: control target
= control target key end

     0   :  { %s1639_s12 = smov 0   ;;  %s1934_s0 = inlined_call_operand.vmem [shape: bf16[8192,27], index: 0, kind: input, shape index: {}]   ;;  %s1935_s1 = inlined_call_operand.vmem [shape: bf16[27,8], index: 1, kind: input, shape index: {}]   ;;  %s1936_s2 = inlined_call_operand.vmem [shape: f32[1,8], index: 2, kind: input, shape index: {}]   ;;  %s1937_s3 = inlined_call_operand.vmem [shape: bf16[8192,8], index: 3, kind: output, shape index: {}]  }
   0x1 LB: > { %s1255_s13 = sadd.s32 4294967295, %s1616_s12   ;;  %p1259_p0 = scmp.ge.s32.totalorder %s1616_s12, 1  ;;  %s1616_s12 = sphi %s1639_s12, %s13_s12  }
   0x2   : > { %p138_p1 = scmp.lt.s32.totalorder %s1616_s12, 17 }
   0x4   : > { %p139_p2 = pnand %p1259_p0, %p138_p1 }
   0x5   : > { %v1576_v0 = vld [vmem:[%s1935_s1] sm:$0xff] (!%p139_p2)   ;;  %vm518_vm0 = vcmask (!%p139_p2), 1044480   ;;  %v1577_v1 = vld [vmem:[%s1935_s1 + $0x8] sm:$0x3f] (!%p139_p2)   ;;  %vm519_vm1 = vcmask (!%p139_p2), 1045504   ;;  %s1260_s18 = sshll.u32 (!%p139_p2), %s1255_s13, 6 }
   0x6   : > { %142 = sbr.rel (%p139_p2) target bundleno = 297 (0x129), region = 32  ;;  %1495 = vmatprep.subr.bf16.mxu0 (!%p139_p2), %v1576_v0  ;;  %1563 = vmatprep.subr.bf16.mxu1 (!%p139_p2), %v1576_v0  ;;  %v1618_v2 = vmov (!%p139_p2), 65535   ;;  %p163_p3 = scmp.lt.s32.totalorder (!%p139_p2), %s1260_s18, 1023  ;;  %vm421_vm2 = vcmask (!%p139_p2), 220160   ;;  %v1730_v38 = vld [vmem:[%s1936_s2] ss:$0 sm:$0xff] (!%p139_p2) }
   0x7   : > { %1496 = vmatpush3.bf16.msra.mxu0 (!%p139_p2), %v1576_v0  ;;  %1565 = vmatpush3.bf16.msra.mxu1 (!%p139_p2), %v1576_v0  ;;  %v520_v3 = vsel (!%p139_p2), %vm518_vm0, 4294967295, %v1618_v2  ;;  %vm1134_vm3 = vcmask (!%p139_p2), 60416  }
   0x8   : > { %v521_v4 = vsel (!%p139_p2), %vm519_vm1, %v520_v3, 0 }
   0x9   : > { %v523_v5 = vand.u32 (!%p139_p2), %v1577_v1, %v521_v4 }
   0xb   : > { %1497 = vmatprep.subr.bf16.mxu0 (!%p139_p2), %v523_v5  ;;  %1564 = vmatprep.subr.bf16.mxu1 (!%p139_p2), %v523_v5 }
   0xc   : > { %1498 = vmatpush3.bf16.msra.mxu0 (!%p139_p2), %v523_v5  ;;  %1566 = vmatpush3.bf16.msra.mxu1 (!%p139_p2), %v523_v5 }
   0xd   : > { %s1939_s18 = smov (!%p163_p3, %s1260_s18), 1023 }
   0xe   : > { %s1261_s19 = sshll.u32 %s1939_s18, 2 }
   0xf   : > { %s1661_s22 = scalar_lea.vmem %s1934_s0, %s1261_s19  ;;  %s1742_s27 = scalar_lea.vmem %s1937_s3, %s1261_s19 }
  0x10   : > { %v1578_v6 = vld [vmem:[%s1661_s22] sm:$0xff]   ;;  %v1580_v8 = vld [vmem:[%s1661_s22 + $0x8] sm:$0xff]   ;;  %v1582_v10 = vld [vmem:[%s1661_s22 + $0x10] sm:$0xff]  }
  0x11   : > { %v1579_v7 = vld [vmem:[%s1661_s22 + $0x80] sm:$0xff]   ;;  %1499 = vmatprep.mubr.msk.bf16.mxu0 %vm421_vm2, %v1578_v6  ;;  %v1581_v9 = vld [vmem:[%s1661_s22 + $0x88] sm:$0xff]   ;;  %v1583_v11 = vld [vmem:[%s1661_s22 + $0x90] sm:$0xff]  }
  0x12   : > { %1531 = vmatprep.mubr.msk.bf16.mxu1 %vm421_vm2, %v1579_v7  ;;  %1500 = vmatmul.mubr.msk.bf16.vlgmr.msra.gmra.mrb[0].mxu0 %vm421_vm2, %v1580_v8  ;;  %v1584_v12 = vld [vmem:[%s1661_s22 + $0x18] sm:$0xff]   ;;  %v1586_v14 = vld [vmem:[%s1661_s22 + $0x20] sm:$0xff]   ;;  %v1588_v16 = vld [vmem:[%s1661_s22 + $0x28] sm:$0xff]  }
  0x13   : > { %1532 = vmatmul.mubr.msk.bf16.vlgmr.msra.gmra.mrb[0].mxu1 %vm421_vm2, %v1581_v9  ;;  %1503 = vmatprep.mubr.msk.bf16.mxu0 %vm421_vm2, %v1582_v10  ;;  %v1585_v13 = vld [vmem:[%s1661_s22 + $0x98] sm:$0xff]   ;;  %v1587_v15 = vld [vmem:[%s1661_s22 + $0xa0] sm:$0xff]   ;;  %v1589_v17 = vld [vmem:[%s1661_s22 + $0xa8] sm:$0xff]  }
  0x14   : > { %1535 = vmatprep.mubr.msk.bf16.mxu1 %vm421_vm2, %v1583_v11  ;;  %v1590_v18 = vld [vmem:[%s1661_s22 + $0x30] sm:$0xff]   ;;  %v1592_v20 = vld [vmem:[%s1661_s22 + $0x38] sm:$0xff]   ;;  %v1594_v22 = vld [vmem:[%s1661_s22 + $0x40] sm:$0xff]  }
  0x15   : > { %v1591_v19 = vld [vmem:[%s1661_s22 + $0xb0] sm:$0xff]   ;;  %v1593_v21 = vld [vmem:[%s1661_s22 + $0xb8] sm:$0xff]   ;;  %v1595_v23 = vld [vmem:[%s1661_s22 + $0xc0] sm:$0xff]  }
  0x16   : > { %v1596_v24 = vld [vmem:[%s1661_s22 + $0x48] sm:$0xff]   ;;  %v1598_v26 = vld [vmem:[%s1661_s22 + $0x50] sm:$0xff]   ;;  %v1600_v28 = vld [vmem:[%s1661_s22 + $0x58] sm:$0xff]  }
  0x17   : > { %v1597_v25 = vld [vmem:[%s1661_s22 + $0xc8] sm:$0xff]   ;;  %v1599_v27 = vld [vmem:[%s1661_s22 + $0xd0] sm:$0xff]   ;;  %v1601_v29 = vld [vmem:[%s1661_s22 + $0xd8] sm:$0xff]  }
  0x18   : > { %v1602_v30 = vld [vmem:[%s1661_s22 + $0x60] sm:$0xff]   ;;  %v1604_v32 = vld [vmem:[%s1661_s22 + $0x68] sm:$0xff]   ;;  %v1606_v34 = vld [vmem:[%s1661_s22 + $0x70] sm:$0xff]  }
  0x19   : > { %v1603_v31 = vld [vmem:[%s1661_s22 + $0xe0] sm:$0xff]   ;;  %v1605_v33 = vld [vmem:[%s1661_s22 + $0xe8] sm:$0xff]   ;;  %v1607_v35 = vld [vmem:[%s1661_s22 + $0xf0] sm:$0xff]  }
  0x1a   : > { %1504 = vmatmul.mubr.msk.bf16.gmra.mrb[4].mxu0 %vm421_vm2, %v1584_v12  ;;  %v1608_v36 = vld [vmem:[%s1661_s22 + $0x78] sm:$0xff]  }
  0x1b   : > { %1536 = vmatmul.mubr.msk.bf16.gmra.mrb[4].mxu1 %vm421_vm2, %v1585_v13  ;;  %1507 = vmatprep.mubr.msk.bf16.mxu0 %vm421_vm2, %v1586_v14  ;;  %v1609_v37 = vld [vmem:[%s1661_s22 + $0xf8] sm:$0xff]  }
  0x1c   : > { %1539 = vmatprep.mubr.msk.bf16.mxu1 %vm421_vm2, %v1587_v15 }
  0x22   : > { %1508 = vmatmul.mubr.msk.bf16.gmra.mrb[8].mxu0 %vm421_vm2, %v1588_v16 }
  0x23   : > { %1540 = vmatmul.mubr.msk.bf16.gmra.mrb[8].mxu1 %vm421_vm2, %v1589_v17  ;;  %1511 = vmatprep.mubr.msk.bf16.mxu0 %vm421_vm2, %v1590_v18 }
  0x24   : > { %1543 = vmatprep.mubr.msk.bf16.mxu1 %vm421_vm2, %v1591_v19 }
  0x2a   : > { %1512 = vmatmul.mubr.msk.bf16.gmra.mrb[12].mxu0 %vm421_vm2, %v1592_v20 }
  0x2b   : > { %1544 = vmatmul.mubr.msk.bf16.gmra.mrb[12].mxu1 %vm421_vm2, %v1593_v21  ;;  %1515 = vmatprep.mubr.msk.bf16.mxu0 %vm421_vm2, %v1594_v22 }
  0x2c   : > { %1547 = vmatprep.mubr.msk.bf16.mxu1 %vm421_vm2, %v1595_v23 }
  0x32   : > { %1516 = vmatmul.mubr.msk.bf16.gmra.mrb[16].mxu0 %vm421_vm2, %v1596_v24 }
  0x33   : > { %1548 = vmatmul.mubr.msk.bf16.gmra.mrb[16].mxu1 %vm421_vm2, %v1597_v25  ;;  %1519 = vmatprep.mubr.msk.bf16.mxu0 %vm421_vm2, %v1598_v26 }
  0x34   : > { %1551 = vmatprep.mubr.msk.bf16.mxu1 %vm421_vm2, %v1599_v27 }
  0x3a   : > { %1520 = vmatmul.mubr.msk.bf16.gmra.mrb[20].mxu0 %vm421_vm2, %v1600_v28 }
  0x3b   : > { %1552 = vmatmul.mubr.msk.bf16.gmra.mrb[20].mxu1 %vm421_vm2, %v1601_v29  ;;  %1523 = vmatprep.mubr.msk.bf16.mxu0 %vm421_vm2, %v1602_v30 }
  0x3c   : > { %1555 = vmatprep.mubr.msk.bf16.mxu1 %vm421_vm2, %v1603_v31 }
  0x42   : > { %1524 = vmatmul.mubr.msk.bf16.gmra.mrb[24].mxu0 %vm421_vm2, %v1604_v32 }
  0x43   : > { %1556 = vmatmul.mubr.msk.bf16.gmra.mrb[24].mxu1 %vm421_vm2, %v1605_v33  ;;  %1527 = vmatprep.mubr.msk.bf16.mxu0 %vm421_vm2, %v1606_v34 }
  0x44   : > { %1559 = vmatprep.mubr.msk.bf16.mxu1 %vm421_vm2, %v1607_v35 }
  0x4a   : > { %1528 = vmatmul.mubr.msk.bf16.gmra.mrb[28].mxu0 %vm421_vm2, %v1608_v36 }
  0x4b   : > { %1560 = vmatmul.mubr.msk.bf16.gmra.mrb[28].mxu1 %vm421_vm2, %v1609_v37 }
  0xe5   : > { %v1501_v39 = vpop.f32.mrb[0].mxu0 }
  0xe6   : > { %v568_v40 = vadd.f32 %v1501_v39, %v1730_v38  ;;  %v1533_v41 = vpop.f32.mrb[0].mxu1  ;;  %v559_v42 = vpop.f32.mrb[1].mxu0 }
  0xe7   : > { %v696_v43 = vadd.f32 %v1533_v41, %v1730_v38  ;;  %v560_v44 = vadd.f32 %v1730_v38, %v559_v42  ;;  %v687_v45 = vpop.f32.mrb[1].mxu1  ;;  %v1502_v46 = vpop.f32.mrb[2].mxu0 }
  0xe8   : > { %v816_v47 = vmax.f32 %v568_v40, 0.0  ;;  %v688_v48 = vadd.f32 %v1730_v38, %v687_v45  ;;  %v571_v49 = vadd.f32 %v1502_v46, %v1730_v38  ;;  %v1534_v50 = vpop.f32.mrb[2].mxu1  ;;  %v562_v51 = vpop.f32.mrb[3].mxu0 }
  0xe9   : > { %v848_v52 = vmax.f32 %v696_v43, 0.0  ;;  %v814_v53 = vmax.f32 %v560_v44, 0.0  ;;  %v699_v54 = vadd.f32 %v1534_v50, %v1730_v38  ;;  %v563_v55 = vadd.f32 %v1730_v38, %v562_v51  ;;  %v690_v56 = vpop.f32.mrb[3].mxu1 }
  0xea   : > { %v1399_v57 = vpack.c.bf16 %v816_v47, %v816_v47  ;;  %v846_v58 = vmax.f32 %v688_v48, 0.0  ;;  %v817_v59 = vmax.f32 %v571_v49, 0.0  ;;  %v691_v60 = vadd.f32 %v1730_v38, %v690_v56 }
  0xeb   : > { %v1431_v61 = vpack.c.bf16 %v848_v52, %v848_v52  ;;  %v1397_v62 = vpack.c.bf16 %v814_v53, %v814_v53  ;;  %v849_v63 = vmax.f32 %v699_v54, 0.0  ;;  %v815_v0 = vmax.f32 %v563_v55, 0.0 }
  0xec   : > { %1137 = vst.msk [vmem:[%s1742_s27 + $0x8] sm:$0xf] %vm1134_vm3, %v1399_v57  ;;  %v1429_v1 = vpack.c.bf16 %v846_v58, %v846_v58  ;;  %v1400_v2 = vpack.c.bf16 %v817_v59, %v817_v59  ;;  %v847_v3 = vmax.f32 %v691_v60, 0.0 }
  0xed   : > { %1169 = vst.msk [vmem:[%s1742_s27 + $0x88] sm:$0xf] %vm1134_vm3, %v1431_v61  ;;  %1135 = vst.msk [vmem:[%s1742_s27] sm:$0xf] %vm1134_vm3, %v1397_v62  ;;  %v1432_v4 = vpack.c.bf16 %v849_v63, %v849_v63  ;;  %v1398_v5 = vpack.c.bf16 %v815_v0, %v815_v0  ;;  %v1505_v6 = vpop.f32.mrb[4].mxu0 }
  0xee   : > { %1167 = vst.msk [vmem:[%s1742_s27 + $0x80] sm:$0xf] %vm1134_vm3, %v1429_v1  ;;  %1138 = vst.msk [vmem:[%s1742_s27 + $0xc] sm:$0xf] %vm1134_vm3, %v1400_v2  ;;  %v1430_v7 = vpack.c.bf16 %v847_v3, %v847_v3  ;;  %v584_v8 = vadd.f32 %v1505_v6, %v1730_v38  ;;  %v1537_v9 = vpop.f32.mrb[4].mxu1  ;;  %v575_v10 = vpop.f32.mrb[5].mxu0 }
  0xef   : > { %1170 = vst.msk [vmem:[%s1742_s27 + $0x8c] sm:$0xf] %vm1134_vm3, %v1432_v4  ;;  %1136 = vst.msk [vmem:[%s1742_s27 + $0x4] sm:$0xf] %vm1134_vm3, %v1398_v5  ;;  %v712_v11 = vadd.f32 %v1537_v9, %v1730_v38  ;;  %v576_v12 = vadd.f32 %v1730_v38, %v575_v10  ;;  %v703_v13 = vpop.f32.mrb[5].mxu1  ;;  %v1506_v14 = vpop.f32.mrb[6].mxu0 }
  0xf0   : > { %1168 = vst.msk [vmem:[%s1742_s27 + $0x84] sm:$0xf] %vm1134_vm3, %v1430_v7  ;;  %v820_v15 = vmax.f32 %v584_v8, 0.0  ;;  %v704_v16 = vadd.f32 %v1730_v38, %v703_v13  ;;  %v587_v17 = vadd.f32 %v1506_v14, %v1730_v38  ;;  %v1538_v18 = vpop.f32.mrb[6].mxu1  ;;  %v578_v19 = vpop.f32.mrb[7].mxu0 }
  0xf1   : > { %v852_v20 = vmax.f32 %v712_v11, 0.0  ;;  %v818_v21 = vmax.f32 %v576_v12, 0.0  ;;  %v715_v22 = vadd.f32 %v1538_v18, %v1730_v38  ;;  %v579_v23 = vadd.f32 %v1730_v38, %v578_v19  ;;  %v706_v24 = vpop.f32.mrb[7].mxu1 }
  0xf2   : > { %v1403_v25 = vpack.c.bf16 %v820_v15, %v820_v15  ;;  %v850_v26 = vmax.f32 %v704_v16, 0.0  ;;  %v821_v27 = vmax.f32 %v587_v17, 0.0  ;;  %v707_v28 = vadd.f32 %v1730_v38, %v706_v24 }
  0xf3   : > { %v1435_v29 = vpack.c.bf16 %v852_v20, %v852_v20  ;;  %v1401_v30 = vpack.c.bf16 %v818_v21, %v818_v21  ;;  %v853_v31 = vmax.f32 %v715_v22, 0.0  ;;  %v819_v32 = vmax.f32 %v579_v23, 0.0 }
  0xf4   : > { %1141 = vst.msk [vmem:[%s1742_s27 + $0x18] sm:$0xf] %vm1134_vm3, %v1403_v25  ;;  %v1433_v33 = vpack.c.bf16 %v850_v26, %v850_v26  ;;  %v1404_v34 = vpack.c.bf16 %v821_v27, %v821_v27  ;;  %v851_v35 = vmax.f32 %v707_v28, 0.0 }
  0xf5   : > { %1173 = vst.msk [vmem:[%s1742_s27 + $0x98] sm:$0xf] %vm1134_vm3, %v1435_v29  ;;  %1139 = vst.msk [vmem:[%s1742_s27 + $0x10] sm:$0xf] %vm1134_vm3, %v1401_v30  ;;  %v1436_v36 = vpack.c.bf16 %v853_v31, %v853_v31  ;;  %v1402_v37 = vpack.c.bf16 %v819_v32, %v819_v32  ;;  %v1509_v39 = vpop.f32.mrb[8].mxu0 }
  0xf6   : > { %1171 = vst.msk [vmem:[%s1742_s27 + $0x90] sm:$0xf] %vm1134_vm3, %v1433_v33  ;;  %1142 = vst.msk [vmem:[%s1742_s27 + $0x1c] sm:$0xf] %vm1134_vm3, %v1404_v34  ;;  %v1434_v40 = vpack.c.bf16 %v851_v35, %v851_v35  ;;  %v600_v41 = vadd.f32 %v1509_v39, %v1730_v38  ;;  %v1541_v42 = vpop.f32.mrb[8].mxu1  ;;  %v591_v43 = vpop.f32.mrb[9].mxu0 }
  0xf7   : > { %1174 = vst.msk [vmem:[%s1742_s27 + $0x9c] sm:$0xf] %vm1134_vm3, %v1436_v36  ;;  %1140 = vst.msk [vmem:[%s1742_s27 + $0x14] sm:$0xf] %vm1134_vm3, %v1402_v37  ;;  %v728_v44 = vadd.f32 %v1541_v42, %v1730_v38  ;;  %v592_v45 = vadd.f32 %v1730_v38, %v591_v43  ;;  %v719_v46 = vpop.f32.mrb[9].mxu1  ;;  %v1510_v47 = vpop.f32.mrb[10].mxu0 }
  0xf8   : > { %1172 = vst.msk [vmem:[%s1742_s27 + $0x94] sm:$0xf] %vm1134_vm3, %v1434_v40  ;;  %v824_v48 = vmax.f32 %v600_v41, 0.0  ;;  %v720_v49 = vadd.f32 %v1730_v38, %v719_v46  ;;  %v603_v50 = vadd.f32 %v1510_v47, %v1730_v38  ;;  %v1542_v51 = vpop.f32.mrb[10].mxu1  ;;  %v594_v52 = vpop.f32.mrb[11].mxu0 }
  0xf9   : > { %v856_v53 = vmax.f32 %v728_v44, 0.0  ;;  %v822_v54 = vmax.f32 %v592_v45, 0.0  ;;  %v731_v55 = vadd.f32 %v1542_v51, %v1730_v38  ;;  %v595_v56 = vadd.f32 %v1730_v38, %v594_v52  ;;  %v722_v57 = vpop.f32.mrb[11].mxu1 }
  0xfa   : > { %v1407_v58 = vpack.c.bf16 %v824_v48, %v824_v48  ;;  %v854_v59 = vmax.f32 %v720_v49, 0.0  ;;  %v825_v60 = vmax.f32 %v603_v50, 0.0  ;;  %v723_v61 = vadd.f32 %v1730_v38, %v722_v57 }
  0xfb   : > { %v1439_v62 = vpack.c.bf16 %v856_v53, %v856_v53  ;;  %v1405_v63 = vpack.c.bf16 %v822_v54, %v822_v54  ;;  %v857_v0 = vmax.f32 %v731_v55, 0.0  ;;  %v823_v1 = vmax.f32 %v595_v56, 0.0 }
  0xfc   : > { %1145 = vst.msk [vmem:[%s1742_s27 + $0x28] sm:$0xf] %vm1134_vm3, %v1407_v58  ;;  %v1437_v2 = vpack.c.bf16 %v854_v59, %v854_v59  ;;  %v1408_v3 = vpack.c.bf16 %v825_v60, %v825_v60  ;;  %v855_v4 = vmax.f32 %v723_v61, 0.0 }
  0xfd   : > { %1177 = vst.msk [vmem:[%s1742_s27 + $0xa8] sm:$0xf] %vm1134_vm3, %v1439_v62  ;;  %1143 = vst.msk [vmem:[%s1742_s27 + $0x20] sm:$0xf] %vm1134_vm3, %v1405_v63  ;;  %v1440_v5 = vpack.c.bf16 %v857_v0, %v857_v0  ;;  %v1406_v6 = vpack.c.bf16 %v823_v1, %v823_v1  ;;  %v1513_v7 = vpop.f32.mrb[12].mxu0 }
  0xfe   : > { %1175 = vst.msk [vmem:[%s1742_s27 + $0xa0] sm:$0xf] %vm1134_vm3, %v1437_v2  ;;  %1146 = vst.msk [vmem:[%s1742_s27 + $0x2c] sm:$0xf] %vm1134_vm3, %v1408_v3  ;;  %v1438_v8 = vpack.c.bf16 %v855_v4, %v855_v4  ;;  %v616_v9 = vadd.f32 %v1513_v7, %v1730_v38  ;;  %v1545_v10 = vpop.f32.mrb[12].mxu1  ;;  %v607_v11 = vpop.f32.mrb[13].mxu0 }
  0xff   : > { %1178 = vst.msk [vmem:[%s1742_s27 + $0xac] sm:$0xf] %vm1134_vm3, %v1440_v5  ;;  %1144 = vst.msk [vmem:[%s1742_s27 + $0x24] sm:$0xf] %vm1134_vm3, %v1406_v6  ;;  %v744_v12 = vadd.f32 %v1545_v10, %v1730_v38  ;;  %v608_v13 = vadd.f32 %v1730_v38, %v607_v11  ;;  %v735_v14 = vpop.f32.mrb[13].mxu1  ;;  %v1514_v15 = vpop.f32.mrb[14].mxu0 }
 0x100   : > { %1176 = vst.msk [vmem:[%s1742_s27 + $0xa4] sm:$0xf] %vm1134_vm3, %v1438_v8  ;;  %v828_v16 = vmax.f32 %v616_v9, 0.0  ;;  %v736_v17 = vadd.f32 %v1730_v38, %v735_v14  ;;  %v619_v18 = vadd.f32 %v1514_v15, %v1730_v38  ;;  %v1546_v19 = vpop.f32.mrb[14].mxu1  ;;  %v610_v20 = vpop.f32.mrb[15].mxu0 }
 0x101   : > { %v860_v21 = vmax.f32 %v744_v12, 0.0  ;;  %v826_v22 = vmax.f32 %v608_v13, 0.0  ;;  %v747_v23 = vadd.f32 %v1546_v19, %v1730_v38  ;;  %v611_v24 = vadd.f32 %v1730_v38, %v610_v20  ;;  %v738_v25 = vpop.f32.mrb[15].mxu1 }
 0x102   : > { %v1411_v26 = vpack.c.bf16 %v828_v16, %v828_v16  ;;  %v858_v27 = vmax.f32 %v736_v17, 0.0  ;;  %v829_v28 = vmax.f32 %v619_v18, 0.0  ;;  %v739_v29 = vadd.f32 %v1730_v38, %v738_v25 }
 0x103   : > { %v1443_v30 = vpack.c.bf16 %v860_v21, %v860_v21  ;;  %v1409_v31 = vpack.c.bf16 %v826_v22, %v826_v22  ;;  %v861_v32 = vmax.f32 %v747_v23, 0.0  ;;  %v827_v33 = vmax.f32 %v611_v24, 0.0 }
 0x104   : > { %1149 = vst.msk [vmem:[%s1742_s27 + $0x38] sm:$0xf] %vm1134_vm3, %v1411_v26  ;;  %v1441_v34 = vpack.c.bf16 %v858_v27, %v858_v27  ;;  %v1412_v35 = vpack.c.bf16 %v829_v28, %v829_v28  ;;  %v859_v36 = vmax.f32 %v739_v29, 0.0 }
 0x105   : > { %1181 = vst.msk [vmem:[%s1742_s27 + $0xb8] sm:$0xf] %vm1134_vm3, %v1443_v30  ;;  %1147 = vst.msk [vmem:[%s1742_s27 + $0x30] sm:$0xf] %vm1134_vm3, %v1409_v31  ;;  %v1444_v37 = vpack.c.bf16 %v861_v32, %v861_v32  ;;  %v1410_v39 = vpack.c.bf16 %v827_v33, %v827_v33  ;;  %v1517_v40 = vpop.f32.mrb[16].mxu0 }
 0x106   : > { %1179 = vst.msk [vmem:[%s1742_s27 + $0xb0] sm:$0xf] %vm1134_vm3, %v1441_v34  ;;  %1150 = vst.msk [vmem:[%s1742_s27 + $0x3c] sm:$0xf] %vm1134_vm3, %v1412_v35  ;;  %v1442_v41 = vpack.c.bf16 %v859_v36, %v859_v36  ;;  %v632_v42 = vadd.f32 %v1517_v40, %v1730_v38  ;;  %v1549_v43 = vpop.f32.mrb[16].mxu1  ;;  %v623_v44 = vpop.f32.mrb[17].mxu0 }
 0x107   : > { %1182 = vst.msk [vmem:[%s1742_s27 + $0xbc] sm:$0xf] %vm1134_vm3, %v1444_v37  ;;  %1148 = vst.msk [vmem:[%s1742_s27 + $0x34] sm:$0xf] %vm1134_vm3, %v1410_v39  ;;  %v760_v45 = vadd.f32 %v1549_v43, %v1730_v38  ;;  %v624_v46 = vadd.f32 %v1730_v38, %v623_v44  ;;  %v751_v47 = vpop.f32.mrb[17].mxu1  ;;  %v1518_v48 = vpop.f32.mrb[18].mxu0 }
 0x108   : > { %1180 = vst.msk [vmem:[%s1742_s27 + $0xb4] sm:$0xf] %vm1134_vm3, %v1442_v41  ;;  %v832_v49 = vmax.f32 %v632_v42, 0.0  ;;  %v752_v50 = vadd.f32 %v1730_v38, %v751_v47  ;;  %v635_v51 = vadd.f32 %v1518_v48, %v1730_v38  ;;  %v1550_v52 = vpop.f32.mrb[18].mxu1  ;;  %v626_v53 = vpop.f32.mrb[19].mxu0 }
 0x109   : > { %v864_v54 = vmax.f32 %v760_v45, 0.0  ;;  %v830_v55 = vmax.f32 %v624_v46, 0.0  ;;  %v763_v56 = vadd.f32 %v1550_v52, %v1730_v38  ;;  %v627_v57 = vadd.f32 %v1730_v38, %v626_v53  ;;  %v754_v58 = vpop.f32.mrb[19].mxu1 }
 0x10a   : > { %v1415_v59 = vpack.c.bf16 %v832_v49, %v832_v49  ;;  %v862_v60 = vmax.f32 %v752_v50, 0.0  ;;  %v833_v61 = vmax.f32 %v635_v51, 0.0  ;;  %v755_v62 = vadd.f32 %v1730_v38, %v754_v58 }
 0x10b   : > { %v1447_v63 = vpack.c.bf16 %v864_v54, %v864_v54  ;;  %v1413_v0 = vpack.c.bf16 %v830_v55, %v830_v55  ;;  %v865_v1 = vmax.f32 %v763_v56, 0.0  ;;  %v831_v2 = vmax.f32 %v627_v57, 0.0 }
 0x10c   : > { %1153 = vst.msk [vmem:[%s1742_s27 + $0x48] sm:$0xf] %vm1134_vm3, %v1415_v59  ;;  %v1445_v3 = vpack.c.bf16 %v862_v60, %v862_v60  ;;  %v1416_v4 = vpack.c.bf16 %v833_v61, %v833_v61  ;;  %v863_v5 = vmax.f32 %v755_v62, 0.0 }
 0x10d   : > { %1185 = vst.msk [vmem:[%s1742_s27 + $0xc8] sm:$0xf] %vm1134_vm3, %v1447_v63  ;;  %1151 = vst.msk [vmem:[%s1742_s27 + $0x40] sm:$0xf] %vm1134_vm3, %v1413_v0  ;;  %v1448_v6 = vpack.c.bf16 %v865_v1, %v865_v1  ;;  %v1414_v7 = vpack.c.bf16 %v831_v2, %v831_v2  ;;  %v1521_v8 = vpop.f32.mrb[20].mxu0 }
 0x10e   : > { %1183 = vst.msk [vmem:[%s1742_s27 + $0xc0] sm:$0xf] %vm1134_vm3, %v1445_v3  ;;  %1154 = vst.msk [vmem:[%s1742_s27 + $0x4c] sm:$0xf] %vm1134_vm3, %v1416_v4  ;;  %v1446_v9 = vpack.c.bf16 %v863_v5, %v863_v5  ;;  %v648_v10 = vadd.f32 %v1521_v8, %v1730_v38  ;;  %v1553_v11 = vpop.f32.mrb[20].mxu1  ;;  %v639_v12 = vpop.f32.mrb[21].mxu0 }
 0x10f   : > { %1186 = vst.msk [vmem:[%s1742_s27 + $0xcc] sm:$0xf] %vm1134_vm3, %v1448_v6  ;;  %1152 = vst.msk [vmem:[%s1742_s27 + $0x44] sm:$0xf] %vm1134_vm3, %v1414_v7  ;;  %v776_v13 = vadd.f32 %v1553_v11, %v1730_v38  ;;  %v640_v14 = vadd.f32 %v1730_v38, %v639_v12  ;;  %v767_v15 = vpop.f32.mrb[21].mxu1  ;;  %v1522_v16 = vpop.f32.mrb[22].mxu0 }
 0x110   : > { %1184 = vst.msk [vmem:[%s1742_s27 + $0xc4] sm:$0xf] %vm1134_vm3, %v1446_v9  ;;  %v836_v17 = vmax.f32 %v648_v10, 0.0  ;;  %v768_v18 = vadd.f32 %v1730_v38, %v767_v15  ;;  %v651_v19 = vadd.f32 %v1522_v16, %v1730_v38  ;;  %v1554_v20 = vpop.f32.mrb[22].mxu1  ;;  %v642_v21 = vpop.f32.mrb[23].mxu0 }
 0x111   : > { %v868_v22 = vmax.f32 %v776_v13, 0.0  ;;  %v834_v23 = vmax.f32 %v640_v14, 0.0  ;;  %v779_v24 = vadd.f32 %v1554_v20, %v1730_v38  ;;  %v643_v25 = vadd.f32 %v1730_v38, %v642_v21  ;;  %v770_v26 = vpop.f32.mrb[23].mxu1 }
 0x112   : > { %v1419_v27 = vpack.c.bf16 %v836_v17, %v836_v17  ;;  %v866_v28 = vmax.f32 %v768_v18, 0.0  ;;  %v837_v29 = vmax.f32 %v651_v19, 0.0  ;;  %v771_v30 = vadd.f32 %v1730_v38, %v770_v26 }
 0x113   : > { %v1451_v31 = vpack.c.bf16 %v868_v22, %v868_v22  ;;  %v1417_v32 = vpack.c.bf16 %v834_v23, %v834_v23  ;;  %v869_v33 = vmax.f32 %v779_v24, 0.0  ;;  %v835_v34 = vmax.f32 %v643_v25, 0.0 }
 0x114   : > { %1157 = vst.msk [vmem:[%s1742_s27 + $0x58] sm:$0xf] %vm1134_vm3, %v1419_v27  ;;  %v1449_v35 = vpack.c.bf16 %v866_v28, %v866_v28  ;;  %v1420_v36 = vpack.c.bf16 %v837_v29, %v837_v29  ;;  %v867_v37 = vmax.f32 %v771_v30, 0.0 }
 0x115   : > { %1189 = vst.msk [vmem:[%s1742_s27 + $0xd8] sm:$0xf] %vm1134_vm3, %v1451_v31  ;;  %1155 = vst.msk [vmem:[%s1742_s27 + $0x50] sm:$0xf] %vm1134_vm3, %v1417_v32  ;;  %v1452_v39 = vpack.c.bf16 %v869_v33, %v869_v33  ;;  %v1418_v40 = vpack.c.bf16 %v835_v34, %v835_v34  ;;  %v1525_v41 = vpop.f32.mrb[24].mxu0 }
 0x116   : > { %1187 = vst.msk [vmem:[%s1742_s27 + $0xd0] sm:$0xf] %vm1134_vm3, %v1449_v35  ;;  %1158 = vst.msk [vmem:[%s1742_s27 + $0x5c] sm:$0xf] %vm1134_vm3, %v1420_v36  ;;  %v1450_v42 = vpack.c.bf16 %v867_v37, %v867_v37  ;;  %v664_v43 = vadd.f32 %v1525_v41, %v1730_v38  ;;  %v1557_v44 = vpop.f32.mrb[24].mxu1  ;;  %v655_v45 = vpop.f32.mrb[25].mxu0 }
 0x117   : > { %1190 = vst.msk [vmem:[%s1742_s27 + $0xdc] sm:$0xf] %vm1134_vm3, %v1452_v39  ;;  %1156 = vst.msk [vmem:[%s1742_s27 + $0x54] sm:$0xf] %vm1134_vm3, %v1418_v40  ;;  %v792_v46 = vadd.f32 %v1557_v44, %v1730_v38  ;;  %v656_v47 = vadd.f32 %v1730_v38, %v655_v45  ;;  %v783_v48 = vpop.f32.mrb[25].mxu1  ;;  %v1526_v49 = vpop.f32.mrb[26].mxu0 }
 0x118   : > { %1188 = vst.msk [vmem:[%s1742_s27 + $0xd4] sm:$0xf] %vm1134_vm3, %v1450_v42  ;;  %v840_v50 = vmax.f32 %v664_v43, 0.0  ;;  %v784_v51 = vadd.f32 %v1730_v38, %v783_v48  ;;  %v667_v52 = vadd.f32 %v1526_v49, %v1730_v38  ;;  %v1558_v53 = vpop.f32.mrb[26].mxu1  ;;  %v658_v54 = vpop.f32.mrb[27].mxu0 }
 0x119   : > { %v872_v55 = vmax.f32 %v792_v46, 0.0  ;;  %v838_v56 = vmax.f32 %v656_v47, 0.0  ;;  %v795_v57 = vadd.f32 %v1558_v53, %v1730_v38  ;;  %v659_v58 = vadd.f32 %v1730_v38, %v658_v54  ;;  %v786_v59 = vpop.f32.mrb[27].mxu1 }
 0x11a   : > { %v1423_v60 = vpack.c.bf16 %v840_v50, %v840_v50  ;;  %v870_v61 = vmax.f32 %v784_v51, 0.0  ;;  %v841_v62 = vmax.f32 %v667_v52, 0.0  ;;  %v787_v63 = vadd.f32 %v1730_v38, %v786_v59 }
 0x11b   : > { %v1455_v0 = vpack.c.bf16 %v872_v55, %v872_v55  ;;  %v1421_v1 = vpack.c.bf16 %v838_v56, %v838_v56  ;;  %v873_v2 = vmax.f32 %v795_v57, 0.0  ;;  %v839_v3 = vmax.f32 %v659_v58, 0.0 }
 0x11c   : > { %1161 = vst.msk [vmem:[%s1742_s27 + $0x68] sm:$0xf] %vm1134_vm3, %v1423_v60  ;;  %v1453_v4 = vpack.c.bf16 %v870_v61, %v870_v61  ;;  %v1424_v5 = vpack.c.bf16 %v841_v62, %v841_v62  ;;  %v871_v6 = vmax.f32 %v787_v63, 0.0 }
 0x11d   : > { %1193 = vst.msk [vmem:[%s1742_s27 + $0xe8] sm:$0xf] %vm1134_vm3, %v1455_v0  ;;  %1159 = vst.msk [vmem:[%s1742_s27 + $0x60] sm:$0xf] %vm1134_vm3, %v1421_v1  ;;  %v1456_v7 = vpack.c.bf16 %v873_v2, %v873_v2  ;;  %v1422_v8 = vpack.c.bf16 %v839_v3, %v839_v3  ;;  %v1529_v9 = vpop.f32.mrb[28].mxu0 }
 0x11e   : > { %1191 = vst.msk [vmem:[%s1742_s27 + $0xe0] sm:$0xf] %vm1134_vm3, %v1453_v4  ;;  %1162 = vst.msk [vmem:[%s1742_s27 + $0x6c] sm:$0xf] %vm1134_vm3, %v1424_v5  ;;  %v1454_v10 = vpack.c.bf16 %v871_v6, %v871_v6  ;;  %v680_v11 = vadd.f32 %v1529_v9, %v1730_v38  ;;  %v1561_v12 = vpop.f32.mrb[28].mxu1  ;;  %v671_v13 = vpop.f32.mrb[29].mxu0 }
 0x11f   : > { %1194 = vst.msk [vmem:[%s1742_s27 + $0xec] sm:$0xf] %vm1134_vm3, %v1456_v7  ;;  %1160 = vst.msk [vmem:[%s1742_s27 + $0x64] sm:$0xf] %vm1134_vm3, %v1422_v8  ;;  %v808_v14 = vadd.f32 %v1561_v12, %v1730_v38  ;;  %v672_v15 = vadd.f32 %v1730_v38, %v671_v13  ;;  %v799_v16 = vpop.f32.mrb[29].mxu1  ;;  %v1530_v17 = vpop.f32.mrb[30].mxu0 }
 0x120   : > { %1192 = vst.msk [vmem:[%s1742_s27 + $0xe4] sm:$0xf] %vm1134_vm3, %v1454_v10  ;;  %v844_v18 = vmax.f32 %v680_v11, 0.0  ;;  %v800_v19 = vadd.f32 %v1730_v38, %v799_v16  ;;  %v683_v20 = vadd.f32 %v1530_v17, %v1730_v38  ;;  %v1562_v21 = vpop.f32.mrb[30].mxu1  ;;  %v674_v22 = vpop.f32.mrb[31].mxu0 }
 0x121   : > { %v876_v23 = vmax.f32 %v808_v14, 0.0  ;;  %v842_v24 = vmax.f32 %v672_v15, 0.0  ;;  %v811_v25 = vadd.f32 %v1562_v21, %v1730_v38  ;;  %v675_v26 = vadd.f32 %v1730_v38, %v674_v22  ;;  %v802_v27 = vpop.f32.mrb[31].mxu1 }
 0x122   : > { %v1427_v28 = vpack.c.bf16 %v844_v18, %v844_v18  ;;  %v874_v29 = vmax.f32 %v800_v19, 0.0  ;;  %v845_v30 = vmax.f32 %v683_v20, 0.0  ;;  %v803_v31 = vadd.f32 %v1730_v38, %v802_v27 }
 0x123   : > { %v1459_v32 = vpack.c.bf16 %v876_v23, %v876_v23  ;;  %v1425_v33 = vpack.c.bf16 %v842_v24, %v842_v24  ;;  %v877_v34 = vmax.f32 %v811_v25, 0.0  ;;  %v843_v35 = vmax.f32 %v675_v26, 0.0 }
 0x124   : > { %1165 = vst.msk [vmem:[%s1742_s27 + $0x78] sm:$0xf] %vm1134_vm3, %v1427_v28  ;;  %v1457_v36 = vpack.c.bf16 %v874_v29, %v874_v29  ;;  %v1428_v37 = vpack.c.bf16 %v845_v30, %v845_v30  ;;  %v875_v39 = vmax.f32 %v803_v31, 0.0 }
 0x125   : > { %1197 = vst.msk [vmem:[%s1742_s27 + $0xf8] sm:$0xf] %vm1134_vm3, %v1459_v32  ;;  %1163 = vst.msk [vmem:[%s1742_s27 + $0x70] sm:$0xf] %vm1134_vm3, %v1425_v33  ;;  %v1460_v40 = vpack.c.bf16 %v877_v34, %v877_v34  ;;  %v1426_v41 = vpack.c.bf16 %v843_v35, %v843_v35 }
 0x126   : > { %1195 = vst.msk [vmem:[%s1742_s27 + $0xf0] sm:$0xf] %vm1134_vm3, %v1457_v36  ;;  %1166 = vst.msk [vmem:[%s1742_s27 + $0x7c] sm:$0xf] %vm1134_vm3, %v1428_v37  ;;  %v1458_v38 = vpack.c.bf16 %v875_v39, %v875_v39 }
 0x127   : > { %1198 = vst.msk [vmem:[%s1742_s27 + $0xfc] sm:$0xf] %vm1134_vm3, %v1460_v40  ;;  %1164 = vst.msk [vmem:[%s1742_s27 + $0x74] sm:$0xf] %vm1134_vm3, %v1426_v41 }
 0x128   : > { %1196 = vst.msk [vmem:[%s1742_s27 + $0xf4] sm:$0xf] %vm1134_vm3, %v1458_v38 }
 0x129 PF: > { %s13_s12 = sadd.s32 1, %s1616_s12  }
 0x12a   : > { %p10_p4 = scmp.ge.s32.totalorder %s13_s12, 18  }
 0x12c   :  { %12 = sbr.rel (!%p10_p4) target bundleno = 1 (0x1), region = 62 }

// kernel: _lambda_.16
= control target key start
LH: loop header
LB: loop body
LE: loop exit
PB: predicated region body
PF: predicated region fallthrough
CT: control target
= control target key end

     0   :  { %s1678_s12 = smov 0   ;;  %s1982_s0 = inlined_call_operand.vmem [shape: bf16[2048,72], index: 0, kind: input, shape index: {}]   ;;  %s1983_s1 = inlined_call_operand.vmem [shape: bf16[72,12], index: 1, kind: input, shape index: {}]   ;;  %s1984_s2 = inlined_call_operand.vmem [shape: f32[1,12], index: 2, kind: input, shape index: {}]   ;;  %s1985_s3 = inlined_call_operand.vmem [shape: bf16[2048,12], index: 3, kind: output, shape index: {}]  }
   0x1 LB: > { %s1273_s13 = sadd.s32 4294967295, %s1656_s12   ;;  %p1277_p0 = scmp.ge.s32.totalorder %s1656_s12, 1  ;;  %s1656_s12 = sphi %s1678_s12, %s13_s12  }
   0x2   : > { %p138_p1 = scmp.lt.s32.totalorder %s1656_s12, 5 }
   0x4   : > { %p139_p2 = pnand %p1277_p0, %p138_p1 }
   0x5   : > { %v1613_v0 = vld [vmem:[%s1983_s1] sm:$0xff] (!%p139_p2)   ;;  %v1614_v1 = vld [vmem:[%s1983_s1 + $0x8] sm:$0xff] (!%p139_p2)   ;;  %s1278_s18 = sshll.u32 (!%p139_p2), %s1273_s13, 6  ;;  %v1615_v2 = vld [vmem:[%s1983_s1 + $0x10] sm:$0xff] (!%p139_p2)   ;;  %vm442_vm0 = vcmask (!%p139_p2), 588800   ;;  %vm539_vm1 = vcmask (!%p139_p2), 1043456  }
   0x6   : > { %142 = sbr.rel (%p139_p2) target bundleno = 304 (0x130), region = 32  ;;  %1519 = vmatprep.subr.bf16.mxu0 (!%p139_p2), %v1613_v0  ;;  %1593 = vmatprep.subr.bf16.mxu1 (!%p139_p2), %v1613_v0  ;;  %p163_p3 = scmp.lt.s32.totalorder (!%p139_p2), %s1278_s18, 255  ;;  %v1616_v3 = vld [vmem:[%s1983_s1 + $0x18] sm:$0xff] (!%p139_p2)   ;;  %v1617_v6 = vld [vmem:[%s1983_s1 + $0x20] ss:$0 sps:$4 sm:$0xff] (!%p139_p2)   ;;  %vm1152_vm2 = vcmask (!%p139_p2), 93184  }
   0x7   : > { %1520 = vmatpush3.bf16.msra.mxu0 (!%p139_p2), %v1613_v0  ;;  %1598 = vmatpush3.bf16.msra.mxu1 (!%p139_p2), %v1613_v0  ;;  %v541_v7 = vsel (!%p139_p2), %vm539_vm1, %v1617_v6, 0  ;;  %v1778_v38 = vld [vmem:[%s1984_s2] ss:$0 sm:$0xff] (!%p139_p2) }
   0x8   : > { %1521 = vmatprep.subr.bf16.mxu0 (!%p139_p2), %v1614_v1  ;;  %1594 = vmatprep.subr.bf16.mxu1 (!%p139_p2), %v1614_v1 }
   0xb   : > { %1522 = vmatpush3.bf16.msra.mxu0 (!%p139_p2), %v1614_v1  ;;  %1599 = vmatpush3.bf16.msra.mxu1 (!%p139_p2), %v1614_v1 }
   0xc   : > { %1523 = vmatprep.subr.bf16.mxu0 (!%p139_p2), %v1615_v2  ;;  %1595 = vmatprep.subr.bf16.mxu1 (!%p139_p2), %v1615_v2 }
   0xd   : > { %s1987_s18 = smov (!%p163_p3, %s1278_s18), 255 }
   0xe   : > { %s1279_s21 = sshll.u32 %s1987_s18, 2 }
   0xf   : > { %s1706_s26 = scalar_lea.vmem %s1982_s0, %s1279_s21  ;;  %1524 = vmatpush3.bf16.msra.mxu0 %v1615_v2  ;;  %1600 = vmatpush3.bf16.msra.mxu1 %v1615_v2  ;;  %s1791_s6 = scalar_lea.vmem %s1985_s3, %s1279_s21 }
  0x10   : > { %v1618_v4 = vld [vmem:[%s1706_s26] sm:$0xff]   ;;  %1525 = vmatprep.subr.bf16.mxu0 %v1616_v3  ;;  %1596 = vmatprep.subr.bf16.mxu1 %v1616_v3  ;;  %v1620_v8 = vld [vmem:[%s1706_s26 + $0x8] sm:$0xff]   ;;  %v1622_v10 = vld [vmem:[%s1706_s26 + $0x10] sm:$0xff]  }
  0x11   : > { %v1619_v5 = vld [vmem:[%s1706_s26 + $0x80] sm:$0xff]   ;;  %1529 = vmatprep.mubr.msk.bf16.mxu0 %vm442_vm0, %v1618_v4  ;;  %v1621_v9 = vld [vmem:[%s1706_s26 + $0x88] sm:$0xff]   ;;  %v1623_v11 = vld [vmem:[%s1706_s26 + $0x90] sm:$0xff]  }
  0x12   : > { %1561 = vmatprep.mubr.msk.bf16.mxu1 %vm442_vm0, %v1619_v5  ;;  %v1624_v12 = vld [vmem:[%s1706_s26 + $0x18] sm:$0xff]   ;;  %v1626_v14 = vld [vmem:[%s1706_s26 + $0x20] sm:$0xff]   ;;  %v1628_v16 = vld [vmem:[%s1706_s26 + $0x28] sm:$0xff]  }
  0x13   : > { %1526 = vmatpush3.bf16.msra.mxu0 %v1616_v3  ;;  %1601 = vmatpush3.bf16.msra.mxu1 %v1616_v3  ;;  %v1625_v13 = vld [vmem:[%s1706_s26 + $0x98] sm:$0xff]   ;;  %v1627_v15 = vld [vmem:[%s1706_s26 + $0xa0] sm:$0xff]   ;;  %v1629_v17 = vld [vmem:[%s1706_s26 + $0xa8] sm:$0xff]  }
  0x14   : > { %1603 = vmatprep.subr.msk.bf16.mxu0 %vm539_vm1, %v1617_v6  ;;  %1604 = vmatprep.subr.msk.bf16.mxu1 %vm539_vm1, %v1617_v6  ;;  %v1630_v18 = vld [vmem:[%s1706_s26 + $0x30] sm:$0xff]   ;;  %v1632_v20 = vld [vmem:[%s1706_s26 + $0x38] sm:$0xff]   ;;  %v1634_v22 = vld [vmem:[%s1706_s26 + $0x40] sm:$0xff]  }
  0x15   : > { %v1631_v19 = vld [vmem:[%s1706_s26 + $0xb0] sm:$0xff]   ;;  %v1633_v21 = vld [vmem:[%s1706_s26 + $0xb8] sm:$0xff]   ;;  %v1635_v23 = vld [vmem:[%s1706_s26 + $0xc0] sm:$0xff]  }
  0x16   : > { %v1636_v24 = vld [vmem:[%s1706_s26 + $0x48] sm:$0xff]   ;;  %v1638_v26 = vld [vmem:[%s1706_s26 + $0x50] sm:$0xff]   ;;  %v1640_v28 = vld [vmem:[%s1706_s26 + $0x58] sm:$0xff]  }
  0x17   : > { %1528 = vmatpush3.bf16.msra.mxu0 %v541_v7  ;;  %1602 = vmatpush3.bf16.msra.mxu1 %v541_v7  ;;  %v1637_v25 = vld [vmem:[%s1706_s26 + $0xc8] sm:$0xff]   ;;  %v1639_v27 = vld [vmem:[%s1706_s26 + $0xd0] sm:$0xff]   ;;  %v1641_v29 = vld [vmem:[%s1706_s26 + $0xd8] sm:$0xff]  }
  0x18   : > { %v1642_v30 = vld [vmem:[%s1706_s26 + $0x60] sm:$0xff]   ;;  %v1644_v32 = vld [vmem:[%s1706_s26 + $0x68] sm:$0xff]   ;;  %v1646_v34 = vld [vmem:[%s1706_s26 + $0x70] sm:$0xff]  }
  0x19   : > { %v1643_v31 = vld [vmem:[%s1706_s26 + $0xe0] sm:$0xff]   ;;  %v1645_v33 = vld [vmem:[%s1706_s26 + $0xe8] sm:$0xff]   ;;  %v1647_v35 = vld [vmem:[%s1706_s26 + $0xf0] sm:$0xff]  }
  0x1a   : > { %1530 = vmatmul.mubr.msk.bf16.vlgmr.msra.gmra.mrb[0].mxu0 %vm442_vm0, %v1620_v8  ;;  %1562 = vmatmul.mubr.msk.bf16.vlgmr.msra.gmra.mrb[0].mxu1 %vm442_vm0, %v1621_v9  ;;  %v1648_v36 = vld [vmem:[%s1706_s26 + $0x78] sm:$0xff]  }
  0x1b   : > { %1533 = vmatprep.mubr.msk.bf16.mxu0 %vm442_vm0, %v1622_v10  ;;  %1565 = vmatprep.mubr.msk.bf16.mxu1 %vm442_vm0, %v1623_v11  ;;  %v1649_v37 = vld [vmem:[%s1706_s26 + $0xf8] sm:$0xff]  }
  0x22   : > { %1534 = vmatmul.mubr.msk.bf16.gmra.mrb[4].mxu0 %vm442_vm0, %v1624_v12  ;;  %1566 = vmatmul.mubr.msk.bf16.gmra.mrb[4].mxu1 %vm442_vm0, %v1625_v13 }
  0x23   : > { %1537 = vmatprep.mubr.msk.bf16.mxu0 %vm442_vm0, %v1626_v14  ;;  %1569 = vmatprep.mubr.msk.bf16.mxu1 %vm442_vm0, %v1627_v15 }
  0x2a   : > { %1538 = vmatmul.mubr.msk.bf16.gmra.mrb[8].mxu0 %vm442_vm0, %v1628_v16  ;;  %1570 = vmatmul.mubr.msk.bf16.gmra.mrb[8].mxu1 %vm442_vm0, %v1629_v17 }
  0x2b   : > { %1541 = vmatprep.mubr.msk.bf16.mxu0 %vm442_vm0, %v1630_v18  ;;  %1573 = vmatprep.mubr.msk.bf16.mxu1 %vm442_vm0, %v1631_v19 }
  0x32   : > { %1542 = vmatmul.mubr.msk.bf16.gmra.mrb[12].mxu0 %vm442_vm0, %v1632_v20  ;;  %1574 = vmatmul.mubr.msk.bf16.gmra.mrb[12].mxu1 %vm442_vm0, %v1633_v21 }
  0x33   : > { %1545 = vmatprep.mubr.msk.bf16.mxu0 %vm442_vm0, %v1634_v22  ;;  %1577 = vmatprep.mubr.msk.bf16.mxu1 %vm442_vm0, %v1635_v23 }
  0x3a   : > { %1546 = vmatmul.mubr.msk.bf16.gmra.mrb[16].mxu0 %vm442_vm0, %v1636_v24  ;;  %1578 = vmatmul.mubr.msk.bf16.gmra.mrb[16].mxu1 %vm442_vm0, %v1637_v25 }
  0x3b   : > { %1549 = vmatprep.mubr.msk.bf16.mxu0 %vm442_vm0, %v1638_v26  ;;  %1581 = vmatprep.mubr.msk.bf16.mxu1 %vm442_vm0, %v1639_v27 }
  0x42   : > { %1550 = vmatmul.mubr.msk.bf16.gmra.mrb[20].mxu0 %vm442_vm0, %v1640_v28  ;;  %1582 = vmatmul.mubr.msk.bf16.gmra.mrb[20].mxu1 %vm442_vm0, %v1641_v29 }
  0x43   : > { %1553 = vmatprep.mubr.msk.bf16.mxu0 %vm442_vm0, %v1642_v30  ;;  %1585 = vmatprep.mubr.msk.bf16.mxu1 %vm442_vm0, %v1643_v31 }
  0x4a   : > { %1554 = vmatmul.mubr.msk.bf16.gmra.mrb[24].mxu0 %vm442_vm0, %v1644_v32  ;;  %1586 = vmatmul.mubr.msk.bf16.gmra.mrb[24].mxu1 %vm442_vm0, %v1645_v33 }
  0x4b   : > { %1557 = vmatprep.mubr.msk.bf16.mxu0 %vm442_vm0, %v1646_v34  ;;  %1589 = vmatprep.mubr.msk.bf16.mxu1 %vm442_vm0, %v1647_v35 }
  0x52   : > { %1558 = vmatmul.mubr.msk.bf16.gmra.mrb[28].mxu0 %vm442_vm0, %v1648_v36  ;;  %1590 = vmatmul.mubr.msk.bf16.gmra.mrb[28].mxu1 %vm442_vm0, %v1649_v37 }
  0xed   : > { %v1531_v39 = vpop.f32.mrb[0].mxu0  ;;  %v1563_v40 = vpop.f32.mrb[0].mxu1 }
  0xee   : > { %v586_v41 = vadd.f32 %v1531_v39, %v1778_v38  ;;  %v714_v42 = vadd.f32 %v1563_v40, %v1778_v38  ;;  %v577_v43 = vpop.f32.mrb[1].mxu0  ;;  %v705_v44 = vpop.f32.mrb[1].mxu1 }
  0xef   : > { %v578_v45 = vadd.f32 %v1778_v38, %v577_v43  ;;  %v706_v46 = vadd.f32 %v1778_v38, %v705_v44  ;;  %v1532_v47 = vpop.f32.mrb[2].mxu0  ;;  %v1564_v48 = vpop.f32.mrb[2].mxu1 }
  0xf0   : > { %v834_v49 = vmax.f32 %v586_v41, 0.0  ;;  %v866_v50 = vmax.f32 %v714_v42, 0.0  ;;  %v589_v51 = vadd.f32 %v1532_v47, %v1778_v38  ;;  %v717_v52 = vadd.f32 %v1564_v48, %v1778_v38  ;;  %v580_v53 = vpop.f32.mrb[3].mxu0  ;;  %v708_v54 = vpop.f32.mrb[3].mxu1 }
  0xf1   : > { %v832_v55 = vmax.f32 %v578_v45, 0.0  ;;  %v864_v56 = vmax.f32 %v706_v46, 0.0  ;;  %v581_v57 = vadd.f32 %v1778_v38, %v580_v53  ;;  %v709_v58 = vadd.f32 %v1778_v38, %v708_v54 }
  0xf2   : > { %v1420_v59 = vpack.c.bf16 %v834_v49, %v834_v49  ;;  %v1452_v60 = vpack.c.bf16 %v866_v50, %v866_v50  ;;  %v835_v61 = vmax.f32 %v589_v51, 0.0  ;;  %v867_v62 = vmax.f32 %v717_v52, 0.0 }
  0xf3   : > { %v1418_v63 = vpack.c.bf16 %v832_v55, %v832_v55  ;;  %v1450_v0 = vpack.c.bf16 %v864_v56, %v864_v56  ;;  %v833_v1 = vmax.f32 %v581_v57, 0.0  ;;  %v865_v2 = vmax.f32 %v709_v58, 0.0 }
  0xf4   : > { %1155 = vst.msk [vmem:[%s1791_s6 + $0x8] sm:$0xf] %vm1152_vm2, %v1420_v59  ;;  %1187 = vst.msk [vmem:[%s1791_s6 + $0x88] sm:$0xf] %vm1152_vm2, %v1452_v60  ;;  %v1421_v3 = vpack.c.bf16 %v835_v61, %v835_v61  ;;  %v1453_v4 = vpack.c.bf16 %v867_v62, %v867_v62 }
  0xf5   : > { %1153 = vst.msk [vmem:[%s1791_s6] sm:$0xf] %vm1152_vm2, %v1418_v63  ;;  %1185 = vst.msk [vmem:[%s1791_s6 + $0x80] sm:$0xf] %vm1152_vm2, %v1450_v0  ;;  %v1419_v5 = vpack.c.bf16 %v833_v1, %v833_v1  ;;  %v1451_v6 = vpack.c.bf16 %v865_v2, %v865_v2  ;;  %v1535_v7 = vpop.f32.mrb[4].mxu0  ;;  %v1567_v8 = vpop.f32.mrb[4].mxu1 }
  0xf6   : > { %1156 = vst.msk [vmem:[%s1791_s6 + $0xc] sm:$0xf] %vm1152_vm2, %v1421_v3  ;;  %1188 = vst.msk [vmem:[%s1791_s6 + $0x8c] sm:$0xf] %vm1152_vm2, %v1453_v4  ;;  %v602_v9 = vadd.f32 %v1535_v7, %v1778_v38  ;;  %v730_v10 = vadd.f32 %v1567_v8, %v1778_v38  ;;  %v593_v11 = vpop.f32.mrb[5].mxu0  ;;  %v721_v12 = vpop.f32.mrb[5].mxu1 }
  0xf7   : > { %1154 = vst.msk [vmem:[%s1791_s6 + $0x4] sm:$0xf] %vm1152_vm2, %v1419_v5  ;;  %1186 = vst.msk [vmem:[%s1791_s6 + $0x84] sm:$0xf] %vm1152_vm2, %v1451_v6  ;;  %v594_v13 = vadd.f32 %v1778_v38, %v593_v11  ;;  %v722_v14 = vadd.f32 %v1778_v38, %v721_v12  ;;  %v1536_v15 = vpop.f32.mrb[6].mxu0  ;;  %v1568_v16 = vpop.f32.mrb[6].mxu1 }
  0xf8   : > { %v838_v17 = vmax.f32 %v602_v9, 0.0  ;;  %v870_v18 = vmax.f32 %v730_v10, 0.0  ;;  %v605_v19 = vadd.f32 %v1536_v15, %v1778_v38  ;;  %v733_v20 = vadd.f32 %v1568_v16, %v1778_v38  ;;  %v596_v21 = vpop.f32.mrb[7].mxu0  ;;  %v724_v22 = vpop.f32.mrb[7].mxu1 }
  0xf9   : > { %v836_v23 = vmax.f32 %v594_v13, 0.0  ;;  %v868_v24 = vmax.f32 %v722_v14, 0.0  ;;  %v597_v25 = vadd.f32 %v1778_v38, %v596_v21  ;;  %v725_v26 = vadd.f32 %v1778_v38, %v724_v22 }
  0xfa   : > { %v1424_v27 = vpack.c.bf16 %v838_v17, %v838_v17  ;;  %v1456_v28 = vpack.c.bf16 %v870_v18, %v870_v18  ;;  %v839_v29 = vmax.f32 %v605_v19, 0.0  ;;  %v871_v30 = vmax.f32 %v733_v20, 0.0 }
  0xfb   : > { %v1422_v31 = vpack.c.bf16 %v836_v23, %v836_v23  ;;  %v1454_v32 = vpack.c.bf16 %v868_v24, %v868_v24  ;;  %v837_v33 = vmax.f32 %v597_v25, 0.0  ;;  %v869_v34 = vmax.f32 %v725_v26, 0.0 }
  0xfc   : > { %1159 = vst.msk [vmem:[%s1791_s6 + $0x18] sm:$0xf] %vm1152_vm2, %v1424_v27  ;;  %1191 = vst.msk [vmem:[%s1791_s6 + $0x98] sm:$0xf] %vm1152_vm2, %v1456_v28  ;;  %v1425_v35 = vpack.c.bf16 %v839_v29, %v839_v29  ;;  %v1457_v36 = vpack.c.bf16 %v871_v30, %v871_v30 }
  0xfd   : > { %1157 = vst.msk [vmem:[%s1791_s6 + $0x10] sm:$0xf] %vm1152_vm2, %v1422_v31  ;;  %1189 = vst.msk [vmem:[%s1791_s6 + $0x90] sm:$0xf] %vm1152_vm2, %v1454_v32  ;;  %v1423_v37 = vpack.c.bf16 %v837_v33, %v837_v33  ;;  %v1455_v39 = vpack.c.bf16 %v869_v34, %v869_v34  ;;  %v1539_v40 = vpop.f32.mrb[8].mxu0  ;;  %v1571_v41 = vpop.f32.mrb[8].mxu1 }
  0xfe   : > { %1160 = vst.msk [vmem:[%s1791_s6 + $0x1c] sm:$0xf] %vm1152_vm2, %v1425_v35  ;;  %1192 = vst.msk [vmem:[%s1791_s6 + $0x9c] sm:$0xf] %vm1152_vm2, %v1457_v36  ;;  %v618_v42 = vadd.f32 %v1539_v40, %v1778_v38  ;;  %v746_v43 = vadd.f32 %v1571_v41, %v1778_v38  ;;  %v609_v44 = vpop.f32.mrb[9].mxu0  ;;  %v737_v45 = vpop.f32.mrb[9].mxu1 }
  0xff   : > { %1158 = vst.msk [vmem:[%s1791_s6 + $0x14] sm:$0xf] %vm1152_vm2, %v1423_v37  ;;  %1190 = vst.msk [vmem:[%s1791_s6 + $0x94] sm:$0xf] %vm1152_vm2, %v1455_v39  ;;  %v610_v46 = vadd.f32 %v1778_v38, %v609_v44  ;;  %v738_v47 = vadd.f32 %v1778_v38, %v737_v45  ;;  %v1540_v48 = vpop.f32.mrb[10].mxu0  ;;  %v1572_v49 = vpop.f32.mrb[10].mxu1 }
 0x100   : > { %v842_v50 = vmax.f32 %v618_v42, 0.0  ;;  %v874_v51 = vmax.f32 %v746_v43, 0.0  ;;  %v621_v52 = vadd.f32 %v1540_v48, %v1778_v38  ;;  %v749_v53 = vadd.f32 %v1572_v49, %v1778_v38  ;;  %v612_v54 = vpop.f32.mrb[11].mxu0  ;;  %v740_v55 = vpop.f32.mrb[11].mxu1 }
 0x101   : > { %v840_v56 = vmax.f32 %v610_v46, 0.0  ;;  %v872_v57 = vmax.f32 %v738_v47, 0.0  ;;  %v613_v58 = vadd.f32 %v1778_v38, %v612_v54  ;;  %v741_v59 = vadd.f32 %v1778_v38, %v740_v55 }
 0x102   : > { %v1428_v60 = vpack.c.bf16 %v842_v50, %v842_v50  ;;  %v1460_v61 = vpack.c.bf16 %v874_v51, %v874_v51  ;;  %v843_v62 = vmax.f32 %v621_v52, 0.0  ;;  %v875_v63 = vmax.f32 %v749_v53, 0.0 }
 0x103   : > { %v1426_v0 = vpack.c.bf16 %v840_v56, %v840_v56  ;;  %v1458_v1 = vpack.c.bf16 %v872_v57, %v872_v57  ;;  %v841_v2 = vmax.f32 %v613_v58, 0.0  ;;  %v873_v3 = vmax.f32 %v741_v59, 0.0 }
 0x104   : > { %1163 = vst.msk [vmem:[%s1791_s6 + $0x28] sm:$0xf] %vm1152_vm2, %v1428_v60  ;;  %1195 = vst.msk [vmem:[%s1791_s6 + $0xa8] sm:$0xf] %vm1152_vm2, %v1460_v61  ;;  %v1429_v4 = vpack.c.bf16 %v843_v62, %v843_v62  ;;  %v1461_v5 = vpack.c.bf16 %v875_v63, %v875_v63 }
 0x105   : > { %1161 = vst.msk [vmem:[%s1791_s6 + $0x20] sm:$0xf] %vm1152_vm2, %v1426_v0  ;;  %1193 = vst.msk [vmem:[%s1791_s6 + $0xa0] sm:$0xf] %vm1152_vm2, %v1458_v1  ;;  %v1427_v6 = vpack.c.bf16 %v841_v2, %v841_v2  ;;  %v1459_v7 = vpack.c.bf16 %v873_v3, %v873_v3  ;;  %v1543_v8 = vpop.f32.mrb[12].mxu0  ;;  %v1575_v9 = vpop.f32.mrb[12].mxu1 }
 0x106   : > { %1164 = vst.msk [vmem:[%s1791_s6 + $0x2c] sm:$0xf] %vm1152_vm2, %v1429_v4  ;;  %1196 = vst.msk [vmem:[%s1791_s6 + $0xac] sm:$0xf] %vm1152_vm2, %v1461_v5  ;;  %v634_v10 = vadd.f32 %v1543_v8, %v1778_v38  ;;  %v762_v11 = vadd.f32 %v1575_v9, %v1778_v38  ;;  %v625_v12 = vpop.f32.mrb[13].mxu0  ;;  %v753_v13 = vpop.f32.mrb[13].mxu1 }
 0x107   : > { %1162 = vst.msk [vmem:[%s1791_s6 + $0x24] sm:$0xf] %vm1152_vm2, %v1427_v6  ;;  %1194 = vst.msk [vmem:[%s1791_s6 + $0xa4] sm:$0xf] %vm1152_vm2, %v1459_v7  ;;  %v626_v14 = vadd.f32 %v1778_v38, %v625_v12  ;;  %v754_v15 = vadd.f32 %v1778_v38, %v753_v13  ;;  %v1544_v16 = vpop.f32.mrb[14].mxu0  ;;  %v1576_v17 = vpop.f32.mrb[14].mxu1 }
 0x108   : > { %v846_v18 = vmax.f32 %v634_v10, 0.0  ;;  %v878_v19 = vmax.f32 %v762_v11, 0.0  ;;  %v637_v20 = vadd.f32 %v1544_v16, %v1778_v38  ;;  %v765_v21 = vadd.f32 %v1576_v17, %v1778_v38  ;;  %v628_v22 = vpop.f32.mrb[15].mxu0  ;;  %v756_v23 = vpop.f32.mrb[15].mxu1 }
 0x109   : > { %v844_v24 = vmax.f32 %v626_v14, 0.0  ;;  %v876_v25 = vmax.f32 %v754_v15, 0.0  ;;  %v629_v26 = vadd.f32 %v1778_v38, %v628_v22  ;;  %v757_v27 = vadd.f32 %v1778_v38, %v756_v23 }
 0x10a   : > { %v1432_v28 = vpack.c.bf16 %v846_v18, %v846_v18  ;;  %v1464_v29 = vpack.c.bf16 %v878_v19, %v878_v19  ;;  %v847_v30 = vmax.f32 %v637_v20, 0.0  ;;  %v879_v31 = vmax.f32 %v765_v21, 0.0 }
 0x10b   : > { %v1430_v32 = vpack.c.bf16 %v844_v24, %v844_v24  ;;  %v1462_v33 = vpack.c.bf16 %v876_v25, %v876_v25  ;;  %v845_v34 = vmax.f32 %v629_v26, 0.0  ;;  %v877_v35 = vmax.f32 %v757_v27, 0.0 }
 0x10c   : > { %1167 = vst.msk [vmem:[%s1791_s6 + $0x38] sm:$0xf] %vm1152_vm2, %v1432_v28  ;;  %1199 = vst.msk [vmem:[%s1791_s6 + $0xb8] sm:$0xf] %vm1152_vm2, %v1464_v29  ;;  %v1433_v36 = vpack.c.bf16 %v847_v30, %v847_v30  ;;  %v1465_v37 = vpack.c.bf16 %v879_v31, %v879_v31 }
 0x10d   : > { %1165 = vst.msk [vmem:[%s1791_s6 + $0x30] sm:$0xf] %vm1152_vm2, %v1430_v32  ;;  %1197 = vst.msk [vmem:[%s1791_s6 + $0xb0] sm:$0xf] %vm1152_vm2, %v1462_v33  ;;  %v1431_v39 = vpack.c.bf16 %v845_v34, %v845_v34  ;;  %v1463_v40 = vpack.c.bf16 %v877_v35, %v877_v35  ;;  %v1547_v41 = vpop.f32.mrb[16].mxu0  ;;  %v1579_v42 = vpop.f32.mrb[16].mxu1 }
 0x10e   : > { %1168 = vst.msk [vmem:[%s1791_s6 + $0x3c] sm:$0xf] %vm1152_vm2, %v1433_v36  ;;  %1200 = vst.msk [vmem:[%s1791_s6 + $0xbc] sm:$0xf] %vm1152_vm2, %v1465_v37  ;;  %v650_v43 = vadd.f32 %v1547_v41, %v1778_v38  ;;  %v778_v44 = vadd.f32 %v1579_v42, %v1778_v38  ;;  %v641_v45 = vpop.f32.mrb[17].mxu0  ;;  %v769_v46 = vpop.f32.mrb[17].mxu1 }
 0x10f   : > { %1166 = vst.msk [vmem:[%s1791_s6 + $0x34] sm:$0xf] %vm1152_vm2, %v1431_v39  ;;  %1198 = vst.msk [vmem:[%s1791_s6 + $0xb4] sm:$0xf] %vm1152_vm2, %v1463_v40  ;;  %v642_v47 = vadd.f32 %v1778_v38, %v641_v45  ;;  %v770_v48 = vadd.f32 %v1778_v38, %v769_v46  ;;  %v1548_v49 = vpop.f32.mrb[18].mxu0  ;;  %v1580_v50 = vpop.f32.mrb[18].mxu1 }
 0x110   : > { %v850_v51 = vmax.f32 %v650_v43, 0.0  ;;  %v882_v52 = vmax.f32 %v778_v44, 0.0  ;;  %v653_v53 = vadd.f32 %v1548_v49, %v1778_v38  ;;  %v781_v54 = vadd.f32 %v1580_v50, %v1778_v38  ;;  %v644_v55 = vpop.f32.mrb[19].mxu0  ;;  %v772_v56 = vpop.f32.mrb[19].mxu1 }
 0x111   : > { %v848_v57 = vmax.f32 %v642_v47, 0.0  ;;  %v880_v58 = vmax.f32 %v770_v48, 0.0  ;;  %v645_v59 = vadd.f32 %v1778_v38, %v644_v55  ;;  %v773_v60 = vadd.f32 %v1778_v38, %v772_v56 }
 0x112   : > { %v1436_v61 = vpack.c.bf16 %v850_v51, %v850_v51  ;;  %v1468_v62 = vpack.c.bf16 %v882_v52, %v882_v52  ;;  %v851_v63 = vmax.f32 %v653_v53, 0.0  ;;  %v883_v0 = vmax.f32 %v781_v54, 0.0 }
 0x113   : > { %v1434_v1 = vpack.c.bf16 %v848_v57, %v848_v57  ;;  %v1466_v2 = vpack.c.bf16 %v880_v58, %v880_v58  ;;  %v849_v3 = vmax.f32 %v645_v59, 0.0  ;;  %v881_v4 = vmax.f32 %v773_v60, 0.0 }
 0x114   : > { %1171 = vst.msk [vmem:[%s1791_s6 + $0x48] sm:$0xf] %vm1152_vm2, %v1436_v61  ;;  %1203 = vst.msk [vmem:[%s1791_s6 + $0xc8] sm:$0xf] %vm1152_vm2, %v1468_v62  ;;  %v1437_v5 = vpack.c.bf16 %v851_v63, %v851_v63  ;;  %v1469_v6 = vpack.c.bf16 %v883_v0, %v883_v0 }
 0x115   : > { %1169 = vst.msk [vmem:[%s1791_s6 + $0x40] sm:$0xf] %vm1152_vm2, %v1434_v1  ;;  %1201 = vst.msk [vmem:[%s1791_s6 + $0xc0] sm:$0xf] %vm1152_vm2, %v1466_v2  ;;  %v1435_v7 = vpack.c.bf16 %v849_v3, %v849_v3  ;;  %v1467_v8 = vpack.c.bf16 %v881_v4, %v881_v4  ;;  %v1551_v9 = vpop.f32.mrb[20].mxu0  ;;  %v1583_v10 = vpop.f32.mrb[20].mxu1 }
 0x116   : > { %1172 = vst.msk [vmem:[%s1791_s6 + $0x4c] sm:$0xf] %vm1152_vm2, %v1437_v5  ;;  %1204 = vst.msk [vmem:[%s1791_s6 + $0xcc] sm:$0xf] %vm1152_vm2, %v1469_v6  ;;  %v666_v11 = vadd.f32 %v1551_v9, %v1778_v38  ;;  %v794_v12 = vadd.f32 %v1583_v10, %v1778_v38  ;;  %v657_v13 = vpop.f32.mrb[21].mxu0  ;;  %v785_v14 = vpop.f32.mrb[21].mxu1 }
 0x117   : > { %1170 = vst.msk [vmem:[%s1791_s6 + $0x44] sm:$0xf] %vm1152_vm2, %v1435_v7  ;;  %1202 = vst.msk [vmem:[%s1791_s6 + $0xc4] sm:$0xf] %vm1152_vm2, %v1467_v8  ;;  %v658_v15 = vadd.f32 %v1778_v38, %v657_v13  ;;  %v786_v16 = vadd.f32 %v1778_v38, %v785_v14  ;;  %v1552_v17 = vpop.f32.mrb[22].mxu0  ;;  %v1584_v18 = vpop.f32.mrb[22].mxu1 }
 0x118   : > { %v854_v19 = vmax.f32 %v666_v11, 0.0  ;;  %v886_v20 = vmax.f32 %v794_v12, 0.0  ;;  %v669_v21 = vadd.f32 %v1552_v17, %v1778_v38  ;;  %v797_v22 = vadd.f32 %v1584_v18, %v1778_v38  ;;  %v660_v23 = vpop.f32.mrb[23].mxu0  ;;  %v788_v24 = vpop.f32.mrb[23].mxu1 }
 0x119   : > { %v852_v25 = vmax.f32 %v658_v15, 0.0  ;;  %v884_v26 = vmax.f32 %v786_v16, 0.0  ;;  %v661_v27 = vadd.f32 %v1778_v38, %v660_v23  ;;  %v789_v28 = vadd.f32 %v1778_v38, %v788_v24 }
 0x11a   : > { %v1440_v29 = vpack.c.bf16 %v854_v19, %v854_v19  ;;  %v1472_v30 = vpack.c.bf16 %v886_v20, %v886_v20  ;;  %v855_v31 = vmax.f32 %v669_v21, 0.0  ;;  %v887_v32 = vmax.f32 %v797_v22, 0.0 }
 0x11b   : > { %v1438_v33 = vpack.c.bf16 %v852_v25, %v852_v25  ;;  %v1470_v34 = vpack.c.bf16 %v884_v26, %v884_v26  ;;  %v853_v35 = vmax.f32 %v661_v27, 0.0  ;;  %v885_v36 = vmax.f32 %v789_v28, 0.0 }
 0x11c   : > { %1175 = vst.msk [vmem:[%s1791_s6 + $0x58] sm:$0xf] %vm1152_vm2, %v1440_v29  ;;  %1207 = vst.msk [vmem:[%s1791_s6 + $0xd8] sm:$0xf] %vm1152_vm2, %v1472_v30  ;;  %v1441_v37 = vpack.c.bf16 %v855_v31, %v855_v31  ;;  %v1473_v39 = vpack.c.bf16 %v887_v32, %v887_v32 }
 0x11d   : > { %1173 = vst.msk [vmem:[%s1791_s6 + $0x50] sm:$0xf] %vm1152_vm2, %v1438_v33  ;;  %1205 = vst.msk [vmem:[%s1791_s6 + $0xd0] sm:$0xf] %vm1152_vm2, %v1470_v34  ;;  %v1439_v40 = vpack.c.bf16 %v853_v35, %v853_v35  ;;  %v1471_v41 = vpack.c.bf16 %v885_v36, %v885_v36  ;;  %v1555_v42 = vpop.f32.mrb[24].mxu0  ;;  %v1587_v43 = vpop.f32.mrb[24].mxu1 }
 0x11e   : > { %1176 = vst.msk [vmem:[%s1791_s6 + $0x5c] sm:$0xf] %vm1152_vm2, %v1441_v37  ;;  %1208 = vst.msk [vmem:[%s1791_s6 + $0xdc] sm:$0xf] %vm1152_vm2, %v1473_v39  ;;  %v682_v44 = vadd.f32 %v1555_v42, %v1778_v38  ;;  %v810_v45 = vadd.f32 %v1587_v43, %v1778_v38  ;;  %v673_v46 = vpop.f32.mrb[25].mxu0  ;;  %v801_v47 = vpop.f32.mrb[25].mxu1 }
 0x11f   : > { %1174 = vst.msk [vmem:[%s1791_s6 + $0x54] sm:$0xf] %vm1152_vm2, %v1439_v40  ;;  %1206 = vst.msk [vmem:[%s1791_s6 + $0xd4] sm:$0xf] %vm1152_vm2, %v1471_v41  ;;  %v674_v48 = vadd.f32 %v1778_v38, %v673_v46  ;;  %v802_v49 = vadd.f32 %v1778_v38, %v801_v47  ;;  %v1556_v50 = vpop.f32.mrb[26].mxu0  ;;  %v1588_v51 = vpop.f32.mrb[26].mxu1 }
 0x120   : > { %v858_v52 = vmax.f32 %v682_v44, 0.0  ;;  %v890_v53 = vmax.f32 %v810_v45, 0.0  ;;  %v685_v54 = vadd.f32 %v1556_v50, %v1778_v38  ;;  %v813_v55 = vadd.f32 %v1588_v51, %v1778_v38  ;;  %v676_v56 = vpop.f32.mrb[27].mxu0  ;;  %v804_v57 = vpop.f32.mrb[27].mxu1 }
 0x121   : > { %v856_v58 = vmax.f32 %v674_v48, 0.0  ;;  %v888_v59 = vmax.f32 %v802_v49, 0.0  ;;  %v677_v60 = vadd.f32 %v1778_v38, %v676_v56  ;;  %v805_v61 = vadd.f32 %v1778_v38, %v804_v57 }
 0x122   : > { %v1444_v62 = vpack.c.bf16 %v858_v52, %v858_v52  ;;  %v1476_v63 = vpack.c.bf16 %v890_v53, %v890_v53  ;;  %v859_v0 = vmax.f32 %v685_v54, 0.0  ;;  %v891_v1 = vmax.f32 %v813_v55, 0.0 }
 0x123   : > { %v1442_v2 = vpack.c.bf16 %v856_v58, %v856_v58  ;;  %v1474_v3 = vpack.c.bf16 %v888_v59, %v888_v59  ;;  %v857_v4 = vmax.f32 %v677_v60, 0.0  ;;  %v889_v5 = vmax.f32 %v805_v61, 0.0 }
 0x124   : > { %1179 = vst.msk [vmem:[%s1791_s6 + $0x68] sm:$0xf] %vm1152_vm2, %v1444_v62  ;;  %1211 = vst.msk [vmem:[%s1791_s6 + $0xe8] sm:$0xf] %vm1152_vm2, %v1476_v63  ;;  %v1445_v6 = vpack.c.bf16 %v859_v0, %v859_v0  ;;  %v1477_v7 = vpack.c.bf16 %v891_v1, %v891_v1 }
 0x125   : > { %1177 = vst.msk [vmem:[%s1791_s6 + $0x60] sm:$0xf] %vm1152_vm2, %v1442_v2  ;;  %1209 = vst.msk [vmem:[%s1791_s6 + $0xe0] sm:$0xf] %vm1152_vm2, %v1474_v3  ;;  %v1443_v8 = vpack.c.bf16 %v857_v4, %v857_v4  ;;  %v1475_v9 = vpack.c.bf16 %v889_v5, %v889_v5  ;;  %v1559_v10 = vpop.f32.mrb[28].mxu0  ;;  %v1591_v11 = vpop.f32.mrb[28].mxu1 }
 0x126   : > { %1180 = vst.msk [vmem:[%s1791_s6 + $0x6c] sm:$0xf] %vm1152_vm2, %v1445_v6  ;;  %1212 = vst.msk [vmem:[%s1791_s6 + $0xec] sm:$0xf] %vm1152_vm2, %v1477_v7  ;;  %v698_v12 = vadd.f32 %v1559_v10, %v1778_v38  ;;  %v826_v13 = vadd.f32 %v1591_v11, %v1778_v38  ;;  %v689_v14 = vpop.f32.mrb[29].mxu0  ;;  %v817_v15 = vpop.f32.mrb[29].mxu1 }
 0x127   : > { %1178 = vst.msk [vmem:[%s1791_s6 + $0x64] sm:$0xf] %vm1152_vm2, %v1443_v8  ;;  %1210 = vst.msk [vmem:[%s1791_s6 + $0xe4] sm:$0xf] %vm1152_vm2, %v1475_v9  ;;  %v690_v16 = vadd.f32 %v1778_v38, %v689_v14  ;;  %v818_v17 = vadd.f32 %v1778_v38, %v817_v15  ;;  %v1560_v18 = vpop.f32.mrb[30].mxu0  ;;  %v1592_v19 = vpop.f32.mrb[30].mxu1 }
 0x128   : > { %v862_v20 = vmax.f32 %v698_v12, 0.0  ;;  %v894_v21 = vmax.f32 %v826_v13, 0.0  ;;  %v701_v22 = vadd.f32 %v1560_v18, %v1778_v38  ;;  %v829_v23 = vadd.f32 %v1592_v19, %v1778_v38  ;;  %v692_v24 = vpop.f32.mrb[31].mxu0  ;;  %v820_v25 = vpop.f32.mrb[31].mxu1 }
 0x129   : > { %v860_v26 = vmax.f32 %v690_v16, 0.0  ;;  %v892_v27 = vmax.f32 %v818_v17, 0.0  ;;  %v693_v28 = vadd.f32 %v1778_v38, %v692_v24  ;;  %v821_v29 = vadd.f32 %v1778_v38, %v820_v25 }
 0x12a   : > { %v1448_v30 = vpack.c.bf16 %v862_v20, %v862_v20  ;;  %v1480_v31 = vpack.c.bf16 %v894_v21, %v894_v21  ;;  %v863_v32 = vmax.f32 %v701_v22, 0.0  ;;  %v895_v33 = vmax.f32 %v829_v23, 0.0 }
 0x12b   : > { %v1446_v34 = vpack.c.bf16 %v860_v26, %v860_v26  ;;  %v1478_v35 = vpack.c.bf16 %v892_v27, %v892_v27  ;;  %v861_v36 = vmax.f32 %v693_v28, 0.0  ;;  %v893_v37 = vmax.f32 %v821_v29, 0.0 }
 0x12c   : > { %1183 = vst.msk [vmem:[%s1791_s6 + $0x78] sm:$0xf] %vm1152_vm2, %v1448_v30  ;;  %1215 = vst.msk [vmem:[%s1791_s6 + $0xf8] sm:$0xf] %vm1152_vm2, %v1480_v31  ;;  %v1449_v39 = vpack.c.bf16 %v863_v32, %v863_v32  ;;  %v1481_v40 = vpack.c.bf16 %v895_v33, %v895_v33 }
 0x12d   : > { %1181 = vst.msk [vmem:[%s1791_s6 + $0x70] sm:$0xf] %vm1152_vm2, %v1446_v34  ;;  %1213 = vst.msk [vmem:[%s1791_s6 + $0xf0] sm:$0xf] %vm1152_vm2, %v1478_v35  ;;  %v1447_v38 = vpack.c.bf16 %v861_v36, %v861_v36  ;;  %v1479_v41 = vpack.c.bf16 %v893_v37, %v893_v37 }
 0x12e   : > { %1184 = vst.msk [vmem:[%s1791_s6 + $0x7c] sm:$0xf] %vm1152_vm2, %v1449_v39  ;;  %1216 = vst.msk [vmem:[%s1791_s6 + $0xfc] sm:$0xf] %vm1152_vm2, %v1481_v40 }
 0x12f   : > { %1182 = vst.msk [vmem:[%s1791_s6 + $0x74] sm:$0xf] %vm1152_vm2, %v1447_v38  ;;  %1214 = vst.msk [vmem:[%s1791_s6 + $0xf4] sm:$0xf] %vm1152_vm2, %v1479_v41 }
 0x130 PF: > { %s13_s12 = sadd.s32 1, %s1656_s12  }
 0x131   : > { %p10_p4 = scmp.ge.s32.totalorder %s13_s12, 6  }
 0x133   :  { %12 = sbr.rel (!%p10_p4) target bundleno = 1 (0x1), region = 62 }

// kernel: _lambda_.17
= control target key start
LH: loop header
LB: loop body
LE: loop exit
PB: predicated region body
PF: predicated region fallthrough
CT: control target
= control target key end

     0   :  { %s1071_s12 = smov 0   ;;  %s1253_s0 = inlined_call_operand.vmem [shape: bf16[512,108], index: 0, kind: input, shape index: {}]   ;;  %s1254_s1 = inlined_call_operand.vmem [shape: bf16[108,24], index: 1, kind: input, shape index: {}]   ;;  %s1255_s2 = inlined_call_operand.vmem [shape: f32[1,24], index: 2, kind: input, shape index: {}]   ;;  %s1256_s3 = inlined_call_operand.vmem [shape: bf16[512,24], index: 3, kind: output, shape index: {}]  }
   0x1 LB: > { %s812_s13 = sadd.s32 4294967295, %s1049_s12   ;;  %p816_p0 = scmp.ge.s32.totalorder %s1049_s12, 1  ;;  %s1049_s12 = sphi %s1071_s12, %s13_s12  }
   0x2   : > { %p138_p1 = scmp.lt.s32.totalorder %s1049_s12, 3 }
   0x4   : > { %p139_p2 = pnand %p816_p0, %p138_p1 }
   0x5   : > { %v1020_v0 = vld [vmem:[%s1254_s1] sm:$0xff] (!%p139_p2)   ;;  %v1021_v1 = vld [vmem:[%s1254_s1 + $0x8] sm:$0xff] (!%p139_p2)   ;;  %s817_s18 = sshll.u32 (!%p139_p2), %s812_s13, 5  ;;  %v1022_v2 = vld [vmem:[%s1254_s1 + $0x10] sm:$0xff] (!%p139_p2)   ;;  %vm349_vm0 = vcmask (!%p139_p2), 883712   ;;  %vm398_vm1 = vcmask (!%p139_p2), 1045504  }
   0x6   : > { %142 = sbr.rel (%p139_p2) target bundleno = 280 (0x118), region = 32  ;;  %950 = vmatprep.subr.bf16.mxu0 (!%p139_p2), %v1020_v0  ;;  %996 = vmatprep.subr.bf16.mxu1 (!%p139_p2), %v1020_v0  ;;  %p163_p3 = scmp.lt.s32.totalorder (!%p139_p2), %s817_s18, 63  ;;  %v1023_v3 = vld [vmem:[%s1254_s1 + $0x18] sm:$0xff] (!%p139_p2)   ;;  %v1024_v6 = vld [vmem:[%s1254_s1 + $0x20] sm:$0xff] (!%p139_p2)   ;;  %v1025_v7 = vld [vmem:[%s1254_s1 + $0x28] sm:$0xff] (!%p139_p2)   ;;  %vm723_vm2 = vcmask (!%p139_p2), 191488  }
   0x7   : > { %951 = vmatpush3.bf16.msra.mxu0 (!%p139_p2), %v1020_v0  ;;  %1003 = vmatpush3.bf16.msra.mxu1 (!%p139_p2), %v1020_v0  ;;  %v1026_v8 = vld [vmem:[%s1254_s1 + $0x30] sm:$0x3f] (!%p139_p2)   ;;  %v1145_v24 = vld [vmem:[%s1255_s2] ss:$0 sm:$0xff] (!%p139_p2) }
   0x8   : > { %952 = vmatprep.subr.bf16.mxu0 (!%p139_p2), %v1021_v1  ;;  %997 = vmatprep.subr.bf16.mxu1 (!%p139_p2), %v1021_v1  ;;  %v400_v9 = vsel (!%p139_p2), %vm398_vm1, %v1026_v8, 0 }
   0xb   : > { %953 = vmatpush3.bf16.msra.mxu0 (!%p139_p2), %v1021_v1  ;;  %1004 = vmatpush3.bf16.msra.mxu1 (!%p139_p2), %v1021_v1 }
   0xc   : > { %954 = vmatprep.subr.bf16.mxu0 (!%p139_p2), %v1022_v2  ;;  %998 = vmatprep.subr.bf16.mxu1 (!%p139_p2), %v1022_v2 }
   0xd   : > { %s1258_s18 = smov (!%p163_p3, %s817_s18), 63 }
   0xe   : > { %s818_s21 = sshll.u32 %s1258_s18, 2 }
   0xf   : > { %s1099_s26 = scalar_lea.vmem %s1253_s0, %s818_s21  ;;  %955 = vmatpush3.bf16.msra.mxu0 %v1022_v2  ;;  %1005 = vmatpush3.bf16.msra.mxu1 %v1022_v2  ;;  %s1158_s10 = scalar_lea.vmem %s1256_s3, %s818_s21 }
  0x10   : > { %v1027_v4 = vld [vmem:[%s1099_s26] sm:$0xff]   ;;  %956 = vmatprep.subr.bf16.mxu0 %v1023_v3  ;;  %999 = vmatprep.subr.bf16.mxu1 %v1023_v3  ;;  %v1029_v10 = vld [vmem:[%s1099_s26 + $0x8] sm:$0xff]   ;;  %v1031_v12 = vld [vmem:[%s1099_s26 + $0x10] sm:$0xff]  }
  0x11   : > { %v1028_v5 = vld [vmem:[%s1099_s26 + $0x40] sm:$0xff]   ;;  %964 = vmatprep.mubr.msk.bf16.mxu0 %vm349_vm0, %v1027_v4  ;;  %v1030_v11 = vld [vmem:[%s1099_s26 + $0x48] sm:$0xff]   ;;  %v1032_v13 = vld [vmem:[%s1099_s26 + $0x50] sm:$0xff]  }
  0x12   : > { %980 = vmatprep.mubr.msk.bf16.mxu1 %vm349_vm0, %v1028_v5  ;;  %v1033_v14 = vld [vmem:[%s1099_s26 + $0x18] sm:$0xff]   ;;  %v1035_v16 = vld [vmem:[%s1099_s26 + $0x20] sm:$0xff]   ;;  %v1037_v18 = vld [vmem:[%s1099_s26 + $0x28] sm:$0xff]  }
  0x13   : > { %957 = vmatpush3.bf16.msra.mxu0 %v1023_v3  ;;  %1006 = vmatpush3.bf16.msra.mxu1 %v1023_v3  ;;  %v1034_v15 = vld [vmem:[%s1099_s26 + $0x58] sm:$0xff]   ;;  %v1036_v17 = vld [vmem:[%s1099_s26 + $0x60] sm:$0xff]   ;;  %v1038_v19 = vld [vmem:[%s1099_s26 + $0x68] sm:$0xff]  }
  0x14   : > { %958 = vmatprep.subr.bf16.mxu0 %v1024_v6  ;;  %1000 = vmatprep.subr.bf16.mxu1 %v1024_v6  ;;  %v1039_v20 = vld [vmem:[%s1099_s26 + $0x30] sm:$0xff]   ;;  %v1041_v22 = vld [vmem:[%s1099_s26 + $0x38] sm:$0xff]  }
  0x15   : > { %v1040_v21 = vld [vmem:[%s1099_s26 + $0x70] sm:$0xff]   ;;  %v1042_v23 = vld [vmem:[%s1099_s26 + $0x78] sm:$0xff]  }
  0x17   : > { %959 = vmatpush3.bf16.msra.mxu0 %v1024_v6  ;;  %1007 = vmatpush3.bf16.msra.mxu1 %v1024_v6 }
  0x18   : > { %960 = vmatprep.subr.bf16.mxu0 %v1025_v7  ;;  %1001 = vmatprep.subr.bf16.mxu1 %v1025_v7 }
  0x1b   : > { %961 = vmatpush3.bf16.msra.mxu0 %v1025_v7  ;;  %1008 = vmatpush3.bf16.msra.mxu1 %v1025_v7 }
  0x1c   : > { %1010 = vmatprep.subr.msk.bf16.mxu0 %vm398_vm1, %v1026_v8  ;;  %1011 = vmatprep.subr.msk.bf16.mxu1 %vm398_vm1, %v1026_v8 }
  0x1f   : > { %963 = vmatpush3.bf16.msra.mxu0 %v400_v9  ;;  %1009 = vmatpush3.bf16.msra.mxu1 %v400_v9 }
  0x22   : > { %965 = vmatmul.mubr.msk.bf16.vlgmr.msra.gmra.mrb[0].mxu0 %vm349_vm0, %v1029_v10  ;;  %981 = vmatmul.mubr.msk.bf16.vlgmr.msra.gmra.mrb[0].mxu1 %vm349_vm0, %v1030_v11 }
  0x23   : > { %968 = vmatprep.mubr.msk.bf16.mxu0 %vm349_vm0, %v1031_v12  ;;  %984 = vmatprep.mubr.msk.bf16.mxu1 %vm349_vm0, %v1032_v13 }
  0x2a   : > { %969 = vmatmul.mubr.msk.bf16.gmra.mrb[4].mxu0 %vm349_vm0, %v1033_v14  ;;  %985 = vmatmul.mubr.msk.bf16.gmra.mrb[4].mxu1 %vm349_vm0, %v1034_v15 }
  0x2b   : > { %972 = vmatprep.mubr.msk.bf16.mxu0 %vm349_vm0, %v1035_v16  ;;  %988 = vmatprep.mubr.msk.bf16.mxu1 %vm349_vm0, %v1036_v17 }
  0x32   : > { %973 = vmatmul.mubr.msk.bf16.gmra.mrb[8].mxu0 %vm349_vm0, %v1037_v18  ;;  %989 = vmatmul.mubr.msk.bf16.gmra.mrb[8].mxu1 %vm349_vm0, %v1038_v19 }
  0x33   : > { %976 = vmatprep.mubr.msk.bf16.mxu0 %vm349_vm0, %v1039_v20  ;;  %992 = vmatprep.mubr.msk.bf16.mxu1 %vm349_vm0, %v1040_v21 }
  0x3a   : > { %977 = vmatmul.mubr.msk.bf16.gmra.mrb[12].mxu0 %vm349_vm0, %v1041_v22  ;;  %993 = vmatmul.mubr.msk.bf16.gmra.mrb[12].mxu1 %vm349_vm0, %v1042_v23 }
  0xf5   : > { %v966_v25 = vpop.f32.mrb[0].mxu0  ;;  %v982_v26 = vpop.f32.mrb[0].mxu1 }
  0xf6   : > { %v445_v27 = vadd.f32 %v966_v25, %v1145_v24  ;;  %v509_v28 = vadd.f32 %v982_v26, %v1145_v24  ;;  %v436_v29 = vpop.f32.mrb[1].mxu0  ;;  %v500_v30 = vpop.f32.mrb[1].mxu1 }
  0xf7   : > { %v437_v31 = vadd.f32 %v1145_v24, %v436_v29  ;;  %v501_v32 = vadd.f32 %v1145_v24, %v500_v30  ;;  %v967_v33 = vpop.f32.mrb[2].mxu0  ;;  %v983_v34 = vpop.f32.mrb[2].mxu1 }
  0xf8   : > { %v565_v35 = vmax.f32 %v445_v27, 0.0  ;;  %v581_v36 = vmax.f32 %v509_v28, 0.0  ;;  %v448_v37 = vadd.f32 %v967_v33, %v1145_v24  ;;  %v512_v38 = vadd.f32 %v983_v34, %v1145_v24  ;;  %v439_v39 = vpop.f32.mrb[3].mxu0  ;;  %v503_v40 = vpop.f32.mrb[3].mxu1 }
  0xf9   : > { %v563_v41 = vmax.f32 %v437_v31, 0.0  ;;  %v579_v42 = vmax.f32 %v501_v32, 0.0  ;;  %v440_v43 = vadd.f32 %v1145_v24, %v439_v39  ;;  %v504_v44 = vadd.f32 %v1145_v24, %v503_v40 }
  0xfa   : > { %v897_v45 = vpack.c.bf16 %v565_v35, %v565_v35  ;;  %v913_v46 = vpack.c.bf16 %v581_v36, %v581_v36  ;;  %v566_v47 = vmax.f32 %v448_v37, 0.0  ;;  %v582_v48 = vmax.f32 %v512_v38, 0.0 }
  0xfb   : > { %v895_v49 = vpack.c.bf16 %v563_v41, %v563_v41  ;;  %v911_v50 = vpack.c.bf16 %v579_v42, %v579_v42  ;;  %v564_v51 = vmax.f32 %v440_v43, 0.0  ;;  %v580_v52 = vmax.f32 %v504_v44, 0.0 }
  0xfc   : > { %726 = vst.msk [vmem:[%s1158_s10 + $0x8] sm:$0xf] %vm723_vm2, %v897_v45  ;;  %742 = vst.msk [vmem:[%s1158_s10 + $0x48] sm:$0xf] %vm723_vm2, %v913_v46  ;;  %v898_v53 = vpack.c.bf16 %v566_v47, %v566_v47  ;;  %v914_v54 = vpack.c.bf16 %v582_v48, %v582_v48 }
  0xfd   : > { %724 = vst.msk [vmem:[%s1158_s10] sm:$0xf] %vm723_vm2, %v895_v49  ;;  %740 = vst.msk [vmem:[%s1158_s10 + $0x40] sm:$0xf] %vm723_vm2, %v911_v50  ;;  %v896_v55 = vpack.c.bf16 %v564_v51, %v564_v51  ;;  %v912_v56 = vpack.c.bf16 %v580_v52, %v580_v52  ;;  %v970_v57 = vpop.f32.mrb[4].mxu0  ;;  %v986_v58 = vpop.f32.mrb[4].mxu1 }
  0xfe   : > { %727 = vst.msk [vmem:[%s1158_s10 + $0xc] sm:$0xf] %vm723_vm2, %v898_v53  ;;  %743 = vst.msk [vmem:[%s1158_s10 + $0x4c] sm:$0xf] %vm723_vm2, %v914_v54  ;;  %v461_v59 = vadd.f32 %v970_v57, %v1145_v24  ;;  %v525_v60 = vadd.f32 %v986_v58, %v1145_v24  ;;  %v452_v61 = vpop.f32.mrb[5].mxu0  ;;  %v516_v62 = vpop.f32.mrb[5].mxu1 }
  0xff   : > { %725 = vst.msk [vmem:[%s1158_s10 + $0x4] sm:$0xf] %vm723_vm2, %v896_v55  ;;  %741 = vst.msk [vmem:[%s1158_s10 + $0x44] sm:$0xf] %vm723_vm2, %v912_v56  ;;  %v453_v63 = vadd.f32 %v1145_v24, %v452_v61  ;;  %v517_v0 = vadd.f32 %v1145_v24, %v516_v62  ;;  %v971_v1 = vpop.f32.mrb[6].mxu0  ;;  %v987_v2 = vpop.f32.mrb[6].mxu1 }
 0x100   : > { %v569_v3 = vmax.f32 %v461_v59, 0.0  ;;  %v585_v4 = vmax.f32 %v525_v60, 0.0  ;;  %v464_v5 = vadd.f32 %v971_v1, %v1145_v24  ;;  %v528_v6 = vadd.f32 %v987_v2, %v1145_v24  ;;  %v455_v7 = vpop.f32.mrb[7].mxu0  ;;  %v519_v8 = vpop.f32.mrb[7].mxu1 }
 0x101   : > { %v567_v9 = vmax.f32 %v453_v63, 0.0  ;;  %v583_v10 = vmax.f32 %v517_v0, 0.0  ;;  %v456_v11 = vadd.f32 %v1145_v24, %v455_v7  ;;  %v520_v12 = vadd.f32 %v1145_v24, %v519_v8 }
 0x102   : > { %v901_v13 = vpack.c.bf16 %v569_v3, %v569_v3  ;;  %v917_v14 = vpack.c.bf16 %v585_v4, %v585_v4  ;;  %v570_v15 = vmax.f32 %v464_v5, 0.0  ;;  %v586_v16 = vmax.f32 %v528_v6, 0.0 }
 0x103   : > { %v899_v17 = vpack.c.bf16 %v567_v9, %v567_v9  ;;  %v915_v18 = vpack.c.bf16 %v583_v10, %v583_v10  ;;  %v568_v19 = vmax.f32 %v456_v11, 0.0  ;;  %v584_v20 = vmax.f32 %v520_v12, 0.0 }
 0x104   : > { %730 = vst.msk [vmem:[%s1158_s10 + $0x18] sm:$0xf] %vm723_vm2, %v901_v13  ;;  %746 = vst.msk [vmem:[%s1158_s10 + $0x58] sm:$0xf] %vm723_vm2, %v917_v14  ;;  %v902_v21 = vpack.c.bf16 %v570_v15, %v570_v15  ;;  %v918_v22 = vpack.c.bf16 %v586_v16, %v586_v16 }
 0x105   : > { %728 = vst.msk [vmem:[%s1158_s10 + $0x10] sm:$0xf] %vm723_vm2, %v899_v17  ;;  %744 = vst.msk [vmem:[%s1158_s10 + $0x50] sm:$0xf] %vm723_vm2, %v915_v18  ;;  %v900_v23 = vpack.c.bf16 %v568_v19, %v568_v19  ;;  %v916_v25 = vpack.c.bf16 %v584_v20, %v584_v20  ;;  %v974_v26 = vpop.f32.mrb[8].mxu0  ;;  %v990_v27 = vpop.f32.mrb[8].mxu1 }
 0x106   : > { %731 = vst.msk [vmem:[%s1158_s10 + $0x1c] sm:$0xf] %vm723_vm2, %v902_v21  ;;  %747 = vst.msk [vmem:[%s1158_s10 + $0x5c] sm:$0xf] %vm723_vm2, %v918_v22  ;;  %v477_v28 = vadd.f32 %v974_v26, %v1145_v24  ;;  %v541_v29 = vadd.f32 %v990_v27, %v1145_v24  ;;  %v468_v30 = vpop.f32.mrb[9].mxu0  ;;  %v532_v31 = vpop.f32.mrb[9].mxu1 }
 0x107   : > { %729 = vst.msk [vmem:[%s1158_s10 + $0x14] sm:$0xf] %vm723_vm2, %v900_v23  ;;  %745 = vst.msk [vmem:[%s1158_s10 + $0x54] sm:$0xf] %vm723_vm2, %v916_v25  ;;  %v469_v32 = vadd.f32 %v1145_v24, %v468_v30  ;;  %v533_v33 = vadd.f32 %v1145_v24, %v532_v31  ;;  %v975_v34 = vpop.f32.mrb[10].mxu0  ;;  %v991_v35 = vpop.f32.mrb[10].mxu1 }
 0x108   : > { %v573_v36 = vmax.f32 %v477_v28, 0.0  ;;  %v589_v37 = vmax.f32 %v541_v29, 0.0  ;;  %v480_v38 = vadd.f32 %v975_v34, %v1145_v24  ;;  %v544_v39 = vadd.f32 %v991_v35, %v1145_v24  ;;  %v471_v40 = vpop.f32.mrb[11].mxu0  ;;  %v535_v41 = vpop.f32.mrb[11].mxu1 }
 0x109   : > { %v571_v42 = vmax.f32 %v469_v32, 0.0  ;;  %v587_v43 = vmax.f32 %v533_v33, 0.0  ;;  %v472_v44 = vadd.f32 %v1145_v24, %v471_v40  ;;  %v536_v45 = vadd.f32 %v1145_v24, %v535_v41 }
 0x10a   : > { %v905_v46 = vpack.c.bf16 %v573_v36, %v573_v36  ;;  %v921_v47 = vpack.c.bf16 %v589_v37, %v589_v37  ;;  %v574_v48 = vmax.f32 %v480_v38, 0.0  ;;  %v590_v49 = vmax.f32 %v544_v39, 0.0 }
 0x10b   : > { %v903_v50 = vpack.c.bf16 %v571_v42, %v571_v42  ;;  %v919_v51 = vpack.c.bf16 %v587_v43, %v587_v43  ;;  %v572_v52 = vmax.f32 %v472_v44, 0.0  ;;  %v588_v53 = vmax.f32 %v536_v45, 0.0 }
 0x10c   : > { %734 = vst.msk [vmem:[%s1158_s10 + $0x28] sm:$0xf] %vm723_vm2, %v905_v46  ;;  %750 = vst.msk [vmem:[%s1158_s10 + $0x68] sm:$0xf] %vm723_vm2, %v921_v47  ;;  %v906_v54 = vpack.c.bf16 %v574_v48, %v574_v48  ;;  %v922_v55 = vpack.c.bf16 %v590_v49, %v590_v49 }
 0x10d   : > { %732 = vst.msk [vmem:[%s1158_s10 + $0x20] sm:$0xf] %vm723_vm2, %v903_v50  ;;  %748 = vst.msk [vmem:[%s1158_s10 + $0x60] sm:$0xf] %vm723_vm2, %v919_v51  ;;  %v904_v56 = vpack.c.bf16 %v572_v52, %v572_v52  ;;  %v920_v57 = vpack.c.bf16 %v588_v53, %v588_v53  ;;  %v978_v58 = vpop.f32.mrb[12].mxu0  ;;  %v994_v59 = vpop.f32.mrb[12].mxu1 }
 0x10e   : > { %735 = vst.msk [vmem:[%s1158_s10 + $0x2c] sm:$0xf] %vm723_vm2, %v906_v54  ;;  %751 = vst.msk [vmem:[%s1158_s10 + $0x6c] sm:$0xf] %vm723_vm2, %v922_v55  ;;  %v493_v60 = vadd.f32 %v978_v58, %v1145_v24  ;;  %v557_v61 = vadd.f32 %v994_v59, %v1145_v24  ;;  %v484_v62 = vpop.f32.mrb[13].mxu0  ;;  %v548_v63 = vpop.f32.mrb[13].mxu1 }
 0x10f   : > { %733 = vst.msk [vmem:[%s1158_s10 + $0x24] sm:$0xf] %vm723_vm2, %v904_v56  ;;  %749 = vst.msk [vmem:[%s1158_s10 + $0x64] sm:$0xf] %vm723_vm2, %v920_v57  ;;  %v485_v0 = vadd.f32 %v1145_v24, %v484_v62  ;;  %v549_v1 = vadd.f32 %v1145_v24, %v548_v63  ;;  %v979_v2 = vpop.f32.mrb[14].mxu0  ;;  %v995_v3 = vpop.f32.mrb[14].mxu1 }
 0x110   : > { %v577_v4 = vmax.f32 %v493_v60, 0.0  ;;  %v593_v5 = vmax.f32 %v557_v61, 0.0  ;;  %v496_v6 = vadd.f32 %v979_v2, %v1145_v24  ;;  %v560_v7 = vadd.f32 %v995_v3, %v1145_v24  ;;  %v487_v8 = vpop.f32.mrb[15].mxu0  ;;  %v551_v9 = vpop.f32.mrb[15].mxu1 }
 0x111   : > { %v575_v10 = vmax.f32 %v485_v0, 0.0  ;;  %v591_v11 = vmax.f32 %v549_v1, 0.0  ;;  %v488_v12 = vadd.f32 %v1145_v24, %v487_v8  ;;  %v552_v13 = vadd.f32 %v1145_v24, %v551_v9 }
 0x112   : > { %v909_v14 = vpack.c.bf16 %v577_v4, %v577_v4  ;;  %v925_v15 = vpack.c.bf16 %v593_v5, %v593_v5  ;;  %v578_v16 = vmax.f32 %v496_v6, 0.0  ;;  %v594_v17 = vmax.f32 %v560_v7, 0.0 }
 0x113   : > { %v907_v18 = vpack.c.bf16 %v575_v10, %v575_v10  ;;  %v923_v19 = vpack.c.bf16 %v591_v11, %v591_v11  ;;  %v576_v20 = vmax.f32 %v488_v12, 0.0  ;;  %v592_v21 = vmax.f32 %v552_v13, 0.0 }
 0x114   : > { %738 = vst.msk [vmem:[%s1158_s10 + $0x38] sm:$0xf] %vm723_vm2, %v909_v14  ;;  %754 = vst.msk [vmem:[%s1158_s10 + $0x78] sm:$0xf] %vm723_vm2, %v925_v15  ;;  %v910_v22 = vpack.c.bf16 %v578_v16, %v578_v16  ;;  %v926_v23 = vpack.c.bf16 %v594_v17, %v594_v17 }
 0x115   : > { %736 = vst.msk [vmem:[%s1158_s10 + $0x30] sm:$0xf] %vm723_vm2, %v907_v18  ;;  %752 = vst.msk [vmem:[%s1158_s10 + $0x70] sm:$0xf] %vm723_vm2, %v923_v19  ;;  %v908_v24 = vpack.c.bf16 %v576_v20, %v576_v20  ;;  %v924_v25 = vpack.c.bf16 %v592_v21, %v592_v21 }
 0x116   : > { %739 = vst.msk [vmem:[%s1158_s10 + $0x3c] sm:$0xf] %vm723_vm2, %v910_v22  ;;  %755 = vst.msk [vmem:[%s1158_s10 + $0x7c] sm:$0xf] %vm723_vm2, %v926_v23 }
 0x117   : > { %737 = vst.msk [vmem:[%s1158_s10 + $0x34] sm:$0xf] %vm723_vm2, %v908_v24  ;;  %753 = vst.msk [vmem:[%s1158_s10 + $0x74] sm:$0xf] %vm723_vm2, %v924_v25 }
 0x118 PF: > { %s13_s12 = sadd.s32 1, %s1049_s12  }
 0x119   : > { %p10_p4 = scmp.ge.s32.totalorder %s13_s12, 4  }
 0x11b   :  { %12 = sbr.rel (!%p10_p4) target bundleno = 1 (0x1), region = 62 }

// kernel: _lambda_.18
= control target key start
LH: loop header
LB: loop body
LE: loop exit
PB: predicated region body
PF: predicated region fallthrough
CT: control target
= control target key end

     0   :  { %s993_s12 = smov 0   ;;  %s1160_s0 = inlined_call_operand.vmem [shape: bf16[512,24], index: 0, kind: input, shape index: {}]   ;;  %s1161_s1 = inlined_call_operand.vmem [shape: bf16[24,36], index: 1, kind: input, shape index: {}]   ;;  %s1162_s2 = inlined_call_operand.vmem [shape: f32[1,36], index: 2, kind: input, shape index: {}]   ;;  %s1163_s3 = inlined_call_operand.vmem [shape: bf16[512,36], index: 3, kind: output, shape index: {}]  }
   0x1 LB: > { %s769_s13 = sadd.s32 4294967295, %s971_s12   ;;  %p773_p0 = scmp.ge.s32.totalorder %s971_s12, 1  ;;  %s971_s12 = sphi %s993_s12, %s13_s12  }
   0x2   : > { %p138_p1 = scmp.lt.s32.totalorder %s971_s12, 3 }
   0x4   : > { %p139_p2 = pnand %p773_p0, %p138_p1 }
   0x5   : > { %v947_v0 = vld [vmem:[%s1161_s1] sm:$0xff] (!%p139_p2)   ;;  %v948_v1 = vld [vmem:[%s1161_s1 + $0x8] ss:$0 sps:$4 sm:$0xff] (!%p139_p2)   ;;  %vm355_vm0 = vcmask (!%p139_p2), 1043456   ;;  %s774_s18 = sshll.u32 (!%p139_p2), %s769_s13, 5  ;;  %vm306_vm1 = vcmask (!%p139_p2), 195584  }
   0x6   : > { %142 = sbr.rel (%p139_p2) target bundleno = 265 (0x109), region = 32  ;;  %897 = vmatprep.subr.bf16.mxu0 (!%p139_p2), %v947_v0  ;;  %933 = vmatprep.subr.bf16.mxu1 (!%p139_p2), %v947_v0  ;;  %p163_p3 = scmp.lt.s32.totalorder (!%p139_p2), %s774_s18, 63  ;;  %v357_v2 = vsel (!%p139_p2), %vm355_vm0, %v948_v1, 0  ;;  %v1052_v19 = vld [vmem:[%s1162_s2] ss:$0 sm:$0xff] (!%p139_p2)  ;;  %vm680_vm2 = vcmask (!%p139_p2), 289792  }
   0x7   : > { %898 = vmatpush3.bf16.msra.mxu0 (!%p139_p2), %v947_v0  ;;  %935 = vmatpush3.bf16.msra.mxu1 (!%p139_p2), %v947_v0 }
   0x8   : > { %937 = vmatprep.subr.msk.bf16.mxu0 (!%p139_p2), %vm355_vm0, %v948_v1  ;;  %938 = vmatprep.subr.msk.bf16.mxu1 (!%p139_p2), %vm355_vm0, %v948_v1 }
   0xb   : > { %900 = vmatpush3.bf16.msra.mxu0 (!%p139_p2), %v357_v2  ;;  %936 = vmatpush3.bf16.msra.mxu1 (!%p139_p2), %v357_v2 }
   0xd   : > { %s1165_s18 = smov (!%p163_p3, %s774_s18), 63 }
   0xe   : > { %s775_s19 = sshll.u32 %s1165_s18, 2 }
   0xf   : > { %s1015_s22 = scalar_lea.vmem %s1160_s0, %s775_s19  ;;  %s1064_s27 = scalar_lea.vmem %s1163_s3, %s775_s19 }
  0x10   : > { %v949_v3 = vld [vmem:[%s1015_s22] sm:$0xff]   ;;  %v951_v5 = vld [vmem:[%s1015_s22 + $0x8] sm:$0xff]   ;;  %v953_v7 = vld [vmem:[%s1015_s22 + $0x10] sm:$0xff]  }
  0x11   : > { %v950_v4 = vld [vmem:[%s1015_s22 + $0x40] sm:$0xff]   ;;  %901 = vmatprep.mubr.msk.bf16.mxu0 %vm306_vm1, %v949_v3  ;;  %v952_v6 = vld [vmem:[%s1015_s22 + $0x48] sm:$0xff]   ;;  %v954_v8 = vld [vmem:[%s1015_s22 + $0x50] sm:$0xff]  }
  0x12   : > { %917 = vmatprep.mubr.msk.bf16.mxu1 %vm306_vm1, %v950_v4  ;;  %902 = vmatmul.mubr.msk.bf16.vlgmr.msra.gmra.mrb[0].mxu0 %vm306_vm1, %v951_v5  ;;  %v955_v9 = vld [vmem:[%s1015_s22 + $0x18] sm:$0xff]   ;;  %v957_v11 = vld [vmem:[%s1015_s22 + $0x20] sm:$0xff]   ;;  %v959_v13 = vld [vmem:[%s1015_s22 + $0x28] sm:$0xff]  }
  0x13   : > { %918 = vmatmul.mubr.msk.bf16.vlgmr.msra.gmra.mrb[0].mxu1 %vm306_vm1, %v952_v6  ;;  %905 = vmatprep.mubr.msk.bf16.mxu0 %vm306_vm1, %v953_v7  ;;  %v956_v10 = vld [vmem:[%s1015_s22 + $0x58] sm:$0xff]   ;;  %v958_v12 = vld [vmem:[%s1015_s22 + $0x60] sm:$0xff]   ;;  %v960_v14 = vld [vmem:[%s1015_s22 + $0x68] sm:$0xff]  }
  0x14   : > { %921 = vmatprep.mubr.msk.bf16.mxu1 %vm306_vm1, %v954_v8  ;;  %v961_v15 = vld [vmem:[%s1015_s22 + $0x30] sm:$0xff]   ;;  %v963_v17 = vld [vmem:[%s1015_s22 + $0x38] sm:$0xff]  }
  0x15   : > { %v962_v16 = vld [vmem:[%s1015_s22 + $0x70] sm:$0xff]   ;;  %v964_v18 = vld [vmem:[%s1015_s22 + $0x78] sm:$0xff]  }
  0x1a   : > { %906 = vmatmul.mubr.msk.bf16.gmra.mrb[4].mxu0 %vm306_vm1, %v955_v9 }
  0x1b   : > { %922 = vmatmul.mubr.msk.bf16.gmra.mrb[4].mxu1 %vm306_vm1, %v956_v10  ;;  %909 = vmatprep.mubr.msk.bf16.mxu0 %vm306_vm1, %v957_v11 }
  0x1c   : > { %925 = vmatprep.mubr.msk.bf16.mxu1 %vm306_vm1, %v958_v12 }
  0x22   : > { %910 = vmatmul.mubr.msk.bf16.gmra.mrb[8].mxu0 %vm306_vm1, %v959_v13 }
  0x23   : > { %926 = vmatmul.mubr.msk.bf16.gmra.mrb[8].mxu1 %vm306_vm1, %v960_v14  ;;  %913 = vmatprep.mubr.msk.bf16.mxu0 %vm306_vm1, %v961_v15 }
  0x24   : > { %929 = vmatprep.mubr.msk.bf16.mxu1 %vm306_vm1, %v962_v16 }
  0x2a   : > { %914 = vmatmul.mubr.msk.bf16.gmra.mrb[12].mxu0 %vm306_vm1, %v963_v17 }
  0x2b   : > { %930 = vmatmul.mubr.msk.bf16.gmra.mrb[12].mxu1 %vm306_vm1, %v964_v18 }
  0xe5   : > { %v903_v20 = vpop.f32.mrb[0].mxu0 }
  0xe6   : > { %v402_v21 = vadd.f32 %v903_v20, %v1052_v19  ;;  %v919_v22 = vpop.f32.mrb[0].mxu1  ;;  %v393_v23 = vpop.f32.mrb[1].mxu0 }
  0xe7   : > { %v466_v24 = vadd.f32 %v919_v22, %v1052_v19  ;;  %v394_v25 = vadd.f32 %v1052_v19, %v393_v23  ;;  %v457_v26 = vpop.f32.mrb[1].mxu1  ;;  %v904_v27 = vpop.f32.mrb[2].mxu0 }
  0xe8   : > { %v522_v28 = vmax.f32 %v402_v21, 0.0  ;;  %v458_v29 = vadd.f32 %v1052_v19, %v457_v26  ;;  %v405_v30 = vadd.f32 %v904_v27, %v1052_v19  ;;  %v920_v31 = vpop.f32.mrb[2].mxu1  ;;  %v396_v32 = vpop.f32.mrb[3].mxu0 }
  0xe9   : > { %v538_v33 = vmax.f32 %v466_v24, 0.0  ;;  %v520_v34 = vmax.f32 %v394_v25, 0.0  ;;  %v469_v35 = vadd.f32 %v920_v31, %v1052_v19  ;;  %v397_v36 = vadd.f32 %v1052_v19, %v396_v32  ;;  %v460_v37 = vpop.f32.mrb[3].mxu1 }
  0xea   : > { %v849_v38 = vpack.c.bf16 %v522_v28, %v522_v28  ;;  %v536_v39 = vmax.f32 %v458_v29, 0.0  ;;  %v523_v40 = vmax.f32 %v405_v30, 0.0  ;;  %v461_v41 = vadd.f32 %v1052_v19, %v460_v37 }
  0xeb   : > { %v865_v42 = vpack.c.bf16 %v538_v33, %v538_v33  ;;  %v847_v43 = vpack.c.bf16 %v520_v34, %v520_v34  ;;  %v539_v44 = vmax.f32 %v469_v35, 0.0  ;;  %v521_v45 = vmax.f32 %v397_v36, 0.0 }
  0xec   : > { %683 = vst.msk [vmem:[%s1064_s27 + $0x8] sm:$0xf] %vm680_vm2, %v849_v38  ;;  %v863_v46 = vpack.c.bf16 %v536_v39, %v536_v39  ;;  %v850_v47 = vpack.c.bf16 %v523_v40, %v523_v40  ;;  %v537_v48 = vmax.f32 %v461_v41, 0.0 }
  0xed   : > { %699 = vst.msk [vmem:[%s1064_s27 + $0x48] sm:$0xf] %vm680_vm2, %v865_v42  ;;  %681 = vst.msk [vmem:[%s1064_s27] sm:$0xf] %vm680_vm2, %v847_v43  ;;  %v866_v49 = vpack.c.bf16 %v539_v44, %v539_v44  ;;  %v848_v50 = vpack.c.bf16 %v521_v45, %v521_v45  ;;  %v907_v51 = vpop.f32.mrb[4].mxu0 }
  0xee   : > { %697 = vst.msk [vmem:[%s1064_s27 + $0x40] sm:$0xf] %vm680_vm2, %v863_v46  ;;  %684 = vst.msk [vmem:[%s1064_s27 + $0xc] sm:$0xf] %vm680_vm2, %v850_v47  ;;  %v864_v52 = vpack.c.bf16 %v537_v48, %v537_v48  ;;  %v418_v53 = vadd.f32 %v907_v51, %v1052_v19  ;;  %v923_v54 = vpop.f32.mrb[4].mxu1  ;;  %v409_v55 = vpop.f32.mrb[5].mxu0 }
  0xef   : > { %700 = vst.msk [vmem:[%s1064_s27 + $0x4c] sm:$0xf] %vm680_vm2, %v866_v49  ;;  %682 = vst.msk [vmem:[%s1064_s27 + $0x4] sm:$0xf] %vm680_vm2, %v848_v50  ;;  %v482_v56 = vadd.f32 %v923_v54, %v1052_v19  ;;  %v410_v57 = vadd.f32 %v1052_v19, %v409_v55  ;;  %v473_v58 = vpop.f32.mrb[5].mxu1  ;;  %v908_v59 = vpop.f32.mrb[6].mxu0 }
  0xf0   : > { %698 = vst.msk [vmem:[%s1064_s27 + $0x44] sm:$0xf] %vm680_vm2, %v864_v52  ;;  %v526_v60 = vmax.f32 %v418_v53, 0.0  ;;  %v474_v61 = vadd.f32 %v1052_v19, %v473_v58  ;;  %v421_v62 = vadd.f32 %v908_v59, %v1052_v19  ;;  %v924_v63 = vpop.f32.mrb[6].mxu1  ;;  %v412_v0 = vpop.f32.mrb[7].mxu0 }
  0xf1   : > { %v542_v1 = vmax.f32 %v482_v56, 0.0  ;;  %v524_v2 = vmax.f32 %v410_v57, 0.0  ;;  %v485_v3 = vadd.f32 %v924_v63, %v1052_v19  ;;  %v413_v4 = vadd.f32 %v1052_v19, %v412_v0  ;;  %v476_v5 = vpop.f32.mrb[7].mxu1 }
  0xf2   : > { %v853_v6 = vpack.c.bf16 %v526_v60, %v526_v60  ;;  %v540_v7 = vmax.f32 %v474_v61, 0.0  ;;  %v527_v8 = vmax.f32 %v421_v62, 0.0  ;;  %v477_v9 = vadd.f32 %v1052_v19, %v476_v5 }
  0xf3   : > { %v869_v10 = vpack.c.bf16 %v542_v1, %v542_v1  ;;  %v851_v11 = vpack.c.bf16 %v524_v2, %v524_v2  ;;  %v543_v12 = vmax.f32 %v485_v3, 0.0  ;;  %v525_v13 = vmax.f32 %v413_v4, 0.0 }
  0xf4   : > { %687 = vst.msk [vmem:[%s1064_s27 + $0x18] sm:$0xf] %vm680_vm2, %v853_v6  ;;  %v867_v14 = vpack.c.bf16 %v540_v7, %v540_v7  ;;  %v854_v15 = vpack.c.bf16 %v527_v8, %v527_v8  ;;  %v541_v16 = vmax.f32 %v477_v9, 0.0 }
  0xf5   : > { %703 = vst.msk [vmem:[%s1064_s27 + $0x58] sm:$0xf] %vm680_vm2, %v869_v10  ;;  %685 = vst.msk [vmem:[%s1064_s27 + $0x10] sm:$0xf] %vm680_vm2, %v851_v11  ;;  %v870_v17 = vpack.c.bf16 %v543_v12, %v543_v12  ;;  %v852_v18 = vpack.c.bf16 %v525_v13, %v525_v13  ;;  %v911_v20 = vpop.f32.mrb[8].mxu0 }
  0xf6   : > { %701 = vst.msk [vmem:[%s1064_s27 + $0x50] sm:$0xf] %vm680_vm2, %v867_v14  ;;  %688 = vst.msk [vmem:[%s1064_s27 + $0x1c] sm:$0xf] %vm680_vm2, %v854_v15  ;;  %v868_v21 = vpack.c.bf16 %v541_v16, %v541_v16  ;;  %v434_v22 = vadd.f32 %v911_v20, %v1052_v19  ;;  %v927_v23 = vpop.f32.mrb[8].mxu1  ;;  %v425_v24 = vpop.f32.mrb[9].mxu0 }
  0xf7   : > { %704 = vst.msk [vmem:[%s1064_s27 + $0x5c] sm:$0xf] %vm680_vm2, %v870_v17  ;;  %686 = vst.msk [vmem:[%s1064_s27 + $0x14] sm:$0xf] %vm680_vm2, %v852_v18  ;;  %v498_v25 = vadd.f32 %v927_v23, %v1052_v19  ;;  %v426_v26 = vadd.f32 %v1052_v19, %v425_v24  ;;  %v489_v27 = vpop.f32.mrb[9].mxu1  ;;  %v912_v28 = vpop.f32.mrb[10].mxu0 }
  0xf8   : > { %702 = vst.msk [vmem:[%s1064_s27 + $0x54] sm:$0xf] %vm680_vm2, %v868_v21  ;;  %v530_v29 = vmax.f32 %v434_v22, 0.0  ;;  %v490_v30 = vadd.f32 %v1052_v19, %v489_v27  ;;  %v437_v31 = vadd.f32 %v912_v28, %v1052_v19  ;;  %v928_v32 = vpop.f32.mrb[10].mxu1  ;;  %v428_v33 = vpop.f32.mrb[11].mxu0 }
  0xf9   : > { %v546_v34 = vmax.f32 %v498_v25, 0.0  ;;  %v528_v35 = vmax.f32 %v426_v26, 0.0  ;;  %v501_v36 = vadd.f32 %v928_v32, %v1052_v19  ;;  %v429_v37 = vadd.f32 %v1052_v19, %v428_v33  ;;  %v492_v38 = vpop.f32.mrb[11].mxu1 }
  0xfa   : > { %v857_v39 = vpack.c.bf16 %v530_v29, %v530_v29  ;;  %v544_v40 = vmax.f32 %v490_v30, 0.0  ;;  %v531_v41 = vmax.f32 %v437_v31, 0.0  ;;  %v493_v42 = vadd.f32 %v1052_v19, %v492_v38 }
  0xfb   : > { %v873_v43 = vpack.c.bf16 %v546_v34, %v546_v34  ;;  %v855_v44 = vpack.c.bf16 %v528_v35, %v528_v35  ;;  %v547_v45 = vmax.f32 %v501_v36, 0.0  ;;  %v529_v46 = vmax.f32 %v429_v37, 0.0 }
  0xfc   : > { %691 = vst.msk [vmem:[%s1064_s27 + $0x28] sm:$0xf] %vm680_vm2, %v857_v39  ;;  %v871_v47 = vpack.c.bf16 %v544_v40, %v544_v40  ;;  %v858_v48 = vpack.c.bf16 %v531_v41, %v531_v41  ;;  %v545_v49 = vmax.f32 %v493_v42, 0.0 }
  0xfd   : > { %707 = vst.msk [vmem:[%s1064_s27 + $0x68] sm:$0xf] %vm680_vm2, %v873_v43  ;;  %689 = vst.msk [vmem:[%s1064_s27 + $0x20] sm:$0xf] %vm680_vm2, %v855_v44  ;;  %v874_v50 = vpack.c.bf16 %v547_v45, %v547_v45  ;;  %v856_v51 = vpack.c.bf16 %v529_v46, %v529_v46  ;;  %v915_v52 = vpop.f32.mrb[12].mxu0 }
  0xfe   : > { %705 = vst.msk [vmem:[%s1064_s27 + $0x60] sm:$0xf] %vm680_vm2, %v871_v47  ;;  %692 = vst.msk [vmem:[%s1064_s27 + $0x2c] sm:$0xf] %vm680_vm2, %v858_v48  ;;  %v872_v53 = vpack.c.bf16 %v545_v49, %v545_v49  ;;  %v450_v54 = vadd.f32 %v915_v52, %v1052_v19  ;;  %v931_v55 = vpop.f32.mrb[12].mxu1  ;;  %v441_v56 = vpop.f32.mrb[13].mxu0 }
  0xff   : > { %708 = vst.msk [vmem:[%s1064_s27 + $0x6c] sm:$0xf] %vm680_vm2, %v874_v50  ;;  %690 = vst.msk [vmem:[%s1064_s27 + $0x24] sm:$0xf] %vm680_vm2, %v856_v51  ;;  %v514_v57 = vadd.f32 %v931_v55, %v1052_v19  ;;  %v442_v58 = vadd.f32 %v1052_v19, %v441_v56  ;;  %v505_v59 = vpop.f32.mrb[13].mxu1  ;;  %v916_v60 = vpop.f32.mrb[14].mxu0 }
 0x100   : > { %706 = vst.msk [vmem:[%s1064_s27 + $0x64] sm:$0xf] %vm680_vm2, %v872_v53  ;;  %v534_v61 = vmax.f32 %v450_v54, 0.0  ;;  %v506_v62 = vadd.f32 %v1052_v19, %v505_v59  ;;  %v453_v63 = vadd.f32 %v916_v60, %v1052_v19  ;;  %v932_v0 = vpop.f32.mrb[14].mxu1  ;;  %v444_v1 = vpop.f32.mrb[15].mxu0 }
 0x101   : > { %v550_v2 = vmax.f32 %v514_v57, 0.0  ;;  %v532_v3 = vmax.f32 %v442_v58, 0.0  ;;  %v517_v4 = vadd.f32 %v932_v0, %v1052_v19  ;;  %v445_v5 = vadd.f32 %v1052_v19, %v444_v1  ;;  %v508_v6 = vpop.f32.mrb[15].mxu1 }
 0x102   : > { %v861_v7 = vpack.c.bf16 %v534_v61, %v534_v61  ;;  %v548_v8 = vmax.f32 %v506_v62, 0.0  ;;  %v535_v9 = vmax.f32 %v453_v63, 0.0  ;;  %v509_v10 = vadd.f32 %v1052_v19, %v508_v6 }
 0x103   : > { %v877_v11 = vpack.c.bf16 %v550_v2, %v550_v2  ;;  %v859_v12 = vpack.c.bf16 %v532_v3, %v532_v3  ;;  %v551_v13 = vmax.f32 %v517_v4, 0.0  ;;  %v533_v14 = vmax.f32 %v445_v5, 0.0 }
 0x104   : > { %695 = vst.msk [vmem:[%s1064_s27 + $0x38] sm:$0xf] %vm680_vm2, %v861_v7  ;;  %v875_v15 = vpack.c.bf16 %v548_v8, %v548_v8  ;;  %v862_v16 = vpack.c.bf16 %v535_v9, %v535_v9  ;;  %v549_v17 = vmax.f32 %v509_v10, 0.0 }
 0x105   : > { %711 = vst.msk [vmem:[%s1064_s27 + $0x78] sm:$0xf] %vm680_vm2, %v877_v11  ;;  %693 = vst.msk [vmem:[%s1064_s27 + $0x30] sm:$0xf] %vm680_vm2, %v859_v12  ;;  %v878_v18 = vpack.c.bf16 %v551_v13, %v551_v13  ;;  %v860_v20 = vpack.c.bf16 %v533_v14, %v533_v14 }
 0x106   : > { %709 = vst.msk [vmem:[%s1064_s27 + $0x70] sm:$0xf] %vm680_vm2, %v875_v15  ;;  %696 = vst.msk [vmem:[%s1064_s27 + $0x3c] sm:$0xf] %vm680_vm2, %v862_v16  ;;  %v876_v19 = vpack.c.bf16 %v549_v17, %v549_v17 }
 0x107   : > { %712 = vst.msk [vmem:[%s1064_s27 + $0x7c] sm:$0xf] %vm680_vm2, %v878_v18  ;;  %694 = vst.msk [vmem:[%s1064_s27 + $0x34] sm:$0xf] %vm680_vm2, %v860_v20 }
 0x108   : > { %710 = vst.msk [vmem:[%s1064_s27 + $0x74] sm:$0xf] %vm680_vm2, %v876_v19 }
 0x109 PF: > { %s13_s12 = sadd.s32 1, %s971_s12  }
 0x10a   : > { %p10_p4 = scmp.ge.s32.totalorder %s13_s12, 4  }
 0x10c   :  { %12 = sbr.rel (!%p10_p4) target bundleno = 1 (0x1), region = 62 }

// kernel: _lambda_.19
= control target key start
LH: loop header
LB: loop body
LE: loop exit
PB: predicated region body
PF: predicated region fallthrough
CT: control target
= control target key end

     0   :  { %s2694_s15 = smov 0   ;;  %s3253_s0 = inlined_call_operand.vmem [shape: bf16[8,64,6], index: 0, kind: input, shape index: {}]   ;;  %s3254_s1 = inlined_call_operand.vmem [shape: bf16[8,64,6], index: 1, kind: input, shape index: {}]   ;;  %s3255_s2 = inlined_call_operand.vmem [shape: bf16[8,64,24], index: 2, kind: input, shape index: {}]   ;;  %s3256_s3 = inlined_call_operand.vmem [shape: bf16[8,64,24], index: 3, kind: input, shape index: {}]   ;;  %s3257_s4 = inlined_call_operand.vmem [shape: bf16[8,64,24], index: 4, kind: output, shape index: {}]  }
   0x1 LB: > { %s2019_s16 = sadd.s32 4294967295, %s2667_s15   ;;  %p2023_p0 = scmp.ge.s32.totalorder %s2667_s15, 1  ;;  %s2667_s15 = sphi %s2694_s15, %s14_s15  }
   0x2   : > { %p200_p1 = scmp.lt.s32.totalorder %s2667_s15, 3 }
   0x4   : > { %p201_p2 = pnand %p2023_p0, %p200_p1 }
   0x5   : > { %s2024_s17 = sshll.u32 (!%p201_p2), %s2019_s16, 2  ;;  %vm386_vm0 = vcmask (!%p201_p2), 48128   ;;  %vm863_vm1 = vcmask (!%p201_p2), 523264   ;;  %vm1892_vm2 = vcmask (!%p201_p2), 191488  }
   0x6   : > { %204 = sbr.rel (%p201_p2) target bundleno = 863 (0x35f), region = 36  ;;  %p247_p3 = scmp.lt.s32.totalorder (!%p201_p2), %s2024_s17, 7 }
   0xd   : > { %s3259_s17 = smov (!%p247_p3, %s2024_s17), 7 }
   0xe   : > { %s2702_s18 = sshll.u32 %s3259_s17, 5 }
   0xf   : > { %s2708_s21 = scalar_lea.vmem %s3253_s0, %s2702_s18  ;;  %s2724_s24 = scalar_lea.vmem %s3254_s1, %s2702_s18 }
  0x10   : > { %v2485_v0 = vld [vmem:[%s2708_s21] sm:$0xff]   ;;  %v2487_v3 = vld [vmem:[%s2708_s21 + $0x8] sm:$0xff]   ;;  %v2489_v6 = vld [vmem:[%s2708_s21 + $0x10] sm:$0xff]   ;;  %s3000_s27 = scalar_lea.vmem %s3255_s2, %s2702_s18  ;;  %s3162_s30 = scalar_lea.vmem %s3256_s3, %s2702_s18 }
  0x11   : > { %v2486_v1 = vld [vmem:[%s2708_s21 + $0x20] sm:$0xff]   ;;  %2461 = vmatprep.subr.msk.bf16.mxu0 %vm386_vm0, %v2485_v0  ;;  %v400_v2 = vsel %vm386_vm0, %v2485_v0, 0  ;;  %v2488_v5 = vld [vmem:[%s2708_s21 + $0x28] sm:$0xff]   ;;  %v2490_v7 = vld [vmem:[%s2708_s21 + $0x30] sm:$0xff]   ;;  %v403_v8 = vsel %vm386_vm0, %v2487_v3, 0  ;;  %v406_v12 = vsel %vm386_vm0, %v2489_v6, 0  ;;  %s3172_s7 = scalar_lea.vmem %s3257_s4, %s2702_s18 }
  0x12   : > { %2465 = vmatprep.subr.msk.bf16.mxu1 %vm386_vm0, %v2486_v1  ;;  %2334 = vmatpush3.bf16.xpose.msra.mxu0 %v400_v2  ;;  %v529_v4 = vsel %vm386_vm0, %v2486_v1, 0  ;;  %v2493_v9 = vld [vmem:[%s2724_s24] sm:$0xff]   ;;  %v532_v10 = vsel %vm386_vm0, %v2488_v5, 0  ;;  %v2491_v13 = vld [vmem:[%s2708_s21 + $0x18] sm:$0xff]   ;;  %v535_v14 = vsel %vm386_vm0, %v2490_v7, 0  ;;  %v2495_v20 = vld [vmem:[%s2724_s24 + $0x8] sm:$0xff]  }
  0x13   : > { %2350 = vmatpush3.bf16.xpose.msra.mxu1 %v529_v4  ;;  %2462 = vmatprep.subr.msk.bf16.mxu0 %vm386_vm0, %v2487_v3  ;;  %v2494_v11 = vld [vmem:[%s2724_s24 + $0x20] sm:$0xff]   ;;  %v2492_v15 = vld [vmem:[%s2708_s21 + $0x38] sm:$0xff]   ;;  %v409_v16 = vsel %vm386_vm0, %v2491_v13, 0  ;;  %v2496_v21 = vld [vmem:[%s2724_s24 + $0x28] sm:$0xff]  }
  0x14   : > { %2466 = vmatprep.subr.msk.bf16.mxu1 %vm386_vm0, %v2488_v5  ;;  %2341 = vmatprep.mubr.msk.bf16.mxu0 %vm386_vm0, %v2493_v9  ;;  %v2497_v17 = vld [vmem:[%s2708_s21 + $0x40] sm:$0xff]   ;;  %v538_v18 = vsel %vm386_vm0, %v2492_v15, 0  ;;  %v2499_v23 = vld [vmem:[%s2708_s21 + $0x48] sm:$0xff]   ;;  %v2501_v26 = vld [vmem:[%s2724_s24 + $0x10] sm:$0xff]  }
  0x15   : > { %2357 = vmatprep.mubr.msk.bf16.mxu1 %vm386_vm0, %v2494_v11  ;;  %v2498_v19 = vld [vmem:[%s2708_s21 + $0x60] sm:$0xff]   ;;  %v658_v22 = vsel %vm386_vm0, %v2497_v17, 0  ;;  %v2500_v25 = vld [vmem:[%s2708_s21 + $0x68] sm:$0xff]   ;;  %v2504_v27 = vld [vmem:[%s2724_s24 + $0x30] sm:$0xff]   ;;  %v661_v30 = vsel %vm386_vm0, %v2499_v23, 0 }
  0x16   : > { %v787_v24 = vsel %vm386_vm0, %v2498_v19, 0  ;;  %v2502_v28 = vld [vmem:[%s2724_s24 + $0x18] sm:$0xff]   ;;  %v2503_v31 = vld [vmem:[%s2708_s21 + $0x50] sm:$0xff]   ;;  %v790_v32 = vsel %vm386_vm0, %v2500_v25, 0  ;;  %v2509_v34 = vld [vmem:[%s2724_s24 + $0x40] sm:$0xff]  }
  0x17   : > { %v2505_v29 = vld [vmem:[%s2724_s24 + $0x38] sm:$0xff]   ;;  %v2506_v33 = vld [vmem:[%s2708_s21 + $0x70] sm:$0xff]   ;;  %v2511_v35 = vld [vmem:[%s2724_s24 + $0x60] sm:$0xff]   ;;  %v664_v36 = vsel %vm386_vm0, %v2503_v31, 0 }
  0x18   : > { %v2507_v37 = vld [vmem:[%s2708_s21 + $0x58] sm:$0xff]   ;;  %v793_v38 = vsel %vm386_vm0, %v2506_v33, 0  ;;  %v2510_v42 = vld [vmem:[%s2724_s24 + $0x48] sm:$0xff]   ;;  %v2513_v44 = vld [vmem:[%s2724_s24 + $0x50] sm:$0xff]  }
  0x19   : > { %v2508_v39 = vld [vmem:[%s2708_s21 + $0x78] sm:$0xff]   ;;  %v667_v40 = vsel %vm386_vm0, %v2507_v37, 0  ;;  %v2512_v43 = vld [vmem:[%s2724_s24 + $0x68] sm:$0xff]   ;;  %v2515_v45 = vld [vmem:[%s2724_s24 + $0x70] sm:$0xff]  }
  0x1a   : > { %2336 = vmatpush3.bf16.xpose.msra.mxu0 %v403_v8  ;;  %v796_v41 = vsel %vm386_vm0, %v2508_v39, 0  ;;  %v2514_v46 = vld [vmem:[%s2724_s24 + $0x58] sm:$0xff]  }
  0x1b   : > { %2352 = vmatpush3.bf16.xpose.msra.mxu1 %v532_v10  ;;  %2463 = vmatprep.subr.msk.bf16.mxu0 %vm386_vm0, %v2489_v6  ;;  %v2516_v47 = vld [vmem:[%s2724_s24 + $0x78] sm:$0xff]  }
  0x1c   : > { %2467 = vmatprep.subr.msk.bf16.mxu1 %vm386_vm0, %v2490_v7 }
  0x22   : > { %2338 = vmatpush3.bf16.xpose.msra.mxu0 %v406_v12 }
  0x23   : > { %2354 = vmatpush3.bf16.xpose.msra.mxu1 %v535_v14  ;;  %2464 = vmatprep.subr.msk.bf16.mxu0 %vm386_vm0, %v2491_v13 }
  0x24   : > { %2468 = vmatprep.subr.msk.bf16.mxu1 %vm386_vm0, %v2492_v15 }
  0x2a   : > { %2340 = vmatpush3.bf16.xpose.msra.mxu0 %v409_v16 }
  0x2b   : > { %2356 = vmatpush3.bf16.xpose.msra.mxu1 %v538_v18  ;;  %2469 = vmatprep.subr.msk.bf16.mxu0 %vm386_vm0, %v2497_v17 }
  0x2c   : > { %2473 = vmatprep.subr.msk.bf16.mxu1 %vm386_vm0, %v2498_v19 }
  0x31   : > { %2342 = vmatmul.mubr.msk.bf16.vlgmr.msra.gmra.mrb[0].mxu0 %vm386_vm0, %v2495_v20 }
  0x32   : > { %2358 = vmatmul.mubr.msk.bf16.vlgmr.msra.gmra.mrb[0].mxu1 %vm386_vm0, %v2496_v21  ;;  %2366 = vmatpush3.bf16.xpose.msra.mxu0 %v658_v22 }
  0x33   : > { %2382 = vmatpush3.bf16.xpose.msra.mxu1 %v787_v24  ;;  %2470 = vmatprep.subr.msk.bf16.mxu0 %vm386_vm0, %v2499_v23 }
  0x34   : > { %2474 = vmatprep.subr.msk.bf16.mxu1 %vm386_vm0, %v2500_v25  ;;  %2345 = vmatprep.mubr.msk.bf16.mxu0 %vm386_vm0, %v2501_v26 }
  0x35   : > { %2361 = vmatprep.mubr.msk.bf16.mxu1 %vm386_vm0, %v2504_v27 }
  0x39   : > { %2346 = vmatmul.mubr.msk.bf16.gmra.mrb[4].mxu0 %vm386_vm0, %v2502_v28 }
  0x3a   : > { %2368 = vmatpush3.bf16.xpose.msra.mxu0 %v661_v30  ;;  %2362 = vmatmul.mubr.msk.bf16.gmra.mrb[4].mxu1 %vm386_vm0, %v2505_v29 }
  0x3b   : > { %2384 = vmatpush3.bf16.xpose.msra.mxu1 %v790_v32  ;;  %2471 = vmatprep.subr.msk.bf16.mxu0 %vm386_vm0, %v2503_v31 }
  0x3c   : > { %2475 = vmatprep.subr.msk.bf16.mxu1 %vm386_vm0, %v2506_v33  ;;  %2373 = vmatprep.mubr.msk.bf16.mxu0 %vm386_vm0, %v2509_v34 }
  0x3d   : > { %2389 = vmatprep.mubr.msk.bf16.mxu1 %vm386_vm0, %v2511_v35 }
  0x42   : > { %2370 = vmatpush3.bf16.xpose.msra.mxu0 %v664_v36 }
  0x43   : > { %2386 = vmatpush3.bf16.xpose.msra.mxu1 %v793_v38  ;;  %2472 = vmatprep.subr.msk.bf16.mxu0 %vm386_vm0, %v2507_v37 }
  0x44   : > { %2476 = vmatprep.subr.msk.bf16.mxu1 %vm386_vm0, %v2508_v39 }
  0x4a   : > { %2372 = vmatpush3.bf16.xpose.msra.mxu0 %v667_v40 }
  0x4b   : > { %2388 = vmatpush3.bf16.xpose.msra.mxu1 %v796_v41 }
  0x51   : > { %2374 = vmatmul.mubr.msk.bf16.vlgmr.msra.gmra.mrb[8].mxu0 %vm386_vm0, %v2510_v42 }
  0x52   : > { %2390 = vmatmul.mubr.msk.bf16.vlgmr.msra.gmra.mrb[8].mxu1 %vm386_vm0, %v2512_v43  ;;  %2377 = vmatprep.mubr.msk.bf16.mxu0 %vm386_vm0, %v2513_v44 }
  0x53   : > { %2393 = vmatprep.mubr.msk.bf16.mxu1 %vm386_vm0, %v2515_v45 }
  0x59   : > { %2378 = vmatmul.mubr.msk.bf16.gmra.mrb[12].mxu0 %vm386_vm0, %v2514_v46 }
  0x5a   : > { %2394 = vmatmul.mubr.msk.bf16.gmra.mrb[12].mxu1 %vm386_vm0, %v2516_v47 }
 0x104   : > { %v2796_v48 = vpop.f32.mrb[0].mxu0 }
 0x105   : > { %v2798_v49 = vpop.f32.mrb[0].mxu1  ;;  %v2800_v50 = vpop.f32.mrb[1].mxu0  ;;  %v870_v51 = vsel %vm863_vm1, %v2796_v48, -inf }
 0x106   : > { %v2804_v52 = vpop.f32.mrb[1].mxu1  ;;  %v894_v53 = vsel %vm863_vm1, %v2798_v49, -inf  ;;  %871 = vmax.xlane.f32.xlu1 %v870_v51  ;;  %v2808_v54 = vpop.f32.mrb[2].mxu0  ;;  %v864_v59 = vsel %vm863_vm1, %v2800_v50, -inf }
 0x107   : > { %895 = vmax.xlane.f32.xlu0 %v894_v53  ;;  %v2810_v55 = vpop.f32.mrb[2].mxu1  ;;  %v2812_v56 = vpop.f32.mrb[3].mxu0  ;;  %v873_v58 = vsel %vm863_vm1, %v2808_v54, -inf  ;;  %v888_v0 = vsel %vm863_vm1, %v2804_v52, -inf }
 0x108   : > { %v2814_v57 = vpop.f32.mrb[3].mxu1  ;;  %v897_v61 = vsel %vm863_vm1, %v2810_v55, -inf  ;;  %v867_v7 = vsel %vm863_vm1, %v2812_v56, -inf }
 0x109   : > { %v891_v6 = vsel %vm863_vm1, %v2814_v57, -inf }
 0x10a   : > { %874 = vmax.xlane.f32.xlu1 %v873_v58 }
 0x10b   : > { %865 = vmax.xlane.f32.xlu0 %v864_v59 }
 0x10c   : > { %v2820_v60 = vpop.f32.mrb[4].mxu0 }
 0x10d   : > { %v2824_v62 = vpop.f32.mrb[5].mxu0  ;;  %v2826_v63 = vpop.f32.mrb[4].mxu1  ;;  %v882_v9 = vsel %vm863_vm1, %v2820_v60, -inf }
 0x10e   : > { %898 = vmax.xlane.f32.xlu1 %v897_v61  ;;  %v2830_v1 = vpop.f32.mrb[6].mxu0  ;;  %v2832_v2 = vpop.f32.mrb[5].mxu1  ;;  %v906_v11 = vsel %vm863_vm1, %v2826_v63, -inf  ;;  %v876_v13 = vsel %vm863_vm1, %v2824_v62, -inf }
 0x10f   : > { %889 = vmax.xlane.f32.xlu0 %v888_v0  ;;  %v2834_v3 = vpop.f32.mrb[7].mxu0  ;;  %v2836_v4 = vpop.f32.mrb[6].mxu1  ;;  %v885_v8 = vsel %vm863_vm1, %v2830_v1, -inf  ;;  %v900_v15 = vsel %vm863_vm1, %v2832_v2, -inf }
 0x110   : > { %v2838_v5 = vpop.f32.mrb[7].mxu1  ;;  %v909_v10 = vsel %vm863_vm1, %v2836_v4, -inf  ;;  %v879_v12 = vsel %vm863_vm1, %v2834_v3, -inf }
 0x111   : > { %v903_v14 = vsel %vm863_vm1, %v2838_v5, -inf }
 0x112   : > { %892 = vmax.xlane.f32.xlu1 %v891_v6 }
 0x113   : > { %868 = vmax.xlane.f32.xlu0 %v867_v7 }
 0x116   : > { %886 = vmax.xlane.f32.xlu1 %v885_v8 }
 0x117   : > { %883 = vmax.xlane.f32.xlu0 %v882_v9 }
 0x11a   : > { %910 = vmax.xlane.f32.xlu1 %v909_v10 }
 0x11b   : > { %907 = vmax.xlane.f32.xlu0 %v906_v11 }
 0x11e   : > { %880 = vmax.xlane.f32.xlu1 %v879_v12 }
 0x11f   : > { %877 = vmax.xlane.f32.xlu0 %v876_v13 }
 0x122   : > { %904 = vmax.xlane.f32.xlu1 %v903_v14 }
 0x123   : > { %901 = vmax.xlane.f32.xlu0 %v900_v15 }
 0x124   : > { %v2860_v16 = vpop.f32.mrb[8].mxu0 }
 0x125   : > { %v2862_v17 = vpop.f32.mrb[9].mxu0  ;;  %v918_v18 = vsel %vm863_vm1, %v2860_v16, -inf  ;;  %v2866_v19 = vpop.f32.mrb[8].mxu1 }
 0x126   : > { %v2868_v20 = vpop.f32.mrb[10].mxu0  ;;  %v2870_v21 = vpop.f32.mrb[9].mxu1  ;;  %v942_v26 = vsel %vm863_vm1, %v2866_v19, -inf  ;;  %v912_v31 = vsel %vm863_vm1, %v2862_v17, -inf }
 0x127   : > { %919 = vmax.xlane.f32.xlu0 %v918_v18  ;;  %v2872_v22 = vpop.f32.mrb[11].mxu0  ;;  %v921_v23 = vsel %vm863_vm1, %v2868_v20, -inf  ;;  %v2876_v24 = vpop.f32.mrb[10].mxu1  ;;  %v936_v38 = vsel %vm863_vm1, %v2870_v21, -inf }
 0x128   : > { %922 = vmax.xlane.f32.xlu1 %v921_v23  ;;  %v2878_v25 = vpop.f32.mrb[11].mxu1  ;;  %v945_v27 = vsel %vm863_vm1, %v2876_v24, -inf  ;;  %v915_v34 = vsel %vm863_vm1, %v2872_v22, -inf }
 0x129   : > { %v939_v39 = vsel %vm863_vm1, %v2878_v25, -inf }
 0x12b   : > { %943 = vmax.xlane.f32.xlu0 %v942_v26 }
 0x12c   : > { %946 = vmax.xlane.f32.xlu1 %v945_v27  ;;  %v2884_v28 = vpop.f32.mrb[12].mxu0 }
 0x12d   : > { %v2886_v29 = vpop.f32.mrb[13].mxu0  ;;  %v2888_v30 = vpop.f32.mrb[12].mxu1  ;;  %v930_v40 = vsel %vm863_vm1, %v2884_v28, -inf }
 0x12e   : > { %v2892_v32 = vpop.f32.mrb[14].mxu0  ;;  %v2894_v33 = vpop.f32.mrb[13].mxu1  ;;  %v924_v42 = vsel %vm863_vm1, %v2886_v29, -inf  ;;  %v954_v46 = vsel %vm863_vm1, %v2888_v30, -inf }
 0x12f   : > { %913 = vmax.xlane.f32.xlu0 %v912_v31  ;;  %v2898_v35 = vpop.f32.mrb[15].mxu0  ;;  %v2900_v36 = vpop.f32.mrb[14].mxu1  ;;  %v933_v41 = vsel %vm863_vm1, %v2892_v32, -inf  ;;  %v948_v44 = vsel %vm863_vm1, %v2894_v33, -inf }
 0x130   : > { %916 = vmax.xlane.f32.xlu1 %v915_v34  ;;  %v2902_v37 = vpop.f32.mrb[15].mxu1  ;;  %v927_v43 = vsel %vm863_vm1, %v2898_v35, -inf  ;;  %v957_v47 = vsel %vm863_vm1, %v2900_v36, -inf }
 0x131   : > { %v951_v45 = vsel %vm863_vm1, %v2902_v37, -inf }
 0x133   : > { %937 = vmax.xlane.f32.xlu0 %v936_v38 }
 0x134   : > { %940 = vmax.xlane.f32.xlu1 %v939_v39 }
 0x137   : > { %931 = vmax.xlane.f32.xlu0 %v930_v40 }
 0x138   : > { %934 = vmax.xlane.f32.xlu1 %v933_v41 }
 0x13b   : > { %925 = vmax.xlane.f32.xlu0 %v924_v42 }
 0x13c   : > { %928 = vmax.xlane.f32.xlu1 %v927_v43 }
 0x13f   : > { %949 = vmax.xlane.f32.xlu0 %v948_v44 }
 0x140   : > { %952 = vmax.xlane.f32.xlu1 %v951_v45 }
 0x143   : > { %955 = vmax.xlane.f32.xlu0 %v954_v46 }
 0x144   : > { %958 = vmax.xlane.f32.xlu1 %v957_v47 }
 0x193   : > { %v872_v51 = vpop.xlane.xlu1 %871 }
 0x194   : > { %v896_v53 = vpop.xlane.xlu0 %895  ;;  %v962_v58 = vsub.f32 %v2796_v48, %v872_v51 }
 0x195   : > { %v970_v59 = vsub.f32 %v2798_v49, %v896_v53 }
 0x196   : > { %v996_v61 = vmul.f32 1.442695, %v962_v58 }
 0x197   : > { %v1012_v0 = vmul.f32 1.442695, %v970_v59  ;;  %v875_v6 = vpop.xlane.xlu1 %874 }
 0x198   : > { %2533 = vpow2.f32 %v996_v61  ;;  %v866_v7 = vpop.xlane.xlu0 %865  ;;  %v963_v8 = vsub.f32 %v2808_v54, %v875_v6 }
 0x199   : > { %v960_v9 = vsub.f32 %v2800_v50, %v866_v7  ;;  %2535 = vpow2.f32 %v1012_v0 }
 0x19a   : > { %v998_v10 = vmul.f32 1.442695, %v963_v8 }
 0x19b   : > { %v992_v11 = vmul.f32 1.442695, %v960_v9  ;;  %v899_v12 = vpop.xlane.xlu1 %898 }
 0x19c   : > { %2537 = vpow2.f32 %v998_v10  ;;  %v890_v13 = vpop.xlane.xlu0 %889  ;;  %v971_v14 = vsub.f32 %v2810_v55, %v899_v12 }
 0x19d   : > { %v968_v48 = vsub.f32 %v2804_v52, %v890_v13  ;;  %2539 = vpow2.f32 %v992_v11 }
 0x19e   : > { %v1014_v49 = vmul.f32 1.442695, %v971_v14 }
 0x19f   : > { %v1008_v15 = vmul.f32 1.442695, %v968_v48  ;;  %v893_v18 = vpop.xlane.xlu1 %892 }
 0x1a0   : > { %2541 = vpow2.f32 %v1014_v49  ;;  %v969_v23 = vsub.f32 %v2814_v57, %v893_v18  ;;  %v869_v54 = vpop.xlane.xlu0 %868 }
 0x1a1   : > { %v961_v50 = vsub.f32 %v2812_v56, %v869_v54  ;;  %2543 = vpow2.f32 %v1008_v15 }
 0x1a2   : > { %v2932_v26 = vpop.eup %2533  ;;  %v1010_v27 = vmul.f32 1.442695, %v969_v23 }
 0x1a3   : > { %v994_v31 = vmul.f32 1.442695, %v961_v50  ;;  %v887_v34 = vpop.xlane.xlu1 %886  ;;  %v1062_v55 = vsel %vm863_vm1, %v2932_v26, 0.0  ;;  %v2936_v52 = vpop.eup %2535 }
 0x1a4   : > { %v884_v38 = vpop.xlane.xlu0 %883  ;;  %v967_v39 = vsub.f32 %v2830_v1, %v887_v34  ;;  %1063 = vadd.xlane.f32.xlu0 %v1062_v55  ;;  %v1086_v43 = vsel %vm863_vm1, %v2936_v52, 0.0 }
 0x1a5   : > { %2545 = vpow2.f32 %v994_v31  ;;  %v966_v57 = vsub.f32 %v2820_v60, %v884_v38 }
 0x1a6   : > { %v2940_v40 = vpop.eup %2537  ;;  %v1006_v56 = vmul.f32 1.442695, %v967_v39  ;;  %2547 = vpow2.f32 %v1010_v27 }
 0x1a7   : > { %v1004_v41 = vmul.f32 1.442695, %v966_v57  ;;  %v911_v42 = vpop.xlane.xlu1 %910  ;;  %v1065_v44 = vsel %vm863_vm1, %v2940_v40, 0.0  ;;  %v2946_v45 = vpop.eup %2539 }
 0x1a8   : > { %v908_v46 = vpop.xlane.xlu0 %907  ;;  %v975_v1 = vsub.f32 %v2836_v4, %v911_v42  ;;  %1087 = vadd.xlane.f32.xlu0 %v1086_v43  ;;  %1066 = vadd.xlane.f32.xlu1 %v1065_v44  ;;  %v1056_v59 = vsel %vm863_vm1, %v2946_v45, 0.0 }
 0x1a9   : > { %2549 = vpow2.f32 %v1004_v41  ;;  %v974_v60 = vsub.f32 %v2826_v63, %v908_v46 }
 0x1aa   : > { %v2950_v47 = vpop.eup %2541  ;;  %2551 = vpow2.f32 %v1006_v56  ;;  %v1022_v53 = vmul.f32 1.442695, %v975_v1 }
 0x1ab   : > { %v1020_v51 = vmul.f32 1.442695, %v974_v60  ;;  %v881_v58 = vpop.xlane.xlu1 %880  ;;  %v1089_v61 = vsel %vm863_vm1, %v2950_v47, 0.0  ;;  %v2956_v0 = vpop.eup %2543 }
 0x1ac   : > { %v878_v4 = vpop.xlane.xlu0 %877  ;;  %v965_v6 = vsub.f32 %v2834_v3, %v881_v58  ;;  %1057 = vadd.xlane.f32.xlu0 %v1056_v59  ;;  %1090 = vadd.xlane.f32.xlu1 %v1089_v61  ;;  %v1080_v11 = vsel %vm863_vm1, %v2956_v0, 0.0 }
 0x1ad   : > { %2553 = vpow2.f32 %v1020_v51  ;;  %v964_v63 = vsub.f32 %v2824_v62, %v878_v4 }
 0x1ae   : > { %2555 = vpow2.f32 %v1022_v53  ;;  %v1002_v9 = vmul.f32 1.442695, %v965_v6  ;;  %v2517_v53 = vld [vmem:[%s3000_s27] sm:$0xff]  }
 0x1af   : > { %v2960_v7 = vpop.eup %2545  ;;  %v1000_v8 = vmul.f32 1.442695, %v964_v63  ;;  %v905_v10 = vpop.xlane.xlu1 %904  ;;  %2397 = vmatprep.subr.bf16.mxu0 %v2517_v53 }
 0x1b0   : > { %v902_v12 = vpop.xlane.xlu0 %901  ;;  %v973_v13 = vsub.f32 %v2838_v5, %v905_v10  ;;  %1081 = vadd.xlane.f32.xlu0 %v1080_v11  ;;  %v1059_v3 = vsel %vm863_vm1, %v2960_v7, 0.0  ;;  %v2967_v14 = vpop.eup %2547  ;;  %2398 = vmatpush3.bf16.msra.mxu0 %v2517_v53  ;;  %v2518_v11 = vld [vmem:[%s3000_s27 + $0x8] sm:$0xff]  }
 0x1b1   : > { %2557 = vpow2.f32 %v1000_v8  ;;  %v972_v62 = vsub.f32 %v2832_v2, %v902_v12  ;;  %1060 = vadd.xlane.f32.xlu1 %v1059_v3  ;;  %v1083_v54 = vsel %vm863_vm1, %v2967_v14, 0.0  ;;  %v2519_v12 = vld [vmem:[%s3000_s27 + $0x20] sm:$0xff]   ;;  %2399 = vmatprep.subr.bf16.mxu0 %v2518_v11 }
 0x1b2   : > { %2559 = vpow2.f32 %v1002_v9  ;;  %v1018_v15 = vmul.f32 1.442695, %v973_v13  ;;  %2413 = vmatprep.subr.bf16.mxu1 %v2519_v12 }
 0x1b3   : > { %v2970_v48 = vpop.eup %2549  ;;  %v1016_v49 = vmul.f32 1.442695, %v972_v62  ;;  %2414 = vmatpush3.bf16.msra.mxu1 %v2519_v12 }
 0x1b4   : > { %v2972_v18 = vpop.eup %2551  ;;  %v920_v23 = vpop.xlane.xlu0 %919  ;;  %v1074_v5 = vsel %vm863_vm1, %v2970_v48, 0.0  ;;  %2400 = vmatpush3.bf16.msra.mxu0 %v2518_v11 }
 0x1b5   : > { %2561 = vpow2.f32 %v1016_v49  ;;  %v978_v50 = vsub.f32 %v2860_v16, %v920_v23  ;;  %1075 = vadd.xlane.f32.xlu0 %v1074_v5  ;;  %1084 = vadd.xlane.f32.xlu1 %v1083_v54  ;;  %v923_v2 = vpop.xlane.xlu1 %922  ;;  %v1077_v57 = vsel %vm863_vm1, %v2972_v18, 0.0 }
 0x1b6   : > { %v979_v27 = vsub.f32 %v2868_v20, %v923_v2  ;;  %2563 = vpow2.f32 %v1018_v15  ;;  %v2521_v2 = vld [vmem:[%s3000_s27 + $0x28] sm:$0xff]  }
 0x1b7   : > { %v2980_v31 = vpop.eup %2553  ;;  %v1028_v34 = vmul.f32 1.442695, %v978_v50  ;;  %v2520_v50 = vld [vmem:[%s3000_s27 + $0x10] sm:$0xff]   ;;  %2415 = vmatprep.subr.bf16.mxu1 %v2521_v2 }
 0x1b8   : > { %v1030_v55 = vmul.f32 1.442695, %v979_v27  ;;  %v944_v38 = vpop.xlane.xlu0 %943  ;;  %v1098_v39 = vsel %vm863_vm1, %v2980_v31, 0.0  ;;  %v2986_v56 = vpop.eup %2555  ;;  %2401 = vmatprep.subr.bf16.mxu0 %v2520_v50  ;;  %2416 = vmatpush3.bf16.msra.mxu1 %v2521_v2 }
 0x1b9   : > { %2565 = vpow2.f32 %v1028_v34  ;;  %v986_v16 = vsub.f32 %v2866_v19, %v944_v38  ;;  %1099 = vadd.xlane.f32.xlu0 %v1098_v39  ;;  %1078 = vadd.xlane.f32.xlu1 %v1077_v57  ;;  %v947_v20 = vpop.xlane.xlu1 %946  ;;  %v1101_v60 = vsel %vm863_vm1, %v2986_v56, 0.0 }
 0x1ba   : > { %v987_v41 = vsub.f32 %v2876_v24, %v947_v20  ;;  %2567 = vpow2.f32 %v1030_v55  ;;  %2402 = vmatpush3.bf16.msra.mxu0 %v2520_v50 }
 0x1bb   : > { %v2990_v42 = vpop.eup %2557  ;;  %v1044_v43 = vmul.f32 1.442695, %v986_v16 }
 0x1bc   : > { %v1046_v44 = vmul.f32 1.442695, %v987_v41  ;;  %v914_v46 = vpop.xlane.xlu0 %913  ;;  %v1068_v1 = vsel %vm863_vm1, %v2990_v42, 0.0  ;;  %v3002_v19 = vpop.eup %2559  ;;  %v2522_v41 = vld [vmem:[%s3000_s27 + $0x18] sm:$0xff]  }
 0x1bd   : > { %2569 = vpow2.f32 %v1044_v43  ;;  %v976_v24 = vsub.f32 %v2862_v17, %v914_v46  ;;  %1069 = vadd.xlane.f32.xlu0 %v1068_v1  ;;  %1102 = vadd.xlane.f32.xlu1 %v1101_v60  ;;  %v917_v51 = vpop.xlane.xlu1 %916  ;;  %v1071_v17 = vsel %vm863_vm1, %v3002_v19, 0.0  ;;  %v2523_v43 = vld [vmem:[%s3000_s27 + $0x30] sm:$0xff]  }
 0x1be   : > { %v977_v58 = vsub.f32 %v2872_v22, %v917_v51  ;;  %2571 = vpow2.f32 %v1046_v44  ;;  %2403 = vmatprep.subr.bf16.mxu0 %v2522_v41  ;;  %2417 = vmatprep.subr.bf16.mxu1 %v2523_v43 }
 0x1bf   : > { %v3007_v59 = vpop.eup %2561  ;;  %v1024_v61 = vmul.f32 1.442695, %v976_v24  ;;  %2404 = vmatpush3.bf16.msra.mxu0 %v2522_v41  ;;  %2418 = vmatpush3.bf16.msra.mxu1 %v2523_v43 }
 0x1c0   : > { %v1026_v4 = vmul.f32 1.442695, %v977_v58  ;;  %v938_v6 = vpop.xlane.xlu0 %937  ;;  %v1092_v63 = vsel %vm863_vm1, %v3007_v59, 0.0  ;;  %v3013_v8 = vpop.eup %2563 }
 0x1c1   : > { %2573 = vpow2.f32 %v1024_v61  ;;  %v984_v22 = vsub.f32 %v2870_v21, %v938_v6  ;;  %1093 = vadd.xlane.f32.xlu0 %v1092_v63  ;;  %1072 = vadd.xlane.f32.xlu1 %v1071_v17  ;;  %v941_v9 = vpop.xlane.xlu1 %940  ;;  %v1095_v21 = vsel %vm863_vm1, %v3013_v8, 0.0  ;;  %v2524_v61 = vld [vmem:[%s3000_s27 + $0x38] sm:$0xff]  }
 0x1c2   : > { %v985_v10 = vsub.f32 %v2878_v25, %v941_v9  ;;  %2575 = vpow2.f32 %v1026_v4  ;;  %2419 = vmatprep.subr.bf16.mxu1 %v2524_v61 }
 0x1c3   : > { %v3019_v13 = vpop.eup %2565  ;;  %v1040_v3 = vmul.f32 1.442695, %v984_v22  ;;  %2420 = vmatpush3.bf16.msra.mxu1 %v2524_v61 }
 0x1c4   : > { %v1042_v62 = vmul.f32 1.442695, %v985_v10  ;;  %v932_v49 = vpop.xlane.xlu0 %931  ;;  %v1110_v15 = vsel %vm863_vm1, %v3019_v13, 0.0  ;;  %v3025_v23 = vpop.eup %2567 }
 0x1c5   : > { %2577 = vpow2.f32 %v1040_v3  ;;  %v982_v25 = vsub.f32 %v2884_v28, %v932_v49  ;;  %1111 = vadd.xlane.f32.xlu0 %v1110_v15  ;;  %1096 = vadd.xlane.f32.xlu1 %v1095_v21  ;;  %v935_v5 = vpop.xlane.xlu1 %934  ;;  %v1113_v39 = vsel %vm863_vm1, %v3025_v23, 0.0 }
 0x1c6   : > { %v983_v54 = vsub.f32 %v2892_v32, %v935_v5  ;;  %2579 = vpow2.f32 %v1042_v62 }
 0x1c7   : > { %v3031_v27 = vpop.eup %2569  ;;  %v1036_v34 = vmul.f32 1.442695, %v982_v25 }
 0x1c8   : > { %v1038_v55 = vmul.f32 1.442695, %v983_v54  ;;  %v926_v38 = vpop.xlane.xlu0 %925  ;;  %v1134_v28 = vsel %vm863_vm1, %v3031_v27, 0.0  ;;  %v3037_v32 = vpop.eup %2571 }
 0x1c9   : > { %2581 = vpow2.f32 %v1036_v34  ;;  %v980_v57 = vsub.f32 %v2886_v29, %v926_v38  ;;  %1135 = vadd.xlane.f32.xlu0 %v1134_v28  ;;  %1114 = vadd.xlane.f32.xlu1 %v1113_v39  ;;  %v929_v16 = vpop.xlane.xlu1 %928  ;;  %v1137_v29 = vsel %vm863_vm1, %v3037_v32, 0.0 }
 0x1ca   : > { %v981_v20 = vsub.f32 %v2898_v35, %v929_v16  ;;  %2583 = vpow2.f32 %v1038_v55  ;;  %v2525_v55 = vld [vmem:[%s3000_s27 + $0x40] sm:$0xff]  }
 0x1cb   : > { %v3043_v44 = vpop.eup %2573  ;;  %v1032_v46 = vmul.f32 1.442695, %v980_v57  ;;  %2429 = vmatprep.subr.bf16.mxu0 %v2525_v55  ;;  %v3098_v16 = vld [vmem:[%s3000_s27 + $0x60] sm:$0xff]  }
 0x1cc   : > { %v1034_v1 = vmul.f32 1.442695, %v981_v20  ;;  %v950_v60 = vpop.xlane.xlu0 %949  ;;  %v1104_v24 = vsel %vm863_vm1, %v3043_v44, 0.0  ;;  %v3049_v35 = vpop.eup %2575  ;;  %2445 = vmatprep.subr.bf16.mxu1 %v3098_v16 }
 0x1cd   : > { %2585 = vpow2.f32 %v1032_v46  ;;  %v988_v51 = vsub.f32 %v2894_v33, %v950_v60  ;;  %1105 = vadd.xlane.f32.xlu0 %v1104_v24  ;;  %1138 = vadd.xlane.f32.xlu1 %v1137_v29  ;;  %v953_v53 = vpop.xlane.xlu1 %952  ;;  %v1107_v33 = vsel %vm863_vm1, %v3049_v35, 0.0 }
 0x1ce   : > { %v989_v58 = vsub.f32 %v2902_v37, %v953_v53  ;;  %2587 = vpow2.f32 %v1034_v1 }
 0x1cf   : > { %v3054_v4 = vpop.eup %2577  ;;  %v1048_v6 = vmul.f32 1.442695, %v988_v51 }
 0x1d0   : > { %v1050_v63 = vmul.f32 1.442695, %v989_v58  ;;  %v956_v17 = vpop.xlane.xlu0 %955  ;;  %v1128_v22 = vsel %vm863_vm1, %v3054_v4, 0.0  ;;  %v3060_v9 = vpop.eup %2579 }
 0x1d1   : > { %2589 = vpow2.f32 %v1048_v6  ;;  %v990_v37 = vsub.f32 %v2888_v30, %v956_v17  ;;  %1129 = vadd.xlane.f32.xlu0 %v1128_v22  ;;  %1108 = vadd.xlane.f32.xlu1 %v1107_v33  ;;  %v959_v10 = vpop.xlane.xlu1 %958  ;;  %v1131_v15 = vsel %vm863_vm1, %v3060_v9, 0.0 }
 0x1d2   : > { %v991_v11 = vsub.f32 %v2900_v36, %v959_v10  ;;  %2591 = vpow2.f32 %v1050_v63 }
 0x1d3   : > { %v3064_v12 = vpop.eup %2581  ;;  %v1052_v3 = vmul.f32 1.442695, %v990_v37 }
 0x1d4   : > { %v1054_v62 = vmul.f32 1.442695, %v991_v11  ;;  %v1122_v49 = vsel %vm863_vm1, %v3064_v12, 0.0  ;;  %v3070_v21 = vpop.eup %2583 }
 0x1d5   : > { %2593 = vpow2.f32 %v1052_v3  ;;  %1123 = vadd.xlane.f32.xlu0 %v1122_v49  ;;  %1132 = vadd.xlane.f32.xlu1 %v1131_v15  ;;  %v1125_v25 = vsel %vm863_vm1, %v3070_v21, 0.0 }
 0x1d6   : > { %2595 = vpow2.f32 %v1054_v62 }
 0x1d7   : > { %v3072_v30 = vpop.eup %2585 }
 0x1d8   : > { %v1116_v36 = vsel %vm863_vm1, %v3072_v30, 0.0  ;;  %v3078_v5 = vpop.eup %2587 }
 0x1d9   : > { %1117 = vadd.xlane.f32.xlu0 %v1116_v36  ;;  %1126 = vadd.xlane.f32.xlu1 %v1125_v25  ;;  %v1119_v2 = vsel %vm863_vm1, %v3078_v5, 0.0 }
 0x1db   : > { %v3080_v54 = vpop.eup %2589 }
 0x1dc   : > { %v1140_v50 = vsel %vm863_vm1, %v3080_v54, 0.0  ;;  %v3086_v34 = vpop.eup %2591 }
 0x1dd   : > { %1141 = vadd.xlane.f32.xlu0 %v1140_v50  ;;  %1120 = vadd.xlane.f32.xlu1 %v1119_v2  ;;  %v1143_v39 = vsel %vm863_vm1, %v3086_v34, 0.0  ;;  %v2526_v2 = vld [vmem:[%s3000_s27 + $0x48] sm:$0xff]  }
 0x1df   : > { %v3089_v38 = vpop.eup %2593 }
 0x1e0   : > { %v1146_v28 = vsel %vm863_vm1, %v3089_v38, 0.0  ;;  %v3095_v57 = vpop.eup %2595 }
 0x1e1   : > { %1147 = vadd.xlane.f32.xlu0 %v1146_v28  ;;  %1144 = vadd.xlane.f32.xlu1 %v1143_v39  ;;  %v1149_v20 = vsel %vm863_vm1, %v3095_v57, 0.0 }
 0x1e5   : > { %1150 = vadd.xlane.f32.xlu1 %v1149_v20 }
 0x231   : > { %v1064_v41 = vpop.xlane.xlu0 %1063 }
 0x235   : > { %v1088_v43 = vpop.xlane.xlu0 %1087  ;;  %v1067_v46 = vpop.xlane.xlu1 %1066 }
 0x236   : > { %2597 = vrcp.f32 %v1067_v46 }
 0x239   : > { %v1058_v1 = vpop.xlane.xlu0 %1057  ;;  %v1091_v60 = vpop.xlane.xlu1 %1090 }
 0x23a   : > { %2599 = vrcp.f32 %v1058_v1 }
 0x23b   : > { %2601 = vrcp.f32 %v1064_v41  ;;  %v2528_v41 = vld [vmem:[%s3000_s27 + $0x50] sm:$0xff]  }
 0x23d   : > { %v1082_v24 = vpop.xlane.xlu0 %1081 }
 0x23e   : > { %v1061_v29 = vpop.xlane.xlu1 %1060 }
 0x23f   : > { %2603 = vrcp.f32 %v1061_v29 }
 0x240   : > { %2605 = vrcp.f32 %v1091_v60  ;;  %v2598_v58 = vpop.eup %2597  ;;  %v2529_v60 = vld [vmem:[%s3000_s27 + $0x68] sm:$0xff]  }
 0x241   : > { %2607 = vrcp.f32 %v1082_v24  ;;  %v1187_v33 = vmul.f32 %v2598_v58, %v2940_v40 }
 0x242   : > { %v1076_v51 = vpop.xlane.xlu0 %1075  ;;  %v1085_v53 = vpop.xlane.xlu1 %1084  ;;  %2609 = vrcp.f32 %v1088_v43 }
 0x243   : > { %2611 = vrcp.f32 %v1085_v53 }
 0x244   : > { %v2600_v63 = vpop.eup %2599 }
 0x245   : > { %v2602_v17 = vpop.eup %2601  ;;  %v1184_v11 = vmul.f32 %v2600_v63, %v2946_v45 }
 0x246   : > { %v1100_v61 = vpop.xlane.xlu0 %1099  ;;  %v1079_v6 = vpop.xlane.xlu1 %1078  ;;  %v1186_v49 = vmul.f32 %v2602_v17, %v2932_v26 }
 0x247   : > { %2613 = vrcp.f32 %v1079_v6 }
 0x248   : > { %v1217_v50 = vpack.c.bf16 %v1187_v33, %v1186_v49 }
 0x249   : > { %v2604_v22 = vpop.eup %2603 }
 0x24a   : > { %v1070_v37 = vpop.xlane.xlu0 %1069  ;;  %v1103_v10 = vpop.xlane.xlu1 %1102  ;;  %v1185_v3 = vmul.f32 %v2604_v22, %v2960_v7 }
 0x24b   : > { %v2606_v62 = vpop.eup %2605  ;;  %2615 = vrcp.f32 %v1070_v37 }
 0x24c   : > { %v2608_v15 = vpop.eup %2607  ;;  %v1216_v36 = vpack.c.bf16 %v1185_v3, %v1184_v11  ;;  %v1195_v39 = vmul.f32 %v2606_v62, %v2950_v47  ;;  %2617 = vrcp.f32 %v1076_v51 }
 0x24d   : > { %v2610_v25 = vpop.eup %2609  ;;  %v1192_v26 = vmul.f32 %v2608_v15, %v2956_v0 }
 0x24e   : > { %v2612_v28 = vpop.eup %2611  ;;  %v1094_v40 = vpop.xlane.xlu0 %1093  ;;  %2405 = vmatprep.mubr.msk.bf16.mxu0 %vm863_vm1, %v1216_v36  ;;  %v1194_v20 = vmul.f32 %v2610_v25, %v2936_v52  ;;  %v2530_v52 = vld [vmem:[%s3000_s27 + $0x58] sm:$0xff]  }
 0x24f   : > { %v1073_v45 = vpop.xlane.xlu1 %1072  ;;  %2406 = vmatmul.mubr.msk.bf16.vlgmr.msra.gmra.mrb[16].mxu0 %vm863_vm1, %v1217_v50  ;;  %v1193_v7 = vmul.f32 %v2612_v28, %v2967_v14 }
 0x250   : > { %2619 = vrcp.f32 %v1073_v45  ;;  %2430 = vmatpush3.bf16.msra.mxu0 %v2525_v55  ;;  %v1221_v43 = vpack.c.bf16 %v1195_v39, %v1194_v20  ;;  %v2531_v55 = vld [vmem:[%s3000_s27 + $0x70] sm:$0xff]  }
 0x251   : > { %2621 = vrcp.f32 %v1103_v10  ;;  %v1220_v47 = vpack.c.bf16 %v1193_v7, %v1192_v26  ;;  %2431 = vmatprep.subr.bf16.mxu0 %v2526_v2  ;;  %v2614_v24 = vpop.eup %2613 }
 0x252   : > { %2623 = vrcp.f32 %v1094_v40  ;;  %v1112_v46 = vpop.xlane.xlu0 %1111  ;;  %v1191_v6 = vmul.f32 %v2614_v24, %v2972_v18 }
 0x253   : > { %v1097_v1 = vpop.xlane.xlu1 %1096  ;;  %2625 = vrcp.f32 %v1100_v61  ;;  %2421 = vmatprep.mubr.msk.bf16.mxu1 %vm863_vm1, %v1220_v47 }
 0x254   : > { %2627 = vrcp.f32 %v1097_v1  ;;  %2422 = vmatmul.mubr.msk.bf16.vlgmr.msra.gmra.mrb[16].mxu1 %vm863_vm1, %v1221_v43  ;;  %2432 = vmatpush3.bf16.msra.mxu0 %v2526_v2 }
 0x255   : > { %2446 = vmatpush3.bf16.msra.mxu1 %v3098_v16  ;;  %2433 = vmatprep.subr.bf16.mxu0 %v2528_v41  ;;  %v2616_v29 = vpop.eup %2615  ;;  %v2532_v16 = vld [vmem:[%s3000_s27 + $0x78] sm:$0xff]  }
 0x256   : > { %v1136_v0 = vpop.xlane.xlu0 %1135  ;;  %2447 = vmatprep.subr.bf16.mxu1 %v2529_v60  ;;  %v2618_v51 = vpop.eup %2617  ;;  %v1188_v17 = vmul.f32 %v2616_v29, %v2990_v42 }
 0x257   : > { %v1115_v14 = vpop.xlane.xlu1 %1114  ;;  %v1190_v37 = vmul.f32 %v2618_v51, %v2970_v48 }
 0x258   : > { %2434 = vmatpush3.bf16.msra.mxu0 %v2528_v41  ;;  %2629 = vrcp.f32 %v1115_v14 }
 0x259   : > { %2448 = vmatpush3.bf16.msra.mxu1 %v2529_v60  ;;  %2435 = vmatprep.subr.bf16.mxu0 %v2530_v52  ;;  %v1219_v18 = vpack.c.bf16 %v1191_v6, %v1190_v37 }
 0x25a   : > { %v2620_v53 = vpop.eup %2619  ;;  %v1106_v58 = vpop.xlane.xlu0 %1105  ;;  %2449 = vmatprep.subr.bf16.mxu1 %v2531_v55 }
 0x25b   : > { %v1139_v61 = vpop.xlane.xlu1 %1138  ;;  %v2622_v63 = vpop.eup %2621  ;;  %v1189_v22 = vmul.f32 %v2620_v53, %v3002_v19  ;;  %2631 = vrcp.f32 %v1106_v58 }
 0x25c   : > { %v2624_v33 = vpop.eup %2623  ;;  %2436 = vmatpush3.bf16.msra.mxu0 %v2530_v52  ;;  %v1199_v15 = vmul.f32 %v2622_v63, %v2986_v56  ;;  %2633 = vrcp.f32 %v1112_v46 }
 0x25d   : > { %v2626_v10 = vpop.eup %2625  ;;  %v1218_v11 = vpack.c.bf16 %v1189_v22, %v1188_v17  ;;  %2450 = vmatpush3.bf16.msra.mxu1 %v2531_v55  ;;  %v1196_v42 = vmul.f32 %v2624_v33, %v3007_v59 }
 0x25e   : > { %v2628_v3 = vpop.eup %2627  ;;  %v1130_v62 = vpop.xlane.xlu0 %1129  ;;  %2451 = vmatprep.subr.bf16.mxu1 %v2532_v16  ;;  %v1198_v19 = vmul.f32 %v2626_v10, %v2980_v31 }
 0x25f   : > { %v1109_v49 = vpop.xlane.xlu1 %1108  ;;  %2409 = vmatprep.mubr.msk.bf16.mxu0 %vm863_vm1, %v1218_v11  ;;  %v1197_v48 = vmul.f32 %v2628_v3, %v3013_v8  ;;  %v2258_v3 = vld [vmem:[%s3162_s30 + $0x28] sm:$0xff]  }
 0x260   : > { %2635 = vrcp.f32 %v1109_v49  ;;  %2410 = vmatmul.mubr.msk.bf16.gmra.mrb[20].mxu0 %vm863_vm1, %v1219_v18  ;;  %v1223_v56 = vpack.c.bf16 %v1199_v15, %v1198_v19  ;;  %v2257_v18 = vld [vmem:[%s3162_s30 + $0x20] sm:$0xff]  }
 0x261   : > { %2637 = vrcp.f32 %v1139_v61  ;;  %v1222_v36 = vpack.c.bf16 %v1197_v48, %v1196_v42  ;;  %2452 = vmatpush3.bf16.msra.mxu1 %v2532_v16 }
 0x262   : > { %2639 = vrcp.f32 %v1130_v62  ;;  %v1124_v25 = vpop.xlane.xlu0 %1123  ;;  %v2630_v2 = vpop.eup %2629 }
 0x263   : > { %v1133_v50 = vpop.xlane.xlu1 %1132  ;;  %2641 = vrcp.f32 %v1136_v0  ;;  %2425 = vmatprep.mubr.msk.bf16.mxu1 %vm863_vm1, %v1222_v36  ;;  %v1203_v40 = vmul.f32 %v2630_v2, %v3025_v23  ;;  %v2212_v36 = vunpack.c.l.bf16 %v2258_v3 }
 0x264   : > { %2643 = vrcp.f32 %v1133_v50  ;;  %2426 = vmatmul.mubr.msk.bf16.gmra.mrb[20].mxu1 %vm863_vm1, %v1223_v56 }
 0x265   : > { %v2632_v28 = vpop.eup %2631 }
 0x266   : > { %v1118_v59 = vpop.xlane.xlu0 %1117  ;;  %v2634_v39 = vpop.eup %2633  ;;  %v1200_v20 = vmul.f32 %v2632_v28, %v3043_v44  ;;  %v2213_v28 = vunpack.c.h.bf16 %v2258_v3 }
 0x267   : > { %v1127_v8 = vpop.xlane.xlu1 %1126  ;;  %v1202_v43 = vmul.f32 %v2634_v39, %v3019_v13 }
 0x268   : > { %2645 = vrcp.f32 %v1127_v8 }
 0x269   : > { %2647 = vrcp.f32 %v1118_v59  ;;  %v1225_v52 = vpack.c.bf16 %v1203_v40, %v1202_v43  ;;  %v2208_v59 = vunpack.c.l.bf16 %v2257_v18  ;;  %v2209_v40 = vunpack.c.h.bf16 %v2257_v18  ;;  %v2262_v18 = vld [vmem:[%s3162_s30 + $0x48] sm:$0xff]  }
 0x26a   : > { %v2636_v31 = vpop.eup %2635  ;;  %v1142_v45 = vpop.xlane.xlu0 %1141  ;;  %2649 = vrcp.f32 %v1124_v25 }
 0x26b   : > { %v1121_v26 = vpop.xlane.xlu1 %1120  ;;  %v2638_v7 = vpop.eup %2637  ;;  %v1201_v47 = vmul.f32 %v2636_v31, %v3049_v35 }
 0x26c   : > { %v2640_v41 = vpop.eup %2639  ;;  %2651 = vrcp.f32 %v1121_v26  ;;  %v1211_v0 = vmul.f32 %v2638_v7, %v3037_v32 }
 0x26d   : > { %v2642_v46 = vpop.eup %2641  ;;  %v1224_v1 = vpack.c.bf16 %v1201_v47, %v1200_v20  ;;  %2653 = vrcp.f32 %v1142_v45  ;;  %v1208_v55 = vmul.f32 %v2640_v41, %v3054_v4 }
 0x26e   : > { %v2644_v60 = vpop.eup %2643  ;;  %v1148_v23 = vpop.xlane.xlu0 %1147  ;;  %v1210_v35 = vmul.f32 %v2642_v46, %v3031_v27 }
 0x26f   : > { %v1145_v14 = vpop.xlane.xlu1 %1144  ;;  %2437 = vmatprep.mubr.msk.bf16.mxu0 %vm863_vm1, %v1224_v1  ;;  %v1209_v44 = vmul.f32 %v2644_v60, %v3060_v9 }
 0x270   : > { %2655 = vrcp.f32 %v1145_v14  ;;  %2438 = vmatmul.mubr.msk.bf16.vlgmr.msra.gmra.mrb[24].mxu0 %vm863_vm1, %v1225_v52  ;;  %v1229_v24 = vpack.c.bf16 %v1211_v0, %v1210_v35  ;;  %v2255_v14 = vld [vmem:[%s3162_s30 + $0x10] sm:$0xff]   ;;  %v2260_v35 = vld [vmem:[%s3162_s30 + $0x38] sm:$0xff]  }
 0x271   : > { %2657 = vrcp.f32 %v1148_v23  ;;  %v1228_v13 = vpack.c.bf16 %v1209_v44, %v1208_v55  ;;  %v2256_v23 = vld [vmem:[%s3162_s30 + $0x18] sm:$0xff]   ;;  %v2200_v44 = vunpack.c.l.bf16 %v2255_v14 }
 0x272   : > { %v2646_v51 = vpop.eup %2645  ;;  %v2204_v55 = vunpack.c.l.bf16 %v2256_v23 }
 0x273   : > { %v1151_v29 = vpop.xlane.xlu1 %1150  ;;  %2453 = vmatprep.mubr.msk.bf16.mxu1 %vm863_vm1, %v1228_v13  ;;  %v2648_v32 = vpop.eup %2647  ;;  %v1207_v9 = vmul.f32 %v2646_v51, %v3070_v21  ;;  %v2205_v13 = vunpack.c.h.bf16 %v2256_v23  ;;  %v2201_v51 = vunpack.c.h.bf16 %v2255_v14  ;;  %v2264_v14 = vld [vmem:[%s3162_s30 + $0x58] sm:$0xff]  }
 0x274   : > { %2659 = vrcp.f32 %v1151_v29  ;;  %2454 = vmatmul.mubr.msk.bf16.vlgmr.msra.gmra.mrb[24].mxu1 %vm863_vm1, %v1229_v24  ;;  %v2650_v53 = vpop.eup %2649  ;;  %v1204_v27 = vmul.f32 %v2648_v32, %v3072_v30  ;;  %v2259_v24 = vld [vmem:[%s3162_s30 + $0x30] sm:$0xff]  }
 0x275   : > { %v1206_v6 = vmul.f32 %v2650_v53, %v3064_v12 }
 0x276   : > { %v2652_v4 = vpop.eup %2651 }
 0x277   : > { %v1205_v58 = vmul.f32 %v2652_v4, %v3078_v5  ;;  %v2654_v61 = vpop.eup %2653  ;;  %v1227_v17 = vpack.c.bf16 %v1207_v9, %v1206_v6  ;;  %v2220_v4 = vunpack.c.l.bf16 %v2260_v35 }
 0x278   : > { %v1212_v33 = vmul.f32 %v2654_v61, %v3080_v54  ;;  %v2254_v54 = vld [vmem:[%s3162_s30 + $0x8] sm:$0xff]  }
 0x279   : > { %v1226_v16 = vpack.c.bf16 %v1205_v58, %v1204_v27  ;;  %v2216_v58 = vunpack.c.l.bf16 %v2259_v24 }
 0x27a   : > { %v2656_v63 = vpop.eup %2655 }
 0x27b   : > { %v2658_v22 = vpop.eup %2657  ;;  %2441 = vmatprep.mubr.msk.bf16.mxu0 %vm863_vm1, %v1226_v16  ;;  %v1213_v37 = vmul.f32 %v2656_v63, %v3086_v34  ;;  %v2191_v34 = vld [vmem:[%s3162_s30] sm:$0xff]   ;;  %v2221_v63 = vunpack.c.h.bf16 %v2260_v35 }
 0x27c   : > { %2442 = vmatmul.mubr.msk.bf16.gmra.mrb[28].mxu0 %vm863_vm1, %v1227_v17  ;;  %v1214_v5 = vmul.f32 %v2658_v22, %v3089_v38  ;;  %v2196_v38 = vunpack.c.l.bf16 %v2254_v54  ;;  %v2192_v11 = vunpack.c.l.bf16 %v2191_v34  ;;  %v2193_v49 = vunpack.c.h.bf16 %v2191_v34 }
 0x27d   : > { %v1230_v30 = vpack.c.bf16 %v1213_v37, %v1212_v33  ;;  %v2217_v37 = vunpack.c.h.bf16 %v2259_v24 }
 0x27e   : > { %v2660_v21 = vpop.eup %2659 }
 0x27f   : > { %v1215_v10 = vmul.f32 %v2660_v21, %v3095_v57  ;;  %2457 = vmatprep.mubr.msk.bf16.mxu1 %vm863_vm1, %v1230_v30  ;;  %v2197_v57 = vunpack.c.h.bf16 %v2254_v54 }
 0x281   : > { %v1231_v12 = vpack.c.bf16 %v1215_v10, %v1214_v5 }
 0x283   : > { %2458 = vmatmul.mubr.msk.bf16.gmra.mrb[28].mxu1 %vm863_vm1, %v1231_v12 }
 0x322   : > { %v2407_v62 = vpop.f32.mrb[16].mxu0 }
 0x323   : > { %v1734_v15 = vmul.f32 %v2407_v62, %v2196_v38  ;;  %v1334_v42 = vpop.f32.mrb[17].mxu0 }
 0x324   : > { %v1732_v48 = vmul.f32 %v2192_v11, %v1334_v42  ;;  %v2408_v19 = vpop.f32.mrb[18].mxu0  ;;  %v2228_v42 = vunpack.c.l.bf16 %v2262_v18 }
 0x325   : > { %v2160_v25 = vpack.c.bf16 %v1734_v15, %v1734_v15  ;;  %v1735_v50 = vmul.f32 %v2408_v19, %v2197_v57  ;;  %v1337_v56 = vpop.f32.mrb[19].mxu0  ;;  %v2261_v15 = vld [vmem:[%s3162_s30 + $0x40] sm:$0xff]   ;;  %v2266_v19 = vld [vmem:[%s3162_s30 + $0x68] sm:$0xff]  }
 0x326   : > { %v2158_v8 = vpack.c.bf16 %v1732_v48, %v1732_v48  ;;  %v1733_v2 = vmul.f32 %v2193_v49, %v1337_v56  ;;  %v2224_v48 = vunpack.c.l.bf16 %v2261_v15  ;;  %v2225_v56 = vunpack.c.h.bf16 %v2261_v15 }
 0x327   : > { %1895 = vst.msk [vmem:[%s3172_s7 + $0x8] sm:$0xf] %vm1892_vm2, %v2160_v25  ;;  %v2161_v39 = vpack.c.bf16 %v1735_v50, %v1735_v50  ;;  %v2423_v31 = vpop.f32.mrb[16].mxu1  ;;  %v2265_v25 = vld [vmem:[%s3162_s30 + $0x60] sm:$0xff]  }
 0x328   : > { %1893 = vst.msk [vmem:[%s3172_s7] sm:$0xf] %vm1892_vm2, %v2158_v8  ;;  %v2159_v45 = vpack.c.bf16 %v1733_v2, %v1733_v2  ;;  %v1742_v26 = vmul.f32 %v2423_v31, %v2212_v36  ;;  %v1435_v7 = vpop.f32.mrb[17].mxu1  ;;  %v2229_v36 = vunpack.c.h.bf16 %v2262_v18  ;;  %v2244_v2 = vunpack.c.l.bf16 %v2266_v19 }
 0x329   : > { %1896 = vst.msk [vmem:[%s3172_s7 + $0xc] sm:$0xf] %vm1892_vm2, %v2161_v39  ;;  %v1740_v20 = vmul.f32 %v2208_v59, %v1435_v7  ;;  %v2424_v47 = vpop.f32.mrb[18].mxu1  ;;  %v2240_v31 = vunpack.c.l.bf16 %v2265_v25  ;;  %v2245_v7 = vunpack.c.h.bf16 %v2266_v19 }
 0x32a   : > { %1894 = vst.msk [vmem:[%s3172_s7 + $0x4] sm:$0xf] %vm1892_vm2, %v2159_v45  ;;  %v2168_v41 = vpack.c.bf16 %v1742_v26, %v1742_v26  ;;  %v1743_v43 = vmul.f32 %v2424_v47, %v2213_v28  ;;  %v1438_v46 = vpop.f32.mrb[19].mxu1 }
 0x32b   : > { %v2166_v1 = vpack.c.bf16 %v1740_v20, %v1740_v20  ;;  %v1741_v60 = vmul.f32 %v2209_v40, %v1438_v46 }
 0x32c   : > { %1903 = vst.msk [vmem:[%s3172_s7 + $0x28] sm:$0xf] %vm1892_vm2, %v2168_v41  ;;  %v2169_v52 = vpack.c.bf16 %v1743_v43, %v1743_v43  ;;  %v2241_v43 = vunpack.c.h.bf16 %v2265_v25 }
 0x32d   : > { %1901 = vst.msk [vmem:[%s3172_s7 + $0x20] sm:$0xf] %vm1892_vm2, %v2166_v1  ;;  %v2167_v0 = vpack.c.bf16 %v1741_v60, %v1741_v60 }
 0x32e   : > { %1904 = vst.msk [vmem:[%s3172_s7 + $0x2c] sm:$0xf] %vm1892_vm2, %v2169_v52 }
 0x32f   : > { %1902 = vst.msk [vmem:[%s3172_s7 + $0x24] sm:$0xf] %vm1892_vm2, %v2167_v0 }
 0x333   : > { %v2411_v29 = vpop.f32.mrb[20].mxu0 }
 0x334   : > { %v1738_v32 = vmul.f32 %v2411_v29, %v2204_v55  ;;  %v1350_v53 = vpop.f32.mrb[21].mxu0 }
 0x335   : > { %v1736_v9 = vmul.f32 %v2200_v44, %v1350_v53  ;;  %v2412_v27 = vpop.f32.mrb[22].mxu0 }
 0x336   : > { %v2164_v61 = vpack.c.bf16 %v1738_v32, %v1738_v32  ;;  %v1739_v6 = vmul.f32 %v2412_v27, %v2205_v13  ;;  %v1353_v16 = vpop.f32.mrb[23].mxu0  ;;  %v2263_v13 = vld [vmem:[%s3162_s30 + $0x50] sm:$0xff]   ;;  %v2236_v32 = vunpack.c.l.bf16 %v2264_v14 }
 0x337   : > { %v2162_v17 = vpack.c.bf16 %v1736_v9, %v1736_v9  ;;  %v1737_v22 = vmul.f32 %v2201_v51, %v1353_v16  ;;  %v2427_v33 = vpop.f32.mrb[20].mxu1  ;;  %v2237_v9 = vunpack.c.h.bf16 %v2264_v14 }
 0x338   : > { %1899 = vst.msk [vmem:[%s3172_s7 + $0x18] sm:$0xf] %vm1892_vm2, %v2164_v61  ;;  %v2165_v21 = vpack.c.bf16 %v1739_v6, %v1739_v6  ;;  %v1746_v30 = vmul.f32 %v2427_v33, %v2220_v4  ;;  %v1451_v5 = vpop.f32.mrb[21].mxu1  ;;  %v2232_v4 = vunpack.c.l.bf16 %v2263_v13  ;;  %v2268_v61 = vld [vmem:[%s3162_s30 + $0x78] sm:$0xff]  }
 0x339   : > { %1897 = vst.msk [vmem:[%s3172_s7 + $0x10] sm:$0xf] %vm1892_vm2, %v2162_v17  ;;  %v2163_v10 = vpack.c.bf16 %v1737_v22, %v1737_v22  ;;  %v1744_v12 = vmul.f32 %v2216_v58, %v1451_v5  ;;  %v2428_v54 = vpop.f32.mrb[22].mxu1  ;;  %v2233_v58 = vunpack.c.h.bf16 %v2263_v13 }
 0x33a   : > { %1900 = vst.msk [vmem:[%s3172_s7 + $0x1c] sm:$0xf] %vm1892_vm2, %v2165_v21  ;;  %v2172_v34 = vpack.c.bf16 %v1746_v30, %v1746_v30  ;;  %v1747_v38 = vmul.f32 %v2428_v54, %v2221_v63  ;;  %v1454_v11 = vpop.f32.mrb[23].mxu1  ;;  %v2267_v63 = vld [vmem:[%s3162_s30 + $0x70] sm:$0xff]   ;;  %v2252_v30 = vunpack.c.l.bf16 %v2268_v61 }
 0x33b   : > { %1898 = vst.msk [vmem:[%s3172_s7 + $0x14] sm:$0xf] %vm1892_vm2, %v2163_v10  ;;  %v2170_v57 = vpack.c.bf16 %v1744_v12, %v1744_v12  ;;  %v1745_v3 = vmul.f32 %v2217_v37, %v1454_v11  ;;  %v2248_v12 = vunpack.c.l.bf16 %v2267_v63 }
 0x33c   : > { %1907 = vst.msk [vmem:[%s3172_s7 + $0x38] sm:$0xf] %vm1892_vm2, %v2172_v34  ;;  %v2173_v62 = vpack.c.bf16 %v1747_v38, %v1747_v38  ;;  %v2253_v34 = vunpack.c.h.bf16 %v2268_v61 }
 0x33d   : > { %1905 = vst.msk [vmem:[%s3172_s7 + $0x30] sm:$0xf] %vm1892_vm2, %v2170_v57  ;;  %v2171_v49 = vpack.c.bf16 %v1745_v3, %v1745_v3  ;;  %v2249_v57 = vunpack.c.h.bf16 %v2267_v63 }
 0x33e   : > { %1908 = vst.msk [vmem:[%s3172_s7 + $0x3c] sm:$0xf] %vm1892_vm2, %v2173_v62 }
 0x33f   : > { %1906 = vst.msk [vmem:[%s3172_s7 + $0x34] sm:$0xf] %vm1892_vm2, %v2171_v49 }
 0x343   : > { %v2439_v50 = vpop.f32.mrb[24].mxu0 }
 0x344   : > { %v1750_v59 = vmul.f32 %v2439_v50, %v2228_v42  ;;  %v1536_v8 = vpop.f32.mrb[25].mxu0 }
 0x345   : > { %v1748_v28 = vmul.f32 %v2224_v48, %v1536_v8  ;;  %v2440_v39 = vpop.f32.mrb[26].mxu0 }
 0x346   : > { %v2176_v40 = vpack.c.bf16 %v1750_v59, %v1750_v59  ;;  %v1751_v45 = vmul.f32 %v2440_v39, %v2229_v36  ;;  %v1539_v26 = vpop.f32.mrb[27].mxu0 }
 0x347   : > { %v2174_v20 = vpack.c.bf16 %v1748_v28, %v1748_v28  ;;  %v1749_v47 = vmul.f32 %v2225_v56, %v1539_v26  ;;  %v2455_v41 = vpop.f32.mrb[24].mxu1 }
 0x348   : > { %1911 = vst.msk [vmem:[%s3172_s7 + $0x48] sm:$0xf] %vm1892_vm2, %v2176_v40  ;;  %v2177_v46 = vpack.c.bf16 %v1751_v45, %v1751_v45  ;;  %v1758_v1 = vmul.f32 %v2455_v41, %v2244_v2  ;;  %v1637_v60 = vpop.f32.mrb[25].mxu1 }
 0x349   : > { %1909 = vst.msk [vmem:[%s3172_s7 + $0x40] sm:$0xf] %vm1892_vm2, %v2174_v20  ;;  %v2175_v52 = vpack.c.bf16 %v1749_v47, %v1749_v47  ;;  %v1756_v0 = vmul.f32 %v2240_v31, %v1637_v60  ;;  %v2456_v23 = vpop.f32.mrb[26].mxu1 }
 0x34a   : > { %1912 = vst.msk [vmem:[%s3172_s7 + $0x4c] sm:$0xf] %vm1892_vm2, %v2177_v46  ;;  %v2184_v55 = vpack.c.bf16 %v1758_v1, %v1758_v1  ;;  %v1759_v44 = vmul.f32 %v2456_v23, %v2245_v7  ;;  %v1640_v35 = vpop.f32.mrb[27].mxu1 }
 0x34b   : > { %1910 = vst.msk [vmem:[%s3172_s7 + $0x44] sm:$0xf] %vm1892_vm2, %v2175_v52  ;;  %v2182_v24 = vpack.c.bf16 %v1756_v0, %v1756_v0  ;;  %v1757_v29 = vmul.f32 %v2241_v43, %v1640_v35 }
 0x34c   : > { %1919 = vst.msk [vmem:[%s3172_s7 + $0x68] sm:$0xf] %vm1892_vm2, %v2184_v55  ;;  %v2185_v51 = vpack.c.bf16 %v1759_v44, %v1759_v44 }
 0x34d   : > { %1917 = vst.msk [vmem:[%s3172_s7 + $0x60] sm:$0xf] %vm1892_vm2, %v2182_v24  ;;  %v2183_v53 = vpack.c.bf16 %v1757_v29, %v1757_v29 }
 0x34e   : > { %1920 = vst.msk [vmem:[%s3172_s7 + $0x6c] sm:$0xf] %vm1892_vm2, %v2185_v51 }
 0x34f   : > { %1918 = vst.msk [vmem:[%s3172_s7 + $0x64] sm:$0xf] %vm1892_vm2, %v2183_v53  ;;  %v2443_v27 = vpop.f32.mrb[28].mxu0 }
 0x350   : > { %v1754_v6 = vmul.f32 %v2443_v27, %v2236_v32  ;;  %v1552_v16 = vpop.f32.mrb[29].mxu0 }
 0x351   : > { %v1752_v17 = vmul.f32 %v2232_v4, %v1552_v16  ;;  %v2444_v22 = vpop.f32.mrb[30].mxu0 }
 0x352   : > { %v2180_v33 = vpack.c.bf16 %v1754_v6, %v1754_v6  ;;  %v1755_v37 = vmul.f32 %v2444_v22, %v2237_v9  ;;  %v1555_v21 = vpop.f32.mrb[31].mxu0 }
 0x353   : > { %v2178_v5 = vpack.c.bf16 %v1752_v17, %v1752_v17  ;;  %v1753_v10 = vmul.f32 %v2233_v58, %v1555_v21 }
 0x354   : > { %1915 = vst.msk [vmem:[%s3172_s7 + $0x58] sm:$0xf] %vm1892_vm2, %v2180_v33  ;;  %v2181_v54 = vpack.c.bf16 %v1755_v37, %v1755_v37 }
 0x355   : > { %1913 = vst.msk [vmem:[%s3172_s7 + $0x50] sm:$0xf] %vm1892_vm2, %v2178_v5  ;;  %v2179_v38 = vpack.c.bf16 %v1753_v10, %v1753_v10 }
 0x356   : > { %v2459_v11 = vpop.f32.mrb[28].mxu1  ;;  %1916 = vst.msk [vmem:[%s3172_s7 + $0x5c] sm:$0xf] %vm1892_vm2, %v2181_v54 }
 0x357   : > { %v1762_v3 = vmul.f32 %v2459_v11, %v2252_v30  ;;  %v1653_v62 = vpop.f32.mrb[29].mxu1  ;;  %1914 = vst.msk [vmem:[%s3172_s7 + $0x54] sm:$0xf] %vm1892_vm2, %v2179_v38 }
 0x358   : > { %v1760_v49 = vmul.f32 %v2248_v12, %v1653_v62  ;;  %v2460_v18 = vpop.f32.mrb[30].mxu1 }
 0x359   : > { %v2188_v15 = vpack.c.bf16 %v1762_v3, %v1762_v3  ;;  %v1763_v42 = vmul.f32 %v2460_v18, %v2253_v34  ;;  %v1656_v48 = vpop.f32.mrb[31].mxu1 }
 0x35a   : > { %v2186_v19 = vpack.c.bf16 %v1760_v49, %v1760_v49  ;;  %v1761_v36 = vmul.f32 %v2249_v57, %v1656_v48 }
 0x35b   : > { %1923 = vst.msk [vmem:[%s3172_s7 + $0x78] sm:$0xf] %vm1892_vm2, %v2188_v15  ;;  %v2189_v25 = vpack.c.bf16 %v1763_v42, %v1763_v42 }
 0x35c   : > { %1921 = vst.msk [vmem:[%s3172_s7 + $0x70] sm:$0xf] %vm1892_vm2, %v2186_v19  ;;  %v2187_v50 = vpack.c.bf16 %v1761_v36, %v1761_v36 }
 0x35d   : > { %1924 = vst.msk [vmem:[%s3172_s7 + $0x7c] sm:$0xf] %vm1892_vm2, %v2189_v25 }
 0x35e   : > { %1922 = vst.msk [vmem:[%s3172_s7 + $0x74] sm:$0xf] %vm1892_vm2, %v2187_v50 }
 0x35f PF: > { %s14_s15 = sadd.s32 1, %s2667_s15  }
 0x360   : > { %p11_p4 = scmp.ge.s32.totalorder %s14_s15, 4  }
 0x362   :  { %13 = sbr.rel (!%p11_p4) target bundleno = 1 (0x1), region = 75 }

// kernel: _lambda_.20
= control target key start
LH: loop header
LB: loop body
LE: loop exit
PB: predicated region body
PF: predicated region fallthrough
CT: control target
= control target key end

     0   :  { %s672_s12 = smov 0   ;;  %s798_s0 = inlined_call_operand.vmem [shape: bf16[128,216], index: 0, kind: input, shape index: {}]   ;;  %s799_s1 = inlined_call_operand.vmem [shape: bf16[216,32], index: 1, kind: input, shape index: {}]   ;;  %s800_s2 = inlined_call_operand.vmem [shape: f32[1,32], index: 2, kind: input, shape index: {}]   ;;  %s801_s3 = inlined_call_operand.vmem [shape: bf16[128,32], index: 3, kind: output, shape index: {}]  }
   0x1 LB: > { %s524_s13 = sadd.s32 4294967295, %s649_s12   ;;  %p528_p0 = scmp.ge.s32.totalorder %s649_s12, 1  ;;  %s649_s12 = sphi %s672_s12, %s13_s12  }
   0x2   : > { %p139_p1 = scmp.lt.s32.totalorder %s649_s12, 3 }
   0x4   : > { %p140_p2 = pnand %p528_p0, %p139_p1 }
   0x5   : > { %v617_v0 = vld [vmem:[%s799_s1] sm:$0xff] (!%p140_p2)   ;;  %v651_v1 = vmov (!%p140_p2), 0   ;;  %v618_v2 = vld [vmem:[%s799_s1 + $0x8] sm:$0xff] (!%p140_p2)   ;;  %s529_s18 = sshll.u32 (!%p140_p2), %s524_s13, 3  ;;  %v619_v3 = vld [vmem:[%s799_s1 + $0x10] sm:$0xff] (!%p140_p2)   ;;  %vm337_vm0 = vcmask (!%p140_p2), 719872  }
   0x6   : > { %143 = sbr.rel (%p140_p2) target bundleno = 291 (0x123), region = 32  ;;  %354 = vmatprep.subr.bf16.mxu0 (!%p140_p2), %v651_v1  ;;  %580 = vmatprep.subr.bf16.mxu1 (!%p140_p2), %v651_v1  ;;  %p165_p3 = scmp.lt.s32.totalorder (!%p140_p2), %s529_s18, 15  ;;  %v620_v4 = vld [vmem:[%s799_s1 + $0x18] sm:$0xff] (!%p140_p2)   ;;  %v621_v5 = vld [vmem:[%s799_s1 + $0x20] sm:$0xff] (!%p140_p2)   ;;  %v622_v8 = vld [vmem:[%s799_s1 + $0x28] sm:$0xff] (!%p140_p2)   ;;  %vm350_vm1 = vcmask (!%p140_p2), 1043456  }
   0x7   : > { %355 = vmatpush1.bf16.msra.mxu0 (!%p140_p2), %v617_v0  ;;  %594 = vmatpush1.bf16.msra.mxu1 (!%p140_p2), %v617_v0  ;;  %v623_v9 = vld [vmem:[%s799_s1 + $0x30] sm:$0xff] (!%p140_p2)   ;;  %v624_v10 = vld [vmem:[%s799_s1 + $0x38] sm:$0xff] (!%p140_p2)   ;;  %v625_v11 = vld [vmem:[%s799_s1 + $0x40] sm:$0xff] (!%p140_p2)   ;;  %vm459_vm2 = vcmask (!%p140_p2), 257024  }
   0x8   : > { %356 = vmatprep.subr.bf16.mxu0 (!%p140_p2), %v651_v1  ;;  %581 = vmatprep.subr.bf16.mxu1 (!%p140_p2), %v651_v1  ;;  %v626_v12 = vld [vmem:[%s799_s1 + $0x48] sm:$0xff] (!%p140_p2)   ;;  %v627_v13 = vld [vmem:[%s799_s1 + $0x50] sm:$0xff] (!%p140_p2)   ;;  %v628_v14 = vld [vmem:[%s799_s1 + $0x58] sm:$0xff] (!%p140_p2)  }
   0x9   : > { %v629_v15 = vld [vmem:[%s799_s1 + $0x60] sm:$0xff] (!%p140_p2)   ;;  %v630_v16 = vld [vmem:[%s799_s1 + $0x68] ss:$0 sps:$4 sm:$0xff] (!%p140_p2)  }
   0xa   : > { %v352_v17 = vsel (!%p140_p2), %vm350_vm1, %v630_v16, 0  ;;  %v534_v24 = vld [vmem:[%s800_s2] ss:$0 sm:$0xff] (!%p140_p2) }
   0xb   : > { %357 = vmatpush1.bf16.msra.mxu0 (!%p140_p2), %v618_v2  ;;  %595 = vmatpush1.bf16.msra.mxu1 (!%p140_p2), %v618_v2 }
   0xc   : > { %358 = vmatprep.subr.bf16.mxu0 (!%p140_p2), %v651_v1  ;;  %582 = vmatprep.subr.bf16.mxu1 (!%p140_p2), %v651_v1 }
   0xd   : > { %s803_s18 = smov (!%p165_p3, %s529_s18), 15 }
   0xe   : > { %s571_s21 = sshll.u32 %s803_s18, 3  ;;  %s533_s24 = sshll.u32 %s803_s18, 2 }
   0xf   : > { %359 = vmatpush1.bf16.msra.mxu0 %v619_v3  ;;  %596 = vmatpush1.bf16.msra.mxu1 %v619_v3  ;;  %s706_s26 = scalar_lea.vmem %s798_s0, %s571_s21  ;;  %s777_s27 = scalar_lea.vmem %s801_s3, %s533_s24 }
  0x10   : > { %360 = vmatprep.subr.bf16.mxu0 %v651_v1  ;;  %583 = vmatprep.subr.bf16.mxu1 %v651_v1  ;;  %v633_v6 = vld [vmem:[%s706_s26 + $0x4] ss:$8 sps:$4 sm:$0xff]   ;;  %v631_v18 = vld [vmem:[%s706_s26] ss:$8 sps:$4 sm:$0xff]   ;;  %v637_v20 = vld [vmem:[%s706_s26 + $0x14] ss:$8 sps:$4 sm:$0xff]  }
  0x11   : > { %557 = vmatprep.mubr.msk.bf16.mxu0 %vm337_vm0, %v633_v6  ;;  %v636_v7 = vld [vmem:[%s706_s26 + $0x24] ss:$8 sps:$4 sm:$0xff]   ;;  %v634_v19 = vld [vmem:[%s706_s26 + $0x20] ss:$8 sps:$4 sm:$0xff]   ;;  %v639_v21 = vld [vmem:[%s706_s26 + $0x34] ss:$8 sps:$4 sm:$0xff]  }
  0x12   : > { %559 = vmatprep.mubr.msk.bf16.mxu1 %vm337_vm0, %v636_v7  ;;  %v641_v22 = vld [vmem:[%s706_s26 + $0x10] ss:$8 sps:$4 sm:$0xff]  }
  0x13   : > { %361 = vmatpush1.bf16.msra.mxu0 %v620_v4  ;;  %597 = vmatpush1.bf16.msra.mxu1 %v620_v4  ;;  %v642_v23 = vld [vmem:[%s706_s26 + $0x30] ss:$8 sps:$4 sm:$0xff]  }
  0x14   : > { %362 = vmatprep.subr.bf16.mxu0 %v651_v1  ;;  %584 = vmatprep.subr.bf16.mxu1 %v651_v1 }
  0x17   : > { %363 = vmatpush1.bf16.msra.mxu0 %v621_v5  ;;  %598 = vmatpush1.bf16.msra.mxu1 %v621_v5 }
  0x18   : > { %364 = vmatprep.subr.bf16.mxu0 %v651_v1  ;;  %585 = vmatprep.subr.bf16.mxu1 %v651_v1 }
  0x1b   : > { %365 = vmatpush1.bf16.msra.mxu0 %v622_v8  ;;  %599 = vmatpush1.bf16.msra.mxu1 %v622_v8 }
  0x1c   : > { %366 = vmatprep.subr.bf16.mxu0 %v651_v1  ;;  %586 = vmatprep.subr.bf16.mxu1 %v651_v1 }
  0x1f   : > { %367 = vmatpush1.bf16.msra.mxu0 %v623_v9  ;;  %600 = vmatpush1.bf16.msra.mxu1 %v623_v9 }
  0x20   : > { %368 = vmatprep.subr.bf16.mxu0 %v651_v1  ;;  %587 = vmatprep.subr.bf16.mxu1 %v651_v1 }
  0x23   : > { %369 = vmatpush1.bf16.msra.mxu0 %v624_v10  ;;  %601 = vmatpush1.bf16.msra.mxu1 %v624_v10 }
  0x24   : > { %370 = vmatprep.subr.bf16.mxu0 %v651_v1  ;;  %588 = vmatprep.subr.bf16.mxu1 %v651_v1 }
  0x27   : > { %371 = vmatpush1.bf16.msra.mxu0 %v625_v11  ;;  %602 = vmatpush1.bf16.msra.mxu1 %v625_v11 }
  0x28   : > { %372 = vmatprep.subr.bf16.mxu0 %v651_v1  ;;  %589 = vmatprep.subr.bf16.mxu1 %v651_v1 }
  0x2b   : > { %373 = vmatpush1.bf16.msra.mxu0 %v626_v12  ;;  %603 = vmatpush1.bf16.msra.mxu1 %v626_v12 }
  0x2c   : > { %374 = vmatprep.subr.bf16.mxu0 %v651_v1  ;;  %590 = vmatprep.subr.bf16.mxu1 %v651_v1 }
  0x2f   : > { %375 = vmatpush1.bf16.msra.mxu0 %v627_v13  ;;  %604 = vmatpush1.bf16.msra.mxu1 %v627_v13 }
  0x30   : > { %376 = vmatprep.subr.bf16.mxu0 %v651_v1  ;;  %591 = vmatprep.subr.bf16.mxu1 %v651_v1 }
  0x33   : > { %377 = vmatpush1.bf16.msra.mxu0 %v628_v14  ;;  %605 = vmatpush1.bf16.msra.mxu1 %v628_v14 }
  0x34   : > { %378 = vmatprep.subr.bf16.mxu0 %v651_v1  ;;  %592 = vmatprep.subr.bf16.mxu1 %v651_v1 }
  0x37   : > { %379 = vmatpush1.bf16.msra.mxu0 %v629_v15  ;;  %606 = vmatpush1.bf16.msra.mxu1 %v629_v15 }
  0x38   : > { %380 = vmatprep.subr.bf16.mxu0 %v651_v1  ;;  %593 = vmatprep.subr.bf16.mxu1 %v651_v1 }
  0x3b   : > { %381 = vmatpush1.bf16.msra.mxu0 %v352_v17  ;;  %607 = vmatpush1.bf16.msra.mxu1 %v352_v17 }
  0x3e   : > { %387 = vmatmul.mubr.bf16.vlgmr.msra.gmra.mrb[0].mxu0 %v631_v18  ;;  %403 = vmatmul.mubr.bf16.vlgmr.msra.gmra.mrb[0].mxu1 %v634_v19 }
  0x3f   : > { %558 = vmatprep.mubr.msk.bf16.mxu0 %vm337_vm0, %v637_v20  ;;  %560 = vmatprep.mubr.msk.bf16.mxu1 %vm337_vm0, %v639_v21 }
  0x46   : > { %395 = vmatmul.mubr.bf16.gmra.mrb[4].mxu0 %v641_v22  ;;  %411 = vmatmul.mubr.bf16.gmra.mrb[4].mxu1 %v642_v23 }
 0x111   : > { %v388_v25 = vpop.f32.mrb[0].mxu0  ;;  %v404_v26 = vpop.f32.mrb[0].mxu1 }
 0x112   : > { %v389_v27 = vadd.f32 %v534_v24, %v388_v25  ;;  %v405_v28 = vadd.f32 %v534_v24, %v404_v26  ;;  %v390_v29 = vpop.f32.mrb[1].mxu0  ;;  %v406_v30 = vpop.f32.mrb[1].mxu1 }
 0x113   : > { %v391_v31 = vpop.f32.mrb[2].mxu0  ;;  %v407_v32 = vpop.f32.mrb[2].mxu1 }
 0x114   : > { %v419_v33 = vmax.f32 %v389_v27, 0.0  ;;  %v423_v34 = vmax.f32 %v405_v28, 0.0  ;;  %v392_v35 = vadd.f32 %v534_v24, %v391_v31  ;;  %v408_v36 = vadd.f32 %v534_v24, %v407_v32  ;;  %v393_v37 = vpop.f32.mrb[3].mxu0  ;;  %v409_v38 = vpop.f32.mrb[3].mxu1 }
 0x116   : > { %v572_v39 = vpack.c.bf16 %v419_v33, %v419_v33  ;;  %v576_v40 = vpack.c.bf16 %v423_v34, %v423_v34  ;;  %v420_v41 = vmax.f32 %v392_v35, 0.0  ;;  %v424_v42 = vmax.f32 %v408_v36, 0.0 }
 0x118   : > { %460 = vst.msk [vmem:[%s777_s27] sm:$0xf] %vm459_vm2, %v572_v39  ;;  %464 = vst.msk [vmem:[%s777_s27 + $0x10] sm:$0xf] %vm459_vm2, %v576_v40  ;;  %v573_v43 = vpack.c.bf16 %v420_v41, %v420_v41  ;;  %v577_v44 = vpack.c.bf16 %v424_v42, %v424_v42 }
 0x119   : > { %v396_v45 = vpop.f32.mrb[4].mxu0  ;;  %v412_v46 = vpop.f32.mrb[4].mxu1 }
 0x11a   : > { %461 = vst.msk [vmem:[%s777_s27 + $0x4] sm:$0xf] %vm459_vm2, %v573_v43  ;;  %465 = vst.msk [vmem:[%s777_s27 + $0x14] sm:$0xf] %vm459_vm2, %v577_v44  ;;  %v397_v47 = vadd.f32 %v534_v24, %v396_v45  ;;  %v413_v48 = vadd.f32 %v534_v24, %v412_v46  ;;  %v398_v49 = vpop.f32.mrb[5].mxu0  ;;  %v414_v50 = vpop.f32.mrb[5].mxu1 }
 0x11b   : > { %v399_v51 = vpop.f32.mrb[6].mxu0  ;;  %v415_v52 = vpop.f32.mrb[6].mxu1 }
 0x11c   : > { %v421_v53 = vmax.f32 %v397_v47, 0.0  ;;  %v425_v54 = vmax.f32 %v413_v48, 0.0  ;;  %v400_v55 = vadd.f32 %v534_v24, %v399_v51  ;;  %v416_v56 = vadd.f32 %v534_v24, %v415_v52  ;;  %v401_v57 = vpop.f32.mrb[7].mxu0  ;;  %v417_v58 = vpop.f32.mrb[7].mxu1 }
 0x11e   : > { %v574_v59 = vpack.c.bf16 %v421_v53, %v421_v53  ;;  %v578_v60 = vpack.c.bf16 %v425_v54, %v425_v54  ;;  %v422_v61 = vmax.f32 %v400_v55, 0.0  ;;  %v426_v62 = vmax.f32 %v416_v56, 0.0 }
 0x120   : > { %462 = vst.msk [vmem:[%s777_s27 + $0x8] sm:$0xf] %vm459_vm2, %v574_v59  ;;  %466 = vst.msk [vmem:[%s777_s27 + $0x18] sm:$0xf] %vm459_vm2, %v578_v60  ;;  %v575_v63 = vpack.c.bf16 %v422_v61, %v422_v61  ;;  %v579_v0 = vpack.c.bf16 %v426_v62, %v426_v62 }
 0x122   : > { %463 = vst.msk [vmem:[%s777_s27 + $0xc] sm:$0xf] %vm459_vm2, %v575_v63  ;;  %467 = vst.msk [vmem:[%s777_s27 + $0x1c] sm:$0xf] %vm459_vm2, %v579_v0 }
 0x123 PF: > { %s13_s12 = sadd.s32 1, %s649_s12  }
 0x124   : > { %p10_p4 = scmp.ge.s32.totalorder %s13_s12, 4  }
 0x126   :  { %12 = sbr.rel (!%p10_p4) target bundleno = 1 (0x1), region = 62 }

// kernel: _lambda_.21
= control target key start
LH: loop header
LB: loop body
LE: loop exit
PB: predicated region body
PF: predicated region fallthrough
CT: control target
= control target key end

     0   :  { %s511_s12 = smov 0   ;;  %s548_s0 = inlined_call_operand.vmem [shape: bf16[128,32], index: 0, kind: input, shape index: {}]   ;;  %s549_s1 = inlined_call_operand.vmem [shape: bf16[32,48], index: 1, kind: input, shape index: {}]   ;;  %s550_s2 = inlined_call_operand.vmem [shape: f32[1,48], index: 2, kind: input, shape index: {}]   ;;  %s551_s3 = inlined_call_operand.vmem [shape: bf16[128,48], index: 3, kind: output, shape index: {}]  }
   0x1 LB: > { %s409_s13 = sadd.s32 4294967295, %s489_s12   ;;  %p413_p0 = scmp.ge.s32.totalorder %s489_s12, 1  ;;  %s489_s12 = sphi %s511_s12, %s13_s12  }
   0x2   : > { %p138_p1 = scmp.lt.s32.totalorder %s489_s12, 3 }
   0x4   : > { %p139_p2 = pnand %p413_p0, %p138_p1 }
   0x5   : > { %v477_v0 = vld [vmem:[%s549_s1] sm:$0xff] (!%p139_p2)   ;;  %s414_s16 = sshll.u32 (!%p139_p2), %s409_s13, 3  ;;  %v478_v1 = vld [vmem:[%s549_s1 + $0x8] sm:$0xff] (!%p139_p2)   ;;  %vm226_vm0 = vcmask (!%p139_p2), 261120   ;;  %vm344_vm1 = vcmask (!%p139_p2), 388096  }
   0x6   : > { %142 = sbr.rel (%p139_p2) target bundleno = 240 (0xf0), region = 32  ;;  %p163_p3 = scmp.lt.s32.totalorder (!%p139_p2), %s414_s16, 15  ;;  %453 = vmatprep.subr.bf16.mxu0 (!%p139_p2), %v477_v0  ;;  %465 = vmatprep.subr.bf16.mxu1 (!%p139_p2), %v477_v0  ;;  %v418_v6 = vld [vmem:[%s550_s2] ss:$0 sm:$0xff] (!%p139_p2) }
   0x7   : > { %454 = vmatpush3.bf16.msra.mxu0 (!%p139_p2), %v477_v0  ;;  %467 = vmatpush3.bf16.msra.mxu1 (!%p139_p2), %v477_v0 }
   0x8   : > { %455 = vmatprep.subr.bf16.mxu0 (!%p139_p2), %v478_v1  ;;  %466 = vmatprep.subr.bf16.mxu1 (!%p139_p2), %v478_v1 }
   0xb   : > { %456 = vmatpush3.bf16.msra.mxu0 (!%p139_p2), %v478_v1  ;;  %468 = vmatpush3.bf16.msra.mxu1 (!%p139_p2), %v478_v1 }
   0xd   : > { %s553_s16 = smov (!%p163_p3, %s414_s16), 15 }
   0xe   : > { %s415_s19 = sshll.u32 %s553_s16, 2 }
   0xf   : > { %s166_s22 = scalar_lea.vmem %s548_s0, %s415_s19  ;;  %s172_s27 = scalar_lea.vmem %s551_s3, %s415_s19 }
  0x10   : > { %v479_v2 = vld [vmem:[%s166_s22] sm:$0xff]   ;;  %v480_v3 = vld [vmem:[%s166_s22 + $0x10] sm:$0xff]   ;;  %v481_v4 = vld [vmem:[%s166_s22 + $0x8] sm:$0xff]  }
  0x11   : > { %457 = vmatprep.mubr.msk.bf16.mxu0 %vm226_vm0, %v479_v2  ;;  %461 = vmatprep.mubr.msk.bf16.mxu1 %vm226_vm0, %v480_v3  ;;  %v482_v5 = vld [vmem:[%s166_s22 + $0x18] sm:$0xff]  }
  0x12   : > { %458 = vmatmul.mubr.msk.bf16.vlgmr.msra.gmra.mrb[0].mxu0 %vm226_vm0, %v481_v4  ;;  %462 = vmatmul.mubr.msk.bf16.vlgmr.msra.gmra.mrb[0].mxu1 %vm226_vm0, %v482_v5 }
  0xe5   : > { %v459_v7 = vpop.f32.mrb[0].mxu0  ;;  %v463_v9 = vpop.f32.mrb[0].mxu1 }
  0xe6   : > { %v282_v8 = vadd.f32 %v459_v7, %v418_v6  ;;  %v273_v10 = vpop.f32.mrb[1].mxu0  ;;  %v298_v11 = vadd.f32 %v463_v9, %v418_v6  ;;  %v289_v13 = vpop.f32.mrb[1].mxu1 }
  0xe7   : > { %v274_v12 = vadd.f32 %v418_v6, %v273_v10  ;;  %v460_v14 = vpop.f32.mrb[2].mxu0  ;;  %v290_v16 = vadd.f32 %v418_v6, %v289_v13  ;;  %v464_v18 = vpop.f32.mrb[2].mxu1 }
  0xe8   : > { %v306_v15 = vmax.f32 %v282_v8, 0.0  ;;  %v285_v17 = vadd.f32 %v460_v14, %v418_v6  ;;  %v276_v19 = vpop.f32.mrb[3].mxu0  ;;  %v310_v20 = vmax.f32 %v298_v11, 0.0  ;;  %v301_v22 = vadd.f32 %v464_v18, %v418_v6  ;;  %v292_v24 = vpop.f32.mrb[3].mxu1 }
  0xe9   : > { %v304_v21 = vmax.f32 %v274_v12, 0.0  ;;  %v277_v23 = vadd.f32 %v418_v6, %v276_v19  ;;  %v308_v26 = vmax.f32 %v290_v16, 0.0  ;;  %v293_v28 = vadd.f32 %v418_v6, %v292_v24 }
  0xea   : > { %v441_v25 = vpack.c.bf16 %v306_v15, %v306_v15  ;;  %v307_v27 = vmax.f32 %v285_v17, 0.0  ;;  %v445_v29 = vpack.c.bf16 %v310_v20, %v310_v20  ;;  %v311_v31 = vmax.f32 %v301_v22, 0.0 }
  0xeb   : > { %v439_v30 = vpack.c.bf16 %v304_v21, %v304_v21  ;;  %v305_v32 = vmax.f32 %v277_v23, 0.0  ;;  %v443_v33 = vpack.c.bf16 %v308_v26, %v308_v26  ;;  %v309_v35 = vmax.f32 %v293_v28, 0.0 }
  0xec   : > { %347 = vst.msk [vmem:[%s172_s27 + $0x8] sm:$0xf] %vm344_vm1, %v441_v25  ;;  %v442_v34 = vpack.c.bf16 %v307_v27, %v307_v27  ;;  %351 = vst.msk [vmem:[%s172_s27 + $0x18] sm:$0xf] %vm344_vm1, %v445_v29  ;;  %v446_v36 = vpack.c.bf16 %v311_v31, %v311_v31 }
  0xed   : > { %345 = vst.msk [vmem:[%s172_s27] sm:$0xf] %vm344_vm1, %v439_v30  ;;  %v440_v37 = vpack.c.bf16 %v305_v32, %v305_v32  ;;  %349 = vst.msk [vmem:[%s172_s27 + $0x10] sm:$0xf] %vm344_vm1, %v443_v33  ;;  %v444_v38 = vpack.c.bf16 %v309_v35, %v309_v35 }
  0xee   : > { %348 = vst.msk [vmem:[%s172_s27 + $0xc] sm:$0xf] %vm344_vm1, %v442_v34  ;;  %352 = vst.msk [vmem:[%s172_s27 + $0x1c] sm:$0xf] %vm344_vm1, %v446_v36 }
  0xef   : > { %346 = vst.msk [vmem:[%s172_s27 + $0x4] sm:$0xf] %vm344_vm1, %v440_v37  ;;  %350 = vst.msk [vmem:[%s172_s27 + $0x14] sm:$0xf] %vm344_vm1, %v444_v38 }
  0xf0 PF: > { %s13_s12 = sadd.s32 1, %s489_s12  }
  0xf1   : > { %p10_p4 = scmp.ge.s32.totalorder %s13_s12, 4  }
  0xf3   :  { %12 = sbr.rel (!%p10_p4) target bundleno = 1 (0x1), region = 62 }

// kernel: _lambda_.22
= control target key start
LH: loop header
LB: loop body
LE: loop exit
PB: predicated region body
PF: predicated region fallthrough
CT: control target
= control target key end

     0   :  { %s1222_s15 = smov 0   ;;  %s1331_s0 = inlined_call_operand.vmem [shape: bf16[8,16,8], index: 0, kind: input, shape index: {}]   ;;  %s1332_s1 = inlined_call_operand.vmem [shape: bf16[8,16,8], index: 1, kind: input, shape index: {}]   ;;  %s1333_s2 = inlined_call_operand.vmem [shape: bf16[8,16,32], index: 2, kind: input, shape index: {}]   ;;  %s1334_s3 = inlined_call_operand.vmem [shape: bf16[8,16,32], index: 3, kind: input, shape index: {}]   ;;  %s1335_s4 = inlined_call_operand.vmem [shape: bf16[8,16,32], index: 4, kind: output, shape index: {}]  }
   0x1 LB: > { %s987_s16 = sadd.s32 4294967295, %s1193_s15   ;;  %p991_p0 = scmp.ge.s32.totalorder %s1193_s15, 1  ;;  %s1193_s15 = sphi %s1222_s15, %s14_s15  }
   0x2   : > { %p200_p1 = scmp.lt.s32.totalorder %s1193_s15, 3 }
   0x4   : > { %p201_p2 = pnand %p991_p0, %p200_p1 }
   0x5   : > { %s992_s17 = sshll.u32 (!%p201_p2), %s987_s16, 2  ;;  %v1195_v0 = vmov (!%p201_p2), 0.0   ;;  %vm1196_vm0 = vmmov (!%p201_p2), 0   ;;  %vm308_vm1 = vcmask (!%p201_p2), 64512   ;;  %vm527_vm2 = vcmask (!%p201_p2), 130048  }
   0x6   : > { %204 = sbr.rel (%p201_p2) target bundleno = 788 (0x314), region = 36  ;;  %1085 = vmatprep.subr.bf16.mxu0 (!%p201_p2), %v1195_v0  ;;  %1091 = vmatprep.subr.bf16.mxu1 (!%p201_p2), %v1195_v0  ;;  %p247_p3 = scmp.lt.s32.totalorder (!%p201_p2), %s992_s17, 7  ;;  %vm884_vm3 = vcmask (!%p201_p2), 257024  }
   0x7   : > { %1087 = vmatprep.mubr.msk.bf16.mxu0 (!%p201_p2), %vm1196_vm0, %v1195_v0  ;;  %1093 = vmatprep.mubr.msk.bf16.mxu1 (!%p201_p2), %vm1196_vm0, %v1195_v0 }
   0xd   : > { %s1337_s17 = smov (!%p247_p3, %s992_s17), 7 }
   0xe   : > { %s1236_s18 = sshll.u32 %s1337_s17, 3 }
   0xf   : > { %s251_s21 = scalar_lea.vmem %s1331_s0, %s1236_s18  ;;  %s258_s24 = scalar_lea.vmem %s1332_s1, %s1236_s18 }
  0x10   : > { %v1143_v1 = vld [vmem:[%s251_s21] sm:$0xff]   ;;  %v1144_v2 = vld [vmem:[%s251_s21 + $0x8] sm:$0xff]   ;;  %v1147_v5 = vld [vmem:[%s251_s21 + $0x10] sm:$0xff]   ;;  %s1286_s27 = scalar_lea.vmem %s1333_s2, %s1236_s18  ;;  %s272_s30 = scalar_lea.vmem %s1334_s3, %s1236_s18 }
  0x11   : > { %v313_v3 = vsel %vm308_vm1, %v1143_v1, 0  ;;  %v370_v4 = vsel %vm308_vm1, %v1144_v2, 0  ;;  %v1148_v6 = vld [vmem:[%s251_s21 + $0x18] sm:$0xff]   ;;  %v1145_v7 = vld [vmem:[%s258_s24] sm:$0xff]   ;;  %v1146_v8 = vld [vmem:[%s258_s24 + $0x8] sm:$0xff]   ;;  %v427_v9 = vsel %vm308_vm1, %v1147_v5, 0  ;;  %s1310_s7 = scalar_lea.vmem %s1335_s4, %s1236_s18 }
  0x12   : > { %1086 = vmatpush3.bf16.xpose.msra.mxu0 %v313_v3  ;;  %1092 = vmatpush3.bf16.xpose.msra.mxu1 %v370_v4  ;;  %v484_v10 = vsel %vm308_vm1, %v1148_v6, 0  ;;  %v1149_v11 = vld [vmem:[%s258_s24 + $0x10] sm:$0xff]   ;;  %v1150_v12 = vld [vmem:[%s258_s24 + $0x18] sm:$0xff]  }
  0x13   : > { %1097 = vmatprep.subr.bf16.mxu0 %v1195_v0  ;;  %1103 = vmatprep.subr.bf16.mxu1 %v1195_v0 }
  0x19   : > { %1088 = vmatmul.mubr.msk.bf16.vlgmr.msra.gmra.mrb[0].mxu0 %vm308_vm1, %v1145_v7  ;;  %1094 = vmatmul.mubr.msk.bf16.vlgmr.msra.gmra.mrb[0].mxu1 %vm308_vm1, %v1146_v8 }
  0x1a   : > { %1098 = vmatpush3.bf16.xpose.msra.mxu0 %v427_v9  ;;  %1104 = vmatpush3.bf16.xpose.msra.mxu1 %v484_v10 }
  0x1b   : > { %1099 = vmatprep.mubr.msk.bf16.mxu0 %vm1196_vm0, %v1195_v0  ;;  %1105 = vmatprep.mubr.msk.bf16.mxu1 %vm1196_vm0, %v1195_v0 }
  0x1c   : > { %1109 = vmatprep.subr.bf16.mxu0 %v1195_v0  ;;  %1115 = vmatprep.subr.bf16.mxu1 %v1195_v0 }
  0x21   : > { %1100 = vmatmul.mubr.msk.bf16.vlgmr.msra.gmra.mrb[4].mxu0 %vm308_vm1, %v1149_v11  ;;  %1106 = vmatmul.mubr.msk.bf16.vlgmr.msra.gmra.mrb[4].mxu1 %vm308_vm1, %v1150_v12 }
  0x22   : > { %1111 = vmatprep.mubr.msk.bf16.mxu0 %vm1196_vm0, %v1195_v0  ;;  %1117 = vmatprep.mubr.msk.bf16.mxu1 %vm1196_vm0, %v1195_v0 }
  0xec   : > { %v349_v13 = vpop.f32.mrb[0].mxu0  ;;  %v406_v14 = vpop.f32.mrb[0].mxu1 }
  0xed   : > { %v1089_v15 = vpop.f32.mrb[1].mxu0  ;;  %v528_v16 = vsel %vm527_vm2, %v349_v13, -inf  ;;  %v534_v17 = vsel %vm527_vm2, %v406_v14, -inf  ;;  %v1095_v18 = vpop.f32.mrb[1].mxu1 }
  0xee   : > { %529 = vmax.xlane.f32.xlu0 %v528_v16  ;;  %v352_v19 = vpop.f32.mrb[2].mxu0  ;;  %535 = vmax.xlane.f32.xlu1 %v534_v17  ;;  %v409_v21 = vpop.f32.mrb[2].mxu1  ;;  %v1152_v15 = vld [vmem:[%s1286_s27 + $0x8] sm:$0xff]  }
  0xef   : > { %v1090_v20 = vpop.f32.mrb[3].mxu0  ;;  %v1096_v22 = vpop.f32.mrb[3].mxu1  ;;  %v537_v23 = vsel %vm527_vm2, %v409_v21, -inf  ;;  %v531_v24 = vsel %vm527_vm2, %v352_v19, -inf  ;;  %1116 = vmatpush3.bf16.msra.mxu1 %v1152_v15 }
  0xf0   : > { %1127 = vmatprep.subr.bf16.mxu1 %v1195_v0 }
  0xf2   : > { %532 = vmax.xlane.f32.xlu0 %v531_v24  ;;  %538 = vmax.xlane.f32.xlu1 %v537_v23 }
  0xf4   : > { %v463_v25 = vpop.f32.mrb[4].mxu0  ;;  %v520_v28 = vpop.f32.mrb[4].mxu1 }
  0xf5   : > { %v1101_v26 = vpop.f32.mrb[5].mxu0  ;;  %v540_v27 = vsel %vm527_vm2, %v463_v25, -inf  ;;  %v1107_v30 = vpop.f32.mrb[5].mxu1  ;;  %v546_v34 = vsel %vm527_vm2, %v520_v28, -inf }
  0xf6   : > { %541 = vmax.xlane.f32.xlu0 %v540_v27  ;;  %v466_v29 = vpop.f32.mrb[6].mxu0  ;;  %v523_v33 = vpop.f32.mrb[6].mxu1 }
  0xf7   : > { %v1102_v31 = vpop.f32.mrb[7].mxu0  ;;  %v543_v32 = vsel %vm527_vm2, %v466_v29, -inf  ;;  %v1108_v35 = vpop.f32.mrb[7].mxu1  ;;  %v549_v36 = vsel %vm527_vm2, %v523_v33, -inf }
  0xf8   : > { %544 = vmax.xlane.f32.xlu1 %v543_v32  ;;  %v1154_v35 = vld [vmem:[%s1286_s27 + $0x18] sm:$0xff]  }
  0xfa   : > { %547 = vmax.xlane.f32.xlu0 %v546_v34 }
  0xfc   : > { %550 = vmax.xlane.f32.xlu1 %v549_v36 }
 0x17b   : > { %v530_v37 = vpop.xlane.xlu0 %529  ;;  %v536_v38 = vpop.xlane.xlu1 %535 }
 0x17c   : > { %v552_v39 = vsub.f32 %v349_v13, %v530_v37  ;;  %v554_v40 = vsub.f32 %v406_v14, %v536_v38  ;;  %v1151_v14 = vld [vmem:[%s1286_s27] sm:$0xff]  }
 0x17d   : > { %1110 = vmatpush3.bf16.msra.mxu0 %v1151_v14 }
 0x17e   : > { %v560_v41 = vmul.f32 1.442695, %v552_v39  ;;  %v564_v42 = vmul.f32 1.442695, %v554_v40  ;;  %1121 = vmatprep.subr.bf16.mxu0 %v1195_v0 }
 0x17f   : > { %v533_v43 = vpop.xlane.xlu0 %532  ;;  %v539_v44 = vpop.xlane.xlu1 %538 }
 0x180   : > { %1155 = vpow2.f32 %v560_v41  ;;  %v553_v45 = vsub.f32 %v352_v19, %v533_v43  ;;  %v555_v46 = vsub.f32 %v409_v21, %v539_v44 }
 0x181   : > { %1157 = vpow2.f32 %v564_v42 }
 0x182   : > { %v562_v47 = vmul.f32 1.442695, %v553_v45  ;;  %v566_v48 = vmul.f32 1.442695, %v555_v46  ;;  %v1051_v46 = vld [vmem:[%s272_s30] sm:$0xff]  }
 0x183   : > { %v542_v49 = vpop.xlane.xlu0 %541 }
 0x184   : > { %1159 = vpow2.f32 %v562_v47  ;;  %v556_v50 = vsub.f32 %v463_v25, %v542_v49  ;;  %v1052_v47 = vunpack.c.l.bf16 %v1051_v46  ;;  %v1053_v49 = vunpack.c.h.bf16 %v1051_v46 }
 0x185   : > { %v545_v51 = vpop.xlane.xlu1 %544  ;;  %1161 = vpow2.f32 %v566_v48  ;;  %v1066_v48 = vld [vmem:[%s272_s30 + $0x8] sm:$0xff]  }
 0x186   : > { %v568_v52 = vmul.f32 1.442695, %v556_v50  ;;  %v557_v53 = vsub.f32 %v466_v29, %v545_v51  ;;  %v1153_v29 = vld [vmem:[%s1286_s27 + $0x10] sm:$0xff]  }
 0x187   : > { %v548_v54 = vpop.xlane.xlu0 %547 }
 0x188   : > { %1163 = vpow2.f32 %v568_v52  ;;  %v570_v55 = vmul.f32 1.442695, %v557_v53  ;;  %v558_v56 = vsub.f32 %v520_v28, %v548_v54  ;;  %v1056_v52 = vunpack.c.l.bf16 %v1066_v48  ;;  %v1067_v54 = vld [vmem:[%s272_s30 + $0x10] sm:$0xff]  }
 0x189   : > { %v551_v57 = vpop.xlane.xlu1 %550 }
 0x18a   : > { %v1156_v58 = vpop.eup %1155  ;;  %1165 = vpow2.f32 %v570_v55  ;;  %v572_v59 = vmul.f32 1.442695, %v558_v56  ;;  %v559_v60 = vsub.f32 %v523_v33, %v551_v57 }
 0x18b   : > { %v576_v61 = vsel %vm527_vm2, %v1156_v58, 0.0  ;;  %v1158_v62 = vpop.eup %1157 }
 0x18c   : > { %1167 = vpow2.f32 %v572_v59  ;;  %v574_v63 = vmul.f32 1.442695, %v559_v60  ;;  %577 = vadd.xlane.f32.xlu0 %v576_v61  ;;  %v582_v2 = vsel %vm527_vm2, %v1158_v62, 0.0 }
 0x18e   : > { %v1160_v1 = vpop.eup %1159  ;;  %1169 = vpow2.f32 %v574_v63  ;;  %v1060_v63 = vunpack.c.l.bf16 %v1067_v54 }
 0x18f   : > { %v579_v3 = vsel %vm527_vm2, %v1160_v1, 0.0  ;;  %v1162_v4 = vpop.eup %1161 }
 0x190   : > { %583 = vadd.xlane.f32.xlu0 %v582_v2  ;;  %580 = vadd.xlane.f32.xlu1 %v579_v3  ;;  %v585_v7 = vsel %vm527_vm2, %v1162_v4, 0.0  ;;  %v1068_v2 = vld [vmem:[%s272_s30 + $0x18] sm:$0xff]  }
 0x192   : > { %v1164_v5 = vpop.eup %1163 }
 0x193   : > { %v588_v6 = vsel %vm527_vm2, %v1164_v5, 0.0 }
 0x194   : > { %v1166_v8 = vpop.eup %1165  ;;  %589 = vadd.xlane.f32.xlu0 %v588_v6  ;;  %586 = vadd.xlane.f32.xlu1 %v585_v7  ;;  %v1061_v6 = vunpack.c.h.bf16 %v1067_v54 }
 0x195   : > { %v591_v11 = vsel %vm527_vm2, %v1166_v8, 0.0 }
 0x196   : > { %v1168_v9 = vpop.eup %1167 }
 0x197   : > { %v594_v10 = vsel %vm527_vm2, %v1168_v9, 0.0 }
 0x198   : > { %v1170_v12 = vpop.eup %1169  ;;  %595 = vadd.xlane.f32.xlu0 %v594_v10  ;;  %592 = vadd.xlane.f32.xlu1 %v591_v11  ;;  %v1064_v11 = vunpack.c.l.bf16 %v1068_v2 }
 0x199   : > { %v597_v13 = vsel %vm527_vm2, %v1170_v12, 0.0 }
 0x19c   : > { %598 = vadd.xlane.f32.xlu1 %v597_v13 }
 0x219   : > { %v578_v16 = vpop.xlane.xlu0 %577 }
 0x21a   : > { %1171 = vrcp.f32 %v578_v16  ;;  %v1065_v16 = vunpack.c.h.bf16 %v1068_v2 }
 0x21d   : > { %v584_v17 = vpop.xlane.xlu0 %583  ;;  %v581_v18 = vpop.xlane.xlu1 %580 }
 0x21e   : > { %1173 = vrcp.f32 %v581_v18 }
 0x21f   : > { %1175 = vrcp.f32 %v584_v17 }
 0x221   : > { %v590_v19 = vpop.xlane.xlu0 %589  ;;  %v587_v20 = vpop.xlane.xlu1 %586 }
 0x222   : > { %1177 = vrcp.f32 %v587_v20 }
 0x223   : > { %1179 = vrcp.f32 %v590_v19 }
 0x224   : > { %v1172_v23 = vpop.eup %1171 }
 0x225   : > { %v596_v21 = vpop.xlane.xlu0 %595  ;;  %v593_v22 = vpop.xlane.xlu1 %592  ;;  %v608_v26 = vmul.f32 %v1172_v23, %v1156_v58  ;;  %v1057_v58 = vunpack.c.h.bf16 %v1066_v48 }
 0x226   : > { %1181 = vrcp.f32 %v593_v22 }
 0x227   : > { %1183 = vrcp.f32 %v596_v21 }
 0x228   : > { %v1174_v24 = vpop.eup %1173 }
 0x229   : > { %v599_v25 = vpop.xlane.xlu1 %598  ;;  %v609_v27 = vmul.f32 %v1174_v24, %v1160_v1  ;;  %v1176_v28 = vpop.eup %1175 }
 0x22a   : > { %1185 = vrcp.f32 %v599_v25  ;;  %v610_v32 = vmul.f32 %v1176_v28, %v1158_v62 }
 0x22b   : > { %v616_v30 = vpack.c.bf16 %v609_v27, %v608_v26 }
 0x22c   : > { %v1178_v31 = vpop.eup %1177 }
 0x22d   : > { %v611_v33 = vmul.f32 %v1178_v31, %v1162_v4  ;;  %1112 = vmatmul.mubr.msk.bf16.vlgmr.msra.gmra.mrb[8].mxu0 %vm527_vm2, %v616_v30  ;;  %v1180_v34 = vpop.eup %1179 }
 0x22e   : > { %1122 = vmatpush3.bf16.msra.mxu0 %v1153_v29  ;;  %1123 = vmatprep.mubr.msk.bf16.mxu0 %vm1196_vm0, %v1195_v0  ;;  %v612_v39 = vmul.f32 %v1180_v34, %v1164_v5 }
 0x22f   : > { %v617_v36 = vpack.c.bf16 %v611_v33, %v610_v32 }
 0x230   : > { %v1182_v37 = vpop.eup %1181 }
 0x231   : > { %v1184_v38 = vpop.eup %1183  ;;  %v613_v40 = vmul.f32 %v1182_v37, %v1166_v8  ;;  %1118 = vmatmul.mubr.msk.bf16.vlgmr.msra.gmra.mrb[8].mxu1 %vm527_vm2, %v617_v36 }
 0x232   : > { %1128 = vmatpush3.bf16.msra.mxu1 %v1154_v35  ;;  %1129 = vmatprep.mubr.msk.bf16.mxu1 %vm1196_vm0, %v1195_v0  ;;  %v614_v43 = vmul.f32 %v1184_v38, %v1168_v9 }
 0x233   : > { %v618_v42 = vpack.c.bf16 %v613_v40, %v612_v39 }
 0x234   : > { %v1186_v41 = vpop.eup %1185 }
 0x235   : > { %v615_v44 = vmul.f32 %v1186_v41, %v1170_v12  ;;  %1124 = vmatmul.mubr.msk.bf16.vlgmr.msra.gmra.mrb[12].mxu0 %vm527_vm2, %v618_v42 }
 0x237   : > { %v619_v45 = vpack.c.bf16 %v615_v44, %v614_v43 }
 0x239   : > { %1130 = vmatmul.mubr.msk.bf16.vlgmr.msra.gmra.mrb[12].mxu1 %vm527_vm2, %v619_v45 }
 0x300   : > { %v671_v50 = vpop.f32.mrb[8].mxu0 }
 0x301   : > { %v844_v0 = vmul.f32 %v1052_v47, %v671_v50  ;;  %v1113_v51 = vpop.f32.mrb[9].mxu0 }
 0x302   : > { %v674_v53 = vpop.f32.mrb[10].mxu0 }
 0x303   : > { %v1042_v55 = vpack.c.bf16 %v844_v0, %v844_v0  ;;  %v845_v56 = vmul.f32 %v1053_v49, %v674_v53  ;;  %v1114_v57 = vpop.f32.mrb[11].mxu0 }
 0x304   : > { %v721_v59 = vpop.f32.mrb[8].mxu1 }
 0x305   : > { %885 = vst.msk [vmem:[%s1310_s7] sm:$0xf] %vm884_vm3, %v1042_v55  ;;  %v1043_v60 = vpack.c.bf16 %v845_v56, %v845_v56  ;;  %v846_v61 = vmul.f32 %v1056_v52, %v721_v59  ;;  %v1119_v62 = vpop.f32.mrb[9].mxu1 }
 0x306   : > { %v724_v1 = vpop.f32.mrb[10].mxu1 }
 0x307   : > { %886 = vst.msk [vmem:[%s1310_s7 + $0x4] sm:$0xf] %vm884_vm3, %v1043_v60  ;;  %v1044_v3 = vpack.c.bf16 %v846_v61, %v846_v61  ;;  %v847_v4 = vmul.f32 %v1057_v58, %v724_v1  ;;  %v1120_v5 = vpop.f32.mrb[11].mxu1 }
 0x308   : > { %v771_v7 = vpop.f32.mrb[12].mxu0 }
 0x309   : > { %887 = vst.msk [vmem:[%s1310_s7 + $0x8] sm:$0xf] %vm884_vm3, %v1044_v3  ;;  %v1045_v8 = vpack.c.bf16 %v847_v4, %v847_v4  ;;  %v848_v9 = vmul.f32 %v1060_v63, %v771_v7  ;;  %v1125_v10 = vpop.f32.mrb[13].mxu0 }
 0x30a   : > { %v774_v12 = vpop.f32.mrb[14].mxu0 }
 0x30b   : > { %888 = vst.msk [vmem:[%s1310_s7 + $0xc] sm:$0xf] %vm884_vm3, %v1045_v8  ;;  %v1046_v13 = vpack.c.bf16 %v848_v9, %v848_v9  ;;  %v849_v14 = vmul.f32 %v1061_v6, %v774_v12  ;;  %v1126_v15 = vpop.f32.mrb[15].mxu0 }
 0x30c   : > { %v821_v17 = vpop.f32.mrb[12].mxu1 }
 0x30d   : > { %889 = vst.msk [vmem:[%s1310_s7 + $0x10] sm:$0xf] %vm884_vm3, %v1046_v13  ;;  %v1047_v18 = vpack.c.bf16 %v849_v14, %v849_v14  ;;  %v850_v19 = vmul.f32 %v1064_v11, %v821_v17  ;;  %v1131_v20 = vpop.f32.mrb[13].mxu1 }
 0x30e   : > { %v824_v21 = vpop.f32.mrb[14].mxu1 }
 0x30f   : > { %890 = vst.msk [vmem:[%s1310_s7 + $0x14] sm:$0xf] %vm884_vm3, %v1047_v18  ;;  %v1048_v22 = vpack.c.bf16 %v850_v19, %v850_v19  ;;  %v851_v23 = vmul.f32 %v1065_v16, %v824_v21  ;;  %v1132_v24 = vpop.f32.mrb[15].mxu1 }
 0x311   : > { %891 = vst.msk [vmem:[%s1310_s7 + $0x18] sm:$0xf] %vm884_vm3, %v1048_v22  ;;  %v1049_v25 = vpack.c.bf16 %v851_v23, %v851_v23 }
 0x313   : > { %892 = vst.msk [vmem:[%s1310_s7 + $0x1c] sm:$0xf] %vm884_vm3, %v1049_v25 }
 0x314 PF: > { %s14_s15 = sadd.s32 1, %s1193_s15  }
 0x315   : > { %p11_p4 = scmp.ge.s32.totalorder %s14_s15, 4  }
 0x317   :  { %13 = sbr.rel (!%p11_p4) target bundleno = 1 (0x1), region = 75 }

// kernel: _lambda_.23
= control target key start
LH: loop header
LB: loop body
LE: loop exit
PB: predicated region body
PF: predicated region fallthrough
CT: control target
= control target key end

     0   :  { %s637_s12 = smov 0   ;;  %s715_s0 = inlined_call_operand.vmem [shape: bf16[32,288], index: 0, kind: input, shape index: {}]   ;;  %s716_s1 = inlined_call_operand.vmem [shape: bf16[288,64], index: 1, kind: input, shape index: {}]   ;;  %s717_s2 = inlined_call_operand.vmem [shape: f32[1,64], index: 2, kind: input, shape index: {}]   ;;  %s718_s3 = inlined_call_operand.vmem [shape: bf16[32,64], index: 3, kind: output, shape index: {}]  }
   0x1 LB: > { %s503_s13 = sadd.s32 4294967295, %s613_s12   ;;  %p507_p0 = scmp.ge.s32.totalorder %s613_s12, 1  ;;  %s613_s12 = sphi %s637_s12, %s13_s12  }
   0x2   : > { %p139_p1 = scmp.lt.s32.totalorder %s613_s12, 3 }
   0x4   : > { %p140_p2 = pnand %p507_p0, %p139_p1 }
   0x5   : > { %v585_v0 = vld [vmem:[%s716_s1 + $0x40] sm:$0xff] (!%p140_p2)   ;;  %v615_v2 = vmov (!%p140_p2), 0.0   ;;  %s508_s18 = sshll.u32 (!%p140_p2), %s503_s13, 1  ;;  %v587_v3 = vld [vmem:[%s716_s1 + $0x48] sm:$0xff] (!%p140_p2)   ;;  %v589_v5 = vld [vmem:[%s716_s1 + $0x50] sm:$0xff] (!%p140_p2)   ;;  %vm616_vm0 = vmmov (!%p140_p2), 0  }
   0x6   : > { %143 = sbr.rel (%p140_p2) target bundleno = 264 (0x108), region = 32  ;;  %v586_v1 = vld [vmem:[%s716_s1] sm:$0xff] (!%p140_p2)   ;;  %566 = vmatprep.subr.bf16.mxu1 (!%p140_p2), %v615_v2  ;;  %541 = vmatprep.subr.bf16.mxu0 (!%p140_p2), %v585_v0  ;;  %p165_p3 = scmp.lt.s32.totalorder (!%p140_p2), %s508_s18, 3  ;;  %v588_v4 = vld [vmem:[%s716_s1 + $0x8] sm:$0xff] (!%p140_p2)   ;;  %v590_v6 = vld [vmem:[%s716_s1 + $0x10] sm:$0xff] (!%p140_p2)   ;;  %vm348_vm1 = vcmask (!%p140_p2), 261120  }
   0x7   : > { %542 = vmatpush3.bf16.msra.mxu0 (!%p140_p2), %v586_v1  ;;  %570 = vmatprep.mubr.msk.bf16.mxu1 (!%p140_p2), %vm616_vm0, %v615_v2  ;;  %v591_v7 = vld [vmem:[%s716_s1 + $0x58] sm:$0xff] (!%p140_p2)   ;;  %v593_v9 = vld [vmem:[%s716_s1 + $0x60] sm:$0xff] (!%p140_p2)   ;;  %v595_v12 = vld [vmem:[%s716_s1 + $0x68] sm:$0xff] (!%p140_p2)   ;;  %vm444_vm2 = vcmask (!%p140_p2), 519168  }
   0x8   : > { %543 = vmatprep.subr.bf16.mxu0 (!%p140_p2), %v587_v3  ;;  %v592_v8 = vld [vmem:[%s716_s1 + $0x18] sm:$0xff] (!%p140_p2)   ;;  %v599_v10 = vld [vmem:[%s716_s1 + $0x80] sm:$0xff] (!%p140_p2)   ;;  %v596_v13 = vld [vmem:[%s716_s1 + $0x28] sm:$0xff] (!%p140_p2)  }
   0x9   : > { %v594_v11 = vld [vmem:[%s716_s1 + $0x20] sm:$0xff] (!%p140_p2)   ;;  %567 = vmatpush3.bf16.msra.mxu1 (!%p140_p2), %v599_v10  ;;  %v605_v15 = vld [vmem:[%s716_s1 + $0x88] sm:$0xff] (!%p140_p2)   ;;  %v597_v16 = vld [vmem:[%s716_s1 + $0x70] sm:$0xff] (!%p140_p2)  }
   0xa   : > { %568 = vmatprep.subr.bf16.mxu1 (!%p140_p2), %v615_v2  ;;  %v598_v18 = vld [vmem:[%s716_s1 + $0x30] sm:$0xff] (!%p140_p2)   ;;  %v600_v19 = vld [vmem:[%s716_s1 + $0x78] sm:$0xff] (!%p140_p2)   ;;  %v512_v28 = vld [vmem:[%s717_s2] ss:$0 sm:$0xff] (!%p140_p2) }
   0xb   : > { %544 = vmatpush3.bf16.msra.mxu0 (!%p140_p2), %v588_v4  ;;  %v601_v20 = vld [vmem:[%s716_s1 + $0x38] sm:$0xff] (!%p140_p2)  }
   0xc   : > { %545 = vmatprep.subr.bf16.mxu0 (!%p140_p2), %v589_v5 }
   0xd   : > { %s720_s18 = smov (!%p165_p3, %s508_s18), 3  ;;  %569 = vmatpush3.bf16.msra.mxu1 %v605_v15 }
   0xe   : > { %s574_s4 = smul.u32 12, %s720_s18  ;;  %s511_s5 = sshll.u32 %s720_s18, 2 }
   0xf   : > { %546 = vmatpush3.bf16.msra.mxu0 %v590_v6  ;;  %s175_s8 = scalar_lea.vmem %s718_s3, %s511_s5 }
  0x10   : > { %547 = vmatprep.subr.bf16.mxu0 %v591_v7  ;;  %s169_s14 = scalar_lea.vmem %s715_s0, %s574_s4 }
  0x11   : > { %v604_v14 = vld [vmem:[%s169_s14 + $0x4] ss:$12 sps:$4 sm:$0xff]   ;;  %v606_v17 = vld [vmem:[%s169_s14 + $0x8] ss:$12 sps:$4 sm:$0xff]   ;;  %v602_v21 = vld [vmem:[%s169_s14] ss:$12 sps:$4 sm:$0xff]  }
  0x12   : > { %384 = vmatprep.mubr.bf16.mxu0 %v604_v14  ;;  %571 = vmatmul.mubr.msk.bf16.vlgmr.msra.gmra.mrb[0].mxu1 %vm348_vm1, %v606_v17 }
  0x13   : > { %548 = vmatpush3.bf16.msra.mxu0 %v592_v8 }
  0x14   : > { %549 = vmatprep.subr.bf16.mxu0 %v593_v9 }
  0x17   : > { %550 = vmatpush3.bf16.msra.mxu0 %v594_v11 }
  0x18   : > { %551 = vmatprep.subr.bf16.mxu0 %v595_v12 }
  0x1b   : > { %552 = vmatpush3.bf16.msra.mxu0 %v596_v13 }
  0x1c   : > { %553 = vmatprep.subr.bf16.mxu0 %v597_v16 }
  0x1f   : > { %554 = vmatpush3.bf16.msra.mxu0 %v598_v18 }
  0x20   : > { %555 = vmatprep.subr.bf16.mxu0 %v600_v19 }
  0x23   : > { %556 = vmatpush3.bf16.msra.mxu0 %v601_v20 }
  0x26   : > { %385 = vmatmul.mubr.bf16.vlgmr.msra.gmra.mrb[0].mxu0 %v602_v21 }
  0xe5   : > { %v427_v22 = vpop.f32.mrb[0].mxu1 }
  0xe6   : > { %v572_v23 = vpop.f32.mrb[1].mxu1 }
  0xe7   : > { %v430_v24 = vpop.f32.mrb[2].mxu1 }
  0xe8   : > { %v573_v25 = vpop.f32.mrb[3].mxu1 }
  0xf9   : > { %v557_v26 = vpop.f32.mrb[0].mxu0 }
  0xfa   : > { %v558_v27 = vpop.f32.mrb[1].mxu0 }
  0xfb   : > { %v559_v29 = vadd.f32 %v558_v27, %v557_v26  ;;  %v560_v30 = vpop.f32.mrb[2].mxu0 }
  0xfc   : > { %v561_v31 = vpop.f32.mrb[3].mxu0 }
  0xfd   : > { %v387_v32 = vadd.f32 %v559_v29, %v512_v28  ;;  %v562_v33 = vadd.f32 %v561_v31, %v560_v30 }
  0xff   : > { %v428_v34 = vadd.f32 %v427_v22, %v387_v32  ;;  %v390_v35 = vadd.f32 %v562_v33, %v512_v28 }
 0x101   : > { %v434_v36 = vmax.f32 %v428_v34, 0.0  ;;  %v431_v37 = vadd.f32 %v430_v24, %v390_v35 }
 0x103   : > { %v539_v38 = vpack.c.bf16 %v434_v36, %v434_v36  ;;  %v435_v39 = vmax.f32 %v431_v37, 0.0 }
 0x105   : > { %445 = vst.msk [vmem:[%s175_s8] sm:$0xf] %vm444_vm2, %v539_v38  ;;  %v540_v40 = vpack.c.bf16 %v435_v39, %v435_v39 }
 0x107   : > { %446 = vst.msk [vmem:[%s175_s8 + $0x4] sm:$0xf] %vm444_vm2, %v540_v40 }
 0x108 PF: > { %s13_s12 = sadd.s32 1, %s613_s12  }
 0x109   : > { %p10_p4 = scmp.ge.s32.totalorder %s13_s12, 4  }
 0x10b   :  { %12 = sbr.rel (!%p10_p4) target bundleno = 1 (0x1), region = 62 }

// kernel: _lambda_.24
= control target key start
LH: loop header
LB: loop body
LE: loop exit
PB: predicated region body
PF: predicated region fallthrough
CT: control target
= control target key end

     0   :  { %vm200_vm0 = vcmask 519168   ;;  %s342_s1 = inlined_call_operand.vmem [shape: bf16[256,64], index: 1, kind: input, shape index: {}]   ;;  %s343_s0 = inlined_call_operand.vmem [shape: bf16[8,256], index: 0, kind: input, shape index: {}]   ;;  %s344_s2 = inlined_call_operand.vmem [shape: f32[1,64], index: 2, kind: input, shape index: {}]   ;;  %s345_s3 = inlined_call_operand.vmem [shape: bf16[8,64], index: 3, kind: output, shape index: {}]  }
   0x1   :  { %v247_v0 = vld [vmem:[%s342_s1 + $0x40] sm:$0xff]   ;;  %v249_v2 = vld [vmem:[%s342_s1 + $0x48] sm:$0xff]   ;;  %v251_v4 = vld [vmem:[%s342_s1 + $0x50] sm:$0xff]  }
   0x2   :  { %v248_v1 = vld [vmem:[%s342_s1] sm:$0xff]   ;;  %225 = vmatprep.subr.bf16.mxu0 %v247_v0  ;;  %v250_v3 = vld [vmem:[%s342_s1 + $0x8] sm:$0xff]   ;;  %v252_v5 = vld [vmem:[%s342_s1 + $0x10] sm:$0xff]  }
   0x3   :  { %226 = vmatpush3.bf16.msra.mxu0 %v248_v1  ;;  %v253_v6 = vld [vmem:[%s342_s1 + $0x58] sm:$0xff]   ;;  %v255_v8 = vld [vmem:[%s342_s1 + $0x60] sm:$0xff]   ;;  %v257_v10 = vld [vmem:[%s342_s1 + $0x68] sm:$0xff]  }
   0x4   :  { %227 = vmatprep.subr.bf16.mxu0 %v249_v2  ;;  %v254_v7 = vld [vmem:[%s342_s1 + $0x18] sm:$0xff]   ;;  %v256_v9 = vld [vmem:[%s342_s1 + $0x20] sm:$0xff]   ;;  %v258_v13 = vld [vmem:[%s342_s1 + $0x28] sm:$0xff]  }
   0x5   :  { %v15_v11 = vld [vmem:[%s343_s0] sm:$0xff]  ;;  %v259_v14 = vld [vmem:[%s342_s1 + $0x70] sm:$0xff]   ;;  %v261_v16 = vld [vmem:[%s342_s1 + $0x78] sm:$0xff]  }
   0x6   :  { %v208_v12 = vcombine.high %v15_v11, %v15_v11  ;;  %v260_v15 = vld [vmem:[%s342_s1 + $0x30] sm:$0xff]   ;;  %v262_v17 = vld [vmem:[%s342_s1 + $0x38] sm:$0xff]   ;;  %v207_v18 = vcombine.low %v15_v11, %v15_v11  ;;  %v206_v20 = vld [vmem:[%s344_s2] ss:$0 sm:$0xff] }
   0x7   :  { %228 = vmatpush3.bf16.msra.mxu0 %v250_v3 }
   0x8   :  { %229 = vmatprep.subr.bf16.mxu0 %v251_v4  ;;  %190 = vmatprep.mubr.bf16.mxu0 %v208_v12 }
   0xb   :  { %230 = vmatpush3.bf16.msra.mxu0 %v252_v5 }
   0xc   :  { %231 = vmatprep.subr.bf16.mxu0 %v253_v6 }
   0xf   :  { %232 = vmatpush3.bf16.msra.mxu0 %v254_v7 }
  0x10   :  { %233 = vmatprep.subr.bf16.mxu0 %v255_v8 }
  0x13   :  { %234 = vmatpush3.bf16.msra.mxu0 %v256_v9 }
  0x14   :  { %235 = vmatprep.subr.bf16.mxu0 %v257_v10 }
  0x17   :  { %236 = vmatpush3.bf16.msra.mxu0 %v258_v13 }
  0x18   :  { %237 = vmatprep.subr.bf16.mxu0 %v259_v14 }
  0x1b   :  { %238 = vmatpush3.bf16.msra.mxu0 %v260_v15 }
  0x1c   :  { %239 = vmatprep.subr.bf16.mxu0 %v261_v16 }
  0x1f   :  { %240 = vmatpush3.bf16.msra.mxu0 %v262_v17 }
  0x22   :  { %191 = vmatmul.mubr.bf16.vlgmr.msra.gmra.mrb[0].mxu0 %v207_v18 }
  0xf5   :  { %v241_v19 = vpop.f32.mrb[0].mxu0 }
  0xf6   :  { %v242_v21 = vpop.f32.mrb[1].mxu0 }
  0xf7   :  { %v243_v22 = vadd.f32 %v242_v21, %v241_v19  ;;  %v244_v23 = vpop.f32.mrb[2].mxu0 }
  0xf8   :  { %v245_v24 = vpop.f32.mrb[3].mxu0 }
  0xf9   :  { %v193_v25 = vadd.f32 %v243_v22, %v206_v20 }
  0xfb   :  { %v198_v26 = vmax.f32 %v193_v25, 0.0 }
  0xfd   :  { %v199_v27 = vpack.c.bf16 %v198_v26, %v198_v26 }
  0xff   :  { %201 = vst.msk [vmem:[%s345_s3] sm:$0xf] %vm200_vm0, %v199_v27 }

// kernel: _lambda_.25
= control target key start
LH: loop header
LB: loop body
LE: loop exit
PB: predicated region body
PF: predicated region fallthrough
CT: control target
= control target key end

     0   :  { %v503_v3 = vmov 0   ;;  %vm250_vm0 = vcmask 523264   ;;  %s646_s1 = inlined_call_operand.vmem [shape: bf16[64,1024], index: 1, kind: input, shape index: {}]   ;;  %s647_s0 = inlined_call_operand.vmem [shape: bf16[8,64], index: 0, kind: input, shape index: {}]   ;;  %s648_s2 = inlined_call_operand.vmem [shape: f32[1,1024], index: 2, kind: input, shape index: {}]   ;;  %s649_s3 = inlined_call_operand.vmem [shape: bf16[8,1024], index: 3, kind: output, shape index: {}]  }
   0x1   :  { %v16_v0 = vld [vmem:[%s646_s1] sm:$0xff]  ;;  %v17_v2 = vld [vmem:[%s646_s1 + $0x8] sm:$0xff]  ;;  %286 = vmatprep.mubr.bf16.mxu0 %v503_v3  ;;  %327 = vmatprep.mubr.bf16.mxu1 %v503_v3  ;;  %v18_v31 = vld [vmem:[%s646_s1 + $0x10] sm:$0xff] }
   0x2   :  { %v20_v1 = vld [vmem:[%s646_s1 + $0x20] sm:$0xff]  ;;  %v21_v5 = vld [vmem:[%s646_s1 + $0x28] sm:$0xff]  ;;  %v22_v32 = vld [vmem:[%s646_s1 + $0x30] sm:$0xff] }
   0x3   :  { %v459_v4 = vcombine.high %v16_v0, %v20_v1  ;;  %v458_v6 = vcombine.low %v16_v0, %v20_v1  ;;  %v24_v7 = vld [vmem:[%s646_s1 + $0x40] sm:$0xff]  ;;  %v461_v9 = vcombine.high %v17_v2, %v21_v5  ;;  %v460_v10 = vcombine.low %v17_v2, %v21_v5  ;;  %v25_v12 = vld [vmem:[%s646_s1 + $0x48] sm:$0xff]  ;;  %v19_v33 = vld [vmem:[%s646_s1 + $0x18] sm:$0xff] }
   0x4   :  { %v28_v8 = vld [vmem:[%s646_s1 + $0x60] sm:$0xff]  ;;  %v29_v13 = vld [vmem:[%s646_s1 + $0x68] sm:$0xff]  ;;  %v23_v34 = vld [vmem:[%s646_s1 + $0x38] sm:$0xff]  ;;  %v463_v37 = vcombine.high %v18_v31, %v22_v32  ;;  %v462_v44 = vcombine.low %v18_v31, %v22_v32  ;;  %v50_v2 = vlaneseq }
   0x5   :  { %v467_v11 = vcombine.high %v24_v7, %v28_v8  ;;  %v32_v14 = vld [vmem:[%s646_s1 + $0x80] sm:$0xff]  ;;  %254 = vmatprep.subr.bf16.mxu0 %v459_v4  ;;  %v469_v15 = vcombine.high %v25_v12, %v29_v13  ;;  %v33_v17 = vld [vmem:[%s646_s1 + $0x88] sm:$0xff]  ;;  %295 = vmatprep.subr.bf16.mxu1 %v461_v9  ;;  %v466_v19 = vcombine.low %v24_v7, %v28_v8  ;;  %v26_v39 = vld [vmem:[%s646_s1 + $0x50] sm:$0xff] }
   0x6   :  { %v36_v16 = vld [vmem:[%s646_s1 + $0xa0] sm:$0xff]  ;;  %v37_v18 = vld [vmem:[%s646_s1 + $0xa8] sm:$0xff]  ;;  %255 = vmatpush1.bf16.msra.mxu0 %v458_v6  ;;  %296 = vmatpush1.bf16.msra.mxu1 %v460_v10  ;;  %v468_v20 = vcombine.low %v25_v12, %v29_v13  ;;  %v465_v38 = vcombine.high %v19_v33, %v23_v34  ;;  %v30_v40 = vld [vmem:[%s646_s1 + $0x70] sm:$0xff]  ;;  %v464_v45 = vcombine.low %v19_v33, %v23_v34 }
   0x7   :  { %256 = vmatprep.subr.bf16.mxu0 %v467_v11  ;;  %v475_v21 = vcombine.high %v32_v14, %v36_v16  ;;  %297 = vmatprep.subr.bf16.mxu1 %v469_v15  ;;  %v477_v22 = vcombine.high %v33_v17, %v37_v18  ;;  %v40_v23 = vld [vmem:[%s646_s1 + $0xc0] sm:$0xff]  ;;  %v41_v25 = vld [vmem:[%s646_s1 + $0xc8] sm:$0xff]  ;;  %v474_v27 = vcombine.low %v32_v14, %v36_v16  ;;  %v27_v41 = vld [vmem:[%s646_s1 + $0x58] sm:$0xff] }
   0x8   :  { %v44_v24 = vld [vmem:[%s646_s1 + $0xe0] sm:$0xff]  ;;  %v45_v26 = vld [vmem:[%s646_s1 + $0xe8] sm:$0xff]  ;;  %v476_v28 = vcombine.low %v33_v17, %v37_v18  ;;  %v31_v42 = vld [vmem:[%s646_s1 + $0x78] sm:$0xff]  ;;  %v471_v46 = vcombine.high %v26_v39, %v30_v40  ;;  %v470_v52 = vcombine.low %v26_v39, %v30_v40 }
   0x9   :  { %v483_v29 = vcombine.high %v40_v23, %v44_v24  ;;  %v485_v30 = vcombine.high %v41_v25, %v45_v26  ;;  %v482_v35 = vcombine.low %v40_v23, %v44_v24  ;;  %v484_v36 = vcombine.low %v41_v25, %v45_v26  ;;  %v15_v43 = vld [vmem:[%s647_s0] sm:$0xf]  ;;  %v34_v48 = vld [vmem:[%s646_s1 + $0x90] sm:$0xff]  ;;  %v35_v50 = vld [vmem:[%s646_s1 + $0x98] sm:$0xff] }
   0xa   :  { %257 = vmatpush1.bf16.msra.mxu0 %v466_v19  ;;  %298 = vmatpush1.bf16.msra.mxu1 %v468_v20  ;;  %v473_v47 = vcombine.high %v27_v41, %v31_v42  ;;  %v38_v49 = vld [vmem:[%s646_s1 + $0xb0] sm:$0xff]  ;;  %v39_v51 = vld [vmem:[%s646_s1 + $0xb8] sm:$0xff]  ;;  %v472_v53 = vcombine.low %v27_v41, %v31_v42  ;;  %v48_v5 = vld [vmem:[%s648_s2] sm:$0xff] }
   0xb   :  { %258 = vmatprep.subr.bf16.mxu0 %v475_v21  ;;  %299 = vmatprep.subr.bf16.mxu1 %v477_v22  ;;  %v479_v54 = vcombine.high %v34_v48, %v38_v49  ;;  %v481_v55 = vcombine.high %v35_v50, %v39_v51  ;;  %v42_v56 = vld [vmem:[%s646_s1 + $0xd0] sm:$0xff]  ;;  %v43_v58 = vld [vmem:[%s646_s1 + $0xd8] sm:$0xff]  ;;  %v478_v60 = vcombine.low %v34_v48, %v38_v49 }
   0xc   :  { %v46_v57 = vld [vmem:[%s646_s1 + $0xf0] sm:$0xff]  ;;  %v47_v59 = vld [vmem:[%s646_s1 + $0xf8] sm:$0xff]  ;;  %v480_v61 = vcombine.low %v35_v50, %v39_v51 }
   0xd   :  { %v487_v62 = vcombine.high %v42_v56, %v46_v57  ;;  %v489_v63 = vcombine.high %v43_v58, %v47_v59  ;;  %v486_v0 = vcombine.low %v42_v56, %v46_v57  ;;  %v488_v1 = vcombine.low %v43_v58, %v47_v59 }
   0xe   :  { %259 = vmatpush1.bf16.msra.mxu0 %v474_v27  ;;  %300 = vmatpush1.bf16.msra.mxu1 %v476_v28 }
   0xf   :  { %260 = vmatprep.subr.bf16.mxu0 %v483_v29  ;;  %301 = vmatprep.subr.bf16.mxu1 %v485_v30 }
  0x12   :  { %261 = vmatpush1.bf16.msra.mxu0 %v482_v35  ;;  %302 = vmatpush1.bf16.msra.mxu1 %v484_v36 }
  0x13   :  { %336 = vmatprep.subr.bf16.mxu0 %v463_v37  ;;  %377 = vmatprep.subr.bf16.mxu1 %v465_v38 }
  0x15   :  { %490 = vmatmul.mubr.msk.bf16.vlgmr.msra.gmra.mrb[0].mxu0 %vm250_vm0, %v15_v43  ;;  %491 = vmatmul.mubr.msk.bf16.vlgmr.msra.gmra.mrb[0].mxu1 %vm250_vm0, %v15_v43 }
  0x16   :  { %337 = vmatpush1.bf16.msra.mxu0 %v462_v44  ;;  %378 = vmatpush1.bf16.msra.mxu1 %v464_v45 }
  0x17   :  { %338 = vmatprep.subr.bf16.mxu0 %v471_v46  ;;  %379 = vmatprep.subr.bf16.mxu1 %v473_v47 }
  0x18   :  { %368 = vmatprep.mubr.bf16.mxu0 %v503_v3  ;;  %409 = vmatprep.mubr.bf16.mxu1 %v503_v3  ;;  %v51_v3 = vshrl.u32 %v50_v2, 7 }
  0x1a   :  { %339 = vmatpush1.bf16.msra.mxu0 %v470_v52  ;;  %380 = vmatpush1.bf16.msra.mxu1 %v472_v53  ;;  %v52_v4 = vsub.s32 0, %v51_v3  ;;  %v60_v6 = vsub.s32 2, %v51_v3  ;;  %v56_v7 = vsub.s32 1, %v51_v3  ;;  %v64_v8 = vsub.s32 3, %v51_v3 }
  0x1b   :  { %340 = vmatprep.subr.bf16.mxu0 %v479_v54  ;;  %381 = vmatprep.subr.bf16.mxu1 %v481_v55  ;;  %v68_v27 = vsub.s32 4, %v51_v3  ;;  %v76_v28 = vsub.s32 6, %v51_v3  ;;  %v72_v29 = vsub.s32 5, %v51_v3  ;;  %v80_v30 = vsub.s32 7, %v51_v3 }
  0x1c   :  { %v53_v9 = vrot.slane %v48_v5, %v52_v4  ;;  %v61_v10 = vrot.slane %v48_v5, %v60_v6  ;;  %v57_v11 = vrot.slane %v48_v5, %v56_v7  ;;  %v65_v12 = vrot.slane %v48_v5, %v64_v8 }
  0x1d   :  { %v69_v31 = vrot.slane %v48_v5, %v68_v27  ;;  %v77_v32 = vrot.slane %v48_v5, %v76_v28  ;;  %v73_v33 = vrot.slane %v48_v5, %v72_v29  ;;  %v81_v34 = vrot.slane %v48_v5, %v80_v30 }
  0x1e   :  { %341 = vmatpush1.bf16.msra.mxu0 %v478_v60  ;;  %382 = vmatpush1.bf16.msra.mxu1 %v480_v61 }
  0x1f   :  { %342 = vmatprep.subr.bf16.mxu0 %v487_v62  ;;  %383 = vmatprep.subr.bf16.mxu1 %v489_v63 }
  0x22   :  { %343 = vmatpush1.bf16.msra.mxu0 %v486_v0  ;;  %384 = vmatpush1.bf16.msra.mxu1 %v488_v1 }
  0x25   :  { %492 = vmatmul.mubr.msk.bf16.vlgmr.msra.gmra.mrb[4].mxu0 %vm250_vm0, %v15_v43  ;;  %493 = vmatmul.mubr.msk.bf16.vlgmr.msra.gmra.mrb[4].mxu1 %vm250_vm0, %v15_v43 }
  0xe8   :  { %v288_v13 = vpop.f32.mrb[0].mxu0  ;;  %v329_v15 = vpop.f32.mrb[0].mxu1 }
  0xe9   :  { %v289_v14 = vadd.f32 %v288_v13, %v53_v9  ;;  %v290_v16 = vpop.f32.mrb[1].mxu0  ;;  %v330_v17 = vadd.f32 %v329_v15, %v61_v10  ;;  %v331_v19 = vpop.f32.mrb[1].mxu1 }
  0xea   :  { %v291_v18 = vadd.f32 %v290_v16, %v57_v11  ;;  %v292_v20 = vpop.f32.mrb[2].mxu0  ;;  %v332_v21 = vadd.f32 %v331_v19, %v65_v12  ;;  %v333_v22 = vpop.f32.mrb[2].mxu1 }
  0xeb   :  { %v293_v23 = vpop.f32.mrb[3].mxu0  ;;  %v334_v25 = vpop.f32.mrb[3].mxu1 }
  0xec   :  { %v498_v24 = vpack.c.bf16 %v291_v18, %v289_v14  ;;  %v499_v26 = vpack.c.bf16 %v332_v21, %v330_v17 }
  0xee   :  { %450 = vst [vmem:[%s649_s3] sm:$0xff] %v498_v24  ;;  %451 = vst [vmem:[%s649_s3 + $0x8] sm:$0xff] %v499_v26 }
  0xf8   :  { %v370_v35 = vpop.f32.mrb[4].mxu0  ;;  %v411_v37 = vpop.f32.mrb[4].mxu1 }
  0xf9   :  { %v371_v36 = vadd.f32 %v370_v35, %v69_v31  ;;  %v372_v38 = vpop.f32.mrb[5].mxu0  ;;  %v412_v39 = vadd.f32 %v411_v37, %v77_v32  ;;  %v413_v41 = vpop.f32.mrb[5].mxu1 }
  0xfa   :  { %v373_v40 = vadd.f32 %v372_v38, %v73_v33  ;;  %v374_v42 = vpop.f32.mrb[6].mxu0  ;;  %v414_v43 = vadd.f32 %v413_v41, %v81_v34  ;;  %v415_v44 = vpop.f32.mrb[6].mxu1 }
  0xfb   :  { %v375_v45 = vpop.f32.mrb[7].mxu0  ;;  %v416_v47 = vpop.f32.mrb[7].mxu1 }
  0xfc   :  { %v500_v46 = vpack.c.bf16 %v373_v40, %v371_v36  ;;  %v501_v48 = vpack.c.bf16 %v414_v43, %v412_v39 }
  0xfe   :  { %452 = vst [vmem:[%s649_s3 + $0x10] sm:$0xff] %v500_v46  ;;  %453 = vst [vmem:[%s649_s3 + $0x18] sm:$0xff] %v501_v48 }

// kernel: _lambda_.26
= control target key start
LH: loop header
LB: loop body
LE: loop exit
PB: predicated region body
PF: predicated region fallthrough
CT: control target
= control target key end

     0   :  { %s918_s9 = smov 0   ;;  %s920_s10 = smov 0   ;;  %s1061_s0 = inlined_call_operand.vmem [shape: bf16[4,2,1024], index: 0, kind: input, shape index: {}]   ;;  %s1062_s1 = inlined_call_operand.vmem [shape: bf16[2,128,512], index: 1, kind: input, shape index: {}]   ;;  %s1063_s2 = inlined_call_operand.vmem [shape: bf16[4,2,256], index: 2, kind: output, shape index: {}]  }
   0x1   :  { %s922_s11 = smov 0  }
   0x2 LB: > { %s934_s12 = sadd.s32 4294967295, %s887_s11   ;;  %s937_s13 = sadd.s32 1, %s887_s11   ;;  %s887_s11 = sphi %s922_s11, %s1067_s11   ;;  %s883_s10 = sphi %s920_s10, %s1066_s10   ;;  %s879_s9 = sphi %s918_s9, %s1065_s9  }
   0x3   : > { %s16_s14 = ssub.s32 %s887_s11, %s937_s13  ;;  %s19_s15 = sadd.s32 1, %s883_s10 }
   0x4   : > { %p17_p0 = scmp.eq.s32.totalorder %s16_s14, 0  ;;  %p26_p1 = scmp.ne.s32.totalorder %s883_s10, %s879_s9 }
   0x5   : > { %p27_p2 = scmp.eq.s32.totalorder %s887_s11, 0  ;;  %p82_p3 = scmp.eq.s32.totalorder %s934_s12, 1 }
   0x6   : > { %s947_s16 = scalar_select %p17_p0, %s883_s10, %s19_s15  }
   0x7   : > { %p28_p4 = por %p27_p2, %p26_p1  ;;  %p949_p5 = por %p82_p3, %p26_p1 }
   0x8   : > { %p694_p6 = scmp.ge.s32.totalorder %s887_s11, 2 }
   0xa   : > { %104 = sbr.rel (%p694_p6) target bundleno = 24 (0x18), region = 16 }
  0x11   : > { %107 = sbr.rel (!%p28_p4) target bundleno = 24 (0x18), region = 20  ;;  %s109_s18 = sand.u32 (%p28_p4), 1, %s883_s10  }
  0x12   : > { %s696_s19 = sshll.u32 (%p28_p4), %s887_s11, 2  ;;  %s695_s20 = sshll.u32 (%p28_p4), %s109_s18, 4 }
  0x13   : > { %s113_s23 = scalar_lea.vmem (%p28_p4), %s1061_s0, %s696_s19  ;;  %s111_s24 = scalar_lea.vmem (%p28_p4), [#allocation2], %s695_s20 }
  0x14   : > { %v129_v0 = vld [vmem:[%s113_s23] sm:$0xf] (%p28_p4)  ;;  %v131_v1 = vld [vmem:[%s113_s23 + $0x8] sm:$0xf] (%p28_p4)  ;;  %v133_v2 = vld [vmem:[%s113_s23 + $0x10] sm:$0xf] (%p28_p4) }
  0x15   : > { %130 = vst [vmem:[%s111_s24] sm:$0xf] (%p28_p4), %v129_v0  ;;  %132 = vst [vmem:[%s111_s24 + $0x4] sm:$0xf] (%p28_p4), %v131_v1  ;;  %v135_v3 = vld [vmem:[%s113_s23 + $0x18] sm:$0xf] (%p28_p4) }
  0x16   : > { %134 = vst [vmem:[%s111_s24 + $0x8] sm:$0xf] (%p28_p4), %v133_v2  ;;  %136 = vst [vmem:[%s111_s24 + $0xc] sm:$0xf] (%p28_p4), %v135_v3 }
  0x18 PF: > { %p697_p7 = scmp.ge.s32.totalorder %s887_s11, 1  ;;  %p174_p8 = scmp.lt.s32.totalorder %s887_s11, 3 }
  0x1a   : > { %p175_p9 = pnand %p697_p7, %p174_p8 }
  0x1b   : > { %s181_s25 = sand.u32 (!%p175_p9), 1, %s879_s9   ;;  %p207_p10 = scmp.lt.s32.totalorder (!%p175_p9), %s934_s12, 1  ;;  %v974_v4 = vmov (!%p175_p9), 0.0   ;;  %v976_v5 = vmov (!%p175_p9), 0  }
  0x1c   : > { %178 = sbr.rel (%p175_p9) target bundleno = 353 (0x161), region = 65  ;;  %s963_s26 = sshll.u32 (!%p175_p9), %s181_s25, 4 }
  0x1d   : > { %s699_s27 = sshll.u32 (!%p175_p9), %s181_s25, 2  ;;  %s183_s5 = scalar_lea.vmem (!%p175_p9), [#allocation2], %s963_s26 }
  0x1e   : > { %s972_s6 = scalar_lea.vmem (!%p175_p9), [#allocation3], %s699_s27  ;;  %s978_s7 = smov (!%p175_p9), 0  }
  0x23   : > { %s208_s28 = scalar_select %p207_p10, %s934_s12, 1 }
  0x25   : > { %s738_s29 = sshll.u32 %s208_s28, 8 }
  0x26   : > { %s969_s4 = scalar_lea.vmem %s1062_s1, %s738_s29 }
  0x27 LB: >> { %v789_v6 = vld [vmem:[%s969_s4 + $0x4] ss:$16 sps:$4 sm:$0xff]   ;;  %v791_v7 = vld [vmem:[%s969_s4 + $0xc] ss:$16 sps:$4 sm:$0xff]   ;;  %v901_v8 = vmov 0   ;;  %p221_p11 = scmp.eq.s32.totalorder %s934_s12, 0  ;;  %v511_v41 = vlaneseq  ;;  %s899_s7 = sphi %s978_s7, %s218_s7   ;;  %v895_v5 = vphi %v976_v5, %v556_v5   ;;  %v891_v4 = vphi %v974_v4, %v553_v4  }
  0x28   : >> { %452 = vmatprep.mubr.bf16.mxu0 %v901_v8  ;;  %493 = vmatprep.mubr.bf16.mxu1 %v901_v8  ;;  %v793_v9 = vld [vmem:[%s969_s4] ss:$16 sps:$4 sm:$0xff]   ;;  %v794_v10 = vld [vmem:[%s969_s4 + $0x8] ss:$16 sps:$4 sm:$0xff]   ;;  %v795_v11 = vld [vmem:[%s969_s4 + $0x24] ss:$16 sps:$4 sm:$0xff]  }
  0x29   : >> { %420 = vmatprep.subr.bf16.mxu0 %v789_v6  ;;  %461 = vmatprep.subr.bf16.mxu1 %v791_v7  ;;  %v797_v12 = vld [vmem:[%s969_s4 + $0x2c] ss:$16 sps:$4 sm:$0xff]   ;;  %v799_v13 = vld [vmem:[%s969_s4 + $0x20] ss:$16 sps:$4 sm:$0xff]   ;;  %v800_v14 = vld [vmem:[%s969_s4 + $0x28] ss:$16 sps:$4 sm:$0xff]  }
  0x2a   : >> { %421 = vmatpush1.bf16.msra.mxu0 %v793_v9  ;;  %462 = vmatpush1.bf16.msra.mxu1 %v794_v10  ;;  %v801_v15 = vld [vmem:[%s969_s4 + $0x44] ss:$16 sps:$4 sm:$0xff]   ;;  %v803_v16 = vld [vmem:[%s969_s4 + $0x4c] ss:$16 sps:$4 sm:$0xff]   ;;  %v805_v17 = vld [vmem:[%s969_s4 + $0x40] ss:$16 sps:$4 sm:$0xff]  }
  0x2b   : >> { %422 = vmatprep.subr.bf16.mxu0 %v795_v11  ;;  %463 = vmatprep.subr.bf16.mxu1 %v797_v12  ;;  %v806_v18 = vld [vmem:[%s969_s4 + $0x48] ss:$16 sps:$4 sm:$0xff]   ;;  %v807_v19 = vld [vmem:[%s969_s4 + $0x64] ss:$16 sps:$4 sm:$0xff]   ;;  %v809_v20 = vld [vmem:[%s969_s4 + $0x6c] ss:$16 sps:$4 sm:$0xff]  }
  0x2c   : >> { %v811_v21 = vld [vmem:[%s969_s4 + $0x60] ss:$16 sps:$4 sm:$0xff]   ;;  %v812_v22 = vld [vmem:[%s969_s4 + $0x68] ss:$16 sps:$4 sm:$0xff]   ;;  %v813_v23 = vld [vmem:[%s969_s4 + $0x84] ss:$16 sps:$4 sm:$0xff]  }
  0x2d   : >> { %v815_v24 = vld [vmem:[%s969_s4 + $0x8c] ss:$16 sps:$4 sm:$0xff]   ;;  %v817_v25 = vld [vmem:[%s969_s4 + $0x80] ss:$16 sps:$4 sm:$0xff]   ;;  %v818_v26 = vld [vmem:[%s969_s4 + $0x88] ss:$16 sps:$4 sm:$0xff]  }
  0x2e   : >> { %423 = vmatpush1.bf16.msra.mxu0 %v799_v13  ;;  %464 = vmatpush1.bf16.msra.mxu1 %v800_v14  ;;  %v819_v27 = vld [vmem:[%s969_s4 + $0xa4] ss:$16 sps:$4 sm:$0xff]   ;;  %v821_v28 = vld [vmem:[%s969_s4 + $0xac] ss:$16 sps:$4 sm:$0xff]   ;;  %v823_v29 = vld [vmem:[%s969_s4 + $0xa0] ss:$16 sps:$4 sm:$0xff]  }
  0x2f   : >> { %424 = vmatprep.subr.bf16.mxu0 %v801_v15  ;;  %465 = vmatprep.subr.bf16.mxu1 %v803_v16  ;;  %v824_v30 = vld [vmem:[%s969_s4 + $0xa8] ss:$16 sps:$4 sm:$0xff]   ;;  %v825_v31 = vld [vmem:[%s969_s4 + $0xc4] ss:$16 sps:$4 sm:$0xff]   ;;  %v827_v32 = vld [vmem:[%s969_s4 + $0xcc] ss:$16 sps:$4 sm:$0xff]  }
  0x30   : >> { %v829_v33 = vld [vmem:[%s969_s4 + $0xc0] ss:$16 sps:$4 sm:$0xff]   ;;  %v830_v34 = vld [vmem:[%s969_s4 + $0xc8] ss:$16 sps:$4 sm:$0xff]   ;;  %v831_v35 = vld [vmem:[%s969_s4 + $0xe4] ss:$16 sps:$4 sm:$0xff]  }
  0x31   : >> { %v833_v36 = vld [vmem:[%s969_s4 + $0xec] ss:$16 sps:$4 sm:$0xff]   ;;  %v835_v37 = vld [vmem:[%s969_s4 + $0xe0] ss:$16 sps:$4 sm:$0xff]   ;;  %v836_v38 = vld [vmem:[%s969_s4 + $0xe8] ss:$16 sps:$4 sm:$0xff]  }
  0x32   : >> { %425 = vmatpush1.bf16.msra.mxu0 %v805_v17  ;;  %466 = vmatpush1.bf16.msra.mxu1 %v806_v18  ;;  %s222_s8 = ssub.s32 3, %s899_s7  ;;  %v902_v39 = vmov 1983009808   ;;  %v512_v43 = vshrl.u32 %v511_v41, 7 }
  0x33   : >> { %426 = vmatprep.subr.bf16.mxu0 %v807_v19  ;;  %467 = vmatprep.subr.bf16.mxu1 %v809_v20  ;;  %s1026_s9 = scalar_select %p221_p11, %s899_s7, %s222_s8  ;;  %v509_v40 = vunpack.c.l.s4 %v902_v39 }
  0x34   : >> { %s218_s7 = sadd.s32 1, %s899_s7  }
  0x35   : >> { %s702_s11 = sshll.u32 %s1026_s9, 2  ;;  %v510_v42 = vunpack.c.0.s8 %v509_v40  ;;  %s557_s15 = scalar_lea.vmem %s972_s6, %s1026_s9 [#allocation3] }
  0x36   : >> { %427 = vmatpush1.bf16.msra.mxu0 %v811_v21  ;;  %468 = vmatpush1.bf16.msra.mxu1 %v812_v22  ;;  %s225_s14 = scalar_lea.vmem %s183_s5, %s702_s11 [#allocation2]  ;;  %p215_p12 = scmp.ge.s32.totalorder %s218_s7, 4  }
  0x37   : >> { %428 = vmatprep.subr.bf16.mxu0 %v813_v23  ;;  %469 = vmatprep.subr.bf16.mxu1 %v815_v24  ;;  %v513_v46 = vsub.s32 %v510_v42, %v512_v43  ;;  %v226_v48 = vld [vmem:[%s225_s14] sm:$0xf] }
  0x38   : >> { %v227_v57 = vunpack.c.l.bf16 %v226_v48 }
  0x3a   : >> { %429 = vmatpush1.bf16.msra.mxu0 %v817_v25  ;;  %470 = vmatpush1.bf16.msra.mxu1 %v818_v26 }
  0x3b   : >> { %430 = vmatprep.subr.bf16.mxu0 %v819_v27  ;;  %471 = vmatprep.subr.bf16.mxu1 %v821_v28 }
  0x3e   : >> { %431 = vmatpush1.bf16.msra.mxu0 %v823_v29  ;;  %472 = vmatpush1.bf16.msra.mxu1 %v824_v30 }
  0x3f   : >> { %432 = vmatprep.subr.bf16.mxu0 %v825_v31  ;;  %473 = vmatprep.subr.bf16.mxu1 %v827_v32 }
  0x42   : >> { %433 = vmatpush1.bf16.msra.mxu0 %v829_v33  ;;  %474 = vmatpush1.bf16.msra.mxu1 %v830_v34 }
  0x43   : >> { %434 = vmatprep.subr.bf16.mxu0 %v831_v35  ;;  %475 = vmatprep.subr.bf16.mxu1 %v833_v36 }
  0x46   : >> { %435 = vmatpush1.bf16.msra.mxu0 %v835_v37  ;;  %476 = vmatpush1.bf16.msra.mxu1 %v836_v38 }
  0x49   : >> { %453 = vmatmul.mubr.bf16.vlgmr.msra.gmra.mrb[0].mxu0 %v895_v5  ;;  %494 = vmatmul.mubr.bf16.vlgmr.msra.gmra.mrb[0].mxu1 %v895_v5 }
 0x11c   : >> { %v454_v44 = vpop.f32.mrb[0].mxu0  ;;  %v495_v45 = vpop.f32.mrb[0].mxu1 }
 0x11d   : >> { %v456_v47 = vpop.f32.mrb[1].mxu0  ;;  %v497_v49 = vpop.f32.mrb[1].mxu1 }
 0x11e   : >> { %v506_v50 = vcombine.low %v454_v44, %v456_v47  ;;  %v507_v51 = vcombine.low %v495_v45, %v497_v49  ;;  %v458_v52 = vpop.f32.mrb[2].mxu0  ;;  %v499_v53 = vpop.f32.mrb[2].mxu1 }
 0x11f   : >> { %v459_v54 = vpop.f32.mrb[3].mxu0  ;;  %v500_v55 = vpop.f32.mrb[3].mxu1 }
 0x120   : >> { %v514_v56 = vrot.slane %v506_v50, %v513_v46  ;;  %v521_v58 = vrot.slane %v507_v51, %v513_v46 }
 0x122   : >> { %v522_v59 = vcombine.low %v514_v56, %v521_v58 }
 0x124   : >> { %v524_v60 = vadd.f32 %v522_v59, %v227_v57 }
 0x126   : >> { %v525_v61 = vsub.f32 0.0, %v524_v60  ;;  %v532_v62 = vrot.slane %v524_v60, 2  ;;  %v543_v2 = vrot.slane %v524_v60, 6  ;;  %v540_v7 = vrot.slane %v524_v60, 4 }
 0x128   : >> { %v526_v63 = vmul.f32 1.442695, %v525_v61  ;;  %v534_v0 = vsub.f32 0.0, %v532_v62  ;;  %v545_v3 = vsub.f32 0.0, %v543_v2 }
 0x12a   : >> { %837 = vpow2.f32 %v526_v63  ;;  %v535_v1 = vmul.f32 1.442695, %v534_v0  ;;  %v546_v5 = vmul.f32 1.442695, %v545_v3 }
 0x12c   : >> { %839 = vpow2.f32 %v535_v1 }
 0x12d   : >> { %841 = vpow2.f32 %v546_v5 }
 0x134   : >> { %v838_v6 = vpop.eup %837 }
 0x135   : >> { %v528_v8 = vadd.f32 1.0, %v838_v6 }
 0x136   : >> { %v840_v9 = vpop.eup %839 }
 0x137   : >> { %843 = vrcp.f32 %v528_v8  ;;  %v537_v10 = vadd.f32 1.0, %v840_v9  ;;  %v842_v11 = vpop.eup %841 }
 0x138   : >> { %845 = vtanh.f32 %v540_v7  ;;  %v548_v15 = vadd.f32 1.0, %v842_v11 }
 0x139   : >> { %847 = vrcp.f32 %v537_v10 }
 0x13a   : >> { %849 = vrcp.f32 %v548_v15 }
 0x141   : >> { %v844_v12 = vpop.eup %843 }
 0x142   : >> { %v846_v13 = vpop.eup %845 }
 0x143   : >> { %v848_v14 = vpop.eup %847  ;;  %v552_v17 = vmul.f32 %v846_v13, %v844_v12 }
 0x144   : >> { %v551_v16 = vmul.f32 %v891_v4, %v848_v14  ;;  %v850_v18 = vpop.eup %849 }
 0x146   : >> { %v553_v4 = vadd.f32 %v552_v17, %v551_v16  }
 0x148   : >> { %851 = vtanh.f32 %v553_v4 }
 0x151   : > { %217 = sbr.rel (!%p215_p12) target bundleno = 39 (0x27), region = 150 }
 0x152   : >> { %v852_v19 = vpop.eup %851 }
 0x153   : >> { %v555_v20 = vmul.f32 %v852_v19, %v850_v18 }
 0x155   : >> { %v556_v5 = vpack.c.bf16 %v555_v20, %v555_v20  }
 0x157   : >> { %558 = vst [vmem:[%s557_s15] sm:$0x1] %v556_v5 }
 0x158   : > { %565 = sbr.rel (!%p949_p5) target bundleno = 353 (0x161), region = 80  ;;  %s566_s20 = scalar_lea.vmem (%p949_p5), %s1063_s2, %s934_s12 }
 0x15e   : > { %v582_v21 = vld [vmem:[%s972_s6] sm:$0x1] (%p949_p5)  ;;  %v584_v22 = vld [vmem:[%s972_s6 + $0x1] sm:$0x1] (%p949_p5)  ;;  %v586_v23 = vld [vmem:[%s972_s6 + $0x2] sm:$0x1] (%p949_p5) }
 0x15f   : > { %583 = vst [vmem:[%s566_s20] sm:$0x1] %v582_v21  ;;  %585 = vst [vmem:[%s566_s20 + $0x2] sm:$0x1] %v584_v22  ;;  %v588_v24 = vld [vmem:[%s972_s6 + $0x3] sm:$0x1] }
 0x160   : > { %587 = vst [vmem:[%s566_s20 + $0x4] sm:$0x1] %v586_v23  ;;  %589 = vst [vmem:[%s566_s20 + $0x6] sm:$0x1] %v588_v24 }
 0x161 PF: > { %p9_p13 = scmp.ge.s32.totalorder %s937_s13, 4   ;;  %s1065_s9 = smov %s883_s10 }
 0x162   : > { %s1066_s10 = smov %s947_s16  ;;  %s1067_s11 = smov %s937_s13 }
 0x163   :  { %11 = sbr.rel (!%p9_p13) target bundleno = 2 (0x2), region = 161 }

// kernel: _lambda_.29
= control target key start
LH: loop header
LB: loop body
LE: loop exit
PB: predicated region body
PF: predicated region fallthrough
CT: control target
= control target key end

     0   :  { %s354_s1 = inlined_call_operand.vmem [shape: bf16[256,128], index: 1, kind: input, shape index: {}]   ;;  %s355_s0 = inlined_call_operand.vmem [shape: bf16[8,256], index: 0, kind: input, shape index: {}]   ;;  %s356_s2 = inlined_call_operand.vmem [shape: f32[1,128], index: 2, kind: input, shape index: {}]   ;;  %s357_s3 = inlined_call_operand.vmem [shape: f32[8,128], index: 3, kind: output, shape index: {}]  }
   0x1   :  { %v255_v0 = vld [vmem:[%s354_s1 + $0x40] sm:$0xff]   ;;  %v257_v2 = vld [vmem:[%s354_s1 + $0x48] sm:$0xff]   ;;  %v259_v4 = vld [vmem:[%s354_s1 + $0x50] sm:$0xff]  }
   0x2   :  { %v256_v1 = vld [vmem:[%s354_s1] sm:$0xff]   ;;  %233 = vmatprep.subr.bf16.mxu0 %v255_v0  ;;  %v258_v3 = vld [vmem:[%s354_s1 + $0x8] sm:$0xff]   ;;  %v260_v5 = vld [vmem:[%s354_s1 + $0x10] sm:$0xff]  }
   0x3   :  { %234 = vmatpush3.bf16.msra.mxu0 %v256_v1  ;;  %v261_v6 = vld [vmem:[%s354_s1 + $0x58] sm:$0xff]   ;;  %v263_v8 = vld [vmem:[%s354_s1 + $0x60] sm:$0xff]   ;;  %v265_v10 = vld [vmem:[%s354_s1 + $0x68] sm:$0xff]  }
   0x4   :  { %235 = vmatprep.subr.bf16.mxu0 %v257_v2  ;;  %v262_v7 = vld [vmem:[%s354_s1 + $0x18] sm:$0xff]   ;;  %v264_v9 = vld [vmem:[%s354_s1 + $0x20] sm:$0xff]   ;;  %v266_v13 = vld [vmem:[%s354_s1 + $0x28] sm:$0xff]  }
   0x5   :  { %v15_v11 = vld [vmem:[%s355_s0] sm:$0xff]  ;;  %v267_v14 = vld [vmem:[%s354_s1 + $0x70] sm:$0xff]   ;;  %v269_v16 = vld [vmem:[%s354_s1 + $0x78] sm:$0xff]  }
   0x6   :  { %v216_v12 = vcombine.high %v15_v11, %v15_v11  ;;  %v268_v15 = vld [vmem:[%s354_s1 + $0x30] sm:$0xff]   ;;  %v270_v17 = vld [vmem:[%s354_s1 + $0x38] sm:$0xff]   ;;  %v215_v18 = vcombine.low %v15_v11, %v15_v11  ;;  %v214_v20 = vld [vmem:[%s356_s2] ss:$0 sm:$0xff] }
   0x7   :  { %236 = vmatpush3.bf16.msra.mxu0 %v258_v3 }
   0x8   :  { %237 = vmatprep.subr.bf16.mxu0 %v259_v4  ;;  %190 = vmatprep.mubr.bf16.mxu0 %v216_v12 }
   0xb   :  { %238 = vmatpush3.bf16.msra.mxu0 %v260_v5 }
   0xc   :  { %239 = vmatprep.subr.bf16.mxu0 %v261_v6 }
   0xf   :  { %240 = vmatpush3.bf16.msra.mxu0 %v262_v7 }
  0x10   :  { %241 = vmatprep.subr.bf16.mxu0 %v263_v8 }
  0x13   :  { %242 = vmatpush3.bf16.msra.mxu0 %v264_v9 }
  0x14   :  { %243 = vmatprep.subr.bf16.mxu0 %v265_v10 }
  0x17   :  { %244 = vmatpush3.bf16.msra.mxu0 %v266_v13 }
  0x18   :  { %245 = vmatprep.subr.bf16.mxu0 %v267_v14 }
  0x1b   :  { %246 = vmatpush3.bf16.msra.mxu0 %v268_v15 }
  0x1c   :  { %247 = vmatprep.subr.bf16.mxu0 %v269_v16 }
  0x1f   :  { %248 = vmatpush3.bf16.msra.mxu0 %v270_v17 }
  0x22   :  { %191 = vmatmul.mubr.bf16.vlgmr.msra.gmra.mrb[0].mxu0 %v215_v18 }
  0xf5   :  { %v249_v19 = vpop.f32.mrb[0].mxu0 }
  0xf6   :  { %v250_v21 = vpop.f32.mrb[1].mxu0 }
  0xf7   :  { %v251_v22 = vadd.f32 %v250_v21, %v249_v19  ;;  %v252_v23 = vpop.f32.mrb[2].mxu0 }
  0xf8   :  { %v253_v24 = vpop.f32.mrb[3].mxu0 }
  0xf9   :  { %v193_v25 = vadd.f32 %v251_v22, %v214_v20 }
  0xfb   :  { %198 = vmax.xlane.f32.xlu0 %v193_v25 }
 0x188   :  { %v199_v26 = vpop.xlane.xlu0 %198 }
 0x189   :  { %v200_v27 = vsub.f32 %v193_v25, %v199_v26 }
 0x18b   :  { %v201_v28 = vmul.f32 1.442695, %v200_v27 }
 0x18d   :  { %273 = vpow2.f32 %v201_v28 }
 0x197   :  { %v274_v29 = vpop.eup %273 }
 0x198   :  { %203 = vadd.xlane.f32.xlu0 %v274_v29 }
 0x225   :  { %v204_v30 = vpop.xlane.xlu0 %203 }
 0x226   :  { %275 = vlog2.f32 %v204_v30 }
 0x230   :  { %v276_v31 = vpop.eup %275 }
 0x231   :  { %v206_v32 = vmul.f32 0.6931472, %v276_v31 }
 0x233   :  { %v207_v33 = vadd.f32 %v206_v32, %v199_v26 }
 0x235   :  { %v208_v34 = vsub.f32 %v193_v25, %v207_v33 }
 0x237   :  { %209 = vst [vmem:[%s357_s3] sm:$0xff] %v208_v34 }

// kernel: _lambda_.27
= control target key start
LH: loop header
LB: loop body
LE: loop exit
PB: predicated region body
PF: predicated region fallthrough
CT: control target
= control target key end

     0   :  { %s1616_s1 = inlined_call_operand.vmem [shape: bf16[256,1024], index: 1, kind: input, shape index: {}]   ;;  %s1617_s0 = inlined_call_operand.vmem [shape: bf16[8,256], index: 0, kind: input, shape index: {}]   ;;  %s1618_s2 = inlined_call_operand.vmem [shape: f32[1,1024], index: 2, kind: input, shape index: {}]   ;;  %s1619_s3 = inlined_call_operand.vmem [shape: bf16[8,1024], index: 3, kind: output, shape index: {}]  }
   0x1   :  { %v15_v0 = vld [vmem:[%s1616_s1] sm:$0xff]  ;;  %v16_v2 = vld [vmem:[%s1616_s1 + $0x8] sm:$0xff] }
   0x2   :  { %v19_v1 = vld [vmem:[%s1616_s1 + $0x20] sm:$0xff]  ;;  %v20_v4 = vld [vmem:[%s1616_s1 + $0x28] sm:$0xff] }
   0x3   :  { %v1039_v3 = vcombine.high %v15_v0, %v19_v1  ;;  %v1038_v5 = vcombine.low %v15_v0, %v19_v1  ;;  %v23_v6 = vld [vmem:[%s1616_s1 + $0x40] sm:$0xff]  ;;  %v1041_v8 = vcombine.high %v16_v2, %v20_v4  ;;  %v1040_v9 = vcombine.low %v16_v2, %v20_v4  ;;  %v24_v11 = vld [vmem:[%s1616_s1 + $0x48] sm:$0xff] }
   0x4   :  { %v27_v7 = vld [vmem:[%s1616_s1 + $0x60] sm:$0xff]  ;;  %v28_v12 = vld [vmem:[%s1616_s1 + $0x68] sm:$0xff] }
   0x5   :  { %v1047_v10 = vcombine.high %v23_v6, %v27_v7  ;;  %v31_v13 = vld [vmem:[%s1616_s1 + $0x80] sm:$0xff]  ;;  %832 = vmatprep.subr.bf16.mxu0 %v1039_v3  ;;  %v1049_v14 = vcombine.high %v24_v11, %v28_v12  ;;  %v32_v16 = vld [vmem:[%s1616_s1 + $0x88] sm:$0xff]  ;;  %873 = vmatprep.subr.bf16.mxu1 %v1041_v8  ;;  %v1046_v18 = vcombine.low %v23_v6, %v27_v7 }
   0x6   :  { %v35_v15 = vld [vmem:[%s1616_s1 + $0xa0] sm:$0xff]  ;;  %v36_v17 = vld [vmem:[%s1616_s1 + $0xa8] sm:$0xff]  ;;  %833 = vmatpush1.bf16.msra.mxu0 %v1038_v5  ;;  %874 = vmatpush1.bf16.msra.mxu1 %v1040_v9  ;;  %v1048_v19 = vcombine.low %v24_v11, %v28_v12 }
   0x7   :  { %834 = vmatprep.subr.bf16.mxu0 %v1047_v10  ;;  %v1055_v20 = vcombine.high %v31_v13, %v35_v15  ;;  %875 = vmatprep.subr.bf16.mxu1 %v1049_v14  ;;  %v1057_v21 = vcombine.high %v32_v16, %v36_v17  ;;  %v39_v22 = vld [vmem:[%s1616_s1 + $0xc0] sm:$0xff]  ;;  %v40_v24 = vld [vmem:[%s1616_s1 + $0xc8] sm:$0xff]  ;;  %v1054_v26 = vcombine.low %v31_v13, %v35_v15 }
   0x8   :  { %v43_v23 = vld [vmem:[%s1616_s1 + $0xe0] sm:$0xff]  ;;  %v44_v25 = vld [vmem:[%s1616_s1 + $0xe8] sm:$0xff]  ;;  %v1056_v27 = vcombine.low %v32_v16, %v36_v17 }
   0x9   :  { %v1063_v28 = vcombine.high %v39_v22, %v43_v23  ;;  %v1065_v29 = vcombine.high %v40_v24, %v44_v25  ;;  %v47_v30 = vld [vmem:[%s1616_s1 + $0x100] sm:$0xff]  ;;  %v48_v32 = vld [vmem:[%s1616_s1 + $0x108] sm:$0xff]  ;;  %v1062_v34 = vcombine.low %v39_v22, %v43_v23  ;;  %v1064_v35 = vcombine.low %v40_v24, %v44_v25 }
   0xa   :  { %835 = vmatpush1.bf16.msra.mxu0 %v1046_v18  ;;  %876 = vmatpush1.bf16.msra.mxu1 %v1048_v19  ;;  %v51_v31 = vld [vmem:[%s1616_s1 + $0x120] sm:$0xff]  ;;  %v52_v33 = vld [vmem:[%s1616_s1 + $0x128] sm:$0xff] }
   0xb   :  { %836 = vmatprep.subr.bf16.mxu0 %v1055_v20  ;;  %877 = vmatprep.subr.bf16.mxu1 %v1057_v21  ;;  %v1071_v36 = vcombine.high %v47_v30, %v51_v31  ;;  %v1073_v37 = vcombine.high %v48_v32, %v52_v33  ;;  %v55_v38 = vld [vmem:[%s1616_s1 + $0x140] sm:$0xff]  ;;  %v56_v40 = vld [vmem:[%s1616_s1 + $0x148] sm:$0xff]  ;;  %v1070_v42 = vcombine.low %v47_v30, %v51_v31 }
   0xc   :  { %v59_v39 = vld [vmem:[%s1616_s1 + $0x160] sm:$0xff]  ;;  %v60_v41 = vld [vmem:[%s1616_s1 + $0x168] sm:$0xff]  ;;  %v1072_v43 = vcombine.low %v48_v32, %v52_v33 }
   0xd   :  { %v1079_v44 = vcombine.high %v55_v38, %v59_v39  ;;  %v1081_v45 = vcombine.high %v56_v40, %v60_v41  ;;  %v63_v46 = vld [vmem:[%s1616_s1 + $0x180] sm:$0xff]  ;;  %v64_v48 = vld [vmem:[%s1616_s1 + $0x188] sm:$0xff]  ;;  %v1078_v50 = vcombine.low %v55_v38, %v59_v39  ;;  %v1080_v51 = vcombine.low %v56_v40, %v60_v41 }
   0xe   :  { %837 = vmatpush1.bf16.msra.mxu0 %v1054_v26  ;;  %878 = vmatpush1.bf16.msra.mxu1 %v1056_v27  ;;  %v67_v47 = vld [vmem:[%s1616_s1 + $0x1a0] sm:$0xff]  ;;  %v68_v49 = vld [vmem:[%s1616_s1 + $0x1a8] sm:$0xff] }
   0xf   :  { %838 = vmatprep.subr.bf16.mxu0 %v1063_v28  ;;  %879 = vmatprep.subr.bf16.mxu1 %v1065_v29  ;;  %v1087_v52 = vcombine.high %v63_v46, %v67_v47  ;;  %v1283_v53 = vld [vmem:[%s1617_s0] sm:$0xff]  ;;  %v1089_v54 = vcombine.high %v64_v48, %v68_v49  ;;  %v72_v58 = vld [vmem:[%s1616_s1 + $0x1c8] sm:$0xff]  ;;  %v1086_v60 = vcombine.low %v63_v46, %v67_v47 }
  0x10   :  { %v71_v55 = vld [vmem:[%s1616_s1 + $0x1c0] sm:$0xff]  ;;  %v1293_v57 = vcombine.high %v1283_v53, %v1283_v53  ;;  %v76_v59 = vld [vmem:[%s1616_s1 + $0x1e8] sm:$0xff]  ;;  %v1088_v61 = vcombine.low %v64_v48, %v68_v49 }
  0x11   :  { %v75_v56 = vld [vmem:[%s1616_s1 + $0x1e0] sm:$0xff]  ;;  %v1097_v63 = vcombine.high %v72_v58, %v76_v59  ;;  %v80_v2 = vld [vmem:[%s1616_s1 + $0x208] sm:$0xff]  ;;  %v1096_v5 = vcombine.low %v72_v58, %v76_v59 }
  0x12   :  { %839 = vmatpush1.bf16.msra.mxu0 %v1062_v34  ;;  %880 = vmatpush1.bf16.msra.mxu1 %v1064_v35  ;;  %v1095_v62 = vcombine.high %v71_v55, %v75_v56  ;;  %v79_v0 = vld [vmem:[%s1616_s1 + $0x200] sm:$0xff]  ;;  %v84_v3 = vld [vmem:[%s1616_s1 + $0x228] sm:$0xff]  ;;  %v1094_v4 = vcombine.low %v71_v55, %v75_v56 }
  0x13   :  { %840 = vmatprep.subr.bf16.mxu0 %v1071_v36  ;;  %881 = vmatprep.subr.bf16.mxu1 %v1073_v37  ;;  %v83_v1 = vld [vmem:[%s1616_s1 + $0x220] sm:$0xff]  ;;  %v1105_v7 = vcombine.high %v80_v2, %v84_v3  ;;  %v88_v10 = vld [vmem:[%s1616_s1 + $0x248] sm:$0xff]  ;;  %v1104_v13 = vcombine.low %v80_v2, %v84_v3  ;;  %v17_v2 = vld [vmem:[%s1616_s1 + $0x10] sm:$0xff] }
  0x14   :  { %864 = vmatprep.mubr.bf16.mxu0 %v1293_v57  ;;  %905 = vmatprep.mubr.bf16.mxu1 %v1293_v57  ;;  %v1103_v6 = vcombine.high %v79_v0, %v83_v1  ;;  %v87_v8 = vld [vmem:[%s1616_s1 + $0x240] sm:$0xff]  ;;  %v92_v11 = vld [vmem:[%s1616_s1 + $0x268] sm:$0xff]  ;;  %v1102_v12 = vcombine.low %v79_v0, %v83_v1  ;;  %v21_v3 = vld [vmem:[%s1616_s1 + $0x30] sm:$0xff] }
  0x15   :  { %v91_v9 = vld [vmem:[%s1616_s1 + $0x260] sm:$0xff]  ;;  %v1113_v15 = vcombine.high %v88_v10, %v92_v11  ;;  %v96_v18 = vld [vmem:[%s1616_s1 + $0x288] sm:$0xff]  ;;  %v1112_v21 = vcombine.low %v88_v10, %v92_v11  ;;  %v25_v10 = vld [vmem:[%s1616_s1 + $0x50] sm:$0xff] }
  0x16   :  { %841 = vmatpush1.bf16.msra.mxu0 %v1070_v42  ;;  %882 = vmatpush1.bf16.msra.mxu1 %v1072_v43  ;;  %v1111_v14 = vcombine.high %v87_v8, %v91_v9  ;;  %v95_v16 = vld [vmem:[%s1616_s1 + $0x280] sm:$0xff]  ;;  %v100_v19 = vld [vmem:[%s1616_s1 + $0x2a8] sm:$0xff]  ;;  %v1110_v20 = vcombine.low %v87_v8, %v91_v9  ;;  %v1043_v8 = vcombine.high %v17_v2, %v21_v3  ;;  %v29_v11 = vld [vmem:[%s1616_s1 + $0x70] sm:$0xff] }
  0x17   :  { %842 = vmatprep.subr.bf16.mxu0 %v1079_v44  ;;  %883 = vmatprep.subr.bf16.mxu1 %v1081_v45  ;;  %v99_v17 = vld [vmem:[%s1616_s1 + $0x2a0] sm:$0xff]  ;;  %v1121_v23 = vcombine.high %v96_v18, %v100_v19  ;;  %v104_v26 = vld [vmem:[%s1616_s1 + $0x2c8] sm:$0xff]  ;;  %v1120_v29 = vcombine.low %v96_v18, %v100_v19  ;;  %v37_v19 = vld [vmem:[%s1616_s1 + $0xb0] sm:$0xff] }
  0x18   :  { %v1119_v22 = vcombine.high %v95_v16, %v99_v17  ;;  %v103_v24 = vld [vmem:[%s1616_s1 + $0x2c0] sm:$0xff]  ;;  %v108_v27 = vld [vmem:[%s1616_s1 + $0x2e8] sm:$0xff]  ;;  %v1118_v28 = vcombine.low %v95_v16, %v99_v17  ;;  %v1051_v17 = vcombine.high %v25_v10, %v29_v11 }
  0x19   :  { %v107_v25 = vld [vmem:[%s1616_s1 + $0x2e0] sm:$0xff]  ;;  %v1129_v31 = vcombine.high %v104_v26, %v108_v27  ;;  %v112_v34 = vld [vmem:[%s1616_s1 + $0x308] sm:$0xff]  ;;  %v1128_v37 = vcombine.low %v104_v26, %v108_v27  ;;  %v41_v26 = vld [vmem:[%s1616_s1 + $0xd0] sm:$0xff] }
  0x1a   :  { %843 = vmatpush1.bf16.msra.mxu0 %v1078_v50  ;;  %884 = vmatpush1.bf16.msra.mxu1 %v1080_v51  ;;  %v1127_v30 = vcombine.high %v103_v24, %v107_v25  ;;  %v111_v32 = vld [vmem:[%s1616_s1 + $0x300] sm:$0xff]  ;;  %v116_v35 = vld [vmem:[%s1616_s1 + $0x328] sm:$0xff]  ;;  %v1126_v36 = vcombine.low %v103_v24, %v107_v25  ;;  %v45_v27 = vld [vmem:[%s1616_s1 + $0xf0] sm:$0xff] }
  0x1b   :  { %844 = vmatprep.subr.bf16.mxu0 %v1087_v52  ;;  %885 = vmatprep.subr.bf16.mxu1 %v1089_v54  ;;  %v115_v33 = vld [vmem:[%s1616_s1 + $0x320] sm:$0xff]  ;;  %v1137_v39 = vcombine.high %v112_v34, %v116_v35  ;;  %v120_v42 = vld [vmem:[%s1616_s1 + $0x348] sm:$0xff]  ;;  %v1136_v45 = vcombine.low %v112_v34, %v116_v35  ;;  %v49_v34 = vld [vmem:[%s1616_s1 + $0x110] sm:$0xff] }
  0x1c   :  { %v1135_v38 = vcombine.high %v111_v32, %v115_v33  ;;  %v119_v40 = vld [vmem:[%s1616_s1 + $0x340] sm:$0xff]  ;;  %v124_v43 = vld [vmem:[%s1616_s1 + $0x368] sm:$0xff]  ;;  %v1134_v44 = vcombine.low %v111_v32, %v115_v33  ;;  %v1067_v32 = vcombine.high %v41_v26, %v45_v27  ;;  %v53_v35 = vld [vmem:[%s1616_s1 + $0x130] sm:$0xff] }
  0x1d   :  { %v123_v41 = vld [vmem:[%s1616_s1 + $0x360] sm:$0xff]  ;;  %v1145_v47 = vcombine.high %v120_v42, %v124_v43  ;;  %v128_v50 = vld [vmem:[%s1616_s1 + $0x388] sm:$0xff]  ;;  %v1144_v54 = vcombine.low %v120_v42, %v124_v43  ;;  %v61_v42 = vld [vmem:[%s1616_s1 + $0x170] sm:$0xff] }
  0x1e   :  { %845 = vmatpush1.bf16.msra.mxu0 %v1086_v60  ;;  %886 = vmatpush1.bf16.msra.mxu1 %v1088_v61  ;;  %v1143_v46 = vcombine.high %v119_v40, %v123_v41  ;;  %v127_v48 = vld [vmem:[%s1616_s1 + $0x380] sm:$0xff]  ;;  %v132_v51 = vld [vmem:[%s1616_s1 + $0x3a8] sm:$0xff]  ;;  %v1142_v52 = vcombine.low %v119_v40, %v123_v41  ;;  %v57_v41 = vld [vmem:[%s1616_s1 + $0x150] sm:$0xff] }
  0x1f   :  { %846 = vmatprep.subr.bf16.mxu0 %v1095_v62  ;;  %887 = vmatprep.subr.bf16.mxu1 %v1097_v63  ;;  %v131_v49 = vld [vmem:[%s1616_s1 + $0x3a0] sm:$0xff]  ;;  %v1153_v56 = vcombine.high %v128_v50, %v132_v51  ;;  %v136_v60 = vld [vmem:[%s1616_s1 + $0x3c8] sm:$0xff]  ;;  %v1152_v63 = vcombine.low %v128_v50, %v132_v51  ;;  %v58_v43 = vld [vmem:[%s1616_s1 + $0x158] sm:$0xff] }
  0x20   :  { %v1151_v55 = vcombine.high %v127_v48, %v131_v49  ;;  %v135_v58 = vld [vmem:[%s1616_s1 + $0x3c0] sm:$0xff]  ;;  %v140_v61 = vld [vmem:[%s1616_s1 + $0x3e8] sm:$0xff]  ;;  %v1150_v62 = vcombine.low %v127_v48, %v131_v49  ;;  %v65_v49 = vld [vmem:[%s1616_s1 + $0x190] sm:$0xff] }
  0x21   :  { %v139_v59 = vld [vmem:[%s1616_s1 + $0x3e0] sm:$0xff]  ;;  %v1161_v1 = vcombine.high %v136_v60, %v140_v61  ;;  %v69_v50 = vld [vmem:[%s1616_s1 + $0x1b0] sm:$0xff]  ;;  %v66_v51 = vld [vmem:[%s1616_s1 + $0x198] sm:$0xff] }
  0x22   :  { %847 = vmatpush1.bf16.msra.mxu0 %v1094_v4  ;;  %888 = vmatpush1.bf16.msra.mxu1 %v1096_v5  ;;  %v1159_v0 = vcombine.high %v135_v58, %v139_v59  ;;  %v18_v4 = vld [vmem:[%s1616_s1 + $0x18] sm:$0xff] }
  0x23   :  { %848 = vmatprep.subr.bf16.mxu0 %v1103_v6  ;;  %889 = vmatprep.subr.bf16.mxu1 %v1105_v7  ;;  %v22_v5 = vld [vmem:[%s1616_s1 + $0x38] sm:$0xff]  ;;  %v1158_v6 = vcombine.low %v135_v58, %v139_v59  ;;  %v1160_v7 = vcombine.low %v136_v60, %v140_v61  ;;  %v73_v59 = vld [vmem:[%s1616_s1 + $0x1d0] sm:$0xff] }
  0x24   :  { %v1045_v9 = vcombine.high %v18_v4, %v22_v5  ;;  %v1044_v16 = vcombine.low %v18_v4, %v22_v5  ;;  %v77_v60 = vld [vmem:[%s1616_s1 + $0x1f0] sm:$0xff]  ;;  %v74_v61 = vld [vmem:[%s1616_s1 + $0x1d8] sm:$0xff] }
  0x25   :  { %v85_v4 = vld [vmem:[%s1616_s1 + $0x230] sm:$0xff]  ;;  %v82_v5 = vld [vmem:[%s1616_s1 + $0x218] sm:$0xff] }
  0x26   :  { %849 = vmatpush1.bf16.msra.mxu0 %v1102_v12  ;;  %890 = vmatpush1.bf16.msra.mxu1 %v1104_v13  ;;  %v1419_v12 = vcombine.low %v1283_v53, %v1283_v53  ;;  %v26_v13 = vld [vmem:[%s1616_s1 + $0x58] sm:$0xff]  ;;  %v33_v53 = vld [vmem:[%s1616_s1 + $0x90] sm:$0xff] }
  0x27   :  { %850 = vmatprep.subr.bf16.mxu0 %v1111_v14  ;;  %891 = vmatprep.subr.bf16.mxu1 %v1113_v15  ;;  %v30_v14 = vld [vmem:[%s1616_s1 + $0x78] sm:$0xff]  ;;  %v1042_v15 = vcombine.low %v17_v2, %v21_v3  ;;  %v1059_v24 = vcombine.high %v33_v53, %v37_v19  ;;  %v81_v3 = vld [vmem:[%s1616_s1 + $0x210] sm:$0xff] }
  0x28   :  { %v1053_v18 = vcombine.high %v26_v13, %v30_v14 }
  0x2a   :  { %851 = vmatpush1.bf16.msra.mxu0 %v1110_v20  ;;  %892 = vmatpush1.bf16.msra.mxu1 %v1112_v21  ;;  %v34_v20 = vld [vmem:[%s1616_s1 + $0x98] sm:$0xff] }
  0x2b   :  { %852 = vmatprep.subr.bf16.mxu0 %v1119_v22  ;;  %893 = vmatprep.subr.bf16.mxu1 %v1121_v23  ;;  %v38_v21 = vld [vmem:[%s1616_s1 + $0xb8] sm:$0xff]  ;;  %v1050_v22 = vcombine.low %v25_v10, %v29_v11  ;;  %v1052_v23 = vcombine.low %v26_v13, %v30_v14  ;;  %v89_v11 = vld [vmem:[%s1616_s1 + $0x250] sm:$0xff] }
  0x2c   :  { %v1061_v25 = vcombine.high %v34_v20, %v38_v21  ;;  %v93_v13 = vld [vmem:[%s1616_s1 + $0x270] sm:$0xff]  ;;  %v90_v14 = vld [vmem:[%s1616_s1 + $0x258] sm:$0xff] }
  0x2e   :  { %853 = vmatpush1.bf16.msra.mxu0 %v1118_v28  ;;  %894 = vmatpush1.bf16.msra.mxu1 %v1120_v29  ;;  %v42_v28 = vld [vmem:[%s1616_s1 + $0xd8] sm:$0xff] }
  0x2f   :  { %854 = vmatprep.subr.bf16.mxu0 %v1127_v30  ;;  %895 = vmatprep.subr.bf16.mxu1 %v1129_v31  ;;  %v46_v29 = vld [vmem:[%s1616_s1 + $0xf8] sm:$0xff]  ;;  %v1058_v30 = vcombine.low %v33_v53, %v37_v19  ;;  %v1060_v31 = vcombine.low %v34_v20, %v38_v21  ;;  %v97_v19 = vld [vmem:[%s1616_s1 + $0x290] sm:$0xff] }
  0x30   :  { %v1069_v33 = vcombine.high %v42_v28, %v46_v29  ;;  %v101_v20 = vld [vmem:[%s1616_s1 + $0x2b0] sm:$0xff]  ;;  %v98_v21 = vld [vmem:[%s1616_s1 + $0x298] sm:$0xff] }
  0x32   :  { %855 = vmatpush1.bf16.msra.mxu0 %v1126_v36  ;;  %896 = vmatpush1.bf16.msra.mxu1 %v1128_v37  ;;  %v54_v36 = vld [vmem:[%s1616_s1 + $0x138] sm:$0xff]  ;;  %v1066_v37 = vcombine.low %v41_v26, %v45_v27  ;;  %v105_v27 = vld [vmem:[%s1616_s1 + $0x2d0] sm:$0xff] }
  0x33   :  { %856 = vmatprep.subr.bf16.mxu0 %v1135_v38  ;;  %897 = vmatprep.subr.bf16.mxu1 %v1137_v39  ;;  %v1068_v38 = vcombine.low %v42_v28, %v46_v29  ;;  %v1075_v39 = vcombine.high %v49_v34, %v53_v35  ;;  %v109_v28 = vld [vmem:[%s1616_s1 + $0x2f0] sm:$0xff]  ;;  %v106_v29 = vld [vmem:[%s1616_s1 + $0x2d8] sm:$0xff] }
  0x36   :  { %857 = vmatpush1.bf16.msra.mxu0 %v1134_v44  ;;  %898 = vmatpush1.bf16.msra.mxu1 %v1136_v45  ;;  %v62_v44 = vld [vmem:[%s1616_s1 + $0x178] sm:$0xff]  ;;  %v1074_v45 = vcombine.low %v49_v34, %v53_v35  ;;  %v113_v35 = vld [vmem:[%s1616_s1 + $0x310] sm:$0xff] }
  0x37   :  { %858 = vmatprep.subr.bf16.mxu0 %v1143_v46  ;;  %899 = vmatprep.subr.bf16.mxu1 %v1145_v47  ;;  %v1083_v47 = vcombine.high %v57_v41, %v61_v42  ;;  %v1085_v48 = vcombine.high %v58_v43, %v62_v44 }
  0x3a   :  { %859 = vmatpush1.bf16.msra.mxu0 %v1142_v52  ;;  %900 = vmatpush1.bf16.msra.mxu1 %v1144_v54  ;;  %v70_v52 = vld [vmem:[%s1616_s1 + $0x1b8] sm:$0xff]  ;;  %v1082_v54 = vcombine.low %v57_v41, %v61_v42  ;;  %v121_v42 = vld [vmem:[%s1616_s1 + $0x350] sm:$0xff] }
  0x3b   :  { %860 = vmatprep.subr.bf16.mxu0 %v1151_v55  ;;  %901 = vmatprep.subr.bf16.mxu1 %v1153_v56  ;;  %v1084_v55 = vcombine.low %v58_v43, %v62_v44  ;;  %v1091_v56 = vcombine.high %v65_v49, %v69_v50  ;;  %v1093_v58 = vcombine.high %v66_v51, %v70_v52  ;;  %v125_v43 = vld [vmem:[%s1616_s1 + $0x370] sm:$0xff]  ;;  %v122_v44 = vld [vmem:[%s1616_s1 + $0x358] sm:$0xff] }
  0x3e   :  { %861 = vmatpush1.bf16.msra.mxu0 %v1150_v62  ;;  %902 = vmatpush1.bf16.msra.mxu1 %v1152_v63  ;;  %v78_v62 = vld [vmem:[%s1616_s1 + $0x1f8] sm:$0xff]  ;;  %v1090_v63 = vcombine.low %v65_v49, %v69_v50  ;;  %v129_v50 = vld [vmem:[%s1616_s1 + $0x390] sm:$0xff] }
  0x3f   :  { %862 = vmatprep.subr.bf16.mxu0 %v1159_v0  ;;  %903 = vmatprep.subr.bf16.mxu1 %v1161_v1  ;;  %v1092_v0 = vcombine.low %v66_v51, %v70_v52  ;;  %v1099_v1 = vcombine.high %v73_v59, %v77_v60  ;;  %v1101_v2 = vcombine.high %v74_v61, %v78_v62  ;;  %v133_v51 = vld [vmem:[%s1616_s1 + $0x3b0] sm:$0xff]  ;;  %v130_v52 = vld [vmem:[%s1616_s1 + $0x398] sm:$0xff] }
  0x42   :  { %863 = vmatpush1.bf16.msra.mxu0 %v1158_v6  ;;  %904 = vmatpush1.bf16.msra.mxu1 %v1160_v7  ;;  %v86_v6 = vld [vmem:[%s1616_s1 + $0x238] sm:$0xff]  ;;  %v1098_v7 = vcombine.low %v73_v59, %v77_v60  ;;  %v137_v60 = vld [vmem:[%s1616_s1 + $0x3d0] sm:$0xff] }
  0x43   :  { %914 = vmatprep.subr.bf16.mxu0 %v1043_v8  ;;  %955 = vmatprep.subr.bf16.mxu1 %v1045_v9  ;;  %v1100_v8 = vcombine.low %v74_v61, %v78_v62  ;;  %v1107_v9 = vcombine.high %v81_v3, %v85_v4  ;;  %v1109_v10 = vcombine.high %v82_v5, %v86_v6  ;;  %v141_v61 = vld [vmem:[%s1616_s1 + $0x3f0] sm:$0xff]  ;;  %v138_v62 = vld [vmem:[%s1616_s1 + $0x3d8] sm:$0xff] }
  0x45   :  { %865 = vmatmul.mubr.bf16.vlgmr.msra.gmra.mrb[0].mxu0 %v1419_v12  ;;  %906 = vmatmul.mubr.bf16.vlgmr.msra.gmra.mrb[0].mxu1 %v1419_v12 }
  0x46   :  { %915 = vmatpush1.bf16.msra.mxu0 %v1042_v15  ;;  %956 = vmatpush1.bf16.msra.mxu1 %v1044_v16  ;;  %v94_v15 = vld [vmem:[%s1616_s1 + $0x278] sm:$0xff]  ;;  %v1106_v16 = vcombine.low %v81_v3, %v85_v4  ;;  %v1162_v4 = vcombine.low %v137_v60, %v141_v61 }
  0x47   :  { %916 = vmatprep.subr.bf16.mxu0 %v1051_v17  ;;  %957 = vmatprep.subr.bf16.mxu1 %v1053_v18  ;;  %v1108_v17 = vcombine.low %v82_v5, %v86_v6  ;;  %v1115_v18 = vcombine.high %v89_v11, %v93_v13  ;;  %v1117_v53 = vcombine.high %v90_v14, %v94_v15  ;;  %v145_v6 = vlaneseq }
  0x48   :  { %946 = vmatprep.mubr.bf16.mxu0 %v1293_v57  ;;  %987 = vmatprep.mubr.bf16.mxu1 %v1293_v57  ;;  %v50_v57 = vld [vmem:[%s1616_s1 + $0x118] sm:$0xff] }
  0x49   :  { %v1077_v40 = vcombine.high %v50_v57, %v54_v36  ;;  %v1076_v46 = vcombine.low %v50_v57, %v54_v36  ;;  %v117_v57 = vld [vmem:[%s1616_s1 + $0x330] sm:$0xff]  ;;  %v114_v36 = vld [vmem:[%s1616_s1 + $0x318] sm:$0xff] }
  0x4a   :  { %917 = vmatpush1.bf16.msra.mxu0 %v1050_v22  ;;  %958 = vmatpush1.bf16.msra.mxu1 %v1052_v23  ;;  %v102_v22 = vld [vmem:[%s1616_s1 + $0x2b8] sm:$0xff]  ;;  %v1114_v23 = vcombine.low %v89_v11, %v93_v13 }
  0x4b   :  { %918 = vmatprep.subr.bf16.mxu0 %v1059_v24  ;;  %959 = vmatprep.subr.bf16.mxu1 %v1061_v25  ;;  %v1116_v24 = vcombine.low %v90_v14, %v94_v15  ;;  %v1123_v25 = vcombine.high %v97_v19, %v101_v20  ;;  %v1125_v26 = vcombine.high %v98_v21, %v102_v22 }
  0x4e   :  { %919 = vmatpush1.bf16.msra.mxu0 %v1058_v30  ;;  %960 = vmatpush1.bf16.msra.mxu1 %v1060_v31  ;;  %v110_v30 = vld [vmem:[%s1616_s1 + $0x2f8] sm:$0xff]  ;;  %v1122_v31 = vcombine.low %v97_v19, %v101_v20 }
  0x4f   :  { %920 = vmatprep.subr.bf16.mxu0 %v1067_v32  ;;  %961 = vmatprep.subr.bf16.mxu1 %v1069_v33  ;;  %v1124_v32 = vcombine.low %v98_v21, %v102_v22  ;;  %v1131_v33 = vcombine.high %v105_v27, %v109_v28  ;;  %v1133_v34 = vcombine.high %v106_v29, %v110_v30 }
  0x52   :  { %921 = vmatpush1.bf16.msra.mxu0 %v1066_v37  ;;  %962 = vmatpush1.bf16.msra.mxu1 %v1068_v38  ;;  %v118_v37 = vld [vmem:[%s1616_s1 + $0x338] sm:$0xff]  ;;  %v1130_v38 = vcombine.low %v105_v27, %v109_v28 }
  0x53   :  { %922 = vmatprep.subr.bf16.mxu0 %v1075_v39  ;;  %963 = vmatprep.subr.bf16.mxu1 %v1077_v40  ;;  %v1132_v39 = vcombine.low %v106_v29, %v110_v30  ;;  %v1139_v40 = vcombine.high %v113_v35, %v117_v57  ;;  %v1141_v41 = vcombine.high %v114_v36, %v118_v37 }
  0x56   :  { %923 = vmatpush1.bf16.msra.mxu0 %v1074_v45  ;;  %964 = vmatpush1.bf16.msra.mxu1 %v1076_v46  ;;  %v126_v45 = vld [vmem:[%s1616_s1 + $0x378] sm:$0xff]  ;;  %v1138_v46 = vcombine.low %v113_v35, %v117_v57 }
  0x57   :  { %924 = vmatprep.subr.bf16.mxu0 %v1083_v47  ;;  %965 = vmatprep.subr.bf16.mxu1 %v1085_v48  ;;  %v1140_v47 = vcombine.low %v114_v36, %v118_v37  ;;  %v1147_v48 = vcombine.high %v121_v42, %v125_v43  ;;  %v1149_v49 = vcombine.high %v122_v44, %v126_v45 }
  0x5a   :  { %925 = vmatpush1.bf16.msra.mxu0 %v1082_v54  ;;  %966 = vmatpush1.bf16.msra.mxu1 %v1084_v55  ;;  %v134_v54 = vld [vmem:[%s1616_s1 + $0x3b8] sm:$0xff]  ;;  %v1146_v55 = vcombine.low %v121_v42, %v125_v43 }
  0x5b   :  { %926 = vmatprep.subr.bf16.mxu0 %v1091_v56  ;;  %967 = vmatprep.subr.bf16.mxu1 %v1093_v58  ;;  %v1148_v56 = vcombine.low %v122_v44, %v126_v45  ;;  %v1155_v58 = vcombine.high %v129_v50, %v133_v51  ;;  %v1157_v59 = vcombine.high %v130_v52, %v134_v54 }
  0x5e   :  { %927 = vmatpush1.bf16.msra.mxu0 %v1090_v63  ;;  %968 = vmatpush1.bf16.msra.mxu1 %v1092_v0  ;;  %v142_v63 = vld [vmem:[%s1616_s1 + $0x3f8] sm:$0xff]  ;;  %v1154_v0 = vcombine.low %v129_v50, %v133_v51 }
  0x5f   :  { %928 = vmatprep.subr.bf16.mxu0 %v1099_v1  ;;  %969 = vmatprep.subr.bf16.mxu1 %v1101_v2  ;;  %v1156_v1 = vcombine.low %v130_v52, %v134_v54  ;;  %v1163_v2 = vcombine.high %v137_v60, %v141_v61  ;;  %v1165_v3 = vcombine.high %v138_v62, %v142_v63 }
  0x60   :  { %v1164_v5 = vcombine.low %v138_v62, %v142_v63 }
  0x62   :  { %929 = vmatpush1.bf16.msra.mxu0 %v1098_v7  ;;  %970 = vmatpush1.bf16.msra.mxu1 %v1100_v8  ;;  %v146_v7 = vshrl.u32 %v145_v6, 7 }
  0x63   :  { %930 = vmatprep.subr.bf16.mxu0 %v1107_v9  ;;  %971 = vmatprep.subr.bf16.mxu1 %v1109_v10  ;;  %v143_v9 = vld [vmem:[%s1618_s2] sm:$0xff] }
  0x64   :  { %v147_v8 = vsub.s32 0, %v146_v7  ;;  %v155_v10 = vsub.s32 2, %v146_v7  ;;  %v151_v11 = vsub.s32 1, %v146_v7  ;;  %v159_v13 = vsub.s32 3, %v146_v7 }
  0x65   :  { %v163_v30 = vsub.s32 4, %v146_v7 }
  0x66   :  { %931 = vmatpush1.bf16.msra.mxu0 %v1106_v16  ;;  %972 = vmatpush1.bf16.msra.mxu1 %v1108_v17  ;;  %v148_v14 = vrot.slane %v143_v9, %v147_v8  ;;  %v156_v15 = vrot.slane %v143_v9, %v155_v10  ;;  %v152_v16 = vrot.slane %v143_v9, %v151_v11 }
  0x67   :  { %932 = vmatprep.subr.bf16.mxu0 %v1115_v18  ;;  %973 = vmatprep.subr.bf16.mxu1 %v1117_v53  ;;  %v160_v17 = vrot.slane %v143_v9, %v159_v13 }
  0x6a   :  { %933 = vmatpush1.bf16.msra.mxu0 %v1114_v23  ;;  %974 = vmatpush1.bf16.msra.mxu1 %v1116_v24 }
  0x6b   :  { %934 = vmatprep.subr.bf16.mxu0 %v1123_v25  ;;  %975 = vmatprep.subr.bf16.mxu1 %v1125_v26 }
  0x6e   :  { %935 = vmatpush1.bf16.msra.mxu0 %v1122_v31  ;;  %976 = vmatpush1.bf16.msra.mxu1 %v1124_v32  ;;  %v171_v31 = vsub.s32 6, %v146_v7  ;;  %v167_v32 = vsub.s32 5, %v146_v7 }
  0x6f   :  { %936 = vmatprep.subr.bf16.mxu0 %v1131_v33  ;;  %977 = vmatprep.subr.bf16.mxu1 %v1133_v34  ;;  %v175_v33 = vsub.s32 7, %v146_v7  ;;  %v164_v34 = vrot.slane %v143_v9, %v163_v30 }
  0x70   :  { %v172_v35 = vrot.slane %v143_v9, %v171_v31  ;;  %v168_v57 = vrot.slane %v143_v9, %v167_v32 }
  0x71   :  { %v176_v36 = vrot.slane %v143_v9, %v175_v33 }
  0x72   :  { %937 = vmatpush1.bf16.msra.mxu0 %v1130_v38  ;;  %978 = vmatpush1.bf16.msra.mxu1 %v1132_v39 }
  0x73   :  { %938 = vmatprep.subr.bf16.mxu0 %v1139_v40  ;;  %979 = vmatprep.subr.bf16.mxu1 %v1141_v41 }
  0x76   :  { %939 = vmatpush1.bf16.msra.mxu0 %v1138_v46  ;;  %980 = vmatpush1.bf16.msra.mxu1 %v1140_v47 }
  0x77   :  { %940 = vmatprep.subr.bf16.mxu0 %v1147_v48  ;;  %981 = vmatprep.subr.bf16.mxu1 %v1149_v49 }
  0x7a   :  { %941 = vmatpush1.bf16.msra.mxu0 %v1146_v55  ;;  %982 = vmatpush1.bf16.msra.mxu1 %v1148_v56 }
  0x7b   :  { %942 = vmatprep.subr.bf16.mxu0 %v1155_v58  ;;  %983 = vmatprep.subr.bf16.mxu1 %v1157_v59 }
  0x7e   :  { %943 = vmatpush1.bf16.msra.mxu0 %v1154_v0  ;;  %984 = vmatpush1.bf16.msra.mxu1 %v1156_v1 }
  0x7f   :  { %944 = vmatprep.subr.bf16.mxu0 %v1163_v2  ;;  %985 = vmatprep.subr.bf16.mxu1 %v1165_v3 }
  0x82   :  { %945 = vmatpush1.bf16.msra.mxu0 %v1162_v4  ;;  %986 = vmatpush1.bf16.msra.mxu1 %v1164_v5 }
  0x85   :  { %947 = vmatmul.mubr.bf16.vlgmr.msra.gmra.mrb[4].mxu0 %v1419_v12  ;;  %988 = vmatmul.mubr.bf16.vlgmr.msra.gmra.mrb[4].mxu1 %v1419_v12 }
 0x118   :  { %v866_v18 = vpop.f32.mrb[0].mxu0  ;;  %v907_v19 = vpop.f32.mrb[0].mxu1 }
 0x119   :  { %v867_v53 = vadd.f32 %v866_v18, %v148_v14  ;;  %v868_v20 = vpop.f32.mrb[1].mxu0  ;;  %v908_v21 = vadd.f32 %v907_v19, %v156_v15  ;;  %v909_v22 = vpop.f32.mrb[1].mxu1 }
 0x11a   :  { %v869_v12 = vadd.f32 %v868_v20, %v152_v16  ;;  %v870_v23 = vpop.f32.mrb[2].mxu0  ;;  %v910_v24 = vadd.f32 %v909_v22, %v160_v17  ;;  %v911_v25 = vpop.f32.mrb[2].mxu1 }
 0x11b   :  { %v871_v26 = vpop.f32.mrb[3].mxu0  ;;  %v912_v28 = vpop.f32.mrb[3].mxu1 }
 0x11c   :  { %v1170_v27 = vpack.c.bf16 %v869_v12, %v867_v53  ;;  %v1171_v29 = vpack.c.bf16 %v910_v24, %v908_v21 }
 0x11e   :  { %1028 = vst [vmem:[%s1619_s3] sm:$0xff] %v1170_v27  ;;  %1029 = vst [vmem:[%s1619_s3 + $0x8] sm:$0xff] %v1171_v29 }
 0x158   :  { %v948_v37 = vpop.f32.mrb[4].mxu0  ;;  %v989_v39 = vpop.f32.mrb[4].mxu1 }
 0x159   :  { %v949_v38 = vadd.f32 %v948_v37, %v164_v34  ;;  %v950_v40 = vpop.f32.mrb[5].mxu0  ;;  %v990_v41 = vadd.f32 %v989_v39, %v172_v35  ;;  %v991_v43 = vpop.f32.mrb[5].mxu1 }
 0x15a   :  { %v951_v42 = vadd.f32 %v950_v40, %v168_v57  ;;  %v952_v44 = vpop.f32.mrb[6].mxu0  ;;  %v992_v45 = vadd.f32 %v991_v43, %v176_v36  ;;  %v993_v46 = vpop.f32.mrb[6].mxu1 }
 0x15b   :  { %v953_v47 = vpop.f32.mrb[7].mxu0  ;;  %v994_v49 = vpop.f32.mrb[7].mxu1 }
 0x15c   :  { %v1172_v48 = vpack.c.bf16 %v951_v42, %v949_v38  ;;  %v1173_v50 = vpack.c.bf16 %v992_v45, %v990_v41 }
 0x15e   :  { %1030 = vst [vmem:[%s1619_s3 + $0x10] sm:$0xff] %v1172_v48  ;;  %1031 = vst [vmem:[%s1619_s3 + $0x18] sm:$0xff] %v1173_v50 }

</bundles_post_ra>
